<compile_context>
chip_gen: v7x
topology: tpu7x:2x2x1
jax: 0.10.0
libtpu: 0.0.40
codegen_flags: <defaults>
</compile_context>

<pallas_src>
import functools

import jax
import jax.numpy as jnp
import numpy as np
from jax import lax
from jax.experimental import pallas as pl
from jax.experimental.pallas import tpu as pltpu


# ----------------------------------------------------------------------------
# In-kernel helpers (operate on VMEM values, NHWC-per-image layout:
# channels ride the 128-lane axis, W rides sublanes, H is the untiled axis).
# ----------------------------------------------------------------------------
def _bn_relu_f32(acc, scale, bias):
    """acc: (H, W, Cout) f32; scale/bias: (Cout,) f32."""
    return jnp.maximum(acc * scale + bias, 0.0)


def _zero_pad_hw(x):
    """(H, W, C) -> (H+2, W+2, C) with a zero 1-px border, built in-kernel."""
    H, W, C = x.shape
    zrow = jnp.zeros((1, W, C), x.dtype)
    x = jnp.concatenate([zrow, x, zrow], axis=0)      # untiled (H) axis: cheap
    zcol = jnp.zeros((H + 2, 1, C), x.dtype)
    return jnp.concatenate([zcol, x, zcol], axis=1)   # sublane (W) axis


def _conv3x3_folded(xpad, w, scale, bias):
    """3x3 conv via one MXU matmul with K = 9*C (im2col fold) + BN + ReLU.

    xpad:  (H+2, W+2, C) bf16 with zero border.
    w:     (9*C, Cout)   bf16, rows ordered (kh, kw, cin).
    scale: (Cout,) f32;  bias: (Cout,) f32.
    Returns (H, W, Cout) f32.
    """
    Hp, Wp, C = xpad.shape
    H, W = Hp - 2, Wp - 2
    # The 3 dx (sublane) shifted views are computed once and reused for all dy
    # (review item: hoist sublane shifts out of the tap loop).
    cols = jnp.concatenate(
        [xpad[:, 0:W, :], xpad[:, 1:W + 1, :], xpad[:, 2:W + 2, :]], axis=-1)
    # dy slices are along the untiled H axis (cheap).  Channel order of
    # `patches` is (dy, dx, c), matching the weight row order (kh, kw, cin).
    patches = jnp.concatenate(
        [cols[0:H], cols[1:H + 1], cols[2:H + 2]], axis=-1)      # (H, W, 9C)
    acc = lax.dot_general(patches, w, (((2,), (0,)), ((), ())),
                          preferred_element_type=jnp.float32)    # (H, W, Cout)
    return _bn_relu_f32(acc, scale, bias)


def _taps_accumulate(xpad, w_ref):
    """Fallback conv: 9 MXU matmuls with K = C (per-tap), hoisted dx shifts.

    xpad:  (H+2, W+2, C) bf16 with zero border.
    w_ref: Ref of shape (9, C, Cout) bf16.
    Returns (H, W, Cout) f32.
    """
    Hp, Wp, C = xpad.shape
    H, W = Hp - 2, Wp - 2
    Cout = w_ref.shape[-1]
    dx_views = [xpad[:, 0:W, :], xpad[:, 1:W + 1, :], xpad[:, 2:W + 2, :]]
    acc = jnp.zeros((H, W, Cout), jnp.float32)
    for dy in range(3):
        for dx in range(3):
            acc = acc + lax.dot_general(
                dx_views[dx][dy:dy + H], w_ref[dy * 3 + dx],
                (((2,), (0,)), ((), ())), preferred_element_type=jnp.float32)
    return acc


# ----------------------------------------------------------------------------
# Primary kernel: fully fused Up.double_conv (concat + conv1 + BN + ReLU +
# conv2 + BN + ReLU), one grid step per batch element.
# ----------------------------------------------------------------------------
def _up_double_conv_kernel(xa_ref, xb_ref, w1_ref, s1_ref, b1_ref,
                           w2_ref, s2_ref, b2_ref, o_ref):
    # xa_ref: (1, H, W, Ca) bf16   skip connection x2
    # xb_ref: (1, H, W, Cb) bf16   upsampled (+diff-padded) x1
    # w1_ref: (9*(Ca+Cb), Cout) bf16;  w2_ref: (9*Cout, Cout) bf16
    # s*/b*:  (1, Cout) f32 folded BatchNorm scale / bias
    # o_ref:  (1, H, W, Cout) f32
    x = jnp.concatenate([xa_ref[0], xb_ref[0]], axis=-1)  # torch.cat([x2,x1],1)
    y1 = _conv3x3_folded(_zero_pad_hw(x), w1_ref[...], s1_ref[0], b1_ref[0])
    y1 = y1.astype(jnp.bfloat16)          # conv1 result stays in VMEM (no HBM)
    y2 = _conv3x3_folded(_zero_pad_hw(y1), w2_ref[...], s2_ref[0], b2_ref[0])
    o_ref[0] = y2.astype(o_ref.dtype)


def up_double_conv_fused(xa, xb, w1, s1, b1, w2, s2, b2):
    """xa: (N,H,W,Ca) bf16; xb: (N,H,W,Cb) bf16; w1: (9*(Ca+Cb),Cout) bf16;
    w2: (9*Cout,Cout) bf16; s*/b*: (1,Cout) f32.  Returns (N,H,W,Cout) f32."""
    N, H, W, Ca = xa.shape
    Cb = xb.shape[-1]
    Cout = w2.shape[-1]
    return pl.pallas_call(
        _up_double_conv_kernel,
        out_shape=jax.ShapeDtypeStruct((N, H, W, Cout), jnp.float32),
        grid=(N,),
        in_specs=[
            pl.BlockSpec((1, H, W, Ca), lambda n: (n, 0, 0, 0)),
            pl.BlockSpec((1, H, W, Cb), lambda n: (n, 0, 0, 0)),
            pl.BlockSpec(w1.shape, lambda n: (0, 0)),
            pl.BlockSpec(s1.shape, lambda n: (0, 0)),
            pl.BlockSpec(b1.shape, lambda n: (0, 0)),
            pl.BlockSpec(w2.shape, lambda n: (0, 0)),
            pl.BlockSpec(s2.shape, lambda n: (0, 0)),
            pl.BlockSpec(b2.shape, lambda n: (0, 0)),
        ],
        out_specs=pl.BlockSpec((1, H, W, Cout), lambda n: (n, 0, 0, 0)),
        compiler_params=pltpu.CompilerParams(
            dimension_semantics=("parallel",)),
    )(xa, xb, w1, s1, b1, w2, s2, b2)


# ----------------------------------------------------------------------------
# Fallback kernels (ops proven to lower on older Mosaic builds): per-tap dots,
# HBM-pre-padded inputs, split weights so the concat is never materialized.
# ----------------------------------------------------------------------------
def _conv3x3_two_input_kernel(xa_ref, xb_ref, wa_ref, wb_ref, s_ref, b_ref,
                              o_ref):
    acc = _taps_accumulate(xa_ref[0], wa_ref) + _taps_accumulate(xb_ref[0],
                                                                 wb_ref)
    o_ref[0] = _bn_relu_f32(acc, s_ref[0], b_ref[0]).astype(o_ref.dtype)


def _conv3x3_one_input_kernel(x_ref, w_ref, s_ref, b_ref, o_ref):
    acc = _taps_accumulate(x_ref[0], w_ref)
    o_ref[0] = _bn_relu_f32(acc, s_ref[0], b_ref[0]).astype(o_ref.dtype)


def conv3x3_bn_relu_split(xa, xb, wa, wb, s, b, out_dtype=jnp.float32):
    N, H, W, Ca = xa.shape
    Cb = xb.shape[-1]
    Cout = wa.shape[-1]
    xa_p = jnp.pad(xa, ((0, 0), (1, 1), (1, 1), (0, 0)))
    xb_p = jnp.pad(xb, ((0, 0), (1, 1), (1, 1), (0, 0)))
    return pl.pallas_call(
        _conv3x3_two_input_kernel,
        out_shape=jax.ShapeDtypeStruct((N, H, W, Cout), out_dtype),
        grid=(N,),
        in_specs=[
            pl.BlockSpec((1, H + 2, W + 2, Ca), lambda n: (n, 0, 0, 0)),
            pl.BlockSpec((1, H + 2, W + 2, Cb), lambda n: (n, 0, 0, 0)),
            pl.BlockSpec(wa.shape, lambda n: (0, 0, 0)),
            pl.BlockSpec(wb.shape, lambda n: (0, 0, 0)),
            pl.BlockSpec(s.shape, lambda n: (0, 0)),
            pl.BlockSpec(b.shape, lambda n: (0, 0)),
        ],
        out_specs=pl.BlockSpec((1, H, W, Cout), lambda n: (n, 0, 0, 0)),
        compiler_params=pltpu.CompilerParams(
            dimension_semantics=("parallel",)),
    )(xa_p, xb_p, wa, wb, s, b)


def conv3x3_bn_relu_single(x, w, s, b, out_dtype=jnp.float32):
    N, H, W, C = x.shape
    Cout = w.shape[-1]
    x_p = jnp.pad(x, ((0, 0), (1, 1), (1, 1), (0, 0)))
    return pl.pallas_call(
        _conv3x3_one_input_kernel,
        out_shape=jax.ShapeDtypeStruct((N, H, W, Cout), out_dtype),
        grid=(N,),
        in_specs=[
            pl.BlockSpec((1, H + 2, W + 2, C), lambda n: (n, 0, 0, 0)),
            pl.BlockSpec(w.shape, lambda n: (0, 0, 0)),
            pl.BlockSpec(s.shape, lambda n: (0, 0)),
            pl.BlockSpec(b.shape, lambda n: (0, 0)),
        ],
        out_specs=pl.BlockSpec((1, H, W, Cout), lambda n: (n, 0, 0, 0)),
        compiler_params=pltpu.CompilerParams(
            dimension_semantics=("parallel",)),
    )(x_p, w, s, b)


# ----------------------------------------------------------------------------
# Plain-JAX glue: x2 bilinear upsample (align_corners=True), BN folding,
# weight re-layout.
# ----------------------------------------------------------------------------
def upsample_bilinear_x2_align_corners(x):
    """x: (N, H, W, C) -> (N, 2H, 2W, C); matches nn.Upsample(2, 'bilinear',
    align_corners=True)."""
    N, H, W, C = x.shape
    Ho, Wo = 2 * H, 2 * W

    def coords(n_in, n_out):
        if n_in == 1:
            return jnp.zeros((n_out,), jnp.float32)
        return jnp.arange(n_out, dtype=jnp.float32) * (n_in - 1) / (n_out - 1)

    ys = coords(H, Ho)
    xs = coords(W, Wo)
    y0 = jnp.floor(ys).astype(jnp.int32)
    y1 = jnp.minimum(y0 + 1, H - 1)
    wy = (ys - y0.astype(jnp.float32))[None, :, None, None]
    x0 = jnp.floor(xs).astype(jnp.int32)
    x1 = jnp.minimum(x0 + 1, W - 1)
    wx = (xs - x0.astype(jnp.float32))[None, None, :, None]

    v = x[:, y0] * (1.0 - wy) + x[:, y1] * wy
    return v[:, :, x0] * (1.0 - wx) + v[:, :, x1] * wx


def fold_bn(conv_bias, gamma, beta, running_mean, running_var, eps=1e-5):
    s = gamma / jnp.sqrt(running_var + eps)
    scale = s
    bias = (conv_bias - running_mean) * s + beta
    return scale.reshape(1, -1), bias.reshape(1, -1)


def torch_weight_to_taps(w_oihw):
    """(Cout, Cin, 3, 3) -> (9, Cin, Cout) with tap order (kh, kw)."""
    Cout, Cin = w_oihw.shape[0], w_oihw.shape[1]
    return jnp.transpose(w_oihw, (2, 3, 1, 0)).reshape(9, Cin, Cout)


# ----------------------------------------------------------------------------
# Module wrapper.
# ----------------------------------------------------------------------------
class UpPallas:
    """Up(in_channels, num_classes, bilinear=True) with BatchNorm in eval mode."""

    def __init__(self, in_channels, num_classes, key):
        keys = jax.random.split(key, 8)
        co, ci = num_classes, in_channels
        self.w1 = 0.1 * jax.random.normal(keys[0], (co, ci, 3, 3), jnp.float32)
        self.b1 = 0.1 * jax.random.normal(keys[1], (co,), jnp.float32)
        self.g1 = 1.0 + 0.1 * jax.random.normal(keys[2], (co,), jnp.float32)
        self.be1 = 0.1 * jax.random.normal(keys[3], (co,), jnp.float32)
        self.w2 = 0.1 * jax.random.normal(keys[4], (co, co, 3, 3), jnp.float32)
        self.b2 = 0.1 * jax.random.normal(keys[5], (co,), jnp.float32)
        self.g2 = 1.0 + 0.1 * jax.random.normal(keys[6], (co,), jnp.float32)
        self.be2 = 0.1 * jax.random.normal(keys[7], (co,), jnp.float32)
        self.mean1 = jnp.zeros((co,), jnp.float32)
        self.var1 = jnp.ones((co,), jnp.float32)
        self.mean2 = jnp.zeros((co,), jnp.float32)
        self.var2 = jnp.ones((co,), jnp.float32)

        # bf16 weights for the MXU (two layouts: per-tap and K-folded).
        self.w1_t = torch_weight_to_taps(self.w1).astype(jnp.bfloat16)
        self.w2_t = torch_weight_to_taps(self.w2).astype(jnp.bfloat16)
        self.w1_k = self.w1_t.reshape(9 * ci, co)
        self.w2_k = self.w2_t.reshape(9 * co, co)
        # Folded BatchNorm (eval mode) scale/bias in f32.
        self.s1, self.sb1 = fold_bn(self.b1, self.g1, self.be1,
                                    self.mean1, self.var1)
        self.s2, self.sb2 = fold_bn(self.b2, self.g2, self.be2,
                                    self.mean2, self.var2)
        self._impl = None

    # Shared preprocessing (NCHW -> NHWC, upsample, diff-pad, bf16 cast).
    def _prepare_inputs(self, x1_nchw, x2_nchw):
        x1 = jnp.transpose(x1_nchw, (0, 2, 3, 1))
        x2 = jnp.transpose(x2_nchw, (0, 2, 3, 1))
        x1 = upsample_bilinear_x2_align_corners(x1)
        diffY = x2.shape[1] - x1.shape[1]
        diffX = x2.shape[2] - x1.shape[2]
        if diffY != 0 or diffX != 0:
            x1 = jnp.pad(x1, ((0, 0),
                              (diffY // 2, diffY - diffY // 2),
                              (diffX // 2, diffX - diffX // 2),
                              (0, 0)))
        return x2.astype(jnp.bfloat16), x1.astype(jnp.bfloat16)

    @functools.partial(jax.jit, static_argnums=0)
    def _forward_fused(self, x1_nchw, x2_nchw):
        xa, xb = self._prepare_inputs(x1_nchw, x2_nchw)
        y = up_double_conv_fused(xa, xb, self.w1_k, self.s1, self.sb1,
                                 self.w2_k, self.s2, self.sb2)
        return jnp.transpose(y, (0, 3, 1, 2))

    @functools.partial(jax.jit, static_argnums=0)
    def _forward_taps(self, x1_nchw, x2_nchw):
        xa, xb = self._prepare_inputs(x1_nchw, x2_nchw)
        Ca = xa.shape[-1]
        w1a = self.w1_t[:, :Ca, :]
        w1b = self.w1_t[:, Ca:, :]
        y = conv3x3_bn_relu_split(xa, xb, w1a, w1b, self.s1, self.sb1,
                                  out_dtype=jnp.bfloat16)
        y = conv3x3_bn_relu_single(y, self.w2_t, self.s2, self.sb2,
                                   out_dtype=jnp.float32)
        return jnp.transpose(y, (0, 3, 1, 2))

    def __call__(self, x1_nchw, x2_nchw):
        if self._impl is None:
            try:
                out = jax.block_until_ready(
                    self._forward_fused(x1_nchw, x2_nchw))
                self._impl = "fused"
                return out
            except Exception:
                # Mosaic builds that reject unaligned minor-dim concatenation
                # (needed by the im2col K-fold) take the per-tap path instead.
                self._impl = "taps"
        if self._impl == "fused":
            return self._forward_fused(x1_nchw, x2_nchw)
        return self._forward_taps(x1_nchw, x2_nchw)


# ----------------------------------------------------------------------------
# Pure-JAX reference (mirrors the kernel's bf16 rounding points exactly).
# ----------------------------------------------------------------------------
def reference_up(mod: UpPallas, x1_nchw, x2_nchw):
    xa, xb = mod._prepare_inputs(x1_nchw, x2_nchw)
    x = jnp.concatenate([xa, xb], axis=-1).astype(jnp.float32)

    def conv_bn_relu(x, w_taps, scale, bias):
        Cin, Cout = w_taps.shape[1], w_taps.shape[2]
        w_hwio = w_taps.astype(jnp.float32).reshape(3, 3, Cin, Cout)
        y = lax.conv_general_dilated(
            x, w_hwio, window_strides=(1, 1), padding="SAME",
            dimension_numbers=("NHWC", "HWIO", "NHWC"),
            precision=lax.Precision.HIGHEST)
        return jnp.maximum(y * scale[0] + bias[0], 0.0)

    y = conv_bn_relu(x, mod.w1_t, mod.s1, mod.sb1)
    y = y.astype(jnp.bfloat16).astype(jnp.float32)   # kernel keeps y1 in bf16
    y = conv_bn_relu(y, mod.w2_t, mod.s2, mod.sb2)
    return jnp.transpose(y, (0, 3, 1, 2))


if __name__ == "__main__":
    key = jax.random.PRNGKey(0)
    k_x1, k_x2, k_params = jax.random.split(key, 3)

    # Up(in_channels=4, num_classes=8): x1 is the coarse feature map (2 ch,
    # 8x8), x2 is the skip connection (2 ch, 16x16).
    N, C_half, H1, W1 = 2, 2, 8, 8
    H2, W2 = 16, 16
    num_classes = 8
    in_channels = 2 * C_half  # 4

    x1 = jax.random.normal(k_x1, (N, C_half, H1, W1), jnp.float32)
    x2 = jax.random.normal(k_x2, (N, C_half, H2, W2), jnp.float32)

    mod = UpPallas(in_channels, num_classes, k_params)

    out = jax.block_until_ready(mod(x1, x2))
    assert out.shape == (N, num_classes, H2, W2), out.shape

    ref = jax.block_until_ready(reference_up(mod, x1, x2))
    # bf16 MXU operands with f32 accumulation: compare at ~1e-2.
    np.testing.assert_allclose(np.asarray(out), np.asarray(ref),
                               rtol=1e-2, atol=1e-2)

    print("KERNEL_OK")
</pallas_src>

<mosaic_0001>
module attributes {stable_mosaic.version = 11 : i64} {
  func.func @_up_double_conv_kernel(%arg0: i32, %arg1: memref<1x16x16x2xbf16, #tpu.memory_space<vmem>>, %arg2: memref<1x16x16x2xbf16, #tpu.memory_space<vmem>>, %arg3: memref<36x8xbf16, #tpu.memory_space<vmem>>, %arg4: memref<1x8xf32, #tpu.memory_space<vmem>>, %arg5: memref<1x8xf32, #tpu.memory_space<vmem>>, %arg6: memref<72x8xbf16, #tpu.memory_space<vmem>>, %arg7: memref<1x8xf32, #tpu.memory_space<vmem>>, %arg8: memref<1x8xf32, #tpu.memory_space<vmem>>, %arg9: memref<1x16x16x8xf32, #tpu.memory_space<vmem>>) attributes {dimension_semantics = [#tpu.dimension_semantics<parallel>], iteration_bounds = array<i64: 2>, scalar_prefetch = 0 : i64, scratch_operands = 0 : i64, tpu.core_type = #tpu.core_type<tc>, window_params = [{transform_indices = @transform_0, window_bounds = array<i64: 1, 16, 16, 2>}, {transform_indices = @transform_1, window_bounds = array<i64: 1, 16, 16, 2>}, {pipeline_mode = #tpu.pipeline_mode<synchronous>, transform_indices = @transform_2, window_bounds = array<i64: 36, 8>}, {pipeline_mode = #tpu.pipeline_mode<synchronous>, transform_indices = @transform_3, window_bounds = array<i64: 1, 8>}, {pipeline_mode = #tpu.pipeline_mode<synchronous>, transform_indices = @transform_4, window_bounds = array<i64: 1, 8>}, {pipeline_mode = #tpu.pipeline_mode<synchronous>, transform_indices = @transform_5, window_bounds = array<i64: 72, 8>}, {pipeline_mode = #tpu.pipeline_mode<synchronous>, transform_indices = @transform_6, window_bounds = array<i64: 1, 8>}, {pipeline_mode = #tpu.pipeline_mode<synchronous>, transform_indices = @transform_7, window_bounds = array<i64: 1, 8>}, {transform_indices = @transform_8, window_bounds = array<i64: 1, 16, 16, 8>}]} {
    %c0 = arith.constant 0 : index
    %c0_0 = arith.constant 0 : index
    %c0_1 = arith.constant 0 : index
    %c0_2 = arith.constant 0 : index
    %0 = vector.load %arg1[%c0, %c0_0, %c0_1, %c0_2] : memref<1x16x16x2xbf16, #tpu.memory_space<vmem>>, vector<1x16x16x2xbf16>
    %1 = vector.shape_cast %0 : vector<1x16x16x2xbf16> to vector<16x16x2xbf16>
    %c0_3 = arith.constant 0 : index
    %c0_4 = arith.constant 0 : index
    %c0_5 = arith.constant 0 : index
    %c0_6 = arith.constant 0 : index
    %2 = vector.load %arg2[%c0_3, %c0_4, %c0_5, %c0_6] : memref<1x16x16x2xbf16, #tpu.memory_space<vmem>>, vector<1x16x16x2xbf16>
    %3 = vector.shape_cast %2 : vector<1x16x16x2xbf16> to vector<16x16x2xbf16>
    %4 = tpu.concatenate %1, %3 in 2 : vector<16x16x2xbf16>, vector<16x16x2xbf16> -> vector<16x16x4xbf16>
    %cst = arith.constant 0.000000e+00 : bf16
    %5 = vector.broadcast %cst : bf16 to vector<1x16x4xbf16>
    %6 = tpu.concatenate %5, %4, %5 in 0 : vector<1x16x4xbf16>, vector<16x16x4xbf16>, vector<1x16x4xbf16> -> vector<18x16x4xbf16>
    %cst_7 = arith.constant 0.000000e+00 : bf16
    %7 = vector.broadcast %cst_7 : bf16 to vector<18x1x4xbf16>
    %8 = tpu.concatenate %7, %6, %7 in 1 : vector<18x1x4xbf16>, vector<18x16x4xbf16>, vector<18x1x4xbf16> -> vector<18x18x4xbf16>
    %c0_8 = arith.constant 0 : index
    %c0_9 = arith.constant 0 : index
    %9 = vector.load %arg3[%c0_8, %c0_9] : memref<36x8xbf16, #tpu.memory_space<vmem>>, vector<36x8xbf16>
    %c0_10 = arith.constant 0 : index
    %c0_11 = arith.constant 0 : index
    %10 = vector.load %arg4[%c0_10, %c0_11] : memref<1x8xf32, #tpu.memory_space<vmem>>, vector<1x8xf32>
    %11 = vector.shape_cast %10 : vector<1x8xf32> to vector<8xf32>
    %c0_12 = arith.constant 0 : index
    %c0_13 = arith.constant 0 : index
    %12 = vector.load %arg5[%c0_12, %c0_13] : memref<1x8xf32, #tpu.memory_space<vmem>>, vector<1x8xf32>
    %13 = vector.shape_cast %12 : vector<1x8xf32> to vector<8xf32>
    %14 = vector.extract_strided_slice %8 {offsets = [0, 0, 0], sizes = [18, 16, 4], strides = [1, 1, 1]} : vector<18x18x4xbf16> to vector<18x16x4xbf16>
    %15 = vector.extract_strided_slice %8 {offsets = [0, 1, 0], sizes = [18, 16, 4], strides = [1, 1, 1]} : vector<18x18x4xbf16> to vector<18x16x4xbf16>
    %16 = vector.extract_strided_slice %8 {offsets = [0, 2, 0], sizes = [18, 16, 4], strides = [1, 1, 1]} : vector<18x18x4xbf16> to vector<18x16x4xbf16>
    %17 = tpu.concatenate %14, %15, %16 in 2 : vector<18x16x4xbf16>, vector<18x16x4xbf16>, vector<18x16x4xbf16> -> vector<18x16x12xbf16>
    %18 = vector.extract_strided_slice %17 {offsets = [0, 0, 0], sizes = [16, 16, 12], strides = [1, 1, 1]} : vector<18x16x12xbf16> to vector<16x16x12xbf16>
    %19 = vector.extract_strided_slice %17 {offsets = [1, 0, 0], sizes = [16, 16, 12], strides = [1, 1, 1]} : vector<18x16x12xbf16> to vector<16x16x12xbf16>
    %20 = vector.extract_strided_slice %17 {offsets = [2, 0, 0], sizes = [16, 16, 12], strides = [1, 1, 1]} : vector<18x16x12xbf16> to vector<16x16x12xbf16>
    %21 = tpu.concatenate %18, %19, %20 in 2 : vector<16x16x12xbf16>, vector<16x16x12xbf16>, vector<16x16x12xbf16> -> vector<16x16x36xbf16>
    %cst_14 = arith.constant dense<0.000000e+00> : vector<16x16x8xf32>
    %22 = tpu.matmul %21, %9, %cst_14 {dimension_numbers = #tpu.dot_dimension_numbers<[2], [0], [0, 1], [1], [0, 0, 0, 1, 1, 1], [], []>} : vector<16x16x36xbf16>, vector<36x8xbf16>, vector<16x16x8xf32> -> vector<16x16x8xf32>
    %23 = vector.shape_cast %11 : vector<8xf32> to vector<1x1x8xf32>
    %24 = vector.broadcast %23 : vector<1x1x8xf32> to vector<16x16x8xf32>
    %25 = arith.mulf %22, %24 : vector<16x16x8xf32>
    %26 = vector.shape_cast %13 : vector<8xf32> to vector<1x1x8xf32>
    %27 = vector.broadcast %26 : vector<1x1x8xf32> to vector<16x16x8xf32>
    %28 = arith.addf %25, %27 : vector<16x16x8xf32>
    %cst_15 = arith.constant 0.000000e+00 : f32
    %29 = vector.broadcast %cst_15 : f32 to vector<16x16x8xf32>
    %30 = arith.maximumf %28, %29 : vector<16x16x8xf32>
    %31 = arith.truncf %30 : vector<16x16x8xf32> to vector<16x16x8xbf16>
    %cst_16 = arith.constant 0.000000e+00 : bf16
    %32 = vector.broadcast %cst_16 : bf16 to vector<1x16x8xbf16>
    %33 = tpu.concatenate %32, %31, %32 in 0 : vector<1x16x8xbf16>, vector<16x16x8xbf16>, vector<1x16x8xbf16> -> vector<18x16x8xbf16>
    %cst_17 = arith.constant 0.000000e+00 : bf16
    %34 = vector.broadcast %cst_17 : bf16 to vector<18x1x8xbf16>
    %35 = tpu.concatenate %34, %33, %34 in 1 : vector<18x1x8xbf16>, vector<18x16x8xbf16>, vector<18x1x8xbf16> -> vector<18x18x8xbf16>
    %c0_18 = arith.constant 0 : index
    %c0_19 = arith.constant 0 : index
    %36 = vector.load %arg6[%c0_18, %c0_19] : memref<72x8xbf16, #tpu.memory_space<vmem>>, vector<72x8xbf16>
    %c0_20 = arith.constant 0 : index
    %c0_21 = arith.constant 0 : index
    %37 = vector.load %arg7[%c0_20, %c0_21] : memref<1x8xf32, #tpu.memory_space<vmem>>, vector<1x8xf32>
    %38 = vector.shape_cast %37 : vector<1x8xf32> to vector<8xf32>
    %c0_22 = arith.constant 0 : index
    %c0_23 = arith.constant 0 : index
    %39 = vector.load %arg8[%c0_22, %c0_23] : memref<1x8xf32, #tpu.memory_space<vmem>>, vector<1x8xf32>
    %40 = vector.shape_cast %39 : vector<1x8xf32> to vector<8xf32>
    %41 = vector.extract_strided_slice %35 {offsets = [0, 0, 0], sizes = [18, 16, 8], strides = [1, 1, 1]} : vector<18x18x8xbf16> to vector<18x16x8xbf16>
    %42 = vector.extract_strided_slice %35 {offsets = [0, 1, 0], sizes = [18, 16, 8], strides = [1, 1, 1]} : vector<18x18x8xbf16> to vector<18x16x8xbf16>
    %43 = vector.extract_strided_slice %35 {offsets = [0, 2, 0], sizes = [18, 16, 8], strides = [1, 1, 1]} : vector<18x18x8xbf16> to vector<18x16x8xbf16>
    %44 = tpu.concatenate %41, %42, %43 in 2 : vector<18x16x8xbf16>, vector<18x16x8xbf16>, vector<18x16x8xbf16> -> vector<18x16x24xbf16>
    %45 = vector.extract_strided_slice %44 {offsets = [0, 0, 0], sizes = [16, 16, 24], strides = [1, 1, 1]} : vector<18x16x24xbf16> to vector<16x16x24xbf16>
    %46 = vector.extract_strided_slice %44 {offsets = [1, 0, 0], sizes = [16, 16, 24], strides = [1, 1, 1]} : vector<18x16x24xbf16> to vector<16x16x24xbf16>
    %47 = vector.extract_strided_slice %44 {offsets = [2, 0, 0], sizes = [16, 16, 24], strides = [1, 1, 1]} : vector<18x16x24xbf16> to vector<16x16x24xbf16>
    %48 = tpu.concatenate %45, %46, %47 in 2 : vector<16x16x24xbf16>, vector<16x16x24xbf16>, vector<16x16x24xbf16> -> vector<16x16x72xbf16>
    %cst_24 = arith.constant dense<0.000000e+00> : vector<16x16x8xf32>
    %49 = tpu.matmul %48, %36, %cst_24 {dimension_numbers = #tpu.dot_dimension_numbers<[2], [0], [0, 1], [1], [0, 0, 0, 1, 1, 1], [], []>} : vector<16x16x72xbf16>, vector<72x8xbf16>, vector<16x16x8xf32> -> vector<16x16x8xf32>
    %50 = vector.shape_cast %38 : vector<8xf32> to vector<1x1x8xf32>
    %51 = vector.broadcast %50 : vector<1x1x8xf32> to vector<16x16x8xf32>
    %52 = arith.mulf %49, %51 : vector<16x16x8xf32>
    %53 = vector.shape_cast %40 : vector<8xf32> to vector<1x1x8xf32>
    %54 = vector.broadcast %53 : vector<1x1x8xf32> to vector<16x16x8xf32>
    %55 = arith.addf %52, %54 : vector<16x16x8xf32>
    %cst_25 = arith.constant 0.000000e+00 : f32
    %56 = vector.broadcast %cst_25 : f32 to vector<16x16x8xf32>
    %57 = arith.maximumf %55, %56 : vector<16x16x8xf32>
    %c0_26 = arith.constant 0 : index
    %c0_27 = arith.constant 0 : index
    %c0_28 = arith.constant 0 : index
    %c0_29 = arith.constant 0 : index
    %58 = vector.load %arg9[%c0_26, %c0_27, %c0_28, %c0_29] : memref<1x16x16x8xf32, #tpu.memory_space<vmem>>, vector<1x16x16x8xf32>
    %59 = vector.shape_cast %58 : vector<1x16x16x8xf32> to vector<16x16x8xf32>
    %60 = vector.shape_cast %57 : vector<16x16x8xf32> to vector<1x16x16x8xf32>
    tpu.vector_store %arg9[%c0_26, %c0_27, %c0_28, %c0_29], %60 {strides = array<i32>} : memref<1x16x16x8xf32, #tpu.memory_space<vmem>>, vector<1x16x16x8xf32>,
    return
  }
  func.func @transform_0(%arg0: i32) -> (i32, i32, i32, i32) {
    %c0_i32 = arith.constant 0 : i32
    %c0_i32_0 = arith.constant 0 : i32
    %c0_i32_1 = arith.constant 0 : i32
    %c0_i32_2 = arith.constant 0 : i32
    return %arg0, %c0_i32, %c0_i32_0, %c0_i32_1 : i32, i32, i32, i32
  }
  func.func @transform_1(%arg0: i32) -> (i32, i32, i32, i32) {
    %c0_i32 = arith.constant 0 : i32
    %c0_i32_0 = arith.constant 0 : i32
    %c0_i32_1 = arith.constant 0 : i32
    %c0_i32_2 = arith.constant 0 : i32
    return %arg0, %c0_i32, %c0_i32_0, %c0_i32_1 : i32, i32, i32, i32
  }
  func.func @transform_2(%arg0: i32) -> (i32, i32) {
    %c0_i32 = arith.constant 0 : i32
    %c0_i32_0 = arith.constant 0 : i32
    %c0_i32_1 = arith.constant 0 : i32
    return %c0_i32, %c0_i32_0 : i32, i32
  }
  func.func @transform_3(%arg0: i32) -> (i32, i32) {
    %c0_i32 = arith.constant 0 : i32
    %c0_i32_0 = arith.constant 0 : i32
    %c0_i32_1 = arith.constant 0 : i32
    return %c0_i32, %c0_i32_0 : i32, i32
  }
  func.func @transform_4(%arg0: i32) -> (i32, i32) {
    %c0_i32 = arith.constant 0 : i32
    %c0_i32_0 = arith.constant 0 : i32
    %c0_i32_1 = arith.constant 0 : i32
    return %c0_i32, %c0_i32_0 : i32, i32
  }
  func.func @transform_5(%arg0: i32) -> (i32, i32) {
    %c0_i32 = arith.constant 0 : i32
    %c0_i32_0 = arith.constant 0 : i32
    %c0_i32_1 = arith.constant 0 : i32
    return %c0_i32, %c0_i32_0 : i32, i32
  }
  func.func @transform_6(%arg0: i32) -> (i32, i32) {
    %c0_i32 = arith.constant 0 : i32
    %c0_i32_0 = arith.constant 0 : i32
    %c0_i32_1 = arith.constant 0 : i32
    return %c0_i32, %c0_i32_0 : i32, i32
  }
  func.func @transform_7(%arg0: i32) -> (i32, i32) {
    %c0_i32 = arith.constant 0 : i32
    %c0_i32_0 = arith.constant 0 : i32
    %c0_i32_1 = arith.constant 0 : i32
    return %c0_i32, %c0_i32_0 : i32, i32
  }
  func.func @transform_8(%arg0: i32) -> (i32, i32, i32, i32) {
    %c0_i32 = arith.constant 0 : i32
    %c0_i32_0 = arith.constant 0 : i32
    %c0_i32_1 = arith.constant 0 : i32
    %c0_i32_2 = arith.constant 0 : i32
    return %arg0, %c0_i32, %c0_i32_0, %c0_i32_1 : i32, i32, i32, i32
  }
}

module attributes {stable_mosaic.version = 11 : i64} {
  func.func @_conv3x3_one_input_kernel(%arg0: i32, %arg1: memref<1x18x18x8xbf16, #tpu.memory_space<vmem>>, %arg2: memref<9x8x8xbf16, #tpu.memory_space<vmem>>, %arg3: memref<1x8xf32, #tpu.memory_space<vmem>>, %arg4: memref<1x8xf32, #tpu.memory_space<vmem>>, %arg5: memref<1x16x16x8xf32, #tpu.memory_space<vmem>>) attributes {dimension_semantics = [#tpu.dimension_semantics<parallel>], iteration_bounds = array<i64: 2>, scalar_prefetch = 0 : i64, scratch_operands = 0 : i64, tpu.core_type = #tpu.core_type<tc>, window_params = [{transform_indices = @transform_0, window_bounds = array<i64: 1, 18, 18, 8>}, {pipeline_mode = #tpu.pipeline_mode<synchronous>, transform_indices = @transform_1, window_bounds = array<i64: 9, 8, 8>}, {pipeline_mode = #tpu.pipeline_mode<synchronous>, transform_indices = @transform_2, window_bounds = array<i64: 1, 8>}, {pipeline_mode = #tpu.pipeline_mode<synchronous>, transform_indices = @transform_3, window_bounds = array<i64: 1, 8>}, {transform_indices = @transform_4, window_bounds = array<i64: 1, 16, 16, 8>}]} {
    %c0 = arith.constant 0 : index
    %c0_0 = arith.constant 0 : index
    %c0_1 = arith.constant 0 : index
    %c0_2 = arith.constant 0 : index
    %0 = vector.load %arg1[%c0, %c0_0, %c0_1, %c0_2] : memref<1x18x18x8xbf16, #tpu.memory_space<vmem>>, vector<1x18x18x8xbf16>
    %1 = vector.shape_cast %0 : vector<1x18x18x8xbf16> to vector<18x18x8xbf16>
    %2 = vector.extract_strided_slice %1 {offsets = [0, 0, 0], sizes = [18, 16, 8], strides = [1, 1, 1]} : vector<18x18x8xbf16> to vector<18x16x8xbf16>
    %3 = vector.extract_strided_slice %1 {offsets = [0, 1, 0], sizes = [18, 16, 8], strides = [1, 1, 1]} : vector<18x18x8xbf16> to vector<18x16x8xbf16>
    %4 = vector.extract_strided_slice %1 {offsets = [0, 2, 0], sizes = [18, 16, 8], strides = [1, 1, 1]} : vector<18x18x8xbf16> to vector<18x16x8xbf16>
    %cst = arith.constant 0.000000e+00 : f32
    %5 = vector.broadcast %cst : f32 to vector<16x16x8xf32>
    %6 = vector.extract_strided_slice %2 {offsets = [0, 0, 0], sizes = [16, 16, 8], strides = [1, 1, 1]} : vector<18x16x8xbf16> to vector<16x16x8xbf16>
    %c0_3 = arith.constant 0 : index
    %c0_4 = arith.constant 0 : index
    %c0_5 = arith.constant 0 : index
    %7 = vector.load %arg2[%c0_3, %c0_4, %c0_5] : memref<9x8x8xbf16, #tpu.memory_space<vmem>>, vector<1x8x8xbf16>
    %8 = vector.shape_cast %7 : vector<1x8x8xbf16> to vector<8x8xbf16>
    %cst_6 = arith.constant dense<0.000000e+00> : vector<16x16x8xf32>
    %9 = tpu.matmul %6, %8, %cst_6 {dimension_numbers = #tpu.dot_dimension_numbers<[2], [0], [0, 1], [1], [0, 0, 0, 1, 1, 1], [], []>} : vector<16x16x8xbf16>, vector<8x8xbf16>, vector<16x16x8xf32> -> vector<16x16x8xf32>
    %10 = arith.addf %5, %9 : vector<16x16x8xf32>
    %11 = vector.extract_strided_slice %3 {offsets = [0, 0, 0], sizes = [16, 16, 8], strides = [1, 1, 1]} : vector<18x16x8xbf16> to vector<16x16x8xbf16>
    %c1 = arith.constant 1 : index
    %c0_7 = arith.constant 0 : index
    %c0_8 = arith.constant 0 : index
    %12 = vector.load %arg2[%c1, %c0_7, %c0_8] : memref<9x8x8xbf16, #tpu.memory_space<vmem>>, vector<1x8x8xbf16>
    %13 = vector.shape_cast %12 : vector<1x8x8xbf16> to vector<8x8xbf16>
    %cst_9 = arith.constant dense<0.000000e+00> : vector<16x16x8xf32>
    %14 = tpu.matmul %11, %13, %cst_9 {dimension_numbers = #tpu.dot_dimension_numbers<[2], [0], [0, 1], [1], [0, 0, 0, 1, 1, 1], [], []>} : vector<16x16x8xbf16>, vector<8x8xbf16>, vector<16x16x8xf32> -> vector<16x16x8xf32>
    %15 = arith.addf %10, %14 : vector<16x16x8xf32>
    %16 = vector.extract_strided_slice %4 {offsets = [0, 0, 0], sizes = [16, 16, 8], strides = [1, 1, 1]} : vector<18x16x8xbf16> to vector<16x16x8xbf16>
    %c2 = arith.constant 2 : index
    %c0_10 = arith.constant 0 : index
    %c0_11 = arith.constant 0 : index
    %17 = vector.load %arg2[%c2, %c0_10, %c0_11] : memref<9x8x8xbf16, #tpu.memory_space<vmem>>, vector<1x8x8xbf16>
    %18 = vector.shape_cast %17 : vector<1x8x8xbf16> to vector<8x8xbf16>
    %cst_12 = arith.constant dense<0.000000e+00> : vector<16x16x8xf32>
    %19 = tpu.matmul %16, %18, %cst_12 {dimension_numbers = #tpu.dot_dimension_numbers<[2], [0], [0, 1], [1], [0, 0, 0, 1, 1, 1], [], []>} : vector<16x16x8xbf16>, vector<8x8xbf16>, vector<16x16x8xf32> -> vector<16x16x8xf32>
    %20 = arith.addf %15, %19 : vector<16x16x8xf32>
    %21 = vector.extract_strided_slice %2 {offsets = [1, 0, 0], sizes = [16, 16, 8], strides = [1, 1, 1]} : vector<18x16x8xbf16> to vector<16x16x8xbf16>
    %c3 = arith.constant 3 : index
    %c0_13 = arith.constant 0 : index
    %c0_14 = arith.constant 0 : index
    %22 = vector.load %arg2[%c3, %c0_13, %c0_14] : memref<9x8x8xbf16, #tpu.memory_space<vmem>>, vector<1x8x8xbf16>
    %23 = vector.shape_cast %22 : vector<1x8x8xbf16> to vector<8x8xbf16>
    %cst_15 = arith.constant dense<0.000000e+00> : vector<16x16x8xf32>
    %24 = tpu.matmul %21, %23, %cst_15 {dimension_numbers = #tpu.dot_dimension_numbers<[2], [0], [0, 1], [1], [0, 0, 0, 1, 1, 1], [], []>} : vector<16x16x8xbf16>, vector<8x8xbf16>, vector<16x16x8xf32> -> vector<16x16x8xf32>
    %25 = arith.addf %20, %24 : vector<16x16x8xf32>
    %26 = vector.extract_strided_slice %3 {offsets = [1, 0, 0], sizes = [16, 16, 8], strides = [1, 1, 1]} : vector<18x16x8xbf16> to vector<16x16x8xbf16>
    %c4 = arith.constant 4 : index
    %c0_16 = arith.constant 0 : index
    %c0_17 = arith.constant 0 : index
    %27 = vector.load %arg2[%c4, %c0_16, %c0_17] : memref<9x8x8xbf16, #tpu.memory_space<vmem>>, vector<1x8x8xbf16>
    %28 = vector.shape_cast %27 : vector<1x8x8xbf16> to vector<8x8xbf16>
    %cst_18 = arith.constant dense<0.000000e+00> : vector<16x16x8xf32>
    %29 = tpu.matmul %26, %28, %cst_18 {dimension_numbers = #tpu.dot_dimension_numbers<[2], [0], [0, 1], [1], [0, 0, 0, 1, 1, 1], [], []>} : vector<16x16x8xbf16>, vector<8x8xbf16>, vector<16x16x8xf32> -> vector<16x16x8xf32>
    %30 = arith.addf %25, %29 : vector<16x16x8xf32>
    %31 = vector.extract_strided_slice %4 {offsets = [1, 0, 0], sizes = [16, 16, 8], strides = [1, 1, 1]} : vector<18x16x8xbf16> to vector<16x16x8xbf16>
    %c5 = arith.constant 5 : index
    %c0_19 = arith.constant 0 : index
    %c0_20 = arith.constant 0 : index
    %32 = vector.load %arg2[%c5, %c0_19, %c0_20] : memref<9x8x8xbf16, #tpu.memory_space<vmem>>, vector<1x8x8xbf16>
    %33 = vector.shape_cast %32 : vector<1x8x8xbf16> to vector<8x8xbf16>
    %cst_21 = arith.constant dense<0.000000e+00> : vector<16x16x8xf32>
    %34 = tpu.matmul %31, %33, %cst_21 {dimension_numbers = #tpu.dot_dimension_numbers<[2], [0], [0, 1], [1], [0, 0, 0, 1, 1, 1], [], []>} : vector<16x16x8xbf16>, vector<8x8xbf16>, vector<16x16x8xf32> -> vector<16x16x8xf32>
    %35 = arith.addf %30, %34 : vector<16x16x8xf32>
    %36 = vector.extract_strided_slice %2 {offsets = [2, 0, 0], sizes = [16, 16, 8], strides = [1, 1, 1]} : vector<18x16x8xbf16> to vector<16x16x8xbf16>
    %c6 = arith.constant 6 : index
    %c0_22 = arith.constant 0 : index
    %c0_23 = arith.constant 0 : index
    %37 = vector.load %arg2[%c6, %c0_22, %c0_23] : memref<9x8x8xbf16, #tpu.memory_space<vmem>>, vector<1x8x8xbf16>
    %38 = vector.shape_cast %37 : vector<1x8x8xbf16> to vector<8x8xbf16>
    %cst_24 = arith.constant dense<0.000000e+00> : vector<16x16x8xf32>
    %39 = tpu.matmul %36, %38, %cst_24 {dimension_numbers = #tpu.dot_dimension_numbers<[2], [0], [0, 1], [1], [0, 0, 0, 1, 1, 1], [], []>} : vector<16x16x8xbf16>, vector<8x8xbf16>, vector<16x16x8xf32> -> vector<16x16x8xf32>
    %40 = arith.addf %35, %39 : vector<16x16x8xf32>
    %41 = vector.extract_strided_slice %3 {offsets = [2, 0, 0], sizes = [16, 16, 8], strides = [1, 1, 1]} : vector<18x16x8xbf16> to vector<16x16x8xbf16>
    %c7 = arith.constant 7 : index
    %c0_25 = arith.constant 0 : index
    %c0_26 = arith.constant 0 : index
    %42 = vector.load %arg2[%c7, %c0_25, %c0_26] : memref<9x8x8xbf16, #tpu.memory_space<vmem>>, vector<1x8x8xbf16>
    %43 = vector.shape_cast %42 : vector<1x8x8xbf16> to vector<8x8xbf16>
    %cst_27 = arith.constant dense<0.000000e+00> : vector<16x16x8xf32>
    %44 = tpu.matmul %41, %43, %cst_27 {dimension_numbers = #tpu.dot_dimension_numbers<[2], [0], [0, 1], [1], [0, 0, 0, 1, 1, 1], [], []>} : vector<16x16x8xbf16>, vector<8x8xbf16>, vector<16x16x8xf32> -> vector<16x16x8xf32>
    %45 = arith.addf %40, %44 : vector<16x16x8xf32>
    %46 = vector.extract_strided_slice %4 {offsets = [2, 0, 0], sizes = [16, 16, 8], strides = [1, 1, 1]} : vector<18x16x8xbf16> to vector<16x16x8xbf16>
    %c8 = arith.constant 8 : index
    %c0_28 = arith.constant 0 : index
    %c0_29 = arith.constant 0 : index
    %47 = vector.load %arg2[%c8, %c0_28, %c0_29] : memref<9x8x8xbf16, #tpu.memory_space<vmem>>, vector<1x8x8xbf16>
    %48 = vector.shape_cast %47 : vector<1x8x8xbf16> to vector<8x8xbf16>
    %cst_30 = arith.constant dense<0.000000e+00> : vector<16x16x8xf32>
    %49 = tpu.matmul %46, %48, %cst_30 {dimension_numbers = #tpu.dot_dimension_numbers<[2], [0], [0, 1], [1], [0, 0, 0, 1, 1, 1], [], []>} : vector<16x16x8xbf16>, vector<8x8xbf16>, vector<16x16x8xf32> -> vector<16x16x8xf32>
    %50 = arith.addf %45, %49 : vector<16x16x8xf32>
    %c0_31 = arith.constant 0 : index
    %c0_32 = arith.constant 0 : index
    %51 = vector.load %arg3[%c0_31, %c0_32] : memref<1x8xf32, #tpu.memory_space<vmem>>, vector<1x8xf32>
    %52 = vector.shape_cast %51 : vector<1x8xf32> to vector<8xf32>
    %c0_33 = arith.constant 0 : index
    %c0_34 = arith.constant 0 : index
    %53 = vector.load %arg4[%c0_33, %c0_34] : memref<1x8xf32, #tpu.memory_space<vmem>>, vector<1x8xf32>
    %54 = vector.shape_cast %53 : vector<1x8xf32> to vector<8xf32>
    %55 = vector.shape_cast %52 : vector<8xf32> to vector<1x1x8xf32>
    %56 = vector.broadcast %55 : vector<1x1x8xf32> to vector<16x16x8xf32>
    %57 = arith.mulf %50, %56 : vector<16x16x8xf32>
    %58 = vector.shape_cast %54 : vector<8xf32> to vector<1x1x8xf32>
    %59 = vector.broadcast %58 : vector<1x1x8xf32> to vector<16x16x8xf32>
    %60 = arith.addf %57, %59 : vector<16x16x8xf32>
    %cst_35 = arith.constant 0.000000e+00 : f32
    %61 = vector.broadcast %cst_35 : f32 to vector<16x16x8xf32>
    %62 = arith.maximumf %60, %61 : vector<16x16x8xf32>
    %c0_36 = arith.constant 0 : index
    %c0_37 = arith.constant 0 : index
    %c0_38 = arith.constant 0 : index
    %c0_39 = arith.constant 0 : index
    %63 = vector.load %arg5[%c0_36, %c0_37, %c0_38, %c0_39] : memref<1x16x16x8xf32, #tpu.memory_space<vmem>>, vector<1x16x16x8xf32>
    %64 = vector.shape_cast %63 : vector<1x16x16x8xf32> to vector<16x16x8xf32>
    %65 = vector.shape_cast %62 : vector<16x16x8xf32> to vector<1x16x16x8xf32>
    tpu.vector_store %arg5[%c0_36, %c0_37, %c0_38, %c0_39], %65 {strides = array<i32>} : memref<1x16x16x8xf32, #tpu.memory_space<vmem>>, vector<1x16x16x8xf32>,
    return
  }
  func.func @transform_0(%arg0: i32) -> (i32, i32, i32, i32) {
    %c0_i32 = arith.constant 0 : i32
    %c0_i32_0 = arith.constant 0 : i32
    %c0_i32_1 = arith.constant 0 : i32
    %c0_i32_2 = arith.constant 0 : i32
    return %arg0, %c0_i32, %c0_i32_0, %c0_i32_1 : i32, i32, i32, i32
  }
  func.func @transform_1(%arg0: i32) -> (i32, i32, i32) {
    %c0_i32 = arith.constant 0 : i32
    %c0_i32_0 = arith.constant 0 : i32
    %c0_i32_1 = arith.constant 0 : i32
    %c0_i32_2 = arith.constant 0 : i32
    return %c0_i32, %c0_i32_0, %c0_i32_1 : i32, i32, i32
  }
  func.func @transform_2(%arg0: i32) -> (i32, i32) {
    %c0_i32 = arith.constant 0 : i32
    %c0_i32_0 = arith.constant 0 : i32
    %c0_i32_1 = arith.constant 0 : i32
    return %c0_i32, %c0_i32_0 : i32, i32
  }
  func.func @transform_3(%arg0: i32) -> (i32, i32) {
    %c0_i32 = arith.constant 0 : i32
    %c0_i32_0 = arith.constant 0 : i32
    %c0_i32_1 = arith.constant 0 : i32
    return %c0_i32, %c0_i32_0 : i32, i32
  }
  func.func @transform_4(%arg0: i32) -> (i32, i32, i32, i32) {
    %c0_i32 = arith.constant 0 : i32
    %c0_i32_0 = arith.constant 0 : i32
    %c0_i32_1 = arith.constant 0 : i32
    %c0_i32_2 = arith.constant 0 : i32
    return %arg0, %c0_i32, %c0_i32_0, %c0_i32_1 : i32, i32, i32, i32
  }
}

module attributes {stable_mosaic.version = 11 : i64} {
  func.func @_conv3x3_two_input_kernel(%arg0: i32, %arg1: memref<1x18x18x2xbf16, #tpu.memory_space<vmem>>, %arg2: memref<1x18x18x2xbf16, #tpu.memory_space<vmem>>, %arg3: memref<9x2x8xbf16, #tpu.memory_space<vmem>>, %arg4: memref<9x2x8xbf16, #tpu.memory_space<vmem>>, %arg5: memref<1x8xf32, #tpu.memory_space<vmem>>, %arg6: memref<1x8xf32, #tpu.memory_space<vmem>>, %arg7: memref<1x16x16x8xbf16, #tpu.memory_space<vmem>>) attributes {dimension_semantics = [#tpu.dimension_semantics<parallel>], iteration_bounds = array<i64: 2>, scalar_prefetch = 0 : i64, scratch_operands = 0 : i64, tpu.core_type = #tpu.core_type<tc>, window_params = [{transform_indices = @transform_0, window_bounds = array<i64: 1, 18, 18, 2>}, {transform_indices = @transform_1, window_bounds = array<i64: 1, 18, 18, 2>}, {pipeline_mode = #tpu.pipeline_mode<synchronous>, transform_indices = @transform_2, window_bounds = array<i64: 9, 2, 8>}, {pipeline_mode = #tpu.pipeline_mode<synchronous>, transform_indices = @transform_3, window_bounds = array<i64: 9, 2, 8>}, {pipeline_mode = #tpu.pipeline_mode<synchronous>, transform_indices = @transform_4, window_bounds = array<i64: 1, 8>}, {pipeline_mode = #tpu.pipeline_mode<synchronous>, transform_indices = @transform_5, window_bounds = array<i64: 1, 8>}, {transform_indices = @transform_6, window_bounds = array<i64: 1, 16, 16, 8>}]} {
    %c0 = arith.constant 0 : index
    %c0_0 = arith.constant 0 : index
    %c0_1 = arith.constant 0 : index
    %c0_2 = arith.constant 0 : index
    %0 = vector.load %arg1[%c0, %c0_0, %c0_1, %c0_2] : memref<1x18x18x2xbf16, #tpu.memory_space<vmem>>, vector<1x18x18x2xbf16>
    %1 = vector.shape_cast %0 : vector<1x18x18x2xbf16> to vector<18x18x2xbf16>
    %2 = vector.extract_strided_slice %1 {offsets = [0, 0, 0], sizes = [18, 16, 2], strides = [1, 1, 1]} : vector<18x18x2xbf16> to vector<18x16x2xbf16>
    %3 = vector.extract_strided_slice %1 {offsets = [0, 1, 0], sizes = [18, 16, 2], strides = [1, 1, 1]} : vector<18x18x2xbf16> to vector<18x16x2xbf16>
    %4 = vector.extract_strided_slice %1 {offsets = [0, 2, 0], sizes = [18, 16, 2], strides = [1, 1, 1]} : vector<18x18x2xbf16> to vector<18x16x2xbf16>
    %cst = arith.constant 0.000000e+00 : f32
    %5 = vector.broadcast %cst : f32 to vector<16x16x8xf32>
    %6 = vector.extract_strided_slice %2 {offsets = [0, 0, 0], sizes = [16, 16, 2], strides = [1, 1, 1]} : vector<18x16x2xbf16> to vector<16x16x2xbf16>
    %c0_3 = arith.constant 0 : index
    %c0_4 = arith.constant 0 : index
    %c0_5 = arith.constant 0 : index
    %7 = vector.load %arg3[%c0_3, %c0_4, %c0_5] : memref<9x2x8xbf16, #tpu.memory_space<vmem>>, vector<1x2x8xbf16>
    %8 = vector.shape_cast %7 : vector<1x2x8xbf16> to vector<2x8xbf16>
    %cst_6 = arith.constant dense<0.000000e+00> : vector<16x16x8xf32>
    %9 = tpu.matmul %6, %8, %cst_6 {dimension_numbers = #tpu.dot_dimension_numbers<[2], [0], [0, 1], [1], [0, 0, 0, 1, 1, 1], [], []>} : vector<16x16x2xbf16>, vector<2x8xbf16>, vector<16x16x8xf32> -> vector<16x16x8xf32>
    %10 = arith.addf %5, %9 : vector<16x16x8xf32>
    %11 = vector.extract_strided_slice %3 {offsets = [0, 0, 0], sizes = [16, 16, 2], strides = [1, 1, 1]} : vector<18x16x2xbf16> to vector<16x16x2xbf16>
    %c1 = arith.constant 1 : index
    %c0_7 = arith.constant 0 : index
    %c0_8 = arith.constant 0 : index
    %12 = vector.load %arg3[%c1, %c0_7, %c0_8] : memref<9x2x8xbf16, #tpu.memory_space<vmem>>, vector<1x2x8xbf16>
    %13 = vector.shape_cast %12 : vector<1x2x8xbf16> to vector<2x8xbf16>
    %cst_9 = arith.constant dense<0.000000e+00> : vector<16x16x8xf32>
    %14 = tpu.matmul %11, %13, %cst_9 {dimension_numbers = #tpu.dot_dimension_numbers<[2], [0], [0, 1], [1], [0, 0, 0, 1, 1, 1], [], []>} : vector<16x16x2xbf16>, vector<2x8xbf16>, vector<16x16x8xf32> -> vector<16x16x8xf32>
    %15 = arith.addf %10, %14 : vector<16x16x8xf32>
    %16 = vector.extract_strided_slice %4 {offsets = [0, 0, 0], sizes = [16, 16, 2], strides = [1, 1, 1]} : vector<18x16x2xbf16> to vector<16x16x2xbf16>
    %c2 = arith.constant 2 : index
    %c0_10 = arith.constant 0 : index
    %c0_11 = arith.constant 0 : index
    %17 = vector.load %arg3[%c2, %c0_10, %c0_11] : memref<9x2x8xbf16, #tpu.memory_space<vmem>>, vector<1x2x8xbf16>
    %18 = vector.shape_cast %17 : vector<1x2x8xbf16> to vector<2x8xbf16>
    %cst_12 = arith.constant dense<0.000000e+00> : vector<16x16x8xf32>
    %19 = tpu.matmul %16, %18, %cst_12 {dimension_numbers = #tpu.dot_dimension_numbers<[2], [0], [0, 1], [1], [0, 0, 0, 1, 1, 1], [], []>} : vector<16x16x2xbf16>, vector<2x8xbf16>, vector<16x16x8xf32> -> vector<16x16x8xf32>
    %20 = arith.addf %15, %19 : vector<16x16x8xf32>
    %21 = vector.extract_strided_slice %2 {offsets = [1, 0, 0], sizes = [16, 16, 2], strides = [1, 1, 1]} : vector<18x16x2xbf16> to vector<16x16x2xbf16>
    %c3 = arith.constant 3 : index
    %c0_13 = arith.constant 0 : index
    %c0_14 = arith.constant 0 : index
    %22 = vector.load %arg3[%c3, %c0_13, %c0_14] : memref<9x2x8xbf16, #tpu.memory_space<vmem>>, vector<1x2x8xbf16>
    %23 = vector.shape_cast %22 : vector<1x2x8xbf16> to vector<2x8xbf16>
    %cst_15 = arith.constant dense<0.000000e+00> : vector<16x16x8xf32>
    %24 = tpu.matmul %21, %23, %cst_15 {dimension_numbers = #tpu.dot_dimension_numbers<[2], [0], [0, 1], [1], [0, 0, 0, 1, 1, 1], [], []>} : vector<16x16x2xbf16>, vector<2x8xbf16>, vector<16x16x8xf32> -> vector<16x16x8xf32>
    %25 = arith.addf %20, %24 : vector<16x16x8xf32>
    %26 = vector.extract_strided_slice %3 {offsets = [1, 0, 0], sizes = [16, 16, 2], strides = [1, 1, 1]} : vector<18x16x2xbf16> to vector<16x16x2xbf16>
    %c4 = arith.constant 4 : index
    %c0_16 = arith.constant 0 : index
    %c0_17 = arith.constant 0 : index
    %27 = vector.load %arg3[%c4, %c0_16, %c0_17] : memref<9x2x8xbf16, #tpu.memory_space<vmem>>, vector<1x2x8xbf16>
    %28 = vector.shape_cast %27 : vector<1x2x8xbf16> to vector<2x8xbf16>
    %cst_18 = arith.constant dense<0.000000e+00> : vector<16x16x8xf32>
    %29 = tpu.matmul %26, %28, %cst_18 {dimension_numbers = #tpu.dot_dimension_numbers<[2], [0], [0, 1], [1], [0, 0, 0, 1, 1, 1], [], []>} : vector<16x16x2xbf16>, vector<2x8xbf16>, vector<16x16x8xf32> -> vector<16x16x8xf32>
    %30 = arith.addf %25, %29 : vector<16x16x8xf32>
    %31 = vector.extract_strided_slice %4 {offsets = [1, 0, 0], sizes = [16, 16, 2], strides = [1, 1, 1]} : vector<18x16x2xbf16> to vector<16x16x2xbf16>
    %c5 = arith.constant 5 : index
    %c0_19 = arith.constant 0 : index
    %c0_20 = arith.constant 0 : index
    %32 = vector.load %arg3[%c5, %c0_19, %c0_20] : memref<9x2x8xbf16, #tpu.memory_space<vmem>>, vector<1x2x8xbf16>
    %33 = vector.shape_cast %32 : vector<1x2x8xbf16> to vector<2x8xbf16>
    %cst_21 = arith.constant dense<0.000000e+00> : vector<16x16x8xf32>
    %34 = tpu.matmul %31, %33, %cst_21 {dimension_numbers = #tpu.dot_dimension_numbers<[2], [0], [0, 1], [1], [0, 0, 0, 1, 1, 1], [], []>} : vector<16x16x2xbf16>, vector<2x8xbf16>, vector<16x16x8xf32> -> vector<16x16x8xf32>
    %35 = arith.addf %30, %34 : vector<16x16x8xf32>
    %36 = vector.extract_strided_slice %2 {offsets = [2, 0, 0], sizes = [16, 16, 2], strides = [1, 1, 1]} : vector<18x16x2xbf16> to vector<16x16x2xbf16>
    %c6 = arith.constant 6 : index
    %c0_22 = arith.constant 0 : index
    %c0_23 = arith.constant 0 : index
    %37 = vector.load %arg3[%c6, %c0_22, %c0_23] : memref<9x2x8xbf16, #tpu.memory_space<vmem>>, vector<1x2x8xbf16>
    %38 = vector.shape_cast %37 : vector<1x2x8xbf16> to vector<2x8xbf16>
    %cst_24 = arith.constant dense<0.000000e+00> : vector<16x16x8xf32>
    %39 = tpu.matmul %36, %38, %cst_24 {dimension_numbers = #tpu.dot_dimension_numbers<[2], [0], [0, 1], [1], [0, 0, 0, 1, 1, 1], [], []>} : vector<16x16x2xbf16>, vector<2x8xbf16>, vector<16x16x8xf32> -> vector<16x16x8xf32>
    %40 = arith.addf %35, %39 : vector<16x16x8xf32>
    %41 = vector.extract_strided_slice %3 {offsets = [2, 0, 0], sizes = [16, 16, 2], strides = [1, 1, 1]} : vector<18x16x2xbf16> to vector<16x16x2xbf16>
    %c7 = arith.constant 7 : index
    %c0_25 = arith.constant 0 : index
    %c0_26 = arith.constant 0 : index
    %42 = vector.load %arg3[%c7, %c0_25, %c0_26] : memref<9x2x8xbf16, #tpu.memory_space<vmem>>, vector<1x2x8xbf16>
    %43 = vector.shape_cast %42 : vector<1x2x8xbf16> to vector<2x8xbf16>
    %cst_27 = arith.constant dense<0.000000e+00> : vector<16x16x8xf32>
    %44 = tpu.matmul %41, %43, %cst_27 {dimension_numbers = #tpu.dot_dimension_numbers<[2], [0], [0, 1], [1], [0, 0, 0, 1, 1, 1], [], []>} : vector<16x16x2xbf16>, vector<2x8xbf16>, vector<16x16x8xf32> -> vector<16x16x8xf32>
    %45 = arith.addf %40, %44 : vector<16x16x8xf32>
    %46 = vector.extract_strided_slice %4 {offsets = [2, 0, 0], sizes = [16, 16, 2], strides = [1, 1, 1]} : vector<18x16x2xbf16> to vector<16x16x2xbf16>
    %c8 = arith.constant 8 : index
    %c0_28 = arith.constant 0 : index
    %c0_29 = arith.constant 0 : index
    %47 = vector.load %arg3[%c8, %c0_28, %c0_29] : memref<9x2x8xbf16, #tpu.memory_space<vmem>>, vector<1x2x8xbf16>
    %48 = vector.shape_cast %47 : vector<1x2x8xbf16> to vector<2x8xbf16>
    %cst_30 = arith.constant dense<0.000000e+00> : vector<16x16x8xf32>
    %49 = tpu.matmul %46, %48, %cst_30 {dimension_numbers = #tpu.dot_dimension_numbers<[2], [0], [0, 1], [1], [0, 0, 0, 1, 1, 1], [], []>} : vector<16x16x2xbf16>, vector<2x8xbf16>, vector<16x16x8xf32> -> vector<16x16x8xf32>
    %50 = arith.addf %45, %49 : vector<16x16x8xf32>
    %c0_31 = arith.constant 0 : index
    %c0_32 = arith.constant 0 : index
    %c0_33 = arith.constant 0 : index
    %c0_34 = arith.constant 0 : index
    %51 = vector.load %arg2[%c0_31, %c0_32, %c0_33, %c0_34] : memref<1x18x18x2xbf16, #tpu.memory_space<vmem>>, vector<1x18x18x2xbf16>
    %52 = vector.shape_cast %51 : vector<1x18x18x2xbf16> to vector<18x18x2xbf16>
    %53 = vector.extract_strided_slice %52 {offsets = [0, 0, 0], sizes = [18, 16, 2], strides = [1, 1, 1]} : vector<18x18x2xbf16> to vector<18x16x2xbf16>
    %54 = vector.extract_strided_slice %52 {offsets = [0, 1, 0], sizes = [18, 16, 2], strides = [1, 1, 1]} : vector<18x18x2xbf16> to vector<18x16x2xbf16>
    %55 = vector.extract_strided_slice %52 {offsets = [0, 2, 0], sizes = [18, 16, 2], strides = [1, 1, 1]} : vector<18x18x2xbf16> to vector<18x16x2xbf16>
    %cst_35 = arith.constant 0.000000e+00 : f32
    %56 = vector.broadcast %cst_35 : f32 to vector<16x16x8xf32>
    %57 = vector.extract_strided_slice %53 {offsets = [0, 0, 0], sizes = [16, 16, 2], strides = [1, 1, 1]} : vector<18x16x2xbf16> to vector<16x16x2xbf16>
    %c0_36 = arith.constant 0 : index
    %c0_37 = arith.constant 0 : index
    %c0_38 = arith.constant 0 : index
    %58 = vector.load %arg4[%c0_36, %c0_37, %c0_38] : memref<9x2x8xbf16, #tpu.memory_space<vmem>>, vector<1x2x8xbf16>
    %59 = vector.shape_cast %58 : vector<1x2x8xbf16> to vector<2x8xbf16>
    %cst_39 = arith.constant dense<0.000000e+00> : vector<16x16x8xf32>
    %60 = tpu.matmul %57, %59, %cst_39 {dimension_numbers = #tpu.dot_dimension_numbers<[2], [0], [0, 1], [1], [0, 0, 0, 1, 1, 1], [], []>} : vector<16x16x2xbf16>, vector<2x8xbf16>, vector<16x16x8xf32> -> vector<16x16x8xf32>
    %61 = arith.addf %56, %60 : vector<16x16x8xf32>
    %62 = vector.extract_strided_slice %54 {offsets = [0, 0, 0], sizes = [16, 16, 2], strides = [1, 1, 1]} : vector<18x16x2xbf16> to vector<16x16x2xbf16>
    %c1_40 = arith.constant 1 : index
    %c0_41 = arith.constant 0 : index
    %c0_42 = arith.constant 0 : index
    %63 = vector.load %arg4[%c1_40, %c0_41, %c0_42] : memref<9x2x8xbf16, #tpu.memory_space<vmem>>, vector<1x2x8xbf16>
    %64 = vector.shape_cast %63 : vector<1x2x8xbf16> to vector<2x8xbf16>
    %cst_43 = arith.constant dense<0.000000e+00> : vector<16x16x8xf32>
    %65 = tpu.matmul %62, %64, %cst_43 {dimension_numbers = #tpu.dot_dimension_numbers<[2], [0], [0, 1], [1], [0, 0, 0, 1, 1, 1], [], []>} : vector<16x16x2xbf16>, vector<2x8xbf16>, vector<16x16x8xf32> -> vector<16x16x8xf32>
    %66 = arith.addf %61, %65 : vector<16x16x8xf32>
    %67 = vector.extract_strided_slice %55 {offsets = [0, 0, 0], sizes = [16, 16, 2], strides = [1, 1, 1]} : vector<18x16x2xbf16> to vector<16x16x2xbf16>
    %c2_44 = arith.constant 2 : index
    %c0_45 = arith.constant 0 : index
    %c0_46 = arith.constant 0 : index
    %68 = vector.load %arg4[%c2_44, %c0_45, %c0_46] : memref<9x2x8xbf16, #tpu.memory_space<vmem>>, vector<1x2x8xbf16>
    %69 = vector.shape_cast %68 : vector<1x2x8xbf16> to vector<2x8xbf16>
    %cst_47 = arith.constant dense<0.000000e+00> : vector<16x16x8xf32>
    %70 = tpu.matmul %67, %69, %cst_47 {dimension_numbers = #tpu.dot_dimension_numbers<[2], [0], [0, 1], [1], [0, 0, 0, 1, 1, 1], [], []>} : vector<16x16x2xbf16>, vector<2x8xbf16>, vector<16x16x8xf32> -> vector<16x16x8xf32>
    %71 = arith.addf %66, %70 : vector<16x16x8xf32>
    %72 = vector.extract_strided_slice %53 {offsets = [1, 0, 0], sizes = [16, 16, 2], strides = [1, 1, 1]} : vector<18x16x2xbf16> to vector<16x16x2xbf16>
    %c3_48 = arith.constant 3 : index
    %c0_49 = arith.constant 0 : index
    %c0_50 = arith.constant 0 : index
    %73 = vector.load %arg4[%c3_48, %c0_49, %c0_50] : memref<9x2x8xbf16, #tpu.memory_space<vmem>>, vector<1x2x8xbf16>
    %74 = vector.shape_cast %73 : vector<1x2x8xbf16> to vector<2x8xbf16>
    %cst_51 = arith.constant dense<0.000000e+00> : vector<16x16x8xf32>
    %75 = tpu.matmul %72, %74, %cst_51 {dimension_numbers = #tpu.dot_dimension_numbers<[2], [0], [0, 1], [1], [0, 0, 0, 1, 1, 1], [], []>} : vector<16x16x2xbf16>, vector<2x8xbf16>, vector<16x16x8xf32> -> vector<16x16x8xf32>
    %76 = arith.addf %71, %75 : vector<16x16x8xf32>
    %77 = vector.extract_strided_slice %54 {offsets = [1, 0, 0], sizes = [16, 16, 2], strides = [1, 1, 1]} : vector<18x16x2xbf16> to vector<16x16x2xbf16>
    %c4_52 = arith.constant 4 : index
    %c0_53 = arith.constant 0 : index
    %c0_54 = arith.constant 0 : index
    %78 = vector.load %arg4[%c4_52, %c0_53, %c0_54] : memref<9x2x8xbf16, #tpu.memory_space<vmem>>, vector<1x2x8xbf16>
    %79 = vector.shape_cast %78 : vector<1x2x8xbf16> to vector<2x8xbf16>
    %cst_55 = arith.constant dense<0.000000e+00> : vector<16x16x8xf32>
    %80 = tpu.matmul %77, %79, %cst_55 {dimension_numbers = #tpu.dot_dimension_numbers<[2], [0], [0, 1], [1], [0, 0, 0, 1, 1, 1], [], []>} : vector<16x16x2xbf16>, vector<2x8xbf16>, vector<16x16x8xf32> -> vector<16x16x8xf32>
    %81 = arith.addf %76, %80 : vector<16x16x8xf32>
    %82 = vector.extract_strided_slice %55 {offsets = [1, 0, 0], sizes = [16, 16, 2], strides = [1, 1, 1]} : vector<18x16x2xbf16> to vector<16x16x2xbf16>
    %c5_56 = arith.constant 5 : index
    %c0_57 = arith.constant 0 : index
    %c0_58 = arith.constant 0 : index
    %83 = vector.load %arg4[%c5_56, %c0_57, %c0_58] : memref<9x2x8xbf16, #tpu.memory_space<vmem>>, vector<1x2x8xbf16>
    %84 = vector.shape_cast %83 : vector<1x2x8xbf16> to vector<2x8xbf16>
    %cst_59 = arith.constant dense<0.000000e+00> : vector<16x16x8xf32>
    %85 = tpu.matmul %82, %84, %cst_59 {dimension_numbers = #tpu.dot_dimension_numbers<[2], [0], [0, 1], [1], [0, 0, 0, 1, 1, 1], [], []>} : vector<16x16x2xbf16>, vector<2x8xbf16>, vector<16x16x8xf32> -> vector<16x16x8xf32>
    %86 = arith.addf %81, %85 : vector<16x16x8xf32>
    %87 = vector.extract_strided_slice %53 {offsets = [2, 0, 0], sizes = [16, 16, 2], strides = [1, 1, 1]} : vector<18x16x2xbf16> to vector<16x16x2xbf16>
    %c6_60 = arith.constant 6 : index
    %c0_61 = arith.constant 0 : index
    %c0_62 = arith.constant 0 : index
    %88 = vector.load %arg4[%c6_60, %c0_61, %c0_62] : memref<9x2x8xbf16, #tpu.memory_space<vmem>>, vector<1x2x8xbf16>
    %89 = vector.shape_cast %88 : vector<1x2x8xbf16> to vector<2x8xbf16>
    %cst_63 = arith.constant dense<0.000000e+00> : vector<16x16x8xf32>
    %90 = tpu.matmul %87, %89, %cst_63 {dimension_numbers = #tpu.dot_dimension_numbers<[2], [0], [0, 1], [1], [0, 0, 0, 1, 1, 1], [], []>} : vector<16x16x2xbf16>, vector<2x8xbf16>, vector<16x16x8xf32> -> vector<16x16x8xf32>
    %91 = arith.addf %86, %90 : vector<16x16x8xf32>
    %92 = vector.extract_strided_slice %54 {offsets = [2, 0, 0], sizes = [16, 16, 2], strides = [1, 1, 1]} : vector<18x16x2xbf16> to vector<16x16x2xbf16>
    %c7_64 = arith.constant 7 : index
    %c0_65 = arith.constant 0 : index
    %c0_66 = arith.constant 0 : index
    %93 = vector.load %arg4[%c7_64, %c0_65, %c0_66] : memref<9x2x8xbf16, #tpu.memory_space<vmem>>, vector<1x2x8xbf16>
    %94 = vector.shape_cast %93 : vector<1x2x8xbf16> to vector<2x8xbf16>
    %cst_67 = arith.constant dense<0.000000e+00> : vector<16x16x8xf32>
    %95 = tpu.matmul %92, %94, %cst_67 {dimension_numbers = #tpu.dot_dimension_numbers<[2], [0], [0, 1], [1], [0, 0, 0, 1, 1, 1], [], []>} : vector<16x16x2xbf16>, vector<2x8xbf16>, vector<16x16x8xf32> -> vector<16x16x8xf32>
    %96 = arith.addf %91, %95 : vector<16x16x8xf32>
    %97 = vector.extract_strided_slice %55 {offsets = [2, 0, 0], sizes = [16, 16, 2], strides = [1, 1, 1]} : vector<18x16x2xbf16> to vector<16x16x2xbf16>
    %c8_68 = arith.constant 8 : index
    %c0_69 = arith.constant 0 : index
    %c0_70 = arith.constant 0 : index
    %98 = vector.load %arg4[%c8_68, %c0_69, %c0_70] : memref<9x2x8xbf16, #tpu.memory_space<vmem>>, vector<1x2x8xbf16>
    %99 = vector.shape_cast %98 : vector<1x2x8xbf16> to vector<2x8xbf16>
    %cst_71 = arith.constant dense<0.000000e+00> : vector<16x16x8xf32>
    %100 = tpu.matmul %97, %99, %cst_71 {dimension_numbers = #tpu.dot_dimension_numbers<[2], [0], [0, 1], [1], [0, 0, 0, 1, 1, 1], [], []>} : vector<16x16x2xbf16>, vector<2x8xbf16>, vector<16x16x8xf32> -> vector<16x16x8xf32>
    %101 = arith.addf %96, %100 : vector<16x16x8xf32>
    %102 = arith.addf %50, %101 : vector<16x16x8xf32>
    %c0_72 = arith.constant 0 : index
    %c0_73 = arith.constant 0 : index
    %103 = vector.load %arg5[%c0_72, %c0_73] : memref<1x8xf32, #tpu.memory_space<vmem>>, vector<1x8xf32>
    %104 = vector.shape_cast %103 : vector<1x8xf32> to vector<8xf32>
    %c0_74 = arith.constant 0 : index
    %c0_75 = arith.constant 0 : index
    %105 = vector.load %arg6[%c0_74, %c0_75] : memref<1x8xf32, #tpu.memory_space<vmem>>, vector<1x8xf32>
    %106 = vector.shape_cast %105 : vector<1x8xf32> to vector<8xf32>
    %107 = vector.shape_cast %104 : vector<8xf32> to vector<1x1x8xf32>
    %108 = vector.broadcast %107 : vector<1x1x8xf32> to vector<16x16x8xf32>
    %109 = arith.mulf %102, %108 : vector<16x16x8xf32>
    %110 = vector.shape_cast %106 : vector<8xf32> to vector<1x1x8xf32>
    %111 = vector.broadcast %110 : vector<1x1x8xf32> to vector<16x16x8xf32>
    %112 = arith.addf %109, %111 : vector<16x16x8xf32>
    %cst_76 = arith.constant 0.000000e+00 : f32
    %113 = vector.broadcast %cst_76 : f32 to vector<16x16x8xf32>
    %114 = arith.maximumf %112, %113 : vector<16x16x8xf32>
    %115 = arith.truncf %114 : vector<16x16x8xf32> to vector<16x16x8xbf16>
    %c0_77 = arith.constant 0 : index
    %c0_78 = arith.constant 0 : index
    %c0_79 = arith.constant 0 : index
    %c0_80 = arith.constant 0 : index
    %116 = vector.load %arg7[%c0_77, %c0_78, %c0_79, %c0_80] : memref<1x16x16x8xbf16, #tpu.memory_space<vmem>>, vector<1x16x16x8xbf16>
    %117 = vector.shape_cast %116 : vector<1x16x16x8xbf16> to vector<16x16x8xbf16>
    %118 = vector.shape_cast %115 : vector<16x16x8xbf16> to vector<1x16x16x8xbf16>
    tpu.vector_store %arg7[%c0_77, %c0_78, %c0_79, %c0_80], %118 {strides = array<i32>} : memref<1x16x16x8xbf16, #tpu.memory_space<vmem>>, vector<1x16x16x8xbf16>,
    return
  }
  func.func @transform_0(%arg0: i32) -> (i32, i32, i32, i32) {
    %c0_i32 = arith.constant 0 : i32
    %c0_i32_0 = arith.constant 0 : i32
    %c0_i32_1 = arith.constant 0 : i32
    %c0_i32_2 = arith.constant 0 : i32
    return %arg0, %c0_i32, %c0_i32_0, %c0_i32_1 : i32, i32, i32, i32
  }
  func.func @transform_1(%arg0: i32) -> (i32, i32, i32, i32) {
    %c0_i32 = arith.constant 0 : i32
    %c0_i32_0 = arith.constant 0 : i32
    %c0_i32_1 = arith.constant 0 : i32
    %c0_i32_2 = arith.constant 0 : i32
    return %arg0, %c0_i32, %c0_i32_0, %c0_i32_1 : i32, i32, i32, i32
  }
  func.func @transform_2(%arg0: i32) -> (i32, i32, i32) {
    %c0_i32 = arith.constant 0 : i32
    %c0_i32_0 = arith.constant 0 : i32
    %c0_i32_1 = arith.constant 0 : i32
    %c0_i32_2 = arith.constant 0 : i32
    return %c0_i32, %c0_i32_0, %c0_i32_1 : i32, i32, i32
  }
  func.func @transform_3(%arg0: i32) -> (i32, i32, i32) {
    %c0_i32 = arith.constant 0 : i32
    %c0_i32_0 = arith.constant 0 : i32
    %c0_i32_1 = arith.constant 0 : i32
    %c0_i32_2 = arith.constant 0 : i32
    return %c0_i32, %c0_i32_0, %c0_i32_1 : i32, i32, i32
  }
  func.func @transform_4(%arg0: i32) -> (i32, i32) {
    %c0_i32 = arith.constant 0 : i32
    %c0_i32_0 = arith.constant 0 : i32
    %c0_i32_1 = arith.constant 0 : i32
    return %c0_i32, %c0_i32_0 : i32, i32
  }
  func.func @transform_5(%arg0: i32) -> (i32, i32) {
    %c0_i32 = arith.constant 0 : i32
    %c0_i32_0 = arith.constant 0 : i32
    %c0_i32_1 = arith.constant 0 : i32
    return %c0_i32, %c0_i32_0 : i32, i32
  }
  func.func @transform_6(%arg0: i32) -> (i32, i32, i32, i32) {
    %c0_i32 = arith.constant 0 : i32
    %c0_i32_0 = arith.constant 0 : i32
    %c0_i32_1 = arith.constant 0 : i32
    %c0_i32_2 = arith.constant 0 : i32
    return %arg0, %c0_i32, %c0_i32_0, %c0_i32_1 : i32, i32, i32, i32
  }
}

</mosaic_0001>

<bundles_post_ra>
// kernel: _forward_fused.1
= control target key start
LH: loop header
LB: loop body
LE: loop exit
PB: predicated region body
PF: predicated region fallthrough
CT: control target
= control target key end

     0   :  { %s3231_s27 = smov 0   ;;  %s4516_s0 = inlined_call_operand.vmem [shape: bf16[2,16,16,2], index: 0, kind: input, shape index: {}]   ;;  %s4517_s1 = inlined_call_operand.vmem [shape: bf16[2,16,16,2], index: 1, kind: input, shape index: {}]   ;;  %s4518_s2 = inlined_call_operand.vmem [shape: bf16[36,8], index: 2, kind: input, shape index: {}]   ;;  %s4519_s3 = inlined_call_operand.vmem [shape: f32[1,8], index: 3, kind: input, shape index: {}]   ;;  %s4520_s4 = inlined_call_operand.vmem [shape: f32[1,8], index: 4, kind: input, shape index: {}]   ;;  %s4521_s5 = inlined_call_operand.vmem [shape: bf16[72,8], index: 5, kind: input, shape index: {}]   ;;  %s4522_s6 = inlined_call_operand.vmem [shape: f32[1,8], index: 6, kind: input, shape index: {}]   ;;  %s4523_s7 = inlined_call_operand.vmem [shape: f32[1,8], index: 7, kind: input, shape index: {}]   ;;  %s4524_s8 = inlined_call_operand.vmem [shape: f32[2,16,16,8], index: 8, kind: output, shape index: {}]  }
   0x1 LB: > { %s2900_s28 = sadd.s32 4294967295, %s3176_s27   ;;  %p2904_p0 = scmp.ge.s32.totalorder %s3176_s27, 1  ;;  %s3176_s27 = sphi %s3231_s27, %s18_s27  }
   0x2   : > { %p272_p1 = scmp.lt.s32.totalorder %s3176_s27, 3 }
   0x4   : > { %p273_p2 = pnand %p2904_p0, %p272_p1 }
   0x5   : > { %p311_p3 = scmp.lt.s32.totalorder (!%p273_p2), %s2900_s28, 1  ;;  %s3178_s11 = smov (!%p273_p2), 2   ;;  %vm583_vm0 = vcmask (!%p273_p2), 15360   ;;  %vm769_vm1 = vcmask (!%p273_p2), 1040384   ;;  %vm770_vm2 = vsmask.f32 (!%p273_p2), 256 }
   0x6   : > { %276 = sbr.rel (%p273_p2) target bundleno = 1176 (0x498), region = 52  ;;  %vm3293_vm3 = vmand (!%p273_p2), %vm769_vm1, %vm770_vm2  ;;  %vm1086_vm4 = vcmask (!%p273_p2), 1046528   ;;  %s3179_s15 = smov (!%p273_p2), 8   ;;  %vm813_vm5 = vsmask.f32 (!%p273_p2), 7424  ;;  %vm1437_vm6 = vcmask (!%p273_p2), 1041408  }
   0x7   : > { %s3181_s16 = smov (!%p273_p2), 4   ;;  %vm1172_vm7 = vcmask (!%p273_p2), 31744   ;;  %vm1207_vm8 = vcmask (!%p273_p2), 64512   ;;  %s3182_s23 = smov (!%p273_p2), 12   ;;  %vm1323_vm9 = vcmask (!%p273_p2), 97280   ;;  %vm1356_vm10 = vcmask (!%p273_p2), 195584  }
   0x8   : > { %s3183_s24 = smov (!%p273_p2), 24   ;;  %vm1404_vm11 = vcmask (!%p273_p2), 293888   ;;  %s3184_s9 = smov (!%p273_p2), 16   ;;  %vm2528_vm12 = vcmask (!%p273_p2), 1043456   ;;  %vm2287_vm13 = vcmask (!%p273_p2), 130048   ;;  %vm2435_vm14 = vcmask (!%p273_p2), 392192  }
   0x9   : > { %vm2495_vm15 = vcmask (!%p273_p2), 588800  }
   0xd   : > { %s4528_s28 = smov (!%p311_p3, %s2900_s28), 1 }
   0xe   : > { %s2989_s29 = sshll.u32 %s4528_s28, 7  ;;  %s2991_s25 = sshll.u32 %s4528_s28, 8 }
   0xf   : > { %s3245_s10 = scalar_lea.vmem %s4517_s1, %s2989_s29  ;;  %s3266_s14 = scalar_lea.vmem %s4516_s0, %s2989_s29 }
  0x10   : > { %v3130_v0 = vld [vmem:[%s3245_s10 + $0x10] sm:$0xff]   ;;  %v3131_v1 = vld [vmem:[%s3245_s10] sm:$0xff]   ;;  %v3132_v2 = vld [vmem:[%s3245_s10 + $0x8] sm:$0xff]   ;;  %s4387_s30 = scalar_lea.vmem %s4524_s8, %s2991_s25 }
  0x11   : > { %555 = vrot.lane.b32.xlu1 %v3130_v0, %s3178_s11  ;;  %551 = vrot.lane.b32.xlu0 %v3131_v1, %s3178_s11  ;;  %v3133_v3 = vld [vmem:[%s3245_s10 + $0x18] sm:$0xff]   ;;  %v3135_v4 = vld [vmem:[%s3245_s10 + $0x28] sm:$0xff]  }
  0x12   : > { %v3134_v5 = vld [vmem:[%s3245_s10 + $0x20] sm:$0xff]   ;;  %v3137_v6 = vld [vmem:[%s3245_s10 + $0x38] sm:$0xff]   ;;  %v3136_v7 = vld [vmem:[%s3245_s10 + $0x30] sm:$0xff]  }
  0x13   : > { %v3139_v8 = vld [vmem:[%s3245_s10 + $0x48] sm:$0xff]   ;;  %v3138_v9 = vld [vmem:[%s3245_s10 + $0x40] sm:$0xff]   ;;  %v3141_v10 = vld [vmem:[%s3245_s10 + $0x58] sm:$0xff]  }
  0x14   : > { %v3140_v11 = vld [vmem:[%s3245_s10 + $0x50] sm:$0xff]   ;;  %v3143_v12 = vld [vmem:[%s3245_s10 + $0x68] sm:$0xff]   ;;  %v3142_v13 = vld [vmem:[%s3245_s10 + $0x60] sm:$0xff]  }
  0x15   : > { %557 = vrot.lane.b32.xlu1 %v3133_v3, %s3178_s11  ;;  %553 = vrot.lane.b32.xlu0 %v3132_v2, %s3178_s11  ;;  %v3145_v14 = vld [vmem:[%s3245_s10 + $0x78] sm:$0xff]   ;;  %v3144_v15 = vld [vmem:[%s3245_s10 + $0x70] sm:$0xff]  }
  0x16   : > { %v3146_v16 = vld [vmem:[%s3266_s14 + $0x10] sm:$0xff]   ;;  %v3147_v17 = vld [vmem:[%s3266_s14] sm:$0xff]   ;;  %v3148_v23 = vld [vmem:[%s3266_s14 + $0x8] sm:$0xff]  }
  0x17   : > { %v3149_v24 = vld [vmem:[%s3266_s14 + $0x18] sm:$0xff]   ;;  %v3150_v34 = vld [vmem:[%s3266_s14 + $0x20] sm:$0xff]   ;;  %v3151_v39 = vld [vmem:[%s3266_s14 + $0x28] sm:$0xff]  }
  0x18   : > { %v3152_v57 = vld [vmem:[%s3266_s14 + $0x30] sm:$0xff]  }
  0x19   : > { %561 = vrot.lane.b32.xlu1 %v3135_v4, %s3178_s11  ;;  %559 = vrot.lane.b32.xlu0 %v3134_v5, %s3178_s11 }
  0x1d   : > { %565 = vrot.lane.b32.xlu1 %v3137_v6, %s3178_s11  ;;  %563 = vrot.lane.b32.xlu0 %v3136_v7, %s3178_s11 }
  0x21   : > { %569 = vrot.lane.b32.xlu1 %v3139_v8, %s3178_s11  ;;  %567 = vrot.lane.b32.xlu0 %v3138_v9, %s3178_s11  ;;  %v3180_v8 = vmov 0  }
  0x22   : > { %v3338_v9 = vrot.slane %v3180_v8, 7 }
  0x25   : > { %573 = vrot.lane.b32.xlu1 %v3141_v10, %s3178_s11  ;;  %571 = vrot.lane.b32.xlu0 %v3140_v11, %s3178_s11 }
  0x29   : > { %577 = vrot.lane.b32.xlu1 %v3143_v12, %s3178_s11  ;;  %575 = vrot.lane.b32.xlu0 %v3142_v13, %s3178_s11 }
  0x2d   : > { %581 = vrot.lane.b32.xlu1 %v3145_v14, %s3178_s11  ;;  %579 = vrot.lane.b32.xlu0 %v3144_v15, %s3178_s11  ;;  %v3153_v14 = vld [vmem:[%s3266_s14 + $0x38] sm:$0xff]  }
  0x83   : > { %v556_v18 = vpop.permute.xlu1 %555  ;;  %v552_v20 = vpop.permute.xlu0 %551 }
  0x84   : > { %v592_v19 = vsel %vm583_vm0, %v3146_v16, %v556_v18  ;;  %v586_v22 = vsel %vm583_vm0, %v3147_v17, %v552_v20 }
  0x85   : > { %v651_v21 = vshrl.u32 %v592_v19, 16  ;;  %v639_v25 = vshrl.u32 %v586_v22, 16  ;;  %v654_v27 = vshll.u32 %v592_v19, 16  ;;  %v642_v30 = vshll.u32 %v586_v22, 16 }
  0x87   : > { %v653_v26 = vrot.slane %v651_v21, 7  ;;  %v558_v28 = vpop.permute.xlu1 %557  ;;  %v641_v29 = vrot.slane %v639_v25, 7  ;;  %v554_v31 = vpop.permute.xlu0 %553  ;;  %v3154_v25 = vld [vmem:[%s3266_s14 + $0x40] sm:$0xff]  }
  0x88   : > { %v589_v32 = vsel %vm583_vm0, %v3148_v23, %v554_v31  ;;  %v595_v33 = vsel %vm583_vm0, %v3149_v24, %v558_v28 }
  0x89   : > { %v644_v36 = vor.u32 %v642_v30, %v641_v29  ;;  %v645_v37 = vshrl.u32 %v589_v32, 16  ;;  %v656_v38 = vor.u32 %v654_v27, %v653_v26  ;;  %v648_v41 = vshll.u32 %v589_v32, 16 }
  0x8a   : > { %v657_v42 = vshrl.u32 %v595_v33, 16  ;;  %v3304_v46 = vsel %vm3293_vm3, %v641_v29, 0  ;;  %v3313_v50 = vsel %vm3293_vm3, %v653_v26, 0  ;;  %v660_v54 = vshll.u32 %v595_v33, 16 }
  0x8b   : > { %v647_v40 = vrot.slane %v645_v37, 7  ;;  %v560_v43 = vpop.permute.xlu0 %559  ;;  %v562_v44 = vpop.permute.xlu1 %561  ;;  %v3300_v45 = vsel %vm3293_vm3, 0, %v644_v36  ;;  %v3309_v49 = vsel %vm3293_vm3, 0, %v656_v38  ;;  %v1091_v56 = vrot.slane %v3304_v46, 1 }
  0x8c   : > { %v598_v47 = vsel %vm583_vm0, %v3150_v34, %v560_v43  ;;  %v601_v52 = vsel %vm583_vm0, %v3151_v39, %v562_v44  ;;  %v659_v53 = vrot.slane %v657_v42, 7  ;;  %v1090_v55 = vrot.slane %v3300_v45, 1 }
  0x8d   : > { %v650_v48 = vor.u32 %v648_v41, %v647_v40  ;;  %v663_v51 = vshrl.u32 %v598_v47, 16  ;;  %v666_v60 = vshll.u32 %v598_v47, 16  ;;  %v1096_v61 = vrot.slane %v3309_v49, 1 }
  0x8e   : > { %v3326_v63 = vsel %vm3293_vm3, %v647_v40, 0  ;;  %v669_v0 = vshrl.u32 %v601_v52, 16  ;;  %v1092_v1 = vsel %vm1086_vm4, %v1090_v55, %v1091_v56  ;;  %v1097_v2 = vrot.slane %v3313_v50, 1 }
  0x8f   : > { %v3321_v58 = vsel %vm3293_vm3, 0, %v650_v48  ;;  %v665_v59 = vrot.slane %v663_v51, 7  ;;  %v564_v62 = vpop.permute.xlu0 %563  ;;  %1140 = vrot.lane.b32.xlu0 %v1092_v1, %s3179_s15  ;;  %v3342_v10 = vsel %vm3293_vm3, %v659_v53, 0  ;;  %v672_v12 = vshll.u32 %v601_v52, 16  ;;  %v566_v17 = vpop.permute.xlu1 %565  ;;  %v3155_v51 = vld [vmem:[%s3266_s14 + $0x48] sm:$0xff]  }
  0x90   : > { %v1098_v5 = vsel %vm1086_vm4, %v1096_v61, %v1097_v2  ;;  %v604_v6 = vsel %vm583_vm0, %v3152_v57, %v564_v62  ;;  %v1093_v7 = vrot.slane %v3321_v58, 1  ;;  %v1094_v13 = vrot.slane %v3326_v63, 1  ;;  %v3156_v57 = vld [vmem:[%s3266_s14 + $0x50] sm:$0xff]  }
  0x91   : > { %v668_v3 = vor.u32 %v666_v60, %v665_v59  ;;  %v3332_v4 = vsel %vm3293_vm3, %v665_v59, 0  ;;  %1144 = vrot.lane.b32.xlu1 %v1098_v5, %s3179_s15  ;;  %v662_v15 = vor.u32 %v660_v54, %v659_v53  ;;  %v671_v16 = vrot.slane %v669_v0, 7 }
  0x92   : > { %v1103_v19 = vrot.slane %v3332_v4, 1  ;;  %v675_v20 = vshrl.u32 %v604_v6, 16  ;;  %v1095_v21 = vsel %vm1086_vm4, %v1093_v7, %v1094_v13  ;;  %v834_v22 = vshll.u32 %v3304_v46, 16 }
  0x93   : > { %v3346_v11 = vsel %vm3293_vm3, 0, %v668_v3  ;;  %1142 = vrot.lane.b32.xlu0 %v1095_v21, %s3179_s15  ;;  %v829_v24 = vshll.u32 %v3300_v45, 16  ;;  %v3362_v26 = vsel %vm3293_vm3, 0, %v3338_v9  ;;  %v858_v27 = vshll.u32 %v3313_v50, 16  ;;  %v568_v31 = vpop.permute.xlu0 %567  ;;  %v570_v56 = vpop.permute.xlu1 %569 }
  0x94   : > { %v1102_v18 = vrot.slane %v3346_v11, 1  ;;  %v846_v28 = vshll.u32 %v3326_v63, 16  ;;  %v870_v29 = vshll.u32 %v3342_v10, 16  ;;  %v607_v30 = vsel %vm583_vm0, %v3153_v14, %v566_v17 }
  0x95   : > { %v3371_v32 = vsel %vm3293_vm3, 0, %v662_v15  ;;  %v674_v33 = vor.u32 %v672_v12, %v671_v16  ;;  %v827_v34 = vshrl.u32 %v3300_v45, 16  ;;  %v831_v36 = vrot.slane %v829_v24, 1 }
  0x96   : > { %v1104_v23 = vsel %vm1086_vm4, %v1102_v18, %v1103_v19  ;;  %v3376_v37 = vsel %vm3293_vm3, %v671_v16, 0  ;;  %v677_v38 = vrot.slane %v675_v20, 7  ;;  %v678_v39 = vshll.u32 %v604_v6, 16 }
  0x97   : > { %1148 = vrot.lane.b32.xlu1 %v1104_v23, %s3179_s15  ;;  %v841_v40 = vshll.u32 %v3321_v58, 16  ;;  %v681_v41 = vshrl.u32 %v607_v30, 16  ;;  %v832_v42 = vor.u32 %v831_v36, %v827_v34  ;;  %v836_v43 = vrot.slane %v834_v22, 1  ;;  %v572_v63 = vpop.permute.xlu0 %571  ;;  %v574_v36 = vpop.permute.xlu1 %573 }
  0x98   : > { %v610_v44 = vsel %vm583_vm0, %v3154_v25, %v568_v31  ;;  %v839_v46 = vshrl.u32 %v3321_v58, 16  ;;  %v1099_v48 = vrot.slane %v3371_v32, 1  ;;  %v1100_v50 = vrot.slane %v3342_v10, 1 }
  0x99   : > { %v843_v47 = vrot.slane %v841_v40, 1  ;;  %v3386_v52 = vsel %vm3293_vm3, 0, %v674_v33  ;;  %v894_v53 = vshll.u32 %v3376_v37, 16  ;;  %v684_v54 = vshll.u32 %v607_v30, 16 }
  0x9a   : > { %v837_v55 = vsel %vm813_vm5, %v832_v42, %v836_v43  ;;  %v680_v59 = vor.u32 %v678_v39, %v677_v38  ;;  %v687_v60 = vshrl.u32 %v610_v44, 16  ;;  %v848_v62 = vrot.slane %v846_v28, 1  ;;  %v3157_v28 = vld [vmem:[%s3266_s14 + $0x58] sm:$0xff]  }
  0x9b   : > { %1020 = vrot.lane.b32.xlu0 %v837_v55, %s3181_s16  ;;  %v844_v61 = vor.u32 %v843_v47, %v839_v46  ;;  %v3394_v0 = vsel %vm3293_vm3, %v677_v38, 0  ;;  %v683_v1 = vrot.slane %v681_v41, 7  ;;  %v851_v2 = vshrl.u32 %v3309_v49, 16  ;;  %v3158_v47 = vld [vmem:[%s3266_s14 + $0x60] sm:$0xff]   ;;  %v576_v55 = vpop.permute.xlu0 %575 }
  0x9c   : > { %v853_v3 = vshll.u32 %v3309_v49, 16  ;;  %v1101_v6 = vsel %vm1086_vm4, %v1099_v48, %v1100_v50  ;;  %v613_v7 = vsel %vm583_vm0, %v3155_v51, %v570_v56  ;;  %v860_v8 = vrot.slane %v858_v27, 1 }
  0x9d   : > { %v849_v5 = vsel %vm813_vm5, %v844_v61, %v848_v62  ;;  %v1105_v13 = vrot.slane %v3386_v52, 1  ;;  %v1106_v14 = vrot.slane %v3376_v37, 1  ;;  %v616_v15 = vsel %vm583_vm0, %v3156_v57, %v572_v63 }
  0x9e   : > { %1022 = vrot.lane.b32.xlu1 %v849_v5, %s3181_s16  ;;  %v855_v12 = vrot.slane %v853_v3, 1  ;;  %v882_v16 = vshll.u32 %v3332_v4, 16  ;;  %v906_v17 = vshll.u32 %v3394_v0, 16  ;;  %v689_v18 = vrot.slane %v687_v60, 7 }
  0x9f   : > { %v690_v19 = vshll.u32 %v610_v44, 16  ;;  %1146 = vrot.lane.b32.xlu0 %v1101_v6, %s3179_s15  ;;  %v3410_v20 = vsel %vm3293_vm3, 0, %v680_v59  ;;  %v686_v21 = vor.u32 %v684_v54, %v683_v1  ;;  %v3414_v22 = vsel %vm3293_vm3, %v683_v1, 0 }
  0xa0   : > { %v856_v23 = vor.u32 %v855_v12, %v851_v2  ;;  %v693_v24 = vshrl.u32 %v613_v7, 16  ;;  %v699_v25 = vshrl.u32 %v616_v15, 16  ;;  %v863_v4 = vshrl.u32 %v3371_v32, 16 }
  0xa1   : > { %v865_v27 = vshll.u32 %v3371_v32, 16  ;;  %v1107_v31 = vsel %vm1086_vm4, %v1105_v13, %v1106_v14  ;;  %v1108_v33 = vrot.slane %v3410_v20, 1  ;;  %v1109_v34 = vrot.slane %v3394_v0, 1 }
  0xa2   : > { %v861_v30 = vsel %vm813_vm5, %v856_v23, %v860_v8  ;;  %v918_v38 = vshll.u32 %v3414_v22, 16  ;;  %v692_v39 = vor.u32 %v690_v19, %v689_v18  ;;  %v872_v41 = vrot.slane %v870_v29, 1 }
  0xa3   : > { %1024 = vrot.lane.b32.xlu1 %v861_v30, %s3181_s16  ;;  %1150 = vrot.lane.b32.xlu0 %v1107_v31, %s3179_s15  ;;  %v867_v40 = vrot.slane %v865_v27, 1  ;;  %v3430_v42 = vsel %vm3293_vm3, 0, %v686_v21  ;;  %v3434_v43 = vsel %vm3293_vm3, %v689_v18, 0  ;;  %v696_v44 = vshll.u32 %v613_v7, 16  ;;  %v3159_v18 = vld [vmem:[%s3266_s14 + $0x68] sm:$0xff]  }
  0xa4   : > { %v877_v46 = vshll.u32 %v3346_v11, 16  ;;  %v695_v48 = vrot.slane %v693_v24, 7  ;;  %v702_v50 = vshll.u32 %v616_v15, 16  ;;  %v619_v54 = vsel %vm583_vm0, %v3157_v28, %v574_v36  ;;  %v578_v24 = vpop.permute.xlu1 %577 }
  0xa5   : > { %v868_v51 = vor.u32 %v867_v40, %v863_v4  ;;  %v701_v10 = vrot.slane %v699_v25, 7  ;;  %v1110_v29 = vsel %vm1086_vm4, %v1108_v33, %v1109_v34  ;;  %v875_v56 = vshrl.u32 %v3346_v11, 16 }
  0xa6   : > { %v879_v57 = vrot.slane %v877_v46, 1  ;;  %v3443_v59 = vsel %vm3293_vm3, 0, %v692_v39  ;;  %v1111_v61 = vrot.slane %v3430_v42, 1  ;;  %v1112_v62 = vrot.slane %v3414_v22, 1 }
  0xa7   : > { %1152 = vrot.lane.b32.xlu1 %v1110_v29, %s3179_s15  ;;  %v873_v60 = vsel %vm813_vm5, %v868_v51, %v872_v41  ;;  %v705_v63 = vshrl.u32 %v619_v54, 16  ;;  %v884_v2 = vrot.slane %v882_v16, 1  ;;  %v622_v3 = vsel %vm583_vm0, %v3158_v47, %v576_v55  ;;  %v580_v41 = vpop.permute.xlu0 %579 }
  0xa8   : > { %1026 = vrot.lane.b32.xlu0 %v873_v60, %s3181_s16  ;;  %v880_v1 = vor.u32 %v879_v57, %v875_v56  ;;  %v698_v5 = vor.u32 %v696_v44, %v695_v48  ;;  %v3453_v6 = vsel %vm3293_vm3, %v695_v48, 0  ;;  %v887_v7 = vshrl.u32 %v3386_v52, 16 }
  0xa9   : > { %v889_v8 = vshll.u32 %v3386_v52, 16  ;;  %v704_v12 = vor.u32 %v702_v50, %v701_v10  ;;  %v1114_v14 = vrot.slane %v3443_v59, 1  ;;  %v1115_v15 = vrot.slane %v3434_v43, 1 }
  0xaa   : > { %v885_v13 = vsel %vm813_vm5, %v880_v1, %v884_v2  ;;  %v1113_v16 = vsel %vm1086_vm4, %v1111_v61, %v1112_v62  ;;  %v711_v19 = vshrl.u32 %v622_v3, 16  ;;  %v896_v23 = vrot.slane %v894_v53, 1  ;;  %v3160_v53 = vld [vmem:[%s3266_s14 + $0x70] sm:$0xff]   ;;  %v3161_v61 = vld [vmem:[%s3266_s14 + $0x78] sm:$0xff]  }
  0xab   : > { %1028 = vrot.lane.b32.xlu1 %v885_v13, %s3181_s16  ;;  %v891_v21 = vrot.slane %v889_v8, 1  ;;  %v707_v25 = vrot.slane %v705_v63, 7  ;;  %v708_v4 = vshll.u32 %v619_v54, 16  ;;  %v899_v27 = vshrl.u32 %v3410_v20, 16 }
  0xac   : > { %1154 = vrot.lane.b32.xlu0 %v1113_v16, %s3179_s15  ;;  %v901_v28 = vshll.u32 %v3410_v20, 16  ;;  %v3470_v30 = vsel %vm3293_vm3, 0, %v698_v5  ;;  %v3474_v31 = vsel %vm3293_vm3, %v701_v10, 0  ;;  %v714_v33 = vshll.u32 %v622_v3, 16  ;;  %v582_v3 = vpop.permute.xlu1 %581 }
  0xad   : > { %v892_v37 = vor.u32 %v891_v21, %v887_v7  ;;  %v1116_v34 = vsel %vm1086_vm4, %v1114_v14, %v1115_v15  ;;  %v625_v36 = vsel %vm583_vm0, %v3159_v18, %v578_v24  ;;  %v908_v40 = vrot.slane %v906_v17, 1 }
  0xae   : > { %v903_v39 = vrot.slane %v901_v28, 1  ;;  %v713_v44 = vrot.slane %v711_v19, 7  ;;  %v1117_v47 = vrot.slane %v3470_v30, 1  ;;  %v1118_v48 = vrot.slane %v3453_v6, 1 }
  0xaf   : > { %1156 = vrot.lane.b32.xlu1 %v1116_v34, %s3179_s15  ;;  %v897_v46 = vsel %vm813_vm5, %v892_v37, %v896_v23  ;;  %v930_v50 = vshll.u32 %v3434_v43, 16  ;;  %v3488_v51 = vsel %vm3293_vm3, 0, %v704_v12  ;;  %v710_v54 = vor.u32 %v708_v4, %v707_v25 }
  0xb0   : > { %1030 = vrot.lane.b32.xlu0 %v897_v46, %s3181_s16  ;;  %v904_v0 = vor.u32 %v903_v39, %v899_v27  ;;  %v942_v17 = vshll.u32 %v3453_v6, 16  ;;  %v717_v55 = vshrl.u32 %v625_v36, 16  ;;  %v628_v10 = vsel %vm583_vm0, %v3160_v53, %v580_v41 }
  0xb1   : > { %v1120_v29 = vrot.slane %v3488_v51, 1  ;;  %v1121_v57 = vrot.slane %v3474_v31, 1  ;;  %v911_v43 = vshrl.u32 %v3430_v42, 16  ;;  %v913_v60 = vshll.u32 %v3430_v42, 16 }
  0xb2   : > { %v909_v56 = vsel %vm813_vm5, %v904_v0, %v908_v40  ;;  %v954_v62 = vshll.u32 %v3474_v31, 16  ;;  %v3502_v63 = vsel %vm3293_vm3, %v707_v25, 0  ;;  %v716_v1 = vor.u32 %v714_v33, %v713_v44 }
  0xb3   : > { %1032 = vrot.lane.b32.xlu1 %v909_v56, %s3181_s16  ;;  %v1119_v2 = vsel %vm1086_vm4, %v1117_v47, %v1118_v48  ;;  %v3508_v5 = vsel %vm3293_vm3, 0, %v710_v54  ;;  %v723_v6 = vshrl.u32 %v628_v10, 16  ;;  %v915_v7 = vrot.slane %v913_v60, 1 }
  0xb4   : > { %1158 = vrot.lane.b32.xlu0 %v1119_v2, %s3179_s15  ;;  %v920_v8 = vrot.slane %v918_v38, 1  ;;  %v3515_v12 = vsel %vm3293_vm3, %v713_v44, 0  ;;  %v720_v13 = vshll.u32 %v625_v36, 16  ;;  %v923_v14 = vshrl.u32 %v3443_v59, 16 }
  0xb5   : > { %v925_v15 = vshll.u32 %v3443_v59, 16  ;;  %v719_v18 = vrot.slane %v717_v55, 7  ;;  %v1122_v16 = vsel %vm1086_vm4, %v1120_v29, %v1121_v57  ;;  %v916_v19 = vor.u32 %v915_v7, %v911_v43 }
  0xb6   : > { %v631_v21 = vsel %vm583_vm0, %v3161_v61, %v582_v3  ;;  %v3523_v23 = vsel %vm3293_vm3, 0, %v716_v1  ;;  %v726_v22 = vshll.u32 %v628_v10, 16  ;;  %v932_v24 = vrot.slane %v930_v50, 1 }
  0xb7   : > { %1160 = vrot.lane.b32.xlu1 %v1122_v16, %s3179_s15  ;;  %v927_v38 = vrot.slane %v925_v15, 1  ;;  %v725_v25 = vrot.slane %v723_v6, 7  ;;  %v921_v4 = vsel %vm813_vm5, %v916_v19, %v920_v8  ;;  %v1123_v27 = vrot.slane %v3508_v5, 1 }
  0xb8   : > { %v1124_v28 = vrot.slane %v3502_v63, 1  ;;  %1034 = vrot.lane.b32.xlu0 %v921_v4, %s3181_s16  ;;  %v729_v31 = vshrl.u32 %v631_v21, 16  ;;  %v935_v37 = vshrl.u32 %v3470_v30, 16  ;;  %v937_v53 = vshll.u32 %v3470_v30, 16 }
  0xb9   : > { %v928_v33 = vor.u32 %v927_v38, %v923_v14  ;;  %v722_v34 = vor.u32 %v720_v13, %v719_v18  ;;  %v1126_v36 = vrot.slane %v3523_v23, 1  ;;  %v1127_v39 = vrot.slane %v3515_v12, 1 }
  0xba   : > { %v949_v40 = vshll.u32 %v3488_v51, 16  ;;  %v3537_v41 = vsel %vm3293_vm3, %v719_v18, 0  ;;  %v939_v46 = vrot.slane %v937_v53, 1  ;;  %v947_v47 = vshrl.u32 %v3488_v51, 16 }
  0xbb   : > { %v933_v44 = vsel %vm813_vm5, %v928_v33, %v932_v24  ;;  %v728_v48 = vor.u32 %v726_v22, %v725_v25  ;;  %v1125_v50 = vsel %vm1086_vm4, %v1123_v27, %v1124_v28  ;;  %v944_v54 = vrot.slane %v942_v17, 1 }
  0xbc   : > { %1036 = vrot.lane.b32.xlu1 %v933_v44, %s3181_s16  ;;  %v951_v0 = vrot.slane %v949_v40, 1  ;;  %v731_v55 = vrot.slane %v729_v31, 7  ;;  %v732_v10 = vshll.u32 %v631_v21, 16  ;;  %1162 = vrot.lane.b32.xlu0 %v1125_v50, %s3179_s15  ;;  %v940_v29 = vor.u32 %v939_v46, %v935_v37 }
  0xbd   : > { %v961_v56 = vshll.u32 %v3508_v5, 16  ;;  %v966_v57 = vshll.u32 %v3502_v63, 16  ;;  %v3548_v43 = vsel %vm3293_vm3, 0, %v722_v34  ;;  %v804_v60 = vsel %vm3293_vm3, %v725_v25, 0 }
  0xbe   : > { %v1128_v61 = vsel %vm1086_vm4, %v1126_v36, %v1127_v39  ;;  %v952_v17 = vor.u32 %v951_v0, %v947_v47  ;;  %v956_v1 = vrot.slane %v954_v62, 1  ;;  %v1129_v2 = vrot.slane %v3548_v43, 1 }
  0xbf   : > { %v973_v3 = vshll.u32 %v3523_v23, 16  ;;  %v945_v6 = vsel %vm813_vm5, %v940_v29, %v944_v54  ;;  %v1130_v63 = vrot.slane %v3537_v41, 1  ;;  %v959_v7 = vshrl.u32 %v3508_v5, 16 }
  0xc0   : > { %1164 = vrot.lane.b32.xlu1 %v1128_v61, %s3179_s15  ;;  %v963_v8 = vrot.slane %v961_v56, 1  ;;  %v3561_v13 = vsel %vm3293_vm3, 0, %v728_v48  ;;  %v734_v14 = vor.u32 %v732_v10, %v731_v55  ;;  %1038 = vrot.lane.b32.xlu0 %v945_v6, %s3181_s16  ;;  %v817_v62 = vshll.u32 %v3362_v26, 16 }
  0xc1   : > { %v978_v15 = vshll.u32 %v3515_v12, 16  ;;  %v1132_v18 = vrot.slane %v3561_v13, 1  ;;  %v1133_v16 = vrot.slane %v804_v60, 1  ;;  %v789_v19 = vsel %vm3293_vm3, %v3338_v9, 0 }
  0xc2   : > { %v805_v21 = vsel %vm3293_vm3, %v731_v55, 0  ;;  %v957_v22 = vsel %vm813_vm5, %v952_v17, %v956_v1  ;;  %v971_v38 = vshrl.u32 %v3523_v23, 16  ;;  %v975_v24 = vrot.slane %v973_v3, 1 }
  0xc3   : > { %v1131_v25 = vsel %vm1086_vm4, %v1129_v2, %v1130_v63  ;;  %v964_v12 = vor.u32 %v963_v8, %v959_v7  ;;  %v968_v4 = vrot.slane %v966_v57, 1  ;;  %v985_v27 = vshll.u32 %v3548_v43, 16 }
  0xc4   : > { %1040 = vrot.lane.b32.xlu1 %v957_v22, %s3181_s16  ;;  %v3579_v28 = vsel %vm3293_vm3, 0, %v734_v14  ;;  %1166 = vrot.lane.b32.xlu0 %v1131_v25, %s3179_s15  ;;  %v815_v9 = vshrl.u32 %v3362_v26, 16  ;;  %v819_v31 = vrot.slane %v817_v62, 1  ;;  %v822_v33 = vshll.u32 %v789_v19, 16  ;;  %v3163_v22 = vld [vmem:[%s4518_s2 + $0x8] sm:$0xff]  }
  0xc5   : > { %v990_v37 = vshll.u32 %v3537_v41, 16  ;;  %v1134_v53 = vsel %vm1086_vm4, %v1132_v18, %v1133_v16  ;;  %v980_v34 = vrot.slane %v978_v15, 1  ;;  %v976_v36 = vor.u32 %v975_v24, %v971_v38  ;;  %v3162_v15 = vld [vmem:[%s4518_s2] sm:$0xff]   ;;  %v3164_v24 = vld [vmem:[%s4518_s2 + $0x10] ss:$0 sps:$4 sm:$0x33]  }
  0xc6   : > { %v1135_v39 = vrot.slane %v3579_v28, 1  ;;  %v1136_v40 = vrot.slane %v805_v21, 1  ;;  %v997_v44 = vshll.u32 %v3561_v13, 16  ;;  %v969_v46 = vsel %vm813_vm5, %v964_v12, %v968_v4  ;;  %3032 = vmatprep.subr.bf16.mxu0 %v3162_v15 }
  0xc7   : > { %v983_v47 = vshrl.u32 %v3548_v43, 16  ;;  %v987_v48 = vrot.slane %v985_v27, 1  ;;  %v1009_v50 = vshll.u32 %v3579_v28, 16  ;;  %v820_v41 = vor.u32 %v819_v31, %v815_v9  ;;  %3033 = vmatpush3.bf16.msra.mxu0 %v3162_v15 }
  0xc8   : > { %1168 = vrot.lane.b32.xlu1 %v1134_v53, %s3179_s15  ;;  %1042 = vrot.lane.b32.xlu0 %v969_v46, %s3181_s16  ;;  %v824_v54 = vrot.slane %v822_v33, 1  ;;  %v1002_v0 = vshll.u32 %v804_v60, 16  ;;  %v1014_v55 = vshll.u32 %v805_v21, 16  ;;  %v981_v10 = vsel %vm813_vm5, %v976_v36, %v980_v34 }
  0xc9   : > { %v992_v29 = vrot.slane %v990_v37, 1  ;;  %v995_v56 = vshrl.u32 %v3561_v13, 16  ;;  %v999_v57 = vrot.slane %v997_v44, 1  ;;  %v1137_v61 = vsel %vm1086_vm4, %v1135_v39, %v1136_v40  ;;  %3034 = vmatprep.subr.bf16.mxu0 %v3163_v22 }
  0xca   : > { %v988_v17 = vor.u32 %v987_v48, %v983_v47  ;;  %v1007_v1 = vshrl.u32 %v3579_v28, 16  ;;  %v1011_v2 = vrot.slane %v1009_v50, 1  ;;  %v3599_v3 = vsel %vm813_vm5, %v820_v41, %v824_v54 }
  0xcb   : > { %v1000_v60 = vor.u32 %v999_v57, %v995_v56  ;;  %v1004_v6 = vrot.slane %v1002_v0, 1  ;;  %v1016_v8 = vrot.slane %v1014_v55, 1  ;;  %v1087_v14 = vrot.slane %v3362_v26, 1  ;;  %3035 = vmatpush3.bf16.msra.mxu0 %v3163_v22 }
  0xcc   : > { %1044 = vrot.lane.b32.xlu1 %v981_v10, %s3181_s16  ;;  %1170 = vrot.lane.b32.xlu0 %v1137_v61, %s3179_s15  ;;  %v993_v63 = vsel %vm813_vm5, %v988_v17, %v992_v29  ;;  %v1012_v7 = vor.u32 %v1011_v2, %v1007_v1  ;;  %v1088_v62 = vrot.slane %v789_v19, 1  ;;  %v1439_v12 = vsel %vm1437_vm6, %v3164_v24, 0 }
  0xcd   : > { %v1005_v18 = vsel %vm813_vm5, %v1000_v60, %v1004_v6  ;;  %3112 = vmatprep.subr.msk.bf16.mxu0 %vm1437_vm6, %v3164_v24 }
  0xce   : > { %v1017_v16 = vsel %vm813_vm5, %v1012_v7, %v1016_v8  ;;  %v3614_v21 = vsel %vm1086_vm4, %v1087_v14, %v1088_v62 }
  0xcf   : > { %3037 = vmatpush3.bf16.msra.mxu0 %v1439_v12 }
  0xd0   : > { %1018 = vrot.lane.b32.xlu1 %v3599_v3, %s3181_s16  ;;  %1046 = vrot.lane.b32.xlu0 %v993_v63, %s3181_s16 }
  0xd4   : > { %1048 = vrot.lane.b32.xlu1 %v1005_v18, %s3181_s16  ;;  %1050 = vrot.lane.b32.xlu0 %v1017_v16, %s3181_s16 }
  0xd8   : > { %1138 = vrot.lane.b32.xlu1 %v3614_v21, %s3179_s15 }
 0x101   : > { %v1141_v19 = vpop.permute.xlu0 %1140 }
 0x103   : > { %v1145_v38 = vpop.permute.xlu1 %1144 }
 0x105   : > { %v1143_v25 = vpop.permute.xlu0 %1142 }
 0x109   : > { %v1149_v4 = vpop.permute.xlu1 %1148 }
 0x10d   : > { %v1021_v27 = vpop.permute.xlu0 %1020 }
 0x10e   : > { %v1176_v9 = vsel %vm1172_vm7, %v3300_v45, %v1021_v27 }
 0x10f   : > { %v3627_v31 = vsel %vm1207_vm8, %v1176_v9, %v1141_v19 }
 0x110   : > { %1258 = vrot.lane.b32.xlu0 %v3627_v31, %s3182_s23  ;;  %v1023_v33 = vpop.permute.xlu1 %1022 }
 0x111   : > { %v1178_v37 = vsel %vm1172_vm7, %v3321_v58, %v1023_v33  ;;  %v1147_v53 = vpop.permute.xlu0 %1146 }
 0x112   : > { %v3634_v34 = vsel %vm1207_vm8, %v1178_v37, %v1143_v25 }
 0x113   : > { %1260 = vrot.lane.b32.xlu1 %v3634_v34, %s3182_s23 }
 0x114   : > { %1291 = vrot.lane.b32.xlu0 %v3634_v34, %s3183_s24 }
 0x115   : > { %v1025_v45 = vpop.permute.xlu1 %1024  ;;  %v1151_v36 = vpop.permute.xlu0 %1150 }
 0x116   : > { %v1180_v39 = vsel %vm1172_vm7, %v3309_v49, %v1025_v45 }
 0x117   : > { %v3643_v40 = vsel %vm1207_vm8, %v1180_v39, %v1145_v38 }
 0x118   : > { %1293 = vrot.lane.b32.xlu1 %v3643_v40, %s3183_s24  ;;  %1262 = vrot.lane.b32.xlu0 %v3643_v40, %s3182_s23 }
 0x119   : > { %v1153_v58 = vpop.permute.xlu1 %1152 }
 0x11a   : > { %v1027_v44 = vpop.permute.xlu0 %1026 }
 0x11b   : > { %v1182_v46 = vsel %vm1172_vm7, %v3371_v32, %v1027_v44 }
 0x11c   : > { %v3652_v47 = vsel %vm1207_vm8, %v1182_v46, %v1147_v53 }
 0x11d   : > { %1295 = vrot.lane.b32.xlu0 %v3652_v47, %s3183_s24  ;;  %1264 = vrot.lane.b32.xlu1 %v3652_v47, %s3182_s23  ;;  %v1029_v49 = vpop.permute.xlu1 %1028 }
 0x11e   : > { %v1184_v48 = vsel %vm1172_vm7, %v3346_v11, %v1029_v49  ;;  %v1155_v50 = vpop.permute.xlu0 %1154 }
 0x11f   : > { %v3661_v41 = vsel %vm1207_vm8, %v1184_v48, %v1149_v4 }
 0x121   : > { %1266 = vrot.lane.b32.xlu0 %v3661_v41, %s3182_s23  ;;  %1297 = vrot.lane.b32.xlu1 %v3661_v41, %s3183_s24  ;;  %v1157_v32 = vpop.permute.xlu1 %1156 }
 0x122   : > { %v1031_v54 = vpop.permute.xlu0 %1030 }
 0x123   : > { %v1186_v0 = vsel %vm1172_vm7, %v3386_v52, %v1031_v54 }
 0x124   : > { %v3670_v55 = vsel %vm1207_vm8, %v1186_v0, %v1151_v36 }
 0x125   : > { %1299 = vrot.lane.b32.xlu0 %v3670_v55, %s3183_s24  ;;  %1268 = vrot.lane.b32.xlu1 %v3670_v55, %s3182_s23  ;;  %v1033_v11 = vpop.permute.xlu1 %1032 }
 0x126   : > { %v1188_v10 = vsel %vm1172_vm7, %v3410_v20, %v1033_v11  ;;  %v1159_v29 = vpop.permute.xlu0 %1158 }
 0x127   : > { %v3679_v56 = vsel %vm1207_vm8, %v1188_v10, %v1153_v58 }
 0x129   : > { %1270 = vrot.lane.b32.xlu0 %v3679_v56, %s3182_s23  ;;  %1301 = vrot.lane.b32.xlu1 %v3679_v56, %s3183_s24  ;;  %v1161_v52 = vpop.permute.xlu1 %1160 }
 0x12a   : > { %v1035_v57 = vpop.permute.xlu0 %1034 }
 0x12b   : > { %v1190_v61 = vsel %vm1172_vm7, %v3430_v42, %v1035_v57 }
 0x12c   : > { %v3688_v17 = vsel %vm1207_vm8, %v1190_v61, %v1155_v50 }
 0x12d   : > { %1303 = vrot.lane.b32.xlu0 %v3688_v17, %s3183_s24  ;;  %1272 = vrot.lane.b32.xlu1 %v3688_v17, %s3182_s23 }
 0x12e   : > { %v1037_v20 = vpop.permute.xlu1 %1036  ;;  %v1163_v2 = vpop.permute.xlu0 %1162 }
 0x12f   : > { %v1192_v1 = vsel %vm1172_vm7, %v3443_v59, %v1037_v20 }
 0x130   : > { %v3697_v60 = vsel %vm1207_vm8, %v1192_v1, %v1157_v32 }
 0x131   : > { %1274 = vrot.lane.b32.xlu0 %v3697_v60, %s3182_s23  ;;  %1305 = vrot.lane.b32.xlu1 %v3697_v60, %s3183_s24 }
 0x132   : > { %v1165_v42 = vpop.permute.xlu1 %1164  ;;  %v1039_v6 = vpop.permute.xlu0 %1038 }
 0x133   : > { %v1194_v63 = vsel %vm1172_vm7, %v3470_v30, %v1039_v6 }
 0x134   : > { %v3706_v7 = vsel %vm1207_vm8, %v1194_v63, %v1159_v29 }
 0x135   : > { %1307 = vrot.lane.b32.xlu0 %v3706_v7, %s3183_s24  ;;  %1276 = vrot.lane.b32.xlu1 %v3706_v7, %s3182_s23 }
 0x136   : > { %v1041_v59 = vpop.permute.xlu1 %1040  ;;  %v1167_v14 = vpop.permute.xlu0 %1166 }
 0x137   : > { %v1196_v8 = vsel %vm1172_vm7, %v3488_v51, %v1041_v59 }
 0x138   : > { %v3715_v62 = vsel %vm1207_vm8, %v1196_v8, %v1161_v52 }
 0x139   : > { %1278 = vrot.lane.b32.xlu0 %v3715_v62, %s3182_s23  ;;  %1309 = vrot.lane.b32.xlu1 %v3715_v62, %s3183_s24 }
 0x13a   : > { %v1169_v30 = vpop.permute.xlu1 %1168  ;;  %v1043_v15 = vpop.permute.xlu0 %1042 }
 0x13b   : > { %v1198_v18 = vsel %vm1172_vm7, %v3508_v5, %v1043_v15 }
 0x13c   : > { %v3724_v16 = vsel %vm1207_vm8, %v1198_v18, %v1163_v2 }
 0x13d   : > { %1311 = vrot.lane.b32.xlu0 %v3724_v16, %s3183_s24  ;;  %1280 = vrot.lane.b32.xlu1 %v3724_v16, %s3182_s23 }
 0x13e   : > { %v1045_v51 = vpop.permute.xlu1 %1044  ;;  %v1171_v22 = vpop.permute.xlu0 %1170 }
 0x13f   : > { %v1200_v19 = vsel %vm1172_vm7, %v3523_v23, %v1045_v51 }
 0x140   : > { %v3733_v38 = vsel %vm1207_vm8, %v1200_v19, %v1165_v42 }
 0x141   : > { %1282 = vrot.lane.b32.xlu0 %v3733_v38, %s3182_s23  ;;  %1313 = vrot.lane.b32.xlu1 %v3733_v38, %s3183_s24 }
 0x142   : > { %v1019_v5 = vpop.permute.xlu1 %1018  ;;  %v1047_v24 = vpop.permute.xlu0 %1046 }
 0x143   : > { %v1202_v25 = vsel %vm1172_vm7, %v3548_v43, %v1047_v24 }
 0x144   : > { %v3742_v12 = vsel %vm1207_vm8, %v1202_v25, %v1167_v14 }
 0x145   : > { %1315 = vrot.lane.b32.xlu0 %v3742_v12, %s3183_s24  ;;  %1284 = vrot.lane.b32.xlu1 %v3742_v12, %s3182_s23 }
 0x146   : > { %v1049_v23 = vpop.permute.xlu1 %1048  ;;  %v1051_v27 = vpop.permute.xlu0 %1050 }
 0x147   : > { %v1204_v4 = vsel %vm1172_vm7, %v3561_v13, %v1049_v23  ;;  %v1206_v43 = vsel %vm1172_vm7, %v3579_v28, %v1051_v27  ;;  %v1174_v13 = vsel %vm1172_vm7, %v3362_v26, %v1019_v5 }
 0x148   : > { %v3751_v9 = vsel %vm1207_vm8, %v1204_v4, %v1169_v30  ;;  %v1241_v33 = vsel %vm1207_vm8, %v1206_v43, %v1171_v22 }
 0x149   : > { %1286 = vrot.lane.b32.xlu0 %v3751_v9, %s3182_s23  ;;  %1317 = vrot.lane.b32.xlu1 %v3751_v9, %s3183_s24 }
 0x14a   : > { %v1139_v37 = vpop.permute.xlu1 %1138 }
 0x14b   : > { %v1209_v53 = vsel %vm1207_vm8, %v1174_v13, %v1139_v37 }
 0x14d   : > { %1319 = vrot.lane.b32.xlu0 %v1241_v33, %s3183_s24  ;;  %1288 = vrot.lane.b32.xlu1 %v1241_v33, %s3182_s23 }
 0x151   : > { %1321 = vrot.lane.b32.xlu1 %v1209_v53, %s3183_s24 }
 0x155   : > { %2105 = vrot.lane.b32.xlu1 %v3599_v3, %s3179_s15 }
 0x182   : > { %v1259_v28 = vpop.permute.xlu0 %1258 }
 0x183   : > { %v1325_v36 = vsel %vm1323_vm9, %v1209_v53, %v1259_v28 }
 0x185   : > { %v1261_v45 = vpop.permute.xlu1 %1260 }
 0x186   : > { %v1292_v39 = vpop.permute.xlu0 %1291  ;;  %v1327_v44 = vsel %vm1323_vm9, %v3627_v31, %v1261_v45 }
 0x187   : > { %v1358_v58 = vsel %vm1356_vm10, %v1325_v36, %v1292_v39 }
 0x188   : > { %3038 = vmatprep.mubr.msk.bf16.mxu0 %vm1404_vm11, %v1358_v58 }
 0x18a   : > { %v1294_v46 = vpop.permute.xlu1 %1293  ;;  %v1263_v49 = vpop.permute.xlu0 %1262 }
 0x18b   : > { %v1360_v48 = vsel %vm1356_vm10, %v1327_v44, %v1294_v46  ;;  %v1329_v3 = vsel %vm1323_vm9, %v3634_v34, %v1263_v49  ;;  %v3834_v44 = vld [vmem:[%s4519_s3] ss:$0 sm:$0xff] }
 0x18c   : > { %3039 = vmatmul.mubr.msk.bf16.vlgmr.msra.gmra.mrb[0].mxu0 %vm1404_vm11, %v1360_v48 }
 0x18f   : > { %v1265_v50 = vpop.permute.xlu1 %1264  ;;  %v1296_v32 = vpop.permute.xlu0 %1295 }
 0x190   : > { %v1362_v54 = vsel %vm1356_vm10, %v1329_v3, %v1296_v32  ;;  %v1331_v0 = vsel %vm1323_vm9, %v3643_v40, %v1265_v50 }
 0x191   : > { %3042 = vmatprep.mubr.msk.bf16.mxu0 %vm1404_vm11, %v1362_v54 }
 0x193   : > { %v1298_v11 = vpop.permute.xlu1 %1297  ;;  %v1267_v31 = vpop.permute.xlu0 %1266 }
 0x194   : > { %v1364_v10 = vsel %vm1356_vm10, %v1331_v0, %v1298_v11  ;;  %v1333_v29 = vsel %vm1323_vm9, %v3652_v47, %v1267_v31 }
 0x195   : > { %3043 = vmatmul.mubr.msk.bf16.gmra.mrb[4].mxu0 %vm1404_vm11, %v1364_v10 }
 0x197   : > { %v1269_v52 = vpop.permute.xlu1 %1268  ;;  %v1300_v34 = vpop.permute.xlu0 %1299 }
 0x198   : > { %v1366_v57 = vsel %vm1356_vm10, %v1333_v29, %v1300_v34  ;;  %v1335_v61 = vsel %vm1323_vm9, %v3661_v41, %v1269_v52 }
 0x199   : > { %3046 = vmatprep.mubr.msk.bf16.mxu0 %vm1404_vm11, %v1366_v57 }
 0x19b   : > { %v1302_v20 = vpop.permute.xlu1 %1301  ;;  %v1271_v40 = vpop.permute.xlu0 %1270 }
 0x19c   : > { %v1368_v1 = vsel %vm1356_vm10, %v1335_v61, %v1302_v20  ;;  %v1337_v2 = vsel %vm1323_vm9, %v3670_v55, %v1271_v40 }
 0x19d   : > { %3047 = vmatmul.mubr.msk.bf16.gmra.mrb[8].mxu0 %vm1404_vm11, %v1368_v1 }
 0x19f   : > { %v1273_v42 = vpop.permute.xlu1 %1272  ;;  %v1304_v47 = vpop.permute.xlu0 %1303 }
 0x1a0   : > { %v1370_v6 = vsel %vm1356_vm10, %v1337_v2, %v1304_v47  ;;  %v1339_v63 = vsel %vm1323_vm9, %v3679_v56, %v1273_v42 }
 0x1a1   : > { %3050 = vmatprep.mubr.msk.bf16.mxu0 %vm1404_vm11, %v1370_v6 }
 0x1a3   : > { %v1306_v59 = vpop.permute.xlu1 %1305  ;;  %v1275_v41 = vpop.permute.xlu0 %1274 }
 0x1a4   : > { %v1372_v8 = vsel %vm1356_vm10, %v1339_v63, %v1306_v59  ;;  %v1341_v14 = vsel %vm1323_vm9, %v3688_v17, %v1275_v41 }
 0x1a5   : > { %3051 = vmatmul.mubr.msk.bf16.gmra.mrb[12].mxu0 %vm1404_vm11, %v1372_v8 }
 0x1a7   : > { %v1277_v30 = vpop.permute.xlu1 %1276  ;;  %v1308_v55 = vpop.permute.xlu0 %1307 }
 0x1a8   : > { %v1374_v15 = vsel %vm1356_vm10, %v1341_v14, %v1308_v55  ;;  %v1343_v18 = vsel %vm1323_vm9, %v3697_v60, %v1277_v30 }
 0x1a9   : > { %3054 = vmatprep.mubr.msk.bf16.mxu0 %vm1404_vm11, %v1374_v15 }
 0x1ab   : > { %v1310_v51 = vpop.permute.xlu1 %1309  ;;  %v1279_v56 = vpop.permute.xlu0 %1278 }
 0x1ac   : > { %v1376_v19 = vsel %vm1356_vm10, %v1343_v18, %v1310_v51  ;;  %v1345_v22 = vsel %vm1323_vm9, %v3706_v7, %v1279_v56 }
 0x1ad   : > { %3055 = vmatmul.mubr.msk.bf16.gmra.mrb[16].mxu0 %vm1404_vm11, %v1376_v19 }
 0x1af   : > { %v1281_v5 = vpop.permute.xlu1 %1280  ;;  %v1312_v17 = vpop.permute.xlu0 %1311 }
 0x1b0   : > { %v1378_v24 = vsel %vm1356_vm10, %v1345_v22, %v1312_v17  ;;  %v1347_v25 = vsel %vm1323_vm9, %v3715_v62, %v1281_v5 }
 0x1b1   : > { %3058 = vmatprep.mubr.msk.bf16.mxu0 %vm1404_vm11, %v1378_v24 }
 0x1b3   : > { %v1314_v23 = vpop.permute.xlu1 %1313  ;;  %v1283_v60 = vpop.permute.xlu0 %1282 }
 0x1b4   : > { %v1380_v4 = vsel %vm1356_vm10, %v1347_v25, %v1314_v23  ;;  %v1349_v27 = vsel %vm1323_vm9, %v3724_v16, %v1283_v60 }
 0x1b5   : > { %3059 = vmatmul.mubr.msk.bf16.gmra.mrb[20].mxu0 %vm1404_vm11, %v1380_v4 }
 0x1b7   : > { %v1285_v43 = vpop.permute.xlu1 %1284  ;;  %v1316_v7 = vpop.permute.xlu0 %1315 }
 0x1b8   : > { %v1382_v33 = vsel %vm1356_vm10, %v1349_v27, %v1316_v7  ;;  %v1351_v37 = vsel %vm1323_vm9, %v3733_v38, %v1285_v43 }
 0x1b9   : > { %3062 = vmatprep.mubr.msk.bf16.mxu0 %vm1404_vm11, %v1382_v33 }
 0x1bb   : > { %v1318_v13 = vpop.permute.xlu1 %1317  ;;  %v1287_v62 = vpop.permute.xlu0 %1286 }
 0x1bc   : > { %v1384_v53 = vsel %vm1356_vm10, %v1351_v37, %v1318_v13  ;;  %v1353_v28 = vsel %vm1323_vm9, %v3742_v12, %v1287_v62  ;;  %v3839_v12 = vld [vmem:[%s4520_s4] ss:$0 sm:$0xff] }
 0x1bd   : > { %3063 = vmatmul.mubr.msk.bf16.gmra.mrb[24].mxu0 %vm1404_vm11, %v1384_v53 }
 0x1bf   : > { %v1289_v45 = vpop.permute.xlu1 %1288  ;;  %v1320_v16 = vpop.permute.xlu0 %1319 }
 0x1c0   : > { %v1386_v36 = vsel %vm1356_vm10, %v1353_v28, %v1320_v16  ;;  %v1355_v39 = vsel %vm1323_vm9, %v3751_v9, %v1289_v45 }
 0x1c1   : > { %3066 = vmatprep.mubr.msk.bf16.mxu0 %vm1404_vm11, %v1386_v36 }
 0x1c3   : > { %v1322_v58 = vpop.permute.xlu1 %1321 }
 0x1c4   : > { %v1388_v38 = vsel %vm1356_vm10, %v1355_v39, %v1322_v58 }
 0x1c5   : > { %3067 = vmatmul.mubr.msk.bf16.gmra.mrb[28].mxu0 %vm1404_vm11, %v1388_v38 }
 0x25f   : > { %v3040_v46 = vpop.f32.mrb[0].mxu0 }
 0x260   : > { %v1610_v49 = vmul.f32 %v3040_v46, %v3834_v44  ;;  %v1475_v48 = vpop.f32.mrb[1].mxu0 }
 0x261   : > { %v1608_v9 = vmul.f32 %v3834_v44, %v1475_v48  ;;  %v3041_v3 = vpop.f32.mrb[2].mxu0 }
 0x262   : > { %v1648_v50 = vadd.f32 %v3839_v12, %v1610_v49  ;;  %v1611_v32 = vmul.f32 %v3041_v3, %v3834_v44  ;;  %v1478_v54 = vpop.f32.mrb[3].mxu0 }
 0x263   : > { %v1646_v0 = vadd.f32 %v3839_v12, %v1608_v9  ;;  %v1609_v11 = vmul.f32 %v3834_v44, %v1478_v54 }
 0x264   : > { %v1649_v31 = vadd.f32 %v3839_v12, %v1611_v32  ;;  %v1680_v29 = vmax.f32 %v1648_v50, 0.0 }
 0x265   : > { %v1647_v10 = vadd.f32 %v3839_v12, %v1609_v11  ;;  %v1678_v34 = vmax.f32 %v1646_v0, 0.0 }
 0x266   : > { %v1681_v52 = vmax.f32 %v1649_v31, 0.0 }
 0x267   : > { %v1679_v57 = vmax.f32 %v1647_v10, 0.0 }
 0x268   : > { %v1711_v61 = vpack.c.bf16 %v1681_v52, %v1680_v29  ;;  %v3044_v20 = vpop.f32.mrb[4].mxu0 }
 0x269   : > { %v1710_v40 = vpack.c.bf16 %v1679_v57, %v1678_v34  ;;  %v1614_v1 = vmul.f32 %v3044_v20, %v3834_v44  ;;  %v1491_v2 = vpop.f32.mrb[5].mxu0 }
 0x26a   : > { %v1734_v42 = vshrl.u32 %v1711_v61, 16  ;;  %v1612_v47 = vmul.f32 %v3834_v44, %v1491_v2  ;;  %v3045_v6 = vpop.f32.mrb[6].mxu0  ;;  %v1737_v30 = vshll.u32 %v1711_v61, 16 }
 0x26b   : > { %v1727_v63 = vshrl.u32 %v1710_v40, 16  ;;  %v1652_v59 = vadd.f32 %v3839_v12, %v1614_v1  ;;  %v1615_v41 = vmul.f32 %v3045_v6, %v3834_v44  ;;  %v1494_v8 = vpop.f32.mrb[7].mxu0  ;;  %v1730_v19 = vshll.u32 %v1710_v40, 16 }
 0x26c   : > { %v1736_v14 = vrot.slane %v1734_v42, 7  ;;  %v1650_v55 = vadd.f32 %v3839_v12, %v1612_v47  ;;  %v1613_v15 = vmul.f32 %v3834_v44, %v1494_v8 }
 0x26d   : > { %v1729_v18 = vrot.slane %v1727_v63, 7  ;;  %v1653_v51 = vadd.f32 %v3839_v12, %v1615_v41  ;;  %v1684_v17 = vmax.f32 %v1652_v59, 0.0 }
 0x26e   : > { %v1739_v56 = vor.u32 %v1737_v30, %v1736_v14  ;;  %v1651_v22 = vadd.f32 %v3839_v12, %v1613_v15  ;;  %v1887_v5 = vsel %vm3293_vm3, %v1736_v14, 0  ;;  %v1682_v24 = vmax.f32 %v1650_v55, 0.0 }
 0x26f   : > { %v1685_v25 = vmax.f32 %v1653_v51, 0.0  ;;  %v1732_v23 = vor.u32 %v1730_v19, %v1729_v18  ;;  %v1933_v43 = vshll.u32 %v1887_v5, 16  ;;  %v2175_v62 = vrot.slane %v1887_v5, 1 }
 0x270   : > { %v1683_v60 = vmax.f32 %v1651_v22, 0.0  ;;  %v3048_v4 = vpop.f32.mrb[8].mxu0  ;;  %v3861_v27 = vsel %vm3293_vm3, 0, %v1739_v56  ;;  %v1886_v36 = vsel %vm3293_vm3, %v1729_v18, 0 }
 0x271   : > { %v1713_v7 = vpack.c.bf16 %v1685_v25, %v1684_v17  ;;  %v1618_v33 = vmul.f32 %v3048_v4, %v3834_v44  ;;  %v1507_v37 = vpop.f32.mrb[9].mxu0  ;;  %v2174_v13 = vrot.slane %v3861_v27, 1  ;;  %v1928_v16 = vshll.u32 %v3861_v27, 16 }
 0x272   : > { %v1712_v53 = vpack.c.bf16 %v1683_v60, %v1682_v24  ;;  %v1616_v28 = vmul.f32 %v3834_v44, %v1507_v37  ;;  %v3049_v45 = vpop.f32.mrb[10].mxu0  ;;  %v1926_v49 = vshrl.u32 %v3861_v27, 16  ;;  %v1935_v50 = vrot.slane %v1933_v43, 1 }
 0x273   : > { %v1748_v39 = vshrl.u32 %v1713_v7, 16  ;;  %v1656_v58 = vadd.f32 %v3839_v12, %v1618_v33  ;;  %v1619_v38 = vmul.f32 %v3049_v45, %v3834_v44  ;;  %v1510_v46 = vpop.f32.mrb[11].mxu0  ;;  %v1751_v32 = vshll.u32 %v1713_v7, 16 }
 0x274   : > { %v1741_v48 = vshrl.u32 %v1712_v53, 16  ;;  %v1654_v9 = vadd.f32 %v3839_v12, %v1616_v28  ;;  %v1617_v3 = vmul.f32 %v3834_v44, %v1510_v46  ;;  %v1744_v54 = vshll.u32 %v1712_v53, 16 }
 0x275   : > { %v1657_v0 = vadd.f32 %v3839_v12, %v1619_v38  ;;  %v2176_v11 = vsel %vm1086_vm4, %v2174_v13, %v2175_v62  ;;  %v1750_v31 = vrot.slane %v1748_v39, 7  ;;  %v1930_v52 = vrot.slane %v1928_v16, 1 }
 0x276   : > { %v1743_v10 = vrot.slane %v1741_v48, 7  ;;  %v1655_v29 = vadd.f32 %v3839_v12, %v1617_v3  ;;  %2223 = vrot.lane.b32.xlu0 %v2176_v11, %s3184_s9  ;;  %v1688_v34 = vmax.f32 %v1656_v58, 0.0  ;;  %v1686_v57 = vmax.f32 %v1654_v9, 0.0 }
 0x277   : > { %v1689_v61 = vmax.f32 %v1657_v0, 0.0  ;;  %v3880_v20 = vsel %vm3293_vm3, 0, %v1732_v23  ;;  %v1931_v1 = vor.u32 %v1930_v52, %v1926_v49  ;;  %v2172_v42 = vrot.slane %v1886_v36, 1 }
 0x278   : > { %v1687_v40 = vmax.f32 %v1655_v29, 0.0  ;;  %v2171_v2 = vrot.slane %v3880_v20, 1  ;;  %v1746_v47 = vor.u32 %v1744_v54, %v1743_v10  ;;  %v3052_v63 = vpop.f32.mrb[12].mxu0  ;;  %v1916_v59 = vshll.u32 %v3880_v20, 16 }
 0x279   : > { %v1715_v6 = vpack.c.bf16 %v1689_v61, %v1688_v34  ;;  %v1921_v41 = vshll.u32 %v1886_v36, 16  ;;  %v1622_v14 = vmul.f32 %v3052_v63, %v3834_v44  ;;  %v1936_v30 = vsel %vm813_vm5, %v1931_v1, %v1935_v50  ;;  %v1523_v15 = vpop.f32.mrb[13].mxu0 }
 0x27a   : > { %v1714_v8 = vpack.c.bf16 %v1687_v40, %v1686_v57  ;;  %v2173_v55 = vsel %vm1086_vm4, %v2171_v2, %v2172_v42  ;;  %2109 = vrot.lane.b32.xlu1 %v1936_v30, %s3179_s15  ;;  %v1620_v51 = vmul.f32 %v3834_v44, %v1523_v15  ;;  %v3053_v56 = vpop.f32.mrb[14].mxu0  ;;  %v1914_v19 = vshrl.u32 %v3880_v20, 16 }
 0x27b   : > { %v1762_v18 = vshrl.u32 %v1715_v6, 16  ;;  %2221 = vrot.lane.b32.xlu0 %v2173_v55, %s3184_s9  ;;  %v1918_v22 = vrot.slane %v1916_v59, 1  ;;  %v1753_v5 = vor.u32 %v1751_v32, %v1750_v31  ;;  %v1660_v24 = vadd.f32 %v3839_v12, %v1622_v14  ;;  %v1526_v23 = vpop.f32.mrb[15].mxu0 }
 0x27c   : > { %v1755_v17 = vshrl.u32 %v1714_v8, 16  ;;  %v1623_v25 = vmul.f32 %v3053_v56, %v3834_v44  ;;  %v1765_v60 = vshll.u32 %v1715_v6, 16  ;;  %v1658_v4 = vadd.f32 %v3839_v12, %v1620_v51 }
 0x27d   : > { %v1621_v43 = vmul.f32 %v3834_v44, %v1526_v23  ;;  %v1919_v7 = vor.u32 %v1918_v22, %v1914_v19  ;;  %v3895_v33 = vrot.slane %v1762_v18, 7  ;;  %v1758_v37 = vshll.u32 %v1714_v8, 16 }
 0x27e   : > { %v1661_v13 = vadd.f32 %v3839_v12, %v1623_v25  ;;  %v1923_v62 = vrot.slane %v1921_v41, 1  ;;  %v1757_v53 = vrot.slane %v1755_v17, 7  ;;  %v1692_v28 = vmax.f32 %v1660_v24, 0.0 }
 0x27f   : > { %v1659_v45 = vadd.f32 %v3839_v12, %v1621_v43  ;;  %v3901_v16 = vsel %vm3293_vm3, 0, %v1746_v47  ;;  %v1690_v36 = vmax.f32 %v1658_v4, 0.0  ;;  %v1888_v38 = vsel %vm3293_vm3, %v1743_v10, 0 }
 0x280   : > { %v1693_v39 = vmax.f32 %v1661_v13, 0.0  ;;  %v1924_v58 = vsel %vm813_vm5, %v1919_v7, %v1923_v62  ;;  %v2177_v49 = vrot.slane %v3901_v16, 1  ;;  %v2178_v48 = vrot.slane %v1888_v38, 1  ;;  %v3056_v9 = vpop.f32.mrb[16].mxu0 }
 0x281   : > { %v1691_v46 = vmax.f32 %v1659_v45, 0.0  ;;  %2107 = vrot.lane.b32.xlu0 %v1924_v58, %s3179_s15  ;;  %v3910_v3 = vsel %vm3293_vm3, 0, %v1753_v5  ;;  %v1626_v32 = vmul.f32 %v3056_v9, %v3834_v44  ;;  %v1889_v54 = vsel %vm3293_vm3, %v1750_v31, 0  ;;  %v1539_v11 = vpop.f32.mrb[17].mxu0 }
 0x282   : > { %v1717_v50 = vpack.c.bf16 %v1693_v39, %v1692_v28  ;;  %v2180_v0 = vrot.slane %v3910_v3, 1  ;;  %v2179_v29 = vsel %vm1086_vm4, %v2177_v49, %v2178_v48  ;;  %v2181_v52 = vrot.slane %v1889_v54, 1  ;;  %v3057_v57 = vpop.f32.mrb[18].mxu0 }
 0x283   : > { %v1716_v10 = vpack.c.bf16 %v1691_v46, %v1690_v36  ;;  %v1624_v34 = vmul.f32 %v3834_v44, %v1539_v11  ;;  %v1767_v61 = vor.u32 %v1765_v60, %v3895_v33  ;;  %2225 = vrot.lane.b32.xlu1 %v2179_v29, %s3184_s9  ;;  %v1664_v1 = vadd.f32 %v3839_v12, %v1626_v32  ;;  %v1542_v2 = vpop.f32.mrb[19].mxu0 }
 0x284   : > { %v1776_v40 = vshrl.u32 %v1717_v50, 16  ;;  %v1760_v42 = vor.u32 %v1758_v37, %v1757_v53  ;;  %v2182_v47 = vsel %vm1086_vm4, %v2180_v0, %v2181_v52  ;;  %v1779_v63 = vshll.u32 %v1717_v50, 16 }
 0x285   : > { %v1769_v31 = vshrl.u32 %v1716_v10, 16  ;;  %v1662_v6 = vadd.f32 %v3839_v12, %v1624_v34  ;;  %2227 = vrot.lane.b32.xlu0 %v2182_v47, %s3184_s9  ;;  %v1938_v59 = vshrl.u32 %v3901_v16, 16  ;;  %v1940_v41 = vshll.u32 %v3901_v16, 16 }
 0x286   : > { %v1945_v8 = vshll.u32 %v1888_v38, 16  ;;  %v3926_v14 = vrot.slane %v1776_v40, 7  ;;  %v1696_v30 = vmax.f32 %v1664_v1, 0.0  ;;  %v1627_v55 = vmul.f32 %v3057_v57, %v3834_v44 }
 0x287   : > { %v1625_v15 = vmul.f32 %v3834_v44, %v1542_v2  ;;  %v3930_v18 = vrot.slane %v1769_v31, 7  ;;  %v1694_v51 = vmax.f32 %v1662_v6, 0.0  ;;  %v1942_v56 = vrot.slane %v1940_v41, 1 }
 0x288   : > { %v1947_v19 = vrot.slane %v1945_v8, 1  ;;  %v1665_v22 = vadd.f32 %v3839_v12, %v1627_v55  ;;  %v1950_v17 = vshrl.u32 %v3910_v3, 16  ;;  %v1952_v24 = vshll.u32 %v3910_v3, 16  ;;  %v3060_v25 = vpop.f32.mrb[20].mxu0 }
 0x289   : > { %v1663_v5 = vadd.f32 %v3839_v12, %v1625_v15  ;;  %v1943_v23 = vor.u32 %v1942_v56, %v1938_v59  ;;  %v1957_v60 = vshll.u32 %v1889_v54, 16  ;;  %v3938_v4 = vsel %vm3293_vm3, 0, %v1760_v42  ;;  %v1555_v7 = vpop.f32.mrb[21].mxu0 }
 0x28a   : > { %v1890_v43 = vsel %vm3293_vm3, %v1757_v53, 0  ;;  %v1697_v37 = vmax.f32 %v1665_v22, 0.0  ;;  %v1954_v62 = vrot.slane %v1952_v24, 1  ;;  %v2183_v28 = vrot.slane %v3938_v4, 1  ;;  %v3061_v45 = vpop.f32.mrb[22].mxu0 }
 0x28b   : > { %v1695_v13 = vmax.f32 %v1663_v5, 0.0  ;;  %v1772_v36 = vshll.u32 %v1716_v10, 16  ;;  %v1948_v39 = vsel %vm813_vm5, %v1943_v23, %v1947_v19  ;;  %v2184_v58 = vrot.slane %v1890_v43, 1  ;;  %v1558_v46 = vpop.f32.mrb[23].mxu0 }
 0x28c   : > { %v1630_v38 = vmul.f32 %v3060_v25, %v3834_v44  ;;  %2111 = vrot.lane.b32.xlu1 %v1948_v39, %s3179_s15  ;;  %v1719_v49 = vpack.c.bf16 %v1697_v37, %v1696_v30  ;;  %v1955_v9 = vor.u32 %v1954_v62, %v1950_v17  ;;  %v3948_v53 = vsel %vm3293_vm3, 0, %v1767_v61 }
 0x28d   : > { %v1718_v48 = vpack.c.bf16 %v1695_v13, %v1694_v51  ;;  %v1781_v50 = vor.u32 %v1779_v63, %v3926_v14  ;;  %v1774_v32 = vor.u32 %v1772_v36, %v3930_v18  ;;  %v1959_v54 = vrot.slane %v1957_v60, 1 }
 0x28e   : > { %v2185_v0 = vsel %vm1086_vm4, %v2183_v28, %v2184_v58  ;;  %v1790_v11 = vshrl.u32 %v1719_v49, 16  ;;  %v1668_v29 = vadd.f32 %v3839_v12, %v1630_v38  ;;  %v1891_v52 = vsel %vm3293_vm3, %v3895_v33, 0 }
 0x28f   : > { %v1783_v10 = vshrl.u32 %v1718_v48, 16  ;;  %v1793_v34 = vshll.u32 %v1719_v49, 16  ;;  %v1960_v57 = vsel %vm813_vm5, %v1955_v9, %v1959_v54  ;;  %v2186_v61 = vrot.slane %v3948_v53, 1 }
 0x290   : > { %v1628_v40 = vmul.f32 %v3834_v44, %v1555_v7  ;;  %v3960_v1 = vrot.slane %v1790_v11, 7  ;;  %v1786_v42 = vshll.u32 %v1718_v48, 16  ;;  %2113 = vrot.lane.b32.xlu0 %v1960_v57, %s3179_s15  ;;  %2229 = vrot.lane.b32.xlu1 %v2185_v0, %s3184_s9  ;;  %v1964_v31 = vshll.u32 %v3938_v4, 16  ;;  %v3064_v47 = vpop.f32.mrb[24].mxu0 }
 0x291   : > { %v3962_v2 = vrot.slane %v1783_v10, 7  ;;  %v2187_v33 = vrot.slane %v1891_v52, 1  ;;  %v1969_v63 = vshll.u32 %v1890_v43, 16  ;;  %v1631_v59 = vmul.f32 %v3061_v45, %v3834_v44  ;;  %v1571_v41 = vpop.f32.mrb[25].mxu0 }
 0x292   : > { %v1666_v6 = vadd.f32 %v3839_v12, %v1628_v40  ;;  %v1700_v8 = vmax.f32 %v1668_v29, 0.0  ;;  %v1962_v30 = vshrl.u32 %v3938_v4, 16  ;;  %v1966_v55 = vrot.slane %v1964_v31, 1  ;;  %v3065_v51 = vpop.f32.mrb[26].mxu0 }
 0x293   : > { %v1629_v15 = vmul.f32 %v3834_v44, %v1558_v46  ;;  %v1795_v56 = vor.u32 %v1793_v34, %v3960_v1  ;;  %v1788_v19 = vor.u32 %v1786_v42, %v3962_v2  ;;  %v2188_v22 = vsel %vm1086_vm4, %v2186_v61, %v2187_v33  ;;  %v1574_v17 = vpop.f32.mrb[27].mxu0 }
 0x294   : > { %v1669_v5 = vadd.f32 %v3839_v12, %v1631_v59  ;;  %2231 = vrot.lane.b32.xlu0 %v2188_v22, %s3184_s9  ;;  %v1698_v24 = vmax.f32 %v1666_v6, 0.0  ;;  %v1967_v25 = vor.u32 %v1966_v55, %v1962_v30  ;;  %v1971_v23 = vrot.slane %v1969_v63, 1 }
 0x295   : > { %v1667_v60 = vadd.f32 %v3839_v12, %v1629_v15  ;;  %v1976_v7 = vshll.u32 %v3948_v53, 16  ;;  %v1981_v37 = vshll.u32 %v1891_v52, 16  ;;  %v3980_v13 = vsel %vm3293_vm3, 0, %v1774_v32 }
 0x296   : > { %v1701_v43 = vmax.f32 %v1669_v5, 0.0  ;;  %v1972_v62 = vsel %vm813_vm5, %v1967_v25, %v1971_v23  ;;  %v1892_v45 = vsel %vm3293_vm3, %v3930_v18, 0  ;;  %v2189_v36 = vrot.slane %v3980_v13, 1 }
 0x297   : > { %v1699_v28 = vmax.f32 %v1667_v60, 0.0  ;;  %2115 = vrot.lane.b32.xlu1 %v1972_v62, %s3179_s15  ;;  %v1974_v58 = vshrl.u32 %v3948_v53, 16  ;;  %v1978_v38 = vrot.slane %v1976_v7, 1  ;;  %v2190_v46 = vrot.slane %v1892_v45, 1 }
 0x298   : > { %v1721_v39 = vpack.c.bf16 %v1701_v43, %v1700_v8  ;;  %v1983_v48 = vrot.slane %v1981_v37, 1  ;;  %v1634_v9 = vmul.f32 %v3064_v47, %v3834_v44  ;;  %v3992_v32 = vsel %vm3293_vm3, 0, %v1781_v50  ;;  %v3068_v54 = vpop.f32.mrb[28].mxu0 }
 0x299   : > { %v1720_v49 = vpack.c.bf16 %v1699_v28, %v1698_v24  ;;  %v1979_v18 = vor.u32 %v1978_v38, %v1974_v58  ;;  %v2191_v11 = vsel %vm1086_vm4, %v2189_v36, %v2190_v46  ;;  %v1893_v10 = vsel %vm3293_vm3, %v3926_v14, 0  ;;  %v1587_v29 = vpop.f32.mrb[29].mxu0 }
 0x29a   : > { %v1804_v0 = vshrl.u32 %v1721_v39, 16  ;;  %v4000_v52 = vsel %vm3293_vm3, 0, %v1795_v56  ;;  %v4004_v34 = vsel %vm3293_vm3, 0, %v1788_v19  ;;  %v1672_v57 = vadd.f32 %v3839_v12, %v1634_v9  ;;  %v4007_v61 = vpop.f32.mrb[30].mxu0 }
 0x29b   : > { %v1797_v50 = vshrl.u32 %v1720_v49, 16  ;;  %v1807_v42 = vshll.u32 %v1721_v39, 16  ;;  %v1984_v31 = vsel %vm813_vm5, %v1979_v18, %v1983_v48  ;;  %2233 = vrot.lane.b32.xlu1 %v2191_v11, %s3184_s9  ;;  %v2192_v14 = vrot.slane %v3992_v32, 1  ;;  %v1590_v47 = vpop.f32.mrb[31].mxu0 }
 0x29c   : > { %v4009_v40 = vrot.slane %v1804_v0, 7  ;;  %v1800_v6 = vshll.u32 %v1720_v49, 16  ;;  %2117 = vrot.lane.b32.xlu0 %v1984_v31, %s3179_s15  ;;  %v2005_v63 = vshll.u32 %v1893_v10, 16  ;;  %v1632_v59 = vmul.f32 %v3834_v44, %v1571_v41 }
 0x29d   : > { %v4014_v33 = vrot.slane %v1797_v50, 7  ;;  %v1704_v8 = vmax.f32 %v1672_v57, 0.0  ;;  %v2193_v30 = vrot.slane %v1893_v10, 1  ;;  %v1988_v55 = vshll.u32 %v3980_v13, 16 }
 0x29e   : > { %v1993_v15 = vshll.u32 %v1892_v45, 16  ;;  %v1670_v56 = vadd.f32 %v3839_v12, %v1632_v59  ;;  %v1986_v19 = vshrl.u32 %v3980_v13, 16  ;;  %v1635_v22 = vmul.f32 %v3065_v51, %v3834_v44 }
 0x29f   : > { %v1633_v5 = vmul.f32 %v3834_v44, %v1574_v17  ;;  %v1809_v24 = vor.u32 %v1807_v42, %v4009_v40  ;;  %v1802_v25 = vor.u32 %v1800_v6, %v4014_v33  ;;  %v2194_v23 = vsel %vm1086_vm4, %v2192_v14, %v2193_v30 }
 0x2a0   : > { %v1990_v41 = vrot.slane %v1988_v55, 1  ;;  %2235 = vrot.lane.b32.xlu0 %v2194_v23, %s3184_s9  ;;  %v1995_v60 = vrot.slane %v1993_v15, 1  ;;  %v1673_v43 = vadd.f32 %v3839_v12, %v1635_v22  ;;  %v1998_v37 = vshrl.u32 %v3992_v32, 16 }
 0x2a1   : > { %v1671_v7 = vadd.f32 %v3839_v12, %v1633_v5  ;;  %v1702_v62 = vmax.f32 %v1670_v56, 0.0  ;;  %v2000_v17 = vshll.u32 %v3992_v32, 16  ;;  %v1894_v28 = vsel %vm3293_vm3, %v3962_v2, 0 }
 0x2a2   : > { %v1991_v51 = vor.u32 %v1990_v41, %v1986_v19  ;;  %v1705_v45 = vmax.f32 %v1673_v43, 0.0  ;;  %v2195_v39 = vrot.slane %v4004_v34, 1  ;;  %v2196_v58 = vrot.slane %v1894_v28, 1 }
 0x2a3   : > { %v1703_v36 = vmax.f32 %v1671_v7, 0.0  ;;  %v2002_v46 = vrot.slane %v2000_v17, 1  ;;  %v2007_v49 = vrot.slane %v2005_v63, 1  ;;  %v1638_v48 = vmul.f32 %v3068_v54, %v3834_v44 }
 0x2a4   : > { %v1996_v38 = vsel %vm813_vm5, %v1991_v51, %v1995_v60  ;;  %v1723_v9 = vpack.c.bf16 %v1705_v45, %v1704_v8  ;;  %v2197_v18 = vsel %vm1086_vm4, %v2195_v39, %v2196_v58  ;;  %v1895_v2 = vsel %vm3293_vm3, %v3960_v1, 0 }
 0x2a5   : > { %2119 = vrot.lane.b32.xlu1 %v1996_v38, %s3179_s15  ;;  %v1722_v0 = vpack.c.bf16 %v1703_v36, %v1702_v62  ;;  %v2003_v11 = vor.u32 %v2002_v46, %v1998_v37  ;;  %v1676_v10 = vadd.f32 %v3839_v12, %v1638_v48  ;;  %v2198_v50 = vrot.slane %v4000_v52, 1 }
 0x2a6   : > { %v1636_v57 = vmul.f32 %v3834_v44, %v1587_v29  ;;  %v4047_v54 = vsel %vm3293_vm3, 0, %v1809_v24  ;;  %v1818_v42 = vshrl.u32 %v1723_v9, 16  ;;  %v4051_v14 = vsel %vm3293_vm3, 0, %v1802_v25 }
 0x2a7   : > { %v1811_v31 = vshrl.u32 %v1722_v0, 16  ;;  %v2008_v6 = vsel %vm813_vm5, %v2003_v11, %v2007_v49  ;;  %v2199_v1 = vrot.slane %v1895_v2, 1  ;;  %v1814_v8 = vshll.u32 %v1722_v0, 16 }
 0x2a8   : > { %v1674_v63 = vadd.f32 %v3839_v12, %v1636_v57  ;;  %2121 = vrot.lane.b32.xlu0 %v2008_v6, %s3179_s15  ;;  %v1708_v29 = vmax.f32 %v1676_v10, 0.0  ;;  %v2012_v30 = vshll.u32 %v4004_v34, 16  ;;  %v2017_v15 = vshll.u32 %v1894_v28, 16 }
 0x2a9   : > { %v1813_v59 = vrot.slane %v1811_v31, 7  ;;  %2237 = vrot.lane.b32.xlu1 %v2197_v18, %s3184_s9  ;;  %v2200_v55 = vsel %vm1086_vm4, %v2198_v50, %v2199_v1  ;;  %v1639_v56 = vmul.f32 %v4007_v61, %v3834_v44  ;;  %v1637_v19 = vmul.f32 %v3834_v44, %v1590_v47 }
 0x2aa   : > { %v1820_v22 = vrot.slane %v1818_v42, 7  ;;  %v1706_v5 = vmax.f32 %v1674_v63, 0.0  ;;  %v2010_v24 = vshrl.u32 %v4004_v34, 16  ;;  %v2014_v25 = vrot.slane %v2012_v30, 1 }
 0x2ab   : > { %v1816_v23 = vor.u32 %v1814_v8, %v1813_v59  ;;  %v1677_v41 = vadd.f32 %v3839_v12, %v1639_v56  ;;  %v1675_v60 = vadd.f32 %v3839_v12, %v1637_v19  ;;  %v2024_v43 = vshll.u32 %v4000_v52, 16 }
 0x2ac   : > { %2239 = vrot.lane.b32.xlu0 %v2200_v55, %s3184_s9  ;;  %v2015_v7 = vor.u32 %v2014_v25, %v2010_v24  ;;  %v2019_v37 = vrot.slane %v2017_v15, 1  ;;  %v2022_v61 = vshrl.u32 %v4000_v52, 16  ;;  %v2029_v62 = vshll.u32 %v1895_v2, 16 }
 0x2ad   : > { %v1709_v44 = vmax.f32 %v1677_v41, 0.0  ;;  %v1707_v47 = vmax.f32 %v1675_v60, 0.0  ;;  %v2026_v51 = vrot.slane %v2024_v43, 1  ;;  %v1896_v17 = vsel %vm3293_vm3, %v4014_v33, 0 }
 0x2ae   : > { %v1821_v28 = vshll.u32 %v1723_v9, 16  ;;  %v2020_v45 = vsel %vm813_vm5, %v2015_v7, %v2019_v37  ;;  %v2201_v12 = vrot.slane %v4051_v14, 1  ;;  %v2202_v36 = vrot.slane %v1896_v17, 1 }
 0x2af   : > { %2123 = vrot.lane.b32.xlu1 %v2020_v45, %s3179_s15  ;;  %v1725_v39 = vpack.c.bf16 %v1709_v44, %v1708_v29  ;;  %v1724_v58 = vpack.c.bf16 %v1707_v47, %v1706_v5  ;;  %v2027_v38 = vor.u32 %v2026_v51, %v2022_v61  ;;  %v1897_v46 = vsel %vm3293_vm3, %v4009_v40, 0 }
 0x2b0   : > { %v1823_v49 = vor.u32 %v1821_v28, %v1820_v22  ;;  %v2031_v48 = vrot.slane %v2029_v62, 1  ;;  %v2203_v0 = vsel %vm1086_vm4, %v2201_v12, %v2202_v36  ;;  %v4080_v33 = vsel %vm3293_vm3, 0, %v1816_v23 }
 0x2b1   : > { %v1832_v9 = vshrl.u32 %v1725_v39, 16  ;;  %v1825_v18 = vshrl.u32 %v1724_v58, 16  ;;  %v2204_v2 = vrot.slane %v4047_v54, 1  ;;  %v2205_v10 = vrot.slane %v1897_v46, 1 }
 0x2b2   : > { %v2032_v11 = vsel %vm813_vm5, %v2027_v38, %v2031_v48  ;;  %v2036_v50 = vshll.u32 %v4051_v14, 16  ;;  %v2041_v57 = vshll.u32 %v1896_v17, 16  ;;  %v1835_v40 = vshll.u32 %v1725_v39, 16 }
 0x2b3   : > { %v1834_v42 = vrot.slane %v1832_v9, 7  ;;  %v1827_v31 = vrot.slane %v1825_v18, 7  ;;  %2125 = vrot.lane.b32.xlu0 %v2032_v11, %s3179_s15  ;;  %2241 = vrot.lane.b32.xlu1 %v2203_v0, %s3184_s9  ;;  %v2048_v6 = vshll.u32 %v4047_v54, 16  ;;  %v1828_v1 = vshll.u32 %v1724_v58, 16 }
 0x2b4   : > { %v2034_v63 = vshrl.u32 %v4051_v14, 16  ;;  %v2038_v8 = vrot.slane %v2036_v50, 1  ;;  %v2053_v29 = vshll.u32 %v1897_v46, 16  ;;  %v2046_v55 = vshrl.u32 %v4047_v54, 16 }
 0x2b5   : > { %v1837_v30 = vor.u32 %v1835_v40, %v1834_v42  ;;  %v2050_v15 = vrot.slane %v2048_v6, 1  ;;  %v1898_v56 = vsel %vm3293_vm3, %v1813_v59, 0  ;;  %v2206_v19 = vsel %vm1086_vm4, %v2204_v2, %v2205_v10 }
 0x2b6   : > { %v2039_v5 = vor.u32 %v2038_v8, %v2034_v63  ;;  %v2043_v24 = vrot.slane %v2041_v57, 1  ;;  %v2207_v25 = vrot.slane %v4080_v33, 1  ;;  %v4096_v23 = vsel %vm3293_vm3, 0, %v1823_v49 }
 0x2b7   : > { %v1830_v41 = vor.u32 %v1828_v1, %v1827_v31  ;;  %2243 = vrot.lane.b32.xlu0 %v2206_v19, %s3184_s9  ;;  %v2051_v60 = vor.u32 %v2050_v15, %v2046_v55  ;;  %v2055_v7 = vrot.slane %v2053_v29, 1  ;;  %v2208_v37 = vrot.slane %v1898_v56, 1 }
 0x2b8   : > { %v2044_v43 = vsel %vm813_vm5, %v2039_v5, %v2043_v24  ;;  %v1899_v59 = vsel %vm3293_vm3, %v1820_v22, 0  ;;  %v4104_v61 = vsel %vm3293_vm3, 0, %v1837_v30  ;;  %v2060_v62 = vshll.u32 %v4080_v33, 16 }
 0x2b9   : > { %2127 = vrot.lane.b32.xlu1 %v2044_v43, %s3179_s15  ;;  %v2065_v44 = vshll.u32 %v1898_v56, 16  ;;  %v2056_v47 = vsel %vm813_vm5, %v2051_v60, %v2055_v7  ;;  %v2209_v51 = vsel %vm1086_vm4, %v2207_v25, %v2208_v37  ;;  %v2210_v17 = vrot.slane %v4096_v23, 1  ;;  %v3165_v25 = vld [vmem:[%s4521_s5] sm:$0xff]   ;;  %v3167_v7 = vld [vmem:[%s4521_s5 + $0x10] sm:$0xff]   ;;  %v3168_v37 = vld [vmem:[%s4521_s5 + $0x18] sm:$0xff]  }
 0x2ba   : > { %v2072_v28 = vshll.u32 %v4096_v23, 16  ;;  %v4114_v22 = vsel %vm3293_vm3, 0, %v1830_v41  ;;  %v2211_v45 = vrot.slane %v1899_v59, 1  ;;  %v2058_v12 = vshrl.u32 %v4080_v33, 16  ;;  %v3166_v41 = vld [vmem:[%s4521_s5 + $0x8] sm:$0xff]   ;;  %3070 = vmatprep.subr.bf16.mxu1 %v3165_v25 }
 0x2bb   : > { %2129 = vrot.lane.b32.xlu0 %v2056_v47, %s3179_s15  ;;  %v2062_v36 = vrot.slane %v2060_v62, 1  ;;  %v2070_v39 = vshrl.u32 %v4096_v23, 16  ;;  %v2077_v38 = vshll.u32 %v1899_v59, 16  ;;  %v1900_v46 = vsel %vm3293_vm3, %v1827_v31, 0  ;;  %3071 = vmatpush3.bf16.msra.mxu1 %v3165_v25  ;;  %v4158_v59 = vpop.permute.xlu1 %2105 }
 0x2bc   : > { %v2074_v58 = vrot.slane %v2072_v28, 1  ;;  %v2067_v48 = vrot.slane %v2065_v44, 1  ;;  %v2212_v0 = vsel %vm1086_vm4, %v2210_v17, %v2211_v45  ;;  %v2213_v18 = vrot.slane %v4114_v22, 1  ;;  %3072 = vmatprep.subr.bf16.mxu1 %v3166_v41  ;;  %v3169_v44 = vld [vmem:[%s4521_s5 + $0x20] ss:$0 sps:$4 sm:$0xff]  }
 0x2bd   : > { %2245 = vrot.lane.b32.xlu1 %v2209_v51, %s3184_s9  ;;  %v2063_v49 = vor.u32 %v2062_v36, %v2058_v12  ;;  %v2084_v2 = vshll.u32 %v4114_v22, 16  ;;  %v2214_v10 = vrot.slane %v1900_v46, 1  ;;  %v2096_v50 = vshll.u32 %v4104_v61, 16 }
 0x2be   : > { %v2075_v9 = vor.u32 %v2074_v58, %v2070_v39  ;;  %v2079_v57 = vrot.slane %v2077_v38, 1  ;;  %v2082_v40 = vshrl.u32 %v4114_v22, 16  ;;  %v2089_v6 = vshll.u32 %v1900_v46, 16 }
 0x2bf   : > { %2247 = vrot.lane.b32.xlu0 %v2212_v0, %s3184_s9  ;;  %v2068_v11 = vsel %vm813_vm5, %v2063_v49, %v2067_v48  ;;  %v2086_v31 = vrot.slane %v2084_v2, 1  ;;  %v1901_v1 = vsel %vm3293_vm3, %v1834_v42, 0  ;;  %v2216_v63 = vrot.slane %v4104_v61, 1  ;;  %3073 = vmatpush3.bf16.msra.mxu1 %v3166_v41 }
 0x2c0   : > { %v2080_v8 = vsel %vm813_vm5, %v2075_v9, %v2079_v57  ;;  %v2215_v29 = vsel %vm1086_vm4, %v2213_v18, %v2214_v10  ;;  %v2098_v55 = vrot.slane %v2096_v50, 1  ;;  %v2217_v15 = vrot.slane %v1901_v1, 1  ;;  %3074 = vmatprep.subr.bf16.mxu1 %v3167_v7 }
 0x2c1   : > { %2131 = vrot.lane.b32.xlu1 %v2068_v11, %s3179_s15  ;;  %v2087_v30 = vor.u32 %v2086_v31, %v2082_v40  ;;  %v2091_v56 = vrot.slane %v2089_v6, 1  ;;  %v2094_v19 = vshrl.u32 %v4104_v61, 16  ;;  %v2101_v5 = vshll.u32 %v1901_v1, 16 }
 0x2c2   : > { %v2218_v35 = vsel %vm1086_vm4, %v2216_v63, %v2217_v15  ;;  %v2530_v47 = vsel %vm2528_vm12, %v3169_v44, 0 }
 0x2c3   : > { %2133 = vrot.lane.b32.xlu0 %v2080_v8, %s3179_s15  ;;  %v2092_v42 = vsel %vm813_vm5, %v2087_v30, %v2091_v56  ;;  %v2099_v24 = vor.u32 %v2098_v55, %v2094_v19  ;;  %v2103_v60 = vrot.slane %v2101_v5, 1  ;;  %3075 = vmatpush3.bf16.msra.mxu1 %v3167_v7 }
 0x2c4   : > { %3076 = vmatprep.subr.bf16.mxu1 %v3168_v37 }
 0x2c5   : > { %2249 = vrot.lane.b32.xlu1 %v2215_v29, %s3184_s9  ;;  %v2104_v43 = vsel %vm813_vm5, %v2099_v24, %v2103_v60 }
 0x2c7   : > { %2251 = vrot.lane.b32.xlu0 %v2218_v35, %s3184_s9  ;;  %3077 = vmatpush3.bf16.msra.mxu1 %v3168_v37 }
 0x2c8   : > { %3113 = vmatprep.subr.msk.bf16.mxu1 %vm2528_vm12, %v3169_v44 }
 0x2c9   : > { %2135 = vrot.lane.b32.xlu1 %v2092_v42, %s3179_s15 }
 0x2cb   : > { %2137 = vrot.lane.b32.xlu0 %v2104_v43, %s3179_s15  ;;  %3079 = vmatpush3.bf16.msra.mxu1 %v2530_v47  ;;  %s3185_s15 = smov 48  }
 0x2cd   : > { %2219 = vrot.lane.b32.xlu1 %v3614_v21, %s3184_s9 }
 0x2e8   : > { %v2224_v62 = vpop.permute.xlu0 %2223 }
 0x2ec   : > { %v2110_v21 = vpop.permute.xlu1 %2109 }
 0x2ed   : > { %v2222_v51 = vpop.permute.xlu0 %2221  ;;  %v2258_v17 = vsel %vm1207_vm8, %v3861_v27, %v2110_v21 }
 0x2ee   : > { %v4166_v28 = vsel %vm2287_vm13, %v2258_v17, %v2224_v62 }
 0x2ef   : > { %2340 = vrot.lane.b32.xlu1 %v4166_v28, %s3183_s24 }
 0x2f3   : > { %v2108_v45 = vpop.permute.xlu0 %2107 }
 0x2f4   : > { %v2256_v12 = vsel %vm1207_vm8, %v3880_v20, %v2108_v45 }
 0x2f5   : > { %v4173_v36 = vsel %vm2287_vm13, %v2256_v12, %v2222_v51  ;;  %v2226_v39 = vpop.permute.xlu1 %2225 }
 0x2f6   : > { %2338 = vrot.lane.b32.xlu0 %v4173_v36, %s3183_s24 }
 0x2f7   : > { %v2228_v27 = vpop.permute.xlu0 %2227 }
 0x2fa   : > { %2371 = vrot.lane.b32.xlu0 %v4166_v28, %s3185_s15 }
 0x2fe   : > { %v2112_v58 = vpop.permute.xlu1 %2111 }
 0x2ff   : > { %v2260_v38 = vsel %vm1207_vm8, %v3901_v16, %v2112_v58 }
 0x300   : > { %v4182_v46 = vsel %vm2287_vm13, %v2260_v38, %v2226_v39 }
 0x301   : > { %2373 = vrot.lane.b32.xlu1 %v4182_v46, %s3185_s15  ;;  %2342 = vrot.lane.b32.xlu0 %v4182_v46, %s3183_s24 }
 0x302   : > { %v2114_v20 = vpop.permute.xlu0 %2113  ;;  %v2230_v48 = vpop.permute.xlu1 %2229 }
 0x303   : > { %v2262_v49 = vsel %vm1207_vm8, %v3910_v3, %v2114_v20 }
 0x304   : > { %v4191_v0 = vsel %vm2287_vm13, %v2262_v49, %v2228_v27 }
 0x305   : > { %2344 = vrot.lane.b32.xlu1 %v4191_v0, %s3183_s24  ;;  %2375 = vrot.lane.b32.xlu0 %v4191_v0, %s3185_s15 }
 0x306   : > { %v2232_v16 = vpop.permute.xlu0 %2231 }
 0x309   : > { %v2116_v9 = vpop.permute.xlu1 %2115 }
 0x30a   : > { %v2264_v18 = vsel %vm1207_vm8, %v3938_v4, %v2116_v9 }
 0x30b   : > { %v4200_v2 = vsel %vm2287_vm13, %v2264_v18, %v2230_v48 }
 0x30c   : > { %2377 = vrot.lane.b32.xlu1 %v4200_v2, %s3185_s15  ;;  %2346 = vrot.lane.b32.xlu0 %v4200_v2, %s3183_s24 }
 0x30d   : > { %v2234_v10 = vpop.permute.xlu1 %2233 }
 0x30e   : > { %v2118_v3 = vpop.permute.xlu0 %2117 }
 0x30f   : > { %v2266_v11 = vsel %vm1207_vm8, %v3948_v53, %v2118_v3 }
 0x310   : > { %v4209_v50 = vsel %vm2287_vm13, %v2266_v11, %v2232_v16 }
 0x311   : > { %2348 = vrot.lane.b32.xlu1 %v4209_v50, %s3183_s24  ;;  %2379 = vrot.lane.b32.xlu0 %v4209_v50, %s3185_s15 }
 0x312   : > { %v2236_v4 = vpop.permute.xlu0 %2235 }
 0x317   : > { %v2120_v57 = vpop.permute.xlu1 %2119 }
 0x318   : > { %v2268_v40 = vsel %vm1207_vm8, %v3980_v13, %v2120_v57 }
 0x319   : > { %v4218_v31 = vsel %vm2287_vm13, %v2268_v40, %v2234_v10 }
 0x31a   : > { %2381 = vrot.lane.b32.xlu1 %v4218_v31, %s3185_s15  ;;  %2350 = vrot.lane.b32.xlu0 %v4218_v31, %s3183_s24  ;;  %v2122_v53 = vpop.permute.xlu0 %2121 }
 0x31b   : > { %v2270_v6 = vsel %vm1207_vm8, %v3992_v32, %v2122_v53  ;;  %v2238_v1 = vpop.permute.xlu1 %2237 }
 0x31c   : > { %v4227_v63 = vsel %vm2287_vm13, %v2270_v6, %v2236_v4 }
 0x31e   : > { %2352 = vrot.lane.b32.xlu1 %v4227_v63, %s3183_s24  ;;  %2383 = vrot.lane.b32.xlu0 %v4227_v63, %s3185_s15  ;;  %v2240_v13 = vpop.permute.xlu0 %2239 }
 0x321   : > { %v2124_v8 = vpop.permute.xlu1 %2123 }
 0x322   : > { %v2272_v29 = vsel %vm1207_vm8, %v4004_v34, %v2124_v8 }
 0x323   : > { %v4236_v30 = vsel %vm2287_vm13, %v2272_v29, %v2238_v1 }
 0x324   : > { %2385 = vrot.lane.b32.xlu1 %v4236_v30, %s3185_s15  ;;  %2354 = vrot.lane.b32.xlu0 %v4236_v30, %s3183_s24 }
 0x325   : > { %v2126_v32 = vpop.permute.xlu0 %2125  ;;  %v2242_v55 = vpop.permute.xlu1 %2241 }
 0x326   : > { %v2274_v15 = vsel %vm1207_vm8, %v4000_v52, %v2126_v32 }
 0x327   : > { %v4245_v56 = vsel %vm2287_vm13, %v2274_v15, %v2240_v13 }
 0x328   : > { %2356 = vrot.lane.b32.xlu1 %v4245_v56, %s3183_s24  ;;  %2387 = vrot.lane.b32.xlu0 %v4245_v56, %s3185_s15 }
 0x329   : > { %v2244_v34 = vpop.permute.xlu0 %2243 }
 0x32b   : > { %v2128_v19 = vpop.permute.xlu1 %2127 }
 0x32c   : > { %v2276_v5 = vsel %vm1207_vm8, %v4051_v14, %v2128_v19 }
 0x32d   : > { %v4254_v35 = vsel %vm2287_vm13, %v2276_v5, %v2242_v55  ;;  %v2130_v42 = vpop.permute.xlu0 %2129 }
 0x32e   : > { %2389 = vrot.lane.b32.xlu1 %v4254_v35, %s3185_s15  ;;  %v2278_v52 = vsel %vm1207_vm8, %v4047_v54, %v2130_v42  ;;  %2358 = vrot.lane.b32.xlu0 %v4254_v35, %s3183_s24 }
 0x32f   : > { %v2246_v24 = vpop.permute.xlu1 %2245  ;;  %v4263_v25 = vsel %vm2287_vm13, %v2278_v52, %v2244_v34 }
 0x331   : > { %v2248_v41 = vpop.permute.xlu0 %2247 }
 0x332   : > { %2360 = vrot.lane.b32.xlu1 %v4263_v25, %s3183_s24  ;;  %2391 = vrot.lane.b32.xlu0 %v4263_v25, %s3185_s15 }
 0x333   : > { %v2132_v14 = vpop.permute.xlu1 %2131 }
 0x334   : > { %v2280_v60 = vsel %vm1207_vm8, %v4080_v33, %v2132_v14 }
 0x335   : > { %v4272_v54 = vsel %vm2287_vm13, %v2280_v60, %v2246_v24  ;;  %v2134_v43 = vpop.permute.xlu0 %2133 }
 0x336   : > { %2393 = vrot.lane.b32.xlu1 %v4272_v54, %s3185_s15  ;;  %v2282_v7 = vsel %vm1207_vm8, %v4096_v23, %v2134_v43  ;;  %2362 = vrot.lane.b32.xlu0 %v4272_v54, %s3183_s24 }
 0x337   : > { %v2250_v37 = vpop.permute.xlu1 %2249  ;;  %v4281_v62 = vsel %vm2287_vm13, %v2282_v7, %v2248_v41 }
 0x339   : > { %v2252_v44 = vpop.permute.xlu0 %2251 }
 0x33a   : > { %2364 = vrot.lane.b32.xlu1 %v4281_v62, %s3183_s24  ;;  %2395 = vrot.lane.b32.xlu0 %v4281_v62, %s3185_s15 }
 0x33b   : > { %v2136_v33 = vpop.permute.xlu1 %2135 }
 0x33c   : > { %v2284_v47 = vsel %vm1207_vm8, %v4114_v22, %v2136_v33  ;;  %v2254_v22 = vsel %vm1207_vm8, %v3362_v26, %v4158_v59 }
 0x33d   : > { %v4290_v23 = vsel %vm2287_vm13, %v2284_v47, %v2250_v37  ;;  %v2138_v21 = vpop.permute.xlu0 %2137 }
 0x33e   : > { %2397 = vrot.lane.b32.xlu1 %v4290_v23, %s3185_s15  ;;  %v2286_v51 = vsel %vm1207_vm8, %v4104_v61, %v2138_v21  ;;  %2366 = vrot.lane.b32.xlu0 %v4290_v23, %s3183_s24 }
 0x33f   : > { %v2321_v17 = vsel %vm2287_vm13, %v2286_v51, %v2252_v44  ;;  %v2220_v45 = vpop.permute.xlu1 %2219 }
 0x340   : > { %v2289_v12 = vsel %vm2287_vm13, %v2254_v22, %v2220_v45 }
 0x342   : > { %2368 = vrot.lane.b32.xlu1 %v2321_v17, %s3183_s24  ;;  %2399 = vrot.lane.b32.xlu0 %v2321_v17, %s3185_s15 }
 0x346   : > { %2401 = vrot.lane.b32.xlu1 %v2289_v12, %s3185_s15 }
 0x361   : > { %v2341_v38 = vpop.permute.xlu1 %2340 }
 0x362   : > { %v2406_v20 = vsel %vm1356_vm10, %v4173_v36, %v2341_v38 }
 0x368   : > { %v2339_v39 = vpop.permute.xlu0 %2338 }
 0x369   : > { %v2404_v61 = vsel %vm1356_vm10, %v2289_v12, %v2339_v39 }
 0x36c   : > { %v2372_v27 = vpop.permute.xlu0 %2371 }
 0x36d   : > { %v2437_v58 = vsel %vm2435_vm14, %v2404_v61, %v2372_v27  ;;  %v4372_v27 = vld [vmem:[%s4522_s6] ss:$0 sm:$0xff] }
 0x36e   : > { %3080 = vmatprep.mubr.msk.bf16.mxu1 %vm2495_vm15, %v2437_v58 }
 0x373   : > { %v2374_v49 = vpop.permute.xlu1 %2373  ;;  %v2343_v26 = vpop.permute.xlu0 %2342 }
 0x374   : > { %v2439_v59 = vsel %vm2435_vm14, %v2406_v20, %v2374_v49  ;;  %v2408_v48 = vsel %vm1356_vm10, %v4166_v28, %v2343_v26 }
 0x375   : > { %3081 = vmatmul.mubr.msk.bf16.vlgmr.msra.gmra.mrb[0].mxu1 %vm2495_vm15, %v2439_v59 }
 0x377   : > { %v2376_v16 = vpop.permute.xlu0 %2375  ;;  %v2345_v9 = vpop.permute.xlu1 %2344 }
 0x378   : > { %v2441_v18 = vsel %vm2435_vm14, %v2408_v48, %v2376_v16  ;;  %v2410_v3 = vsel %vm1356_vm10, %v4182_v46, %v2345_v9 }
 0x379   : > { %3084 = vmatprep.mubr.msk.bf16.mxu1 %vm2495_vm15, %v2441_v18 }
 0x37e   : > { %v2378_v11 = vpop.permute.xlu1 %2377  ;;  %v2347_v36 = vpop.permute.xlu0 %2346 }
 0x37f   : > { %v2443_v10 = vsel %vm2435_vm14, %v2410_v3, %v2378_v11  ;;  %v2412_v4 = vsel %vm1356_vm10, %v4191_v0, %v2347_v36 }
 0x380   : > { %3085 = vmatmul.mubr.msk.bf16.gmra.mrb[4].mxu1 %vm2495_vm15, %v2443_v10 }
 0x383   : > { %v2380_v57 = vpop.permute.xlu0 %2379  ;;  %v2349_v40 = vpop.permute.xlu1 %2348 }
 0x384   : > { %v2445_v28 = vsel %vm2435_vm14, %v2412_v4, %v2380_v57  ;;  %v2414_v53 = vsel %vm1356_vm10, %v4200_v2, %v2349_v40 }
 0x385   : > { %3088 = vmatprep.mubr.msk.bf16.mxu1 %vm2495_vm15, %v2445_v28 }
 0x38c   : > { %v2382_v6 = vpop.permute.xlu1 %2381  ;;  %v2351_v46 = vpop.permute.xlu0 %2350 }
 0x38d   : > { %v2447_v1 = vsel %vm2435_vm14, %v2414_v53, %v2382_v6  ;;  %v2416_v13 = vsel %vm1356_vm10, %v4209_v50, %v2351_v46 }
 0x38e   : > { %3089 = vmatmul.mubr.msk.bf16.gmra.mrb[8].mxu1 %vm2495_vm15, %v2447_v1 }
 0x390   : > { %v2384_v8 = vpop.permute.xlu0 %2383  ;;  %v2353_v0 = vpop.permute.xlu1 %2352 }
 0x391   : > { %v2449_v29 = vsel %vm2435_vm14, %v2416_v13, %v2384_v8  ;;  %v2418_v32 = vsel %vm1356_vm10, %v4218_v31, %v2353_v0 }
 0x392   : > { %3092 = vmatprep.mubr.msk.bf16.mxu1 %vm2495_vm15, %v2449_v29 }
 0x396   : > { %v2386_v55 = vpop.permute.xlu1 %2385  ;;  %v2355_v2 = vpop.permute.xlu0 %2354 }
 0x397   : > { %v2451_v15 = vsel %vm2435_vm14, %v2418_v32, %v2386_v55  ;;  %v2420_v34 = vsel %vm1356_vm10, %v4227_v63, %v2355_v2 }
 0x398   : > { %3093 = vmatmul.mubr.msk.bf16.gmra.mrb[12].mxu1 %vm2495_vm15, %v2451_v15 }
 0x39a   : > { %v2357_v19 = vpop.permute.xlu1 %2356  ;;  %v2388_v50 = vpop.permute.xlu0 %2387 }
 0x39b   : > { %v2453_v5 = vsel %vm2435_vm14, %v2420_v34, %v2388_v50  ;;  %v2422_v42 = vsel %vm1356_vm10, %v4236_v30, %v2357_v19 }
 0x39c   : > { %3096 = vmatprep.mubr.msk.bf16.mxu1 %vm2495_vm15, %v2453_v5 }
 0x3a0   : > { %v2390_v52 = vpop.permute.xlu1 %2389  ;;  %v2359_v31 = vpop.permute.xlu0 %2358 }
 0x3a1   : > { %v2455_v24 = vsel %vm2435_vm14, %v2422_v42, %v2390_v52  ;;  %v2424_v41 = vsel %vm1356_vm10, %v4245_v56, %v2359_v31 }
 0x3a2   : > { %3097 = vmatmul.mubr.msk.bf16.gmra.mrb[16].mxu1 %vm2495_vm15, %v2455_v24 }
 0x3a4   : > { %v2361_v14 = vpop.permute.xlu1 %2360  ;;  %v2392_v63 = vpop.permute.xlu0 %2391 }
 0x3a5   : > { %v2457_v60 = vsel %vm2435_vm14, %v2424_v41, %v2392_v63  ;;  %v2426_v43 = vsel %vm1356_vm10, %v4254_v35, %v2361_v14 }
 0x3a6   : > { %3100 = vmatprep.mubr.msk.bf16.mxu1 %vm2495_vm15, %v2457_v60 }
 0x3a8   : > { %v2394_v7 = vpop.permute.xlu1 %2393  ;;  %v2363_v30 = vpop.permute.xlu0 %2362 }
 0x3a9   : > { %v2459_v37 = vsel %vm2435_vm14, %v2426_v43, %v2394_v7  ;;  %v2428_v44 = vsel %vm1356_vm10, %v4263_v25, %v2363_v30 }
 0x3aa   : > { %3101 = vmatmul.mubr.msk.bf16.gmra.mrb[20].mxu1 %vm2495_vm15, %v2459_v37 }
 0x3ac   : > { %v2365_v33 = vpop.permute.xlu1 %2364  ;;  %v2396_v56 = vpop.permute.xlu0 %2395 }
 0x3ad   : > { %v2461_v47 = vsel %vm2435_vm14, %v2428_v44, %v2396_v56  ;;  %v2430_v21 = vsel %vm1356_vm10, %v4272_v54, %v2365_v33 }
 0x3ae   : > { %3104 = vmatprep.mubr.msk.bf16.mxu1 %vm2495_vm15, %v2461_v47 }
 0x3b0   : > { %v2398_v51 = vpop.permute.xlu1 %2397  ;;  %v2367_v35 = vpop.permute.xlu0 %2366 }
 0x3b1   : > { %v2463_v17 = vsel %vm2435_vm14, %v2430_v21, %v2398_v51  ;;  %v2432_v45 = vsel %vm1356_vm10, %v4281_v62, %v2367_v35  ;;  %v4377_v62 = vld [vmem:[%s4523_s7] ss:$0 sm:$0xff] }
 0x3b2   : > { %3105 = vmatmul.mubr.msk.bf16.gmra.mrb[24].mxu1 %vm2495_vm15, %v2463_v17 }
 0x3b4   : > { %v2369_v25 = vpop.permute.xlu1 %2368  ;;  %v2400_v22 = vpop.permute.xlu0 %2399 }
 0x3b5   : > { %v2465_v12 = vsel %vm2435_vm14, %v2432_v45, %v2400_v22  ;;  %v2434_v39 = vsel %vm1356_vm10, %v4290_v23, %v2369_v25 }
 0x3b6   : > { %3108 = vmatprep.mubr.msk.bf16.mxu1 %vm2495_vm15, %v2465_v12 }
 0x3b8   : > { %v2402_v54 = vpop.permute.xlu1 %2401 }
 0x3b9   : > { %v2467_v61 = vsel %vm2435_vm14, %v2434_v39, %v2402_v54 }
 0x3ba   : > { %3109 = vmatmul.mubr.msk.bf16.gmra.mrb[28].mxu1 %vm2495_vm15, %v2467_v61 }
 0x448   : > { %v3082_v58 = vpop.f32.mrb[0].mxu1 }
 0x449   : > { %v2701_v38 = vmul.f32 %v3082_v58, %v4372_v27  ;;  %v2566_v23 = vpop.f32.mrb[1].mxu1 }
 0x44a   : > { %v2699_v20 = vmul.f32 %v4372_v27, %v2566_v23  ;;  %v3083_v49 = vpop.f32.mrb[2].mxu1 }
 0x44b   : > { %v2739_v26 = vadd.f32 %v4377_v62, %v2701_v38  ;;  %v2702_v59 = vmul.f32 %v3083_v49, %v4372_v27  ;;  %v2569_v48 = vpop.f32.mrb[3].mxu1 }
 0x44c   : > { %v2737_v16 = vadd.f32 %v4377_v62, %v2699_v20  ;;  %v2700_v9 = vmul.f32 %v4372_v27, %v2569_v48 }
 0x44d   : > { %v2771_v18 = vmax.f32 %v2739_v26, 0.0  ;;  %v2740_v3 = vadd.f32 %v4377_v62, %v2702_v59 }
 0x44e   : > { %v2769_v11 = vmax.f32 %v2737_v16, 0.0  ;;  %v2738_v36 = vadd.f32 %v4377_v62, %v2700_v9 }
 0x44f   : > { %2803 = vst.msk [vmem:[%s4387_s30 + $0x10] sm:$0xff] %vm1207_vm8, %v2771_v18  ;;  %v2772_v10 = vmax.f32 %v2740_v3, 0.0 }
 0x450   : > { %2801 = vst.msk [vmem:[%s4387_s30] sm:$0xff] %vm1207_vm8, %v2769_v11  ;;  %v2770_v4 = vmax.f32 %v2738_v36, 0.0 }
 0x451   : > { %2804 = vst.msk [vmem:[%s4387_s30 + $0x18] sm:$0xff] %vm1207_vm8, %v2772_v10 }
 0x452   : > { %2802 = vst.msk [vmem:[%s4387_s30 + $0x8] sm:$0xff] %vm1207_vm8, %v2770_v4 }
 0x453   : > { %v3086_v57 = vpop.f32.mrb[4].mxu1 }
 0x454   : > { %v2705_v28 = vmul.f32 %v3086_v57, %v4372_v27  ;;  %v2582_v40 = vpop.f32.mrb[5].mxu1 }
 0x455   : > { %v2703_v53 = vmul.f32 %v4372_v27, %v2582_v40  ;;  %v3087_v6 = vpop.f32.mrb[6].mxu1 }
 0x456   : > { %v2743_v46 = vadd.f32 %v4377_v62, %v2705_v28  ;;  %v2706_v1 = vmul.f32 %v3087_v6, %v4372_v27  ;;  %v2585_v13 = vpop.f32.mrb[7].mxu1 }
 0x457   : > { %v2741_v8 = vadd.f32 %v4377_v62, %v2703_v53  ;;  %v2704_v0 = vmul.f32 %v4372_v27, %v2585_v13 }
 0x458   : > { %v2775_v29 = vmax.f32 %v2743_v46, 0.0  ;;  %v2744_v32 = vadd.f32 %v4377_v62, %v2706_v1 }
 0x459   : > { %v2773_v55 = vmax.f32 %v2741_v8, 0.0  ;;  %v2742_v2 = vadd.f32 %v4377_v62, %v2704_v0 }
 0x45a   : > { %2807 = vst.msk [vmem:[%s4387_s30 + $0x30] sm:$0xff] %vm1207_vm8, %v2775_v29  ;;  %v2776_v15 = vmax.f32 %v2744_v32, 0.0 }
 0x45b   : > { %2805 = vst.msk [vmem:[%s4387_s30 + $0x20] sm:$0xff] %vm1207_vm8, %v2773_v55  ;;  %v2774_v34 = vmax.f32 %v2742_v2, 0.0 }
 0x45c   : > { %2808 = vst.msk [vmem:[%s4387_s30 + $0x38] sm:$0xff] %vm1207_vm8, %v2776_v15 }
 0x45d   : > { %2806 = vst.msk [vmem:[%s4387_s30 + $0x28] sm:$0xff] %vm1207_vm8, %v2774_v34 }
 0x461   : > { %v3090_v19 = vpop.f32.mrb[8].mxu1 }
 0x462   : > { %v2709_v50 = vmul.f32 %v3090_v19, %v4372_v27  ;;  %v2598_v5 = vpop.f32.mrb[9].mxu1 }
 0x463   : > { %v2707_v42 = vmul.f32 %v4372_v27, %v2598_v5  ;;  %v3091_v52 = vpop.f32.mrb[10].mxu1 }
 0x464   : > { %v2747_v31 = vadd.f32 %v4377_v62, %v2709_v50  ;;  %v2710_v24 = vmul.f32 %v3091_v52, %v4372_v27  ;;  %v2601_v41 = vpop.f32.mrb[11].mxu1 }
 0x465   : > { %v2745_v14 = vadd.f32 %v4377_v62, %v2707_v42  ;;  %v2708_v63 = vmul.f32 %v4372_v27, %v2601_v41 }
 0x466   : > { %v2779_v60 = vmax.f32 %v2747_v31, 0.0  ;;  %v2748_v43 = vadd.f32 %v4377_v62, %v2710_v24 }
 0x467   : > { %v2777_v7 = vmax.f32 %v2745_v14, 0.0  ;;  %v2746_v30 = vadd.f32 %v4377_v62, %v2708_v63 }
 0x468   : > { %2811 = vst.msk [vmem:[%s4387_s30 + $0x50] sm:$0xff] %vm1207_vm8, %v2779_v60  ;;  %v2780_v37 = vmax.f32 %v2748_v43, 0.0 }
 0x469   : > { %2809 = vst.msk [vmem:[%s4387_s30 + $0x40] sm:$0xff] %vm1207_vm8, %v2777_v7  ;;  %v2778_v44 = vmax.f32 %v2746_v30, 0.0 }
 0x46a   : > { %2812 = vst.msk [vmem:[%s4387_s30 + $0x58] sm:$0xff] %vm1207_vm8, %v2780_v37 }
 0x46b   : > { %2810 = vst.msk [vmem:[%s4387_s30 + $0x48] sm:$0xff] %vm1207_vm8, %v2778_v44  ;;  %v3094_v33 = vpop.f32.mrb[12].mxu1 }
 0x46c   : > { %v2713_v56 = vmul.f32 %v3094_v33, %v4372_v27  ;;  %v2614_v47 = vpop.f32.mrb[13].mxu1 }
 0x46d   : > { %v2711_v21 = vmul.f32 %v4372_v27, %v2614_v47  ;;  %v3095_v51 = vpop.f32.mrb[14].mxu1 }
 0x46e   : > { %v2751_v35 = vadd.f32 %v4377_v62, %v2713_v56  ;;  %v2714_v17 = vmul.f32 %v3095_v51, %v4372_v27  ;;  %v2617_v45 = vpop.f32.mrb[15].mxu1 }
 0x46f   : > { %v2749_v25 = vadd.f32 %v4377_v62, %v2711_v21  ;;  %v2712_v22 = vmul.f32 %v4372_v27, %v2617_v45 }
 0x470   : > { %v2783_v12 = vmax.f32 %v2751_v35, 0.0  ;;  %v2752_v39 = vadd.f32 %v4377_v62, %v2714_v17 }
 0x471   : > { %v2781_v54 = vmax.f32 %v2749_v25, 0.0  ;;  %v2750_v61 = vadd.f32 %v4377_v62, %v2712_v22 }
 0x472   : > { %2815 = vst.msk [vmem:[%s4387_s30 + $0x70] sm:$0xff] %vm1207_vm8, %v2783_v12  ;;  %v2784_v58 = vmax.f32 %v2752_v39, 0.0 }
 0x473   : > { %2813 = vst.msk [vmem:[%s4387_s30 + $0x60] sm:$0xff] %vm1207_vm8, %v2781_v54  ;;  %v2782_v38 = vmax.f32 %v2750_v61, 0.0 }
 0x474   : > { %2816 = vst.msk [vmem:[%s4387_s30 + $0x78] sm:$0xff] %vm1207_vm8, %v2784_v58 }
 0x475   : > { %2814 = vst.msk [vmem:[%s4387_s30 + $0x68] sm:$0xff] %vm1207_vm8, %v2782_v38  ;;  %v3098_v23 = vpop.f32.mrb[16].mxu1 }
 0x476   : > { %v2717_v20 = vmul.f32 %v3098_v23, %v4372_v27  ;;  %v2630_v49 = vpop.f32.mrb[17].mxu1 }
 0x477   : > { %v2715_v26 = vmul.f32 %v4372_v27, %v2630_v49  ;;  %v3099_v59 = vpop.f32.mrb[18].mxu1 }
 0x478   : > { %v2755_v48 = vadd.f32 %v4377_v62, %v2717_v20  ;;  %v2718_v16 = vmul.f32 %v3099_v59, %v4372_v27  ;;  %v2633_v9 = vpop.f32.mrb[19].mxu1 }
 0x479   : > { %v2753_v18 = vadd.f32 %v4377_v62, %v2715_v26  ;;  %v2716_v3 = vmul.f32 %v4372_v27, %v2633_v9 }
 0x47a   : > { %v2787_v11 = vmax.f32 %v2755_v48, 0.0  ;;  %v2756_v36 = vadd.f32 %v4377_v62, %v2718_v16 }
 0x47b   : > { %v2785_v10 = vmax.f32 %v2753_v18, 0.0  ;;  %v2754_v4 = vadd.f32 %v4377_v62, %v2716_v3 }
 0x47c   : > { %2819 = vst.msk [vmem:[%s4387_s30 + $0x90] sm:$0xff] %vm1207_vm8, %v2787_v11  ;;  %v2788_v57 = vmax.f32 %v2756_v36, 0.0 }
 0x47d   : > { %2817 = vst.msk [vmem:[%s4387_s30 + $0x80] sm:$0xff] %vm1207_vm8, %v2785_v10  ;;  %v2786_v28 = vmax.f32 %v2754_v4, 0.0  ;;  %v3102_v40 = vpop.f32.mrb[20].mxu1 }
 0x47e   : > { %2820 = vst.msk [vmem:[%s4387_s30 + $0x98] sm:$0xff] %vm1207_vm8, %v2788_v57  ;;  %v2721_v53 = vmul.f32 %v3102_v40, %v4372_v27  ;;  %v2646_v6 = vpop.f32.mrb[21].mxu1 }
 0x47f   : > { %2818 = vst.msk [vmem:[%s4387_s30 + $0x88] sm:$0xff] %vm1207_vm8, %v2786_v28  ;;  %v2719_v46 = vmul.f32 %v4372_v27, %v2646_v6  ;;  %v3103_v1 = vpop.f32.mrb[22].mxu1 }
 0x480   : > { %v2759_v13 = vadd.f32 %v4377_v62, %v2721_v53  ;;  %v2722_v8 = vmul.f32 %v3103_v1, %v4372_v27  ;;  %v2649_v0 = vpop.f32.mrb[23].mxu1 }
 0x481   : > { %v2757_v29 = vadd.f32 %v4377_v62, %v2719_v46  ;;  %v2720_v32 = vmul.f32 %v4372_v27, %v2649_v0 }
 0x482   : > { %v2791_v55 = vmax.f32 %v2759_v13, 0.0  ;;  %v2760_v2 = vadd.f32 %v4377_v62, %v2722_v8 }
 0x483   : > { %v2789_v15 = vmax.f32 %v2757_v29, 0.0  ;;  %v2758_v34 = vadd.f32 %v4377_v62, %v2720_v32 }
 0x484   : > { %2823 = vst.msk [vmem:[%s4387_s30 + $0xb0] sm:$0xff] %vm1207_vm8, %v2791_v55  ;;  %v2792_v19 = vmax.f32 %v2760_v2, 0.0 }
 0x485   : > { %2821 = vst.msk [vmem:[%s4387_s30 + $0xa0] sm:$0xff] %vm1207_vm8, %v2789_v15  ;;  %v2790_v50 = vmax.f32 %v2758_v34, 0.0  ;;  %v3106_v5 = vpop.f32.mrb[24].mxu1 }
 0x486   : > { %2824 = vst.msk [vmem:[%s4387_s30 + $0xb8] sm:$0xff] %vm1207_vm8, %v2792_v19  ;;  %v2725_v42 = vmul.f32 %v3106_v5, %v4372_v27  ;;  %v2662_v52 = vpop.f32.mrb[25].mxu1 }
 0x487   : > { %2822 = vst.msk [vmem:[%s4387_s30 + $0xa8] sm:$0xff] %vm1207_vm8, %v2790_v50  ;;  %v2723_v31 = vmul.f32 %v4372_v27, %v2662_v52  ;;  %v3107_v24 = vpop.f32.mrb[26].mxu1 }
 0x488   : > { %v2763_v41 = vadd.f32 %v4377_v62, %v2725_v42  ;;  %v2726_v14 = vmul.f32 %v3107_v24, %v4372_v27  ;;  %v2665_v63 = vpop.f32.mrb[27].mxu1 }
 0x489   : > { %v2761_v60 = vadd.f32 %v4377_v62, %v2723_v31  ;;  %v2724_v43 = vmul.f32 %v4372_v27, %v2665_v63 }
 0x48a   : > { %v2795_v7 = vmax.f32 %v2763_v41, 0.0  ;;  %v2764_v30 = vadd.f32 %v4377_v62, %v2726_v14 }
 0x48b   : > { %v2793_v37 = vmax.f32 %v2761_v60, 0.0  ;;  %v2762_v44 = vadd.f32 %v4377_v62, %v2724_v43 }
 0x48c   : > { %2827 = vst.msk [vmem:[%s4387_s30 + $0xd0] sm:$0xff] %vm1207_vm8, %v2795_v7  ;;  %v2796_v33 = vmax.f32 %v2764_v30, 0.0 }
 0x48d   : > { %2825 = vst.msk [vmem:[%s4387_s30 + $0xc0] sm:$0xff] %vm1207_vm8, %v2793_v37  ;;  %v2794_v56 = vmax.f32 %v2762_v44, 0.0  ;;  %v3110_v47 = vpop.f32.mrb[28].mxu1 }
 0x48e   : > { %2828 = vst.msk [vmem:[%s4387_s30 + $0xd8] sm:$0xff] %vm1207_vm8, %v2796_v33  ;;  %v2729_v21 = vmul.f32 %v3110_v47, %v4372_v27  ;;  %v2678_v51 = vpop.f32.mrb[29].mxu1 }
 0x48f   : > { %2826 = vst.msk [vmem:[%s4387_s30 + $0xc8] sm:$0xff] %vm1207_vm8, %v2794_v56  ;;  %v2727_v35 = vmul.f32 %v4372_v27, %v2678_v51  ;;  %v3111_v17 = vpop.f32.mrb[30].mxu1 }
 0x490   : > { %v2767_v45 = vadd.f32 %v4377_v62, %v2729_v21  ;;  %v2730_v25 = vmul.f32 %v3111_v17, %v4372_v27  ;;  %v2681_v22 = vpop.f32.mrb[31].mxu1 }
 0x491   : > { %v2765_v12 = vadd.f32 %v4377_v62, %v2727_v35  ;;  %v2728_v39 = vmul.f32 %v4372_v27, %v2681_v22 }
 0x492   : > { %v2799_v54 = vmax.f32 %v2767_v45, 0.0  ;;  %v2768_v61 = vadd.f32 %v4377_v62, %v2730_v25 }
 0x493   : > { %v2797_v58 = vmax.f32 %v2765_v12, 0.0  ;;  %v2766_v38 = vadd.f32 %v4377_v62, %v2728_v39 }
 0x494   : > { %2831 = vst.msk [vmem:[%s4387_s30 + $0xf0] sm:$0xff] %vm1207_vm8, %v2799_v54  ;;  %v2800_v23 = vmax.f32 %v2768_v61, 0.0 }
 0x495   : > { %2829 = vst.msk [vmem:[%s4387_s30 + $0xe0] sm:$0xff] %vm1207_vm8, %v2797_v58  ;;  %v2798_v20 = vmax.f32 %v2766_v38, 0.0 }
 0x496   : > { %2832 = vst.msk [vmem:[%s4387_s30 + $0xf8] sm:$0xff] %vm1207_vm8, %v2800_v23 }
 0x497   : > { %2830 = vst.msk [vmem:[%s4387_s30 + $0xe8] sm:$0xff] %vm1207_vm8, %v2798_v20 }
 0x498 PF: > { %s18_s27 = sadd.s32 1, %s3176_s27  }
 0x499   : > { %p15_p4 = scmp.ge.s32.totalorder %s18_s27, 4  }
 0x49b   :  { %17 = sbr.rel (!%p15_p4) target bundleno = 1 (0x1), region = 85 }

// kernel: _forward_taps.3
= control target key start
LH: loop header
LB: loop body
LE: loop exit
PB: predicated region body
PF: predicated region fallthrough
CT: control target
= control target key end

     0   :  { %s4139_s15 = smov 0   ;;  %s5267_s0 = inlined_call_operand.vmem [shape: bf16[2,18,18,8], index: 0, kind: input, shape index: {}]   ;;  %s5268_s1 = inlined_call_operand.vmem [shape: bf16[9,8,8], index: 1, kind: input, shape index: {}]   ;;  %s5269_s2 = inlined_call_operand.vmem [shape: f32[1,8], index: 2, kind: input, shape index: {}]   ;;  %s5270_s3 = inlined_call_operand.vmem [shape: f32[1,8], index: 3, kind: input, shape index: {}]   ;;  %s5271_s4 = inlined_call_operand.vmem [shape: f32[2,16,16,8], index: 4, kind: output, shape index: {}]  }
   0x1 LB: > { %s3111_s16 = sadd.s32 4294967295, %s4112_s15   ;;  %p3115_p0 = scmp.ge.s32.totalorder %s4112_s15, 1  ;;  %s4112_s15 = sphi %s4139_s15, %s14_s15  }
   0x2   : > { %p162_p1 = scmp.lt.s32.totalorder %s4112_s15, 3 }
   0x4   : > { %p163_p2 = pnand %p3115_p0, %p162_p1 }
   0x6   : > { %166 = sbr.rel (%p163_p2) target bundleno = 555 (0x22b), region = 36 }
   0xd   : > { %v3119_v0 = vld [vmem:[%s5268_s1 + $0x4] sm:$0xf]  ;;  %vm740_vm0 = vcmask 1043456   ;;  %v3251_v1 = vld [vmem:[%s5268_s1 + $0x10] sm:$0xf]  ;;  %p188_p3 = scmp.lt.s32.totalorder %s3111_s16, 1 }
   0xe   : > { %4065 = vmatprep.subr.msk.bf16.mxu1 %vm740_vm0, %v3119_v0  ;;  %4069 = vmatprep.subr.msk.bf16.mxu0 %vm740_vm0, %v3251_v1  ;;  %v742_v2 = vsel %vm740_vm0, %v3119_v0, 0  ;;  %v4157_v3 = vsel %vm740_vm0, %v3251_v1, 0  ;;  %v253_v4 = vld [vmem:[%s5268_s1] sm:$0xf]  ;;  %v3269_v5 = vld [vmem:[%s5268_s1 + $0x14] sm:$0xf] }
   0xf   : > { %5303 = vst [vmem:[#allocation2_spill] sm:$0xff] %v4157_v3  ;;  %3502 = vmatpush3.bf16.msra.mxu1 %v742_v2  ;;  %3638 = vmatpush3.bf16.msra.mxu0 %v4157_v3  ;;  %s5350_s16 = smov (!%p188_p3, %s3111_s16), 1  ;;  %vm256_vm1 = vsmask.f32 3328  ;;  %vm257_vm2 = vsmask.f32 7440 }
  0x10   : > { %4066 = vmatprep.subr.msk.bf16.mxu1 %vm740_vm0, %v253_v4  ;;  %4071 = vmatprep.subr.msk.bf16.mxu0 %vm740_vm0, %v3269_v5  ;;  %s4075_s25 = smul.u32 216, %s5350_s16  ;;  %v4177_v6 = vsel %vm740_vm0, %v253_v4, 0  ;;  %v4180_v7 = vsel %vm740_vm0, %v3269_v5, 0  ;;  %v4185_v8 = vld [vmem:[%s5268_s1 + $0x18] sm:$0xf]  ;;  %vm691_vm3 = vcmask 64512   ;;  %vm4221_vm4 = vmor %vm256_vm1, %vm257_vm2 }
  0x11   : > { %v4209_v20 = vsel %vm740_vm0, %v4185_v8, 0  ;;  %vm1215_vm5 = vcmask 1042432   ;;  %vm1216_vm6 = vcmask 1046532   ;;  %s3347_s21 = sshll.u32 %s5350_s16, 8 }
  0x12   : > { %s4174_s28 = scalar_lea.vmem %s5267_s0, %s4075_s25  ;;  %vm4402_vm7 = vmor %vm1215_vm5, %vm1216_vm6  ;;  %s5132_s24 = scalar_lea.vmem %s5271_s4, %s3347_s21 }
  0x13   : > { %v4188_v9 = vld [vmem:[%s4174_s28] sm:$0xf]  ;;  %v4191_v10 = vld [vmem:[%s4174_s28 + $0x4] sm:$0xf]  ;;  %v201_v11 = vld [vmem:[%s4174_s28 + $0x8] sm:$0x1] }
  0x14   : > { %v260_v12 = vshrl.u32 %v4188_v9, 16  ;;  %v263_v13 = vshll.u32 %v4188_v9, 16  ;;  %v269_v14 = vshll.u32 %v4191_v10, 16  ;;  %v273_v15 = vshrl.u32 %v4191_v10, 16  ;;  %v4199_v16 = vld [vmem:[%s4174_s28 + $0xc] sm:$0xf] }
  0x15   : > { %v279_v17 = vshll.u32 %v201_v11, 16  ;;  %v4202_v18 = vld [vmem:[%s4174_s28 + $0x10] sm:$0xf]  ;;  %v4205_v19 = vld [vmem:[%s4174_s28 + $0x14] sm:$0x1]  ;;  %v284_v26 = vshrl.u32 %v4199_v16, 16 }
  0x16   : > { %v262_v21 = vrot.slane %v260_v12, 4  ;;  %v265_v22 = vrot.slane %v263_v13, 5  ;;  %v271_v23 = vrot.slane %v269_v14, 5  ;;  %v275_v24 = vrot.slane %v273_v15, 4  ;;  %v4217_v33 = vld [vmem:[%s4174_s28 + $0x18] sm:$0xf] }
  0x17   : > { %v281_v25 = vrot.slane %v279_v17, 5  ;;  %v287_v27 = vshll.u32 %v4199_v16, 16  ;;  %v293_v28 = vshll.u32 %v4202_v18, 16  ;;  %v297_v31 = vshrl.u32 %v4202_v18, 16  ;;  %v4230_v39 = vld [vmem:[%s4174_s28 + $0x1c] sm:$0xf] }
  0x18   : > { %v266_v29 = vor.u32 %v265_v22, %v262_v21  ;;  %v276_v30 = vor.u32 %v275_v24, %v271_v23  ;;  %v303_v32 = vshll.u32 %v4205_v19, 16  ;;  %v286_v35 = vrot.slane %v284_v26, 4  ;;  %v4234_v46 = vld [vmem:[%s4174_s28 + $0x20] sm:$0x1]  ;;  %v4244_v57 = vld [vmem:[%s4174_s28 + $0x24] sm:$0xf] }
  0x19   : > { %v289_v36 = vrot.slane %v287_v27, 5  ;;  %v295_v37 = vrot.slane %v293_v28, 5  ;;  %v4227_v38 = vcombine.low %v4199_v16, %v4202_v18  ;;  %v299_v42 = vrot.slane %v297_v31, 4  ;;  %v4249_v62 = vld [vmem:[%s4174_s28 + $0x28] sm:$0xf] }
  0x1a   : > { %v267_v40 = vrot.slane %v266_v29, 4  ;;  %v277_v41 = vrot.slane %v276_v30, 4  ;;  %v305_v43 = vrot.slane %v303_v32, 5  ;;  %v1230_v45 = vrot.slane %v4205_v19, 5  ;;  %v4257_v4 = vld [vmem:[%s4174_s28 + $0x2c] sm:$0x1] }
  0x1b   : > { %v290_v44 = vor.u32 %v289_v36, %v286_v35  ;;  %v308_v47 = vshrl.u32 %v4217_v33, 16  ;;  %v311_v48 = vshll.u32 %v4217_v33, 16  ;;  %v300_v51 = vor.u32 %v299_v42, %v295_v37  ;;  %v4263_v14 = vld [vmem:[%s4174_s28 + $0x30] sm:$0xf]  ;;  %v4275_v28 = vld [vmem:[%s4174_s28 + $0x34] sm:$0xf] }
  0x1c   : > { %v272_v49 = vsel %vm4221_vm4, %v267_v40, %v271_v23  ;;  %v282_v50 = vsel %vm4221_vm4, %v277_v41, %v281_v25  ;;  %v317_v52 = vshll.u32 %v4230_v39, 16  ;;  %v321_v60 = vshrl.u32 %v4230_v39, 16  ;;  %v4270_v23 = vld [vmem:[%s5268_s1 + $0x8] sm:$0xf]  ;;  %v4282_v32 = vld [vmem:[%s4174_s28 + $0x38] sm:$0x1] }
  0x1d   : > { %v3120_v53 = vcombine.low %v272_v49, %v282_v50  ;;  %v291_v54 = vrot.slane %v290_v44, 4  ;;  %v310_v55 = vrot.slane %v308_v47, 4  ;;  %v313_v56 = vrot.slane %v311_v48, 5  ;;  %v4290_v48 = vld [vmem:[%s4174_s28 + $0x3c] sm:$0xf] }
  0x1e   : > { %v301_v58 = vrot.slane %v300_v51, 4  ;;  %v319_v59 = vrot.slane %v317_v52, 5  ;;  %v327_v61 = vshll.u32 %v4234_v46, 16  ;;  %v1234_v1 = vrot.slane %v4230_v39, 5  ;;  %v4298_v52 = vld [vmem:[%s4174_s28 + $0x40] sm:$0xf] }
  0x1f   : > { %3503 = vmatprep.mubr.msk.bf16.mxu1 %vm691_vm3, %v3120_v53  ;;  %v296_v63 = vsel %vm4221_vm4, %v291_v54, %v295_v37  ;;  %v314_v0 = vor.u32 %v313_v56, %v310_v55  ;;  %v1237_v2 = vrot.slane %v4234_v46, 5  ;;  %v323_v11 = vrot.slane %v321_v60, 4 }
  0x20   : > { %v306_v5 = vsel %vm4221_vm4, %v301_v58, %v305_v43  ;;  %v329_v12 = vrot.slane %v327_v61, 5  ;;  %v332_v13 = vshrl.u32 %v4244_v57, 16  ;;  %v335_v21 = vshll.u32 %v4244_v57, 16 }
  0x21   : > { %v3121_v15 = vcombine.low %v296_v63, %v306_v5  ;;  %v315_v17 = vrot.slane %v314_v0, 4  ;;  %v341_v22 = vshll.u32 %v4249_v62, 16  ;;  %v324_v24 = vor.u32 %v323_v11, %v319_v59  ;;  %v4310_v5 = vld [vmem:[%s4174_s28 + $0x44] sm:$0x1] }
  0x22   : > { %v334_v25 = vrot.slane %v332_v13, 4  ;;  %v345_v26 = vshrl.u32 %v4249_v62, 16  ;;  %v351_v27 = vshll.u32 %v4257_v4, 16  ;;  %v337_v30 = vrot.slane %v335_v21, 5  ;;  %v4315_v13 = vld [vmem:[%s4174_s28 + $0x48] sm:$0xf] }
  0x23   : > { %3639 = vmatprep.mubr.msk.bf16.mxu0 %vm691_vm3, %v3121_v15  ;;  %3504 = vmatmul.mubr.msk.bf16.vlgmr.msra.gmra.mrb[0].mxu1 %vm691_vm3, %v3121_v15  ;;  %v320_v29 = vsel %vm4221_vm4, %v315_v17, %v319_v59  ;;  %v343_v31 = vrot.slane %v341_v22, 5  ;;  %v356_v35 = vshrl.u32 %v4263_v14, 16  ;;  %v325_v36 = vrot.slane %v324_v24, 4  ;;  %v4322_v24 = vld [vmem:[%s4174_s28 + $0x4c] sm:$0xf] }
  0x24   : > { %3536 = vmatpush3.bf16.msra.mxu1 %v4177_v6  ;;  %v347_v37 = vrot.slane %v345_v26, 4  ;;  %v353_v40 = vrot.slane %v351_v27, 5  ;;  %v359_v41 = vshll.u32 %v4263_v14, 16  ;;  %v338_v42 = vor.u32 %v337_v30, %v334_v25 }
  0x25   : > { %v358_v43 = vrot.slane %v356_v35, 4  ;;  %v365_v44 = vshll.u32 %v4275_v28, 16  ;;  %v369_v47 = vshrl.u32 %v4275_v28, 16  ;;  %4067 = vmatprep.subr.msk.bf16.mxu1 %vm740_vm0, %v4270_v23  ;;  %v330_v49 = vsel %vm4221_vm4, %v325_v36, %v329_v12 }
  0x26   : > { %v348_v6 = vor.u32 %v347_v37, %v343_v31  ;;  %v361_v50 = vrot.slane %v359_v41, 5  ;;  %v375_v51 = vshll.u32 %v4282_v32, 16  ;;  %v4300_v53 = vcombine.low %v320_v29, %v330_v49 }
  0x27   : > { %v339_v54 = vrot.slane %v338_v42, 4  ;;  %v367_v55 = vrot.slane %v365_v44, 5  ;;  %v371_v56 = vrot.slane %v369_v47, 4  ;;  %v380_v61 = vshrl.u32 %v4290_v48, 16  ;;  %v4344_v42 = vld [vmem:[%s4174_s28 + $0x54] sm:$0xf] }
  0x28   : > { %5306 = vst [vmem:[#allocation3_spill] sm:$0xff] %v4300_v53  ;;  %v349_v58 = vrot.slane %v348_v6, 4  ;;  %v362_v59 = vor.u32 %v361_v50, %v358_v43  ;;  %v377_v60 = vrot.slane %v375_v51, 5  ;;  %3640 = vmatmul.mubr.msk.bf16.vlgmr.msra.gmra.mrb[0].mxu0 %vm691_vm3, %v4300_v53  ;;  %3507 = vmatprep.mubr.msk.bf16.mxu1 %vm691_vm3, %v4300_v53  ;;  %v383_v11 = vshll.u32 %v4290_v48, 16  ;;  %5308 = vst [vmem:[#allocation5_spill] sm:$0xff] %v4344_v42 }
  0x29   : > { %v344_v63 = vsel %vm4221_vm4, %v339_v54, %v343_v31  ;;  %v372_v0 = vor.u32 %v371_v56, %v367_v55  ;;  %v389_v12 = vshll.u32 %v4298_v52, 16  ;;  %3672 = vmatpush3.bf16.msra.mxu0 %v4180_v7  ;;  %v382_v21 = vrot.slane %v380_v61, 4  ;;  %v4349_v6 = vld [vmem:[%s4174_s28 + $0x58] sm:$0xf] }
  0x2a   : > { %v354_v15 = vsel %vm4221_vm4, %v349_v58, %v353_v40  ;;  %v363_v17 = vrot.slane %v362_v59, 4  ;;  %v393_v22 = vshrl.u32 %v4298_v52, 16  ;;  %v385_v27 = vrot.slane %v383_v11, 5  ;;  %4072 = vmatprep.subr.msk.bf16.mxu0 %vm740_vm0, %v4185_v8  ;;  %v4339_v8 = vld [vmem:[%s4174_s28 + $0x50] sm:$0x1] }
  0x2b   : > { %v4324_v25 = vcombine.low %v344_v63, %v354_v15  ;;  %v373_v26 = vrot.slane %v372_v0, 4  ;;  %v391_v29 = vrot.slane %v389_v12, 5  ;;  %v399_v31 = vshll.u32 %v4310_v5, 16  ;;  %v4362_v11 = vld [vmem:[%s4174_s28 + $0x5c] sm:$0x1] }
  0x2c   : > { %v368_v7 = vsel %vm4221_vm4, %v363_v17, %v367_v55  ;;  %v395_v30 = vrot.slane %v393_v22, 4  ;;  %v404_v35 = vshrl.u32 %v4315_v13, 16  ;;  %v386_v37 = vor.u32 %v385_v27, %v382_v21  ;;  %v4366_v15 = vld [vmem:[%s4174_s28 + $0x60] sm:$0xf]  ;;  %v4371_v27 = vld [vmem:[%s4174_s28 + $0x64] sm:$0xf] }
  0x2d   : > { %5307 = vst [vmem:[#allocation4_spill] sm:$0xff] %v4324_v25  ;;  %3643 = vmatprep.mubr.msk.bf16.mxu0 %vm691_vm3, %v4324_v25  ;;  %3508 = vmatmul.mubr.msk.bf16.gmra.mrb[4].mxu1 %vm691_vm3, %v4324_v25  ;;  %v378_v36 = vsel %vm4221_vm4, %v373_v26, %v377_v60  ;;  %v407_v40 = vshll.u32 %v4315_v13, 16  ;;  %v413_v41 = vshll.u32 %v4322_v24, 16  ;;  %v401_v47 = vrot.slane %v399_v31, 5  ;;  %v4583_v25 = vld [vmem:[%s4174_s28 + $0xa8] sm:$0xf] }
  0x2e   : > { %v4346_v43 = vcombine.low %v368_v7, %v378_v36  ;;  %v396_v44 = vor.u32 %v395_v30, %v391_v29  ;;  %v406_v49 = vrot.slane %v404_v35, 4  ;;  %v387_v50 = vrot.slane %v386_v37, 4 }
  0x2f   : > { %v409_v51 = vrot.slane %v407_v40, 5  ;;  %v415_v54 = vrot.slane %v413_v41, 5  ;;  %v417_v55 = vshrl.u32 %v4322_v24, 16  ;;  %v423_v58 = vshll.u32 %v4339_v8, 16 }
  0x30   : > { %5309 = vst [vmem:[#allocation6_spill] sm:$0xff] %v4346_v43  ;;  %3511 = vmatprep.mubr.msk.bf16.mxu1 %vm691_vm3, %v4346_v43  ;;  %v397_v56 = vrot.slane %v396_v44, 4  ;;  %v428_v59 = vshrl.u32 %v4344_v42, 16  ;;  %v431_v60 = vshll.u32 %v4344_v42, 16  ;;  %3644 = vmatmul.mubr.msk.bf16.gmra.mrb[4].mxu0 %vm691_vm3, %v4346_v43  ;;  %v392_v61 = vsel %vm4221_vm4, %v387_v50, %v391_v29 }
  0x31   : > { %v410_v63 = vor.u32 %v409_v51, %v406_v49  ;;  %v419_v0 = vrot.slane %v417_v55, 4  ;;  %v437_v12 = vshll.u32 %v4349_v6, 16  ;;  %v425_v21 = vrot.slane %v423_v58, 5 }
  0x32   : > { %v402_v17 = vsel %vm4221_vm4, %v397_v56, %v401_v47  ;;  %v430_v22 = vrot.slane %v428_v59, 4  ;;  %v433_v26 = vrot.slane %v431_v60, 5  ;;  %v441_v36 = vshrl.u32 %v4349_v6, 16  ;;  %v4385_v47 = vld [vmem:[%s4174_s28 + $0x68] sm:$0x1] }
  0x33   : > { %v4373_v7 = vcombine.low %v392_v61, %v402_v17  ;;  %v411_v29 = vrot.slane %v410_v63, 4  ;;  %v420_v30 = vor.u32 %v419_v0, %v415_v54  ;;  %v439_v31 = vrot.slane %v437_v12, 5 }
  0x34   : > { %v434_v35 = vor.u32 %v433_v26, %v430_v22  ;;  %v447_v37 = vshll.u32 %v4362_v11, 16  ;;  %v452_v40 = vshrl.u32 %v4366_v15, 16  ;;  %v455_v49 = vshll.u32 %v4366_v15, 16 }
  0x35   : > { %5310 = vst [vmem:[#allocation7_spill] sm:$0xff] %v4373_v7  ;;  %3647 = vmatprep.mubr.msk.bf16.mxu0 %vm691_vm3, %v4373_v7  ;;  %3512 = vmatmul.mubr.msk.bf16.gmra.mrb[8].mxu1 %vm691_vm3, %v4373_v7  ;;  %v416_v41 = vsel %vm4221_vm4, %v411_v29, %v415_v54  ;;  %v421_v44 = vrot.slane %v420_v30, 4  ;;  %v461_v50 = vshll.u32 %v4371_v27, 16  ;;  %v443_v55 = vrot.slane %v441_v36, 4  ;;  %v4393_v54 = vld [vmem:[%s4174_s28 + $0x6c] sm:$0xf] }
  0x36   : > { %v435_v51 = vrot.slane %v434_v35, 4  ;;  %v449_v56 = vrot.slane %v447_v37, 5  ;;  %v454_v58 = vrot.slane %v452_v40, 4  ;;  %v457_v60 = vrot.slane %v455_v49, 5  ;;  %v4409_v36 = vld [vmem:[%s4174_s28 + $0x70] sm:$0xf] }
  0x37   : > { %v426_v59 = vsel %vm4221_vm4, %v421_v44, %v425_v21  ;;  %v463_v61 = vrot.slane %v461_v50, 5  ;;  %v465_v63 = vshrl.u32 %v4371_v27, 16  ;;  %v444_v17 = vor.u32 %v443_v55, %v439_v31  ;;  %v4560_v7 = vld [vmem:[%s4174_s28 + $0xa0] sm:$0xf] }
  0x38   : > { %v4395_v0 = vcombine.low %v416_v41, %v426_v59  ;;  %v440_v12 = vsel %vm4221_vm4, %v435_v51, %v439_v31  ;;  %v471_v22 = vshll.u32 %v4385_v47, 16  ;;  %v458_v21 = vor.u32 %v457_v60, %v454_v58  ;;  %v4422_v51 = vld [vmem:[%s4174_s28 + $0x74] sm:$0x1] }
  0x39   : > { %v467_v29 = vrot.slane %v465_v63, 4  ;;  %v3186_v30 = vrot.slane %v4199_v16, 9  ;;  %v1227_v35 = vrot.slane %v4202_v18, 5  ;;  %v445_v31 = vrot.slane %v444_v17, 4 }
  0x3a   : > { %5311 = vst [vmem:[#allocation8_spill] sm:$0xff] %v4395_v0  ;;  %3648 = vmatmul.mubr.msk.bf16.gmra.mrb[8].mxu0 %vm691_vm3, %v4395_v0  ;;  %3515 = vmatprep.mubr.msk.bf16.mxu1 %vm691_vm3, %v4395_v0  ;;  %v473_v37 = vrot.slane %v471_v22, 5  ;;  %v476_v40 = vshrl.u32 %v4393_v54, 16  ;;  %v479_v41 = vshll.u32 %v4393_v54, 16  ;;  %v459_v44 = vrot.slane %v458_v21, 4 }
  0x3b   : > { %v468_v49 = vor.u32 %v467_v29, %v463_v61  ;;  %v1228_v16 = vsel %vm4402_vm7, %v3186_v30, %v1227_v35  ;;  %v1229_v18 = vrot.slane %v1227_v35, 4  ;;  %v450_v50 = vsel %vm4221_vm4, %v445_v31, %v449_v56  ;;  %v4434_v56 = vld [vmem:[%s4174_s28 + $0x78] sm:$0xf]  ;;  %v4450_v31 = vld [vmem:[%s4174_s28 + $0x7c] sm:$0xf] }
  0x3c   : > { %v478_v55 = vrot.slane %v476_v40, 4  ;;  %v481_v58 = vrot.slane %v479_v41, 5  ;;  %v485_v59 = vshll.u32 %v4409_v36, 16  ;;  %v4425_v60 = vcombine.low %v440_v12, %v450_v50 }
  0x3d   : > { %v464_v63 = vsel %vm4221_vm4, %v459_v44, %v463_v61  ;;  %v469_v17 = vrot.slane %v468_v49, 4  ;;  %v1231_v22 = vsel %vm4402_vm7, %v1229_v18, %v1230_v45  ;;  %v489_v35 = vshrl.u32 %v4409_v36, 16  ;;  %v4455_v49 = vld [vmem:[%s4174_s28 + $0x80] sm:$0x1] }
  0x3e   : > { %5314 = vst [vmem:[#allocation9_spill] sm:$0xff] %v4425_v60  ;;  %v4436_v21 = vcombine.low %v1228_v16, %v1231_v22  ;;  %v482_v29 = vor.u32 %v481_v58, %v478_v55  ;;  %v487_v30 = vrot.slane %v485_v59, 5  ;;  %3651 = vmatprep.mubr.msk.bf16.mxu0 %vm691_vm3, %v4425_v60  ;;  %3516 = vmatmul.mubr.msk.bf16.gmra.mrb[12].mxu1 %vm691_vm3, %v4425_v60  ;;  %v495_v45 = vshll.u32 %v4422_v51, 16  ;;  %v4553_v60 = vld [vmem:[%s4174_s28 + $0x9c] sm:$0xf] }
  0x3f   : > { %v474_v19 = vsel %vm4221_vm4, %v469_v17, %v473_v37  ;;  %v3187_v61 = vrot.slane %v4217_v33, 9  ;;  %v1236_v12 = vrot.slane %v1234_v1, 4  ;;  %v491_v44 = vrot.slane %v489_v35, 4 }
  0x40   : > { %5315 = vst [vmem:[#allocation10_spill] sm:$0xff] %v4436_v21  ;;  %v4452_v40 = vcombine.low %v464_v63, %v474_v19  ;;  %v483_v41 = vrot.slane %v482_v29, 4  ;;  %v500_v16 = vshrl.u32 %v4434_v56, 16  ;;  %v497_v18 = vrot.slane %v495_v45, 5  ;;  %v4481_v29 = vld [vmem:[%s4174_s28 + $0x84] sm:$0xf] }
  0x41   : > { %v1235_v37 = vsel %vm4402_vm7, %v3187_v61, %v1234_v1  ;;  %v1238_v50 = vsel %vm4402_vm7, %v1236_v12, %v1237_v2  ;;  %v503_v55 = vshll.u32 %v4434_v56, 16  ;;  %v492_v59 = vor.u32 %v491_v44, %v487_v30 }
  0x42   : > { %5316 = vst [vmem:[#allocation11_spill] sm:$0xff] %v4452_v40  ;;  %3652 = vmatmul.mubr.msk.bf16.gmra.mrb[12].mxu0 %vm691_vm3, %v4452_v40  ;;  %3519 = vmatprep.mubr.msk.bf16.mxu1 %vm691_vm3, %v4452_v40  ;;  %v488_v58 = vsel %vm4221_vm4, %v483_v41, %v487_v30  ;;  %v4473_v63 = vcombine.low %v1235_v37, %v1238_v50  ;;  %v502_v1 = vrot.slane %v500_v16, 4  ;;  %v509_v2 = vshll.u32 %v4450_v31, 16  ;;  %v4487_v16 = vld [vmem:[%s4174_s28 + $0x88] sm:$0xf] }
  0x43   : > { %3673 = vmatprep.mubr.msk.bf16.mxu0 %vm691_vm3, %v4436_v21  ;;  %v505_v46 = vrot.slane %v503_v55, 5  ;;  %v513_v17 = vshrl.u32 %v4450_v31, 16  ;;  %v519_v22 = vshll.u32 %v4455_v49, 16  ;;  %v493_v35 = vrot.slane %v492_v59, 4 }
  0x44   : > { %5317 = vst [vmem:[#allocation12_spill] sm:$0xff] %v4473_v63  ;;  %v3188_v30 = vrot.slane %v4244_v57, 9  ;;  %v1241_v19 = vrot.slane %v4249_v62, 5  ;;  %v1244_v45 = vrot.slane %v4257_v4, 5  ;;  %v511_v12 = vrot.slane %v509_v2, 5 }
  0x45   : > { %v506_v61 = vor.u32 %v505_v46, %v502_v1  ;;  %v515_v41 = vrot.slane %v513_v17, 4  ;;  %v521_v44 = vrot.slane %v519_v22, 5  ;;  %v498_v37 = vsel %vm4221_vm4, %v493_v35, %v497_v18  ;;  %v4497_v1 = vld [vmem:[%s4174_s28 + $0x8c] sm:$0x1] }
  0x46   : > { %v1242_v50 = vsel %vm4402_vm7, %v3188_v30, %v1241_v19  ;;  %v1243_v55 = vrot.slane %v1241_v19, 4  ;;  %v524_v59 = vshrl.u32 %v4481_v29, 16  ;;  %v4494_v3 = vcombine.low %v488_v58, %v498_v37 }
  0x47   : > { %v507_v40 = vrot.slane %v506_v61, 4  ;;  %v516_v4 = vor.u32 %v515_v41, %v511_v12  ;;  %v527_v46 = vshll.u32 %v4481_v29, 16  ;;  %v533_v18 = vshll.u32 %v4487_v16, 16  ;;  %v4511_v61 = vld [vmem:[%s4174_s28 + $0x90] sm:$0xf] }
  0x48   : > { %5318 = vst [vmem:[#allocation13_spill] sm:$0xff] %v4494_v3  ;;  %v1245_v2 = vsel %vm4402_vm7, %v1243_v55, %v1244_v45  ;;  %v526_v17 = vrot.slane %v524_v59, 4  ;;  %v537_v22 = vshrl.u32 %v4487_v16, 16  ;;  %3520 = vmatmul.mubr.msk.bf16.gmra.mrb[16].mxu1 %vm691_vm3, %v4494_v3  ;;  %v4516_v45 = vld [vmem:[%s5268_s1 + $0x1c] sm:$0xf]  ;;  %v1248_v59 = vrot.slane %v4275_v28, 5 }
  0x49   : > { %v512_v58 = vsel %vm4221_vm4, %v507_v40, %v511_v12  ;;  %v517_v35 = vrot.slane %v516_v4, 4  ;;  %v4508_v30 = vcombine.low %v1242_v50, %v1245_v2  ;;  %v529_v19 = vrot.slane %v527_v46, 5  ;;  %5320 = vst [vmem:[#allocation15_spill] sm:$0xff] %v4516_v45  ;;  %v4530_v46 = vld [vmem:[%s4174_s28 + $0x94] sm:$0xf] }
  0x4a   : > { %3674 = vmatmul.mubr.msk.bf16.vlgmr.msra.gmra.mrb[0].mxu0 %vm691_vm3, %v4473_v63  ;;  %v535_v41 = vrot.slane %v533_v18, 5  ;;  %v539_v37 = vrot.slane %v537_v22, 4  ;;  %v543_v40 = vshll.u32 %v4497_v1, 16  ;;  %v3189_v12 = vrot.slane %v4263_v14, 9  ;;  %v4535_v3 = vld [vmem:[%s4174_s28 + $0x98] sm:$0x1] }
  0x4b   : > { %5319 = vst [vmem:[#allocation14_spill] sm:$0xff] %v4508_v30  ;;  %3706 = vmatpush3.bf16.msra.mxu0 %v4209_v20  ;;  %v522_v50 = vsel %vm4221_vm4, %v517_v35, %v521_v44  ;;  %3677 = vmatprep.mubr.msk.bf16.mxu0 %vm691_vm3, %v4508_v30  ;;  %v530_v55 = vor.u32 %v529_v19, %v526_v17  ;;  %v1251_v4 = vrot.slane %v4282_v32, 5  ;;  %v548_v20 = vshrl.u32 %v4511_v61, 16 }
  0x4c   : > { %v4532_v2 = vcombine.low %v512_v58, %v522_v50  ;;  %v540_v18 = vor.u32 %v539_v37, %v535_v41  ;;  %v545_v22 = vrot.slane %v543_v40, 5  ;;  %4073 = vmatprep.subr.msk.bf16.mxu0 %vm740_vm0, %v4516_v45  ;;  %v1249_v17 = vsel %vm4402_vm7, %v3189_v12, %v1248_v59 }
  0x4d   : > { %v531_v44 = vrot.slane %v530_v55, 4  ;;  %v1250_v35 = vrot.slane %v1248_v59, 4  ;;  %v551_v32 = vshll.u32 %v4511_v61, 16  ;;  %v550_v19 = vrot.slane %v548_v20, 4 }
  0x4e   : > { %5321 = vst [vmem:[#allocation16_spill] sm:$0xff] %v4532_v2  ;;  %3523 = vmatprep.mubr.msk.bf16.mxu1 %vm691_vm3, %v4532_v2  ;;  %v541_v58 = vrot.slane %v540_v18, 4  ;;  %v557_v37 = vshll.u32 %v4530_v46, 16  ;;  %v561_v40 = vshrl.u32 %v4530_v46, 16  ;;  %v567_v59 = vshll.u32 %v4535_v3, 16 }
  0x4f   : > { %v536_v50 = vsel %vm4221_vm4, %v531_v44, %v535_v41  ;;  %v1252_v55 = vsel %vm4402_vm7, %v1250_v35, %v1251_v4  ;;  %v553_v12 = vrot.slane %v551_v32, 5  ;;  %v3190_v4 = vrot.slane %v4290_v48, 9 }
  0x50   : > { %v546_v2 = vsel %vm4221_vm4, %v541_v58, %v545_v22  ;;  %v4557_v18 = vcombine.low %v1249_v17, %v1252_v55  ;;  %v559_v20 = vrot.slane %v557_v37, 5  ;;  %v563_v0 = vrot.slane %v561_v40, 4  ;;  %v4573_v58 = vld [vmem:[%s4174_s28 + $0xa4] sm:$0x1] }
  0x51   : > { %v4562_v43 = vcombine.low %v536_v50, %v546_v2  ;;  %v554_v41 = vor.u32 %v553_v12, %v550_v19  ;;  %v569_v44 = vrot.slane %v567_v59, 5  ;;  %v1255_v32 = vrot.slane %v4298_v52, 5 }
  0x52   : > { %5322 = vst [vmem:[#allocation17_spill] sm:$0xff] %v4557_v18  ;;  %3678 = vmatmul.mubr.msk.bf16.gmra.mrb[4].mxu0 %vm691_vm3, %v4557_v18  ;;  %v564_v35 = vor.u32 %v563_v0, %v559_v20  ;;  %v1258_v22 = vrot.slane %v4310_v5, 5  ;;  %v572_v17 = vshrl.u32 %v4553_v60, 16  ;;  %v575_v19 = vshll.u32 %v4553_v60, 16 }
  0x53   : > { %5323 = vst [vmem:[#allocation18_spill] sm:$0xff] %v4562_v43  ;;  %3524 = vmatmul.mubr.msk.bf16.gmra.mrb[20].mxu1 %vm691_vm3, %v4562_v43  ;;  %v555_v2 = vrot.slane %v554_v41, 4  ;;  %v581_v37 = vshll.u32 %v4560_v7, 16  ;;  %v585_v0 = vshrl.u32 %v4560_v7, 16  ;;  %v1256_v5 = vsel %vm4402_vm7, %v3190_v4, %v1255_v32 }
  0x54   : > { %v565_v40 = vrot.slane %v564_v35, 4  ;;  %v1257_v50 = vrot.slane %v1255_v32, 4  ;;  %v574_v55 = vrot.slane %v572_v17, 4  ;;  %v577_v59 = vrot.slane %v575_v19, 5  ;;  %v4592_v32 = vld [vmem:[%s4174_s28 + $0xac] sm:$0xf] }
  0x55   : > { %v560_v12 = vsel %vm4221_vm4, %v555_v2, %v559_v20  ;;  %v583_v41 = vrot.slane %v581_v37, 5  ;;  %v587_v43 = vrot.slane %v585_v0, 4  ;;  %v591_v35 = vshll.u32 %v4573_v58, 16 }
  0x56   : > { %v570_v53 = vsel %vm4221_vm4, %v565_v40, %v569_v44  ;;  %v1259_v18 = vsel %vm4402_vm7, %v1257_v50, %v1258_v22  ;;  %v3191_v4 = vrot.slane %v4315_v13, 9  ;;  %v578_v2 = vor.u32 %v577_v59, %v574_v55 }
  0x57   : > { %v4594_v17 = vcombine.low %v560_v12, %v570_v53  ;;  %v4596_v20 = vcombine.low %v1256_v5, %v1259_v18  ;;  %v588_v19 = vor.u32 %v587_v43, %v583_v41  ;;  %v593_v37 = vrot.slane %v591_v35, 5  ;;  %v4606_v18 = vld [vmem:[%s4174_s28 + $0xb0] sm:$0x1] }
  0x58   : > { %v1262_v0 = vrot.slane %v4322_v24, 5  ;;  %v1265_v44 = vrot.slane %v4339_v8, 5  ;;  %v596_v22 = vshrl.u32 %v4583_v25, 16  ;;  %v579_v53 = vrot.slane %v578_v2, 4 }
  0x59   : > { %5324 = vst [vmem:[#allocation19_spill] sm:$0xff] %v4594_v17  ;;  %5325 = vst [vmem:[#allocation20_spill] sm:$0xff] %v4596_v20  ;;  %3527 = vmatprep.mubr.msk.bf16.mxu1 %vm691_vm3, %v4594_v17  ;;  %3681 = vmatprep.mubr.msk.bf16.mxu0 %vm691_vm3, %v4596_v20  ;;  %v589_v40 = vrot.slane %v588_v19, 4  ;;  %v599_v43 = vshll.u32 %v4583_v25, 16  ;;  %v605_v5 = vshll.u32 %v4592_v32, 16  ;;  %v609_v12 = vshrl.u32 %v4592_v32, 16 }
  0x5a   : > { %v1263_v8 = vsel %vm4402_vm7, %v3191_v4, %v1262_v0  ;;  %v1264_v50 = vrot.slane %v1262_v0, 4  ;;  %v598_v55 = vrot.slane %v596_v22, 4  ;;  %v584_v59 = vsel %vm4221_vm4, %v579_v53, %v583_v41  ;;  %v4618_v17 = vld [vmem:[%s4174_s28 + $0xb4] sm:$0xf]  ;;  %v4630_v53 = vld [vmem:[%s4174_s28 + $0xb8] sm:$0xf] }
  0x5b   : > { %v594_v35 = vsel %vm4221_vm4, %v589_v40, %v593_v37  ;;  %v601_v2 = vrot.slane %v599_v43, 5  ;;  %v607_v19 = vrot.slane %v605_v5, 5  ;;  %v611_v0 = vrot.slane %v609_v12, 4 }
  0x5c   : > { %v4620_v20 = vcombine.low %v584_v59, %v594_v35  ;;  %v1266_v4 = vsel %vm4402_vm7, %v1264_v50, %v1265_v44  ;;  %v615_v22 = vshll.u32 %v4606_v18, 16  ;;  %v3192_v41 = vrot.slane %v4344_v42, 9  ;;  %v4636_v44 = vld [vmem:[%s4174_s28 + $0xbc] sm:$0x1] }
  0x5d   : > { %v4625_v30 = vcombine.low %v1263_v8, %v1266_v4  ;;  %v602_v63 = vor.u32 %v601_v2, %v598_v55  ;;  %v1269_v37 = vrot.slane %v4349_v6, 5  ;;  %v612_v40 = vor.u32 %v611_v0, %v607_v19 }
  0x5e   : > { %5326 = vst [vmem:[#allocation21_spill] sm:$0xff] %v4620_v20  ;;  %3528 = vmatmul.mubr.msk.bf16.gmra.mrb[24].mxu1 %vm691_vm3, %v4620_v20  ;;  %v617_v43 = vrot.slane %v615_v22, 5  ;;  %v1272_v5 = vrot.slane %v4362_v11, 5  ;;  %v620_v50 = vshrl.u32 %v4618_v17, 16  ;;  %v623_v59 = vshll.u32 %v4618_v17, 16 }
  0x5f   : > { %5327 = vst [vmem:[#allocation22_spill] sm:$0xff] %v4625_v30  ;;  %3682 = vmatmul.mubr.msk.bf16.gmra.mrb[8].mxu0 %vm691_vm3, %v4625_v30  ;;  %v603_v8 = vrot.slane %v602_v63, 4  ;;  %v1270_v55 = vsel %vm4402_vm7, %v3192_v41, %v1269_v37  ;;  %v1271_v12 = vrot.slane %v1269_v37, 4  ;;  %v613_v35 = vrot.slane %v612_v40, 4 }
  0x60   : > { %v622_v2 = vrot.slane %v620_v50, 4  ;;  %v629_v4 = vshll.u32 %v4630_v53, 16  ;;  %v633_v11 = vshrl.u32 %v4630_v53, 16  ;;  %v625_v20 = vrot.slane %v623_v59, 5 }
  0x61   : > { %v608_v0 = vsel %vm4221_vm4, %v603_v8, %v607_v19  ;;  %v1273_v22 = vsel %vm4402_vm7, %v1271_v12, %v1272_v5  ;;  %v639_v63 = vshll.u32 %v4636_v44, 16  ;;  %v618_v41 = vsel %vm4221_vm4, %v613_v35, %v617_v43 }
  0x62   : > { %v4653_v37 = vcombine.low %v1270_v55, %v1273_v22  ;;  %v631_v40 = vrot.slane %v629_v4, 5  ;;  %v635_v50 = vrot.slane %v633_v11, 4  ;;  %v4655_v30 = vcombine.low %v608_v0, %v618_v41 }
  0x63   : > { %v626_v21 = vor.u32 %v625_v20, %v622_v2  ;;  %v641_v45 = vrot.slane %v639_v63, 5  ;;  %v3193_v42 = vrot.slane %v4366_v15, 9  ;;  %v1276_v5 = vrot.slane %v4371_v27, 5 }
  0x64   : > { %3685 = vmatprep.mubr.msk.bf16.mxu0 %vm691_vm3, %v4653_v37  ;;  %v636_v19 = vor.u32 %v635_v50, %v631_v40  ;;  %v1279_v8 = vrot.slane %v4385_v47, 5  ;;  %v3194_v43 = vrot.slane %v4393_v54, 9  ;;  %3531 = vmatprep.mubr.msk.bf16.mxu1 %vm691_vm3, %v4655_v30  ;;  %v3152_v20 = vcombine.low %v4188_v9, %v4191_v10 }
  0x65   : > { %v627_v55 = vrot.slane %v626_v21, 4  ;;  %v1283_v12 = vrot.slane %v4409_v36, 5  ;;  %v1286_v59 = vrot.slane %v4422_v51, 5  ;;  %v1277_v2 = vsel %vm4402_vm7, %v3193_v42, %v1276_v5 }
  0x66   : > { %v637_v35 = vrot.slane %v636_v19, 4  ;;  %v1278_v4 = vrot.slane %v1276_v5, 4  ;;  %v1290_v47 = vrot.slane %v4450_v31, 5  ;;  %v3195_v9 = vrot.slane %v4434_v56, 9 }
  0x67   : > { %v632_v11 = vsel %vm4221_vm4, %v627_v55, %v631_v40  ;;  %v1284_v21 = vsel %vm4402_vm7, %v3194_v43, %v1283_v12  ;;  %v1285_v0 = vrot.slane %v1283_v12, 4  ;;  %v1293_v42 = vrot.slane %v4455_v49, 5 }
  0x68   : > { %v642_v10 = vsel %vm4221_vm4, %v637_v35, %v641_v45  ;;  %v1280_v51 = vsel %vm4402_vm7, %v1278_v4, %v1279_v8  ;;  %v1292_v22 = vrot.slane %v1290_v47, 4  ;;  %v3196_v19 = vrot.slane %v4481_v29, 9 }
  0x69   : > { %v4682_v63 = vcombine.low %v632_v11, %v642_v10  ;;  %v4684_v41 = vcombine.low %v1277_v2, %v1280_v51  ;;  %v1287_v40 = vsel %vm4402_vm7, %v1285_v0, %v1286_v59  ;;  %v1297_v5 = vrot.slane %v4487_v16, 5 }
  0x6a   : > { %v4688_v50 = vcombine.low %v1284_v21, %v1287_v40  ;;  %v1300_v49 = vrot.slane %v4497_v1, 5  ;;  %v1291_v45 = vsel %vm4402_vm7, %v3195_v9, %v1290_v47  ;;  %v1294_v8 = vsel %vm4402_vm7, %v1292_v22, %v1293_v42 }
  0x6b   : > { %3532 = vmatmul.mubr.msk.bf16.gmra.mrb[28].mxu1 %vm691_vm3, %v4682_v63  ;;  %3686 = vmatmul.mubr.msk.bf16.gmra.mrb[12].mxu0 %vm691_vm3, %v4684_v41  ;;  %v1299_v43 = vrot.slane %v1297_v5, 4  ;;  %v1304_v55 = vrot.slane %v4530_v46, 5  ;;  %v1311_v12 = vrot.slane %v4560_v7, 5  ;;  %v1298_v59 = vsel %vm4402_vm7, %v3196_v19, %v1297_v5 }
  0x6c   : > { %3537 = vmatprep.mubr.msk.bf16.mxu1 %vm691_vm3, %v3152_v20  ;;  %3689 = vmatprep.mubr.msk.bf16.mxu0 %vm691_vm3, %v4688_v50  ;;  %v4710_v20 = vcombine.low %v1291_v45, %v1294_v8  ;;  %v3197_v35 = vrot.slane %v4511_v61, 9  ;;  %v1307_v4 = vrot.slane %v4535_v3, 5  ;;  %v4716_v47 = vcombine.low %v4217_v33, %v4230_v39  ;;  %v4728_v3 = vld [vmem:[%s5268_s1 + $0xc] sm:$0xf] }
  0x6d   : > { %v1301_v1 = vsel %vm4402_vm7, %v1299_v43, %v1300_v49  ;;  %v1306_v2 = vrot.slane %v1304_v55, 4  ;;  %v3198_v11 = vrot.slane %v4553_v60, 9  ;;  %v1427_v21 = vsel %vm740_vm0, %v4270_v23, 0 }
  0x6e   : > { %v4721_v0 = vcombine.low %v1298_v59, %v1301_v1  ;;  %v1313_v9 = vrot.slane %v1311_v12, 4  ;;  %v1314_v10 = vrot.slane %v4573_v58, 5  ;;  %v1318_v51 = vrot.slane %v4592_v32, 5 }
  0x6f   : > { %v1305_v33 = vsel %vm4402_vm7, %v3197_v35, %v1304_v55  ;;  %v1308_v39 = vsel %vm4402_vm7, %v1306_v2, %v1307_v4  ;;  %v4742_v23 = vcombine.low %v4244_v57, %v4249_v62  ;;  %v1312_v58 = vsel %vm4402_vm7, %v3198_v11, %v1311_v12 }
  0x70   : > { %v4748_v22 = vcombine.low %v4366_v15, %v4371_v27  ;;  %v1315_v42 = vsel %vm4402_vm7, %v1313_v9, %v1314_v10  ;;  %v3199_v40 = vrot.slane %v4583_v25, 9  ;;  %v1325_v19 = vrot.slane %v4630_v53, 5 }
  0x71   : > { %v4758_v57 = vcombine.low %v4393_v54, %v4409_v36  ;;  %v4762_v62 = vcombine.low %v1305_v33, %v1308_v39  ;;  %v1320_v15 = vrot.slane %v1318_v51, 4  ;;  %v1321_v27 = vrot.slane %v4606_v18, 5  ;;  %v249_v18 = vld [vmem:[%s4174_s28 + $0xc8] sm:$0x1] }
  0x72   : > { %v4767_v5 = vcombine.low %v4434_v56, %v4450_v31  ;;  %v4771_v49 = vcombine.low %v4481_v29, %v4487_v16  ;;  %v4775_v54 = vcombine.low %v4511_v61, %v4530_v46  ;;  %v4779_v36 = vcombine.low %v4553_v60, %v4560_v7  ;;  %v4798_v61 = vld [vmem:[%s4174_s28 + $0xc4] sm:$0xf] }
  0x73   : > { %3538 = vmatmul.mubr.msk.bf16.vlgmr.msra.gmra.mrb[0].mxu1 %vm691_vm3, %v4227_v38  ;;  %3690 = vmatmul.mubr.msk.bf16.gmra.mrb[16].mxu0 %vm691_vm3, %v4710_v20  ;;  %v4783_v45 = vcombine.low %v4583_v25, %v4592_v32  ;;  %v4787_v56 = vcombine.low %v4263_v14, %v4275_v28  ;;  %v4789_v31 = vcombine.low %v1312_v58, %v1315_v42  ;;  %v3200_v16 = vrot.slane %v4618_v17, 9  ;;  %v5328_v42 = vld [vmem:[#allocation5_spill] sm:$0xff] }
  0x74   : > { %3570 = vmatpush3.bf16.msra.mxu1 %v1427_v21  ;;  %3541 = vmatprep.mubr.msk.bf16.mxu1 %vm691_vm3, %v4716_v47  ;;  %v4793_v29 = vcombine.low %v4618_v17, %v4630_v53  ;;  %v1327_v7 = vrot.slane %v1325_v19, 4  ;;  %v1328_v60 = vrot.slane %v4636_v44, 5  ;;  %v1319_v14 = vsel %vm4402_vm7, %v3199_v40, %v1318_v51  ;;  %v4818_v17 = vld [vmem:[%s4174_s28 + $0xc0] sm:$0xf] }
  0x75   : > { %3693 = vmatprep.mubr.msk.bf16.mxu0 %vm691_vm3, %v4721_v0  ;;  %4068 = vmatprep.subr.msk.bf16.mxu1 %vm740_vm0, %v4728_v3  ;;  %v1322_v28 = vsel %vm4402_vm7, %v1320_v15, %v1321_v27  ;;  %v2061_v25 = vrot.slane %v4798_v61, 5  ;;  %v1326_v46 = vsel %vm4402_vm7, %v3200_v16, %v1325_v19  ;;  %v4823_v53 = vcombine.low %v4290_v48, %v4298_v52 }
  0x76   : > { %v1329_v32 = vsel %vm4402_vm7, %v1327_v7, %v1328_v60  ;;  %v4825_v44 = vcombine.low %v1319_v14, %v1322_v28  ;;  %v4829_v8 = vcombine.low %v4315_v13, %v4322_v24  ;;  %v1831_v43 = vshrl.u32 %v4818_v17, 16  ;;  %v3324_v60 = vld [vmem:[%s5268_s1 + $0x20] sm:$0xf]  ;;  %v4102_v14 = vld [vmem:[%s4174_s28 + $0x4] sm:$0xf] }
  0x77   : > { %v1834_v55 = vshll.u32 %v4818_v17, 16  ;;  %v1840_v12 = vshll.u32 %v4798_v61, 16  ;;  %v1844_v59 = vshrl.u32 %v4798_v61, 16  ;;  %v4835_v1 = vcombine.low %v1326_v46, %v1329_v32  ;;  %v4104_v32 = vld [vmem:[%s4174_s28] sm:$0xf] }
  0x78   : > { %v3270_v35 = vrot.slane %v4818_v17, 9  ;;  %v2063_v48 = vrot.slane %v2061_v25, 4  ;;  %v2064_v52 = vrot.slane %v249_v18, 5  ;;  %v1833_v2 = vrot.slane %v1831_v43, 4 }
  0x79   : > { %v1836_v4 = vrot.slane %v1834_v55, 5  ;;  %v1842_v11 = vrot.slane %v1840_v12, 5  ;;  %v1846_v21 = vrot.slane %v1844_v59, 4  ;;  %v1850_v9 = vshll.u32 %v249_v18, 16 }
  0x7a   : > { %v2062_v10 = vsel %vm4402_vm7, %v3270_v35, %v2061_v25  ;;  %v2065_v51 = vsel %vm4402_vm7, %v2063_v48, %v2064_v52  ;;  %v4852_v40 = vcombine.low %v5328_v42, %v4349_v6  ;;  %v5329_v6 = vld [vmem:[#allocation15_spill] sm:$0xff]  ;;  %v1220_v28 = vrot.slane %v4102_v14, 5  ;;  %v5330_v48 = vld [vmem:[#allocation10_spill] sm:$0xff]  ;;  %v5331_v52 = vld [vmem:[#allocation12_spill] sm:$0xff] }
  0x7b   : > { %3542 = vmatmul.mubr.msk.bf16.gmra.mrb[4].mxu1 %vm691_vm3, %v4742_v23  ;;  %3694 = vmatmul.mubr.msk.bf16.gmra.mrb[20].mxu0 %vm691_vm3, %v4762_v62  ;;  %v1837_v13 = vor.u32 %v1836_v4, %v1833_v2  ;;  %v1847_v24 = vor.u32 %v1846_v21, %v1842_v11  ;;  %v1852_v58 = vrot.slane %v1850_v9, 5  ;;  %v4854_v19 = vcombine.low %v2062_v10, %v2065_v51  ;;  %v4103_v25 = vld [vmem:[%s4174_s28 + $0x8] sm:$0x1]  ;;  %v4105_v2 = vld [vmem:[%s5268_s1 + $0x10] sm:$0xf]  ;;  %v5333_v4 = vld [vmem:[#allocation17_spill] sm:$0xff] }
  0x7c   : > { %3545 = vmatprep.mubr.msk.bf16.mxu1 %vm691_vm3, %v4787_v56  ;;  %3697 = vmatprep.mubr.msk.bf16.mxu0 %vm691_vm3, %v4789_v31  ;;  %v2507_v7 = vsel %vm740_vm0, %v5329_v6, 0  ;;  %v1223_v46 = vrot.slane %v4103_v25, 5  ;;  %v3185_v18 = vrot.slane %v4104_v32, 9  ;;  %v1222_v43 = vrot.slane %v1220_v28, 4  ;;  %v5334_v21 = vld [vmem:[#allocation20_spill] sm:$0xff]  ;;  %v5341_v42 = vld [vmem:[#allocation9_spill] sm:$0xff] }
  0x7d   : > { %v1838_v33 = vrot.slane %v1837_v13, 4  ;;  %v1848_v39 = vrot.slane %v1847_v24, 4  ;;  %v1633_v35 = vsel %vm740_vm0, %v4728_v3, 0  ;;  %v5332_v3 = vld [vmem:[#allocation14_spill] sm:$0xff]  ;;  %v4949_v24 = vld [vmem:[%s4174_s28 + $0xcc] sm:$0xf] }
  0x7e   : > { %v1221_v55 = vsel %vm4402_vm7, %v3185_v18, %v1220_v28  ;;  %v1224_v12 = vsel %vm4402_vm7, %v1222_v43, %v1223_v46  ;;  %v5335_v13 = vld [vmem:[#allocation22_spill] sm:$0xff]  ;;  %v4952_v9 = vld [vmem:[%s4174_s28 + $0xd0] sm:$0xf]  ;;  %v2719_v10 = vsel %vm740_vm0, %v3324_v60, 0  ;;  %v2480_v14 = vshll.u32 %v4949_v24, 16  ;;  %v5347_v46 = vld [vmem:[#allocation19_spill] sm:$0xff] }
  0x7f   : > { %v1843_v15 = vsel %vm4221_vm4, %v1838_v33, %v1842_v11  ;;  %v1853_v27 = vsel %vm4221_vm4, %v1848_v39, %v1852_v58  ;;  %v3201_v59 = vcombine.low %v1221_v55, %v1224_v12  ;;  %v4938_v11 = vcombine.low %v4818_v17, %v4798_v61  ;;  %v5336_v17 = vld [vmem:[#allocation3_spill] sm:$0xff]  ;;  %v5337_v51 = vld [vmem:[#allocation4_spill] sm:$0xff]  ;;  %v5338_v33 = vld [vmem:[#allocation6_spill] sm:$0xff] }
  0x80   : > { %v4860_v16 = vcombine.low %v1843_v15, %v1853_v27  ;;  %v3289_v61 = vcombine.low %v4949_v24, %v4952_v9  ;;  %v5339_v39 = vld [vmem:[#allocation7_spill] sm:$0xff]  ;;  %v5340_v58 = vld [vmem:[#allocation8_spill] sm:$0xff]  ;;  %v5343_v27 = vld [vmem:[#allocation13_spill] sm:$0xff]  ;;  %v2490_v28 = vshrl.u32 %v4952_v9, 16  ;;  %v2482_v32 = vrot.slane %v2480_v14, 5 }
  0x81   : > { %v5342_v15 = vld [vmem:[#allocation11_spill] sm:$0xff]  ;;  %v5344_v6 = vld [vmem:[#allocation16_spill] sm:$0xff]  ;;  %v5346_v25 = vld [vmem:[#allocation2_spill] sm:$0xff]  ;;  %v2707_v34 = vrot.slane %v4952_v9, 5 }
  0x82   : > { %v2492_v43 = vrot.slane %v2490_v28, 4  ;;  %v252_v55 = vld [vmem:[%s4174_s28 + $0xd4] sm:$0x1]  ;;  %v5348_v12 = vld [vmem:[#allocation21_spill] sm:$0xff] }
  0x83   : > { %3546 = vmatmul.mubr.msk.bf16.gmra.mrb[8].mxu1 %vm691_vm3, %v4823_v53  ;;  %3698 = vmatmul.mubr.msk.bf16.gmra.mrb[24].mxu0 %vm691_vm3, %v4825_v44 }
  0x84   : > { %3549 = vmatprep.mubr.msk.bf16.mxu1 %vm691_vm3, %v4829_v8  ;;  %3701 = vmatprep.mubr.msk.bf16.mxu0 %vm691_vm3, %v4835_v1 }
  0x8b   : > { %3550 = vmatmul.mubr.msk.bf16.gmra.mrb[12].mxu1 %vm691_vm3, %v4852_v40  ;;  %3702 = vmatmul.mubr.msk.bf16.gmra.mrb[28].mxu0 %vm691_vm3, %v4854_v19 }
  0x8c   : > { %3553 = vmatprep.mubr.msk.bf16.mxu1 %vm691_vm3, %v4748_v22  ;;  %3707 = vmatprep.mubr.msk.bf16.mxu0 %vm691_vm3, %v4716_v47 }
  0x93   : > { %3554 = vmatmul.mubr.msk.bf16.gmra.mrb[16].mxu1 %vm691_vm3, %v4758_v57  ;;  %3708 = vmatmul.mubr.msk.bf16.vlgmr.msra.gmra.mrb[0].mxu0 %vm691_vm3, %v4742_v23 }
  0x94   : > { %3740 = vmatpush3.bf16.msra.mxu0 %v2507_v7  ;;  %3557 = vmatprep.mubr.msk.bf16.mxu1 %vm691_vm3, %v4767_v5  ;;  %v5345_v7 = vld [vmem:[#allocation18_spill] sm:$0xff] }
  0x95   : > { %3711 = vmatprep.mubr.msk.bf16.mxu0 %vm691_vm3, %v4787_v56  ;;  %4074 = vmatprep.subr.msk.bf16.mxu0 %vm740_vm0, %v3324_v60  ;;  %v2477_v60 = vshrl.u32 %v4949_v24, 16 }
  0x9b   : > { %3558 = vmatmul.mubr.msk.bf16.gmra.mrb[20].mxu1 %vm691_vm3, %v4771_v49  ;;  %3712 = vmatmul.mubr.msk.bf16.gmra.mrb[4].mxu0 %vm691_vm3, %v4823_v53 }
  0x9c   : > { %3561 = vmatprep.mubr.msk.bf16.mxu1 %vm691_vm3, %v4775_v54  ;;  %3715 = vmatprep.mubr.msk.bf16.mxu0 %vm691_vm3, %v4829_v8 }
  0xa3   : > { %3562 = vmatmul.mubr.msk.bf16.gmra.mrb[24].mxu1 %vm691_vm3, %v4779_v36  ;;  %3716 = vmatmul.mubr.msk.bf16.gmra.mrb[8].mxu0 %vm691_vm3, %v4852_v40 }
  0xa4   : > { %3565 = vmatprep.mubr.msk.bf16.mxu1 %vm691_vm3, %v4783_v45  ;;  %3719 = vmatprep.mubr.msk.bf16.mxu0 %vm691_vm3, %v4748_v22 }
  0xab   : > { %3566 = vmatmul.mubr.msk.bf16.gmra.mrb[28].mxu1 %vm691_vm3, %v4793_v29  ;;  %3720 = vmatmul.mubr.msk.bf16.gmra.mrb[12].mxu0 %vm691_vm3, %v4758_v57 }
  0xac   : > { %3571 = vmatprep.mubr.msk.bf16.mxu1 %vm691_vm3, %v3201_v59  ;;  %3723 = vmatprep.mubr.msk.bf16.mxu0 %vm691_vm3, %v4767_v5 }
  0xb3   : > { %3572 = vmatmul.mubr.msk.bf16.vlgmr.msra.gmra.mrb[0].mxu1 %vm691_vm3, %v5330_v48  ;;  %3724 = vmatmul.mubr.msk.bf16.gmra.mrb[16].mxu0 %vm691_vm3, %v4771_v49 }
  0xb4   : > { %3604 = vmatpush3.bf16.msra.mxu1 %v1633_v35  ;;  %3575 = vmatprep.mubr.msk.bf16.mxu1 %vm691_vm3, %v5331_v52  ;;  %v2496_v35 = vshll.u32 %v252_v55, 16 }
  0xb5   : > { %3727 = vmatprep.mubr.msk.bf16.mxu0 %vm691_vm3, %v4775_v54  ;;  %4070 = vmatprep.subr.msk.bf16.mxu1 %vm740_vm0, %v4105_v2 }
  0xbb   : > { %3576 = vmatmul.mubr.msk.bf16.gmra.mrb[4].mxu1 %vm691_vm3, %v5332_v3  ;;  %3728 = vmatmul.mubr.msk.bf16.gmra.mrb[20].mxu0 %vm691_vm3, %v4779_v36 }
  0xbc   : > { %3579 = vmatprep.mubr.msk.bf16.mxu1 %vm691_vm3, %v5333_v4  ;;  %3731 = vmatprep.mubr.msk.bf16.mxu0 %vm691_vm3, %v4783_v45 }
  0xc3   : > { %3580 = vmatmul.mubr.msk.bf16.gmra.mrb[8].mxu1 %vm691_vm3, %v5334_v21  ;;  %3732 = vmatmul.mubr.msk.bf16.gmra.mrb[24].mxu0 %vm691_vm3, %v4793_v29 }
  0xc4   : > { %3583 = vmatprep.mubr.msk.bf16.mxu1 %vm691_vm3, %v5335_v13  ;;  %3735 = vmatprep.mubr.msk.bf16.mxu0 %vm691_vm3, %v4938_v11 }
  0xcb   : > { %3584 = vmatmul.mubr.msk.bf16.gmra.mrb[12].mxu1 %vm691_vm3, %v4653_v37  ;;  %3736 = vmatmul.mubr.msk.bf16.gmra.mrb[28].mxu0 %vm691_vm3, %v3289_v61  ;;  %v2498_v61 = vrot.slane %v2496_v35, 5 }
  0xcc   : > { %3587 = vmatprep.mubr.msk.bf16.mxu1 %vm691_vm3, %v4684_v41  ;;  %3741 = vmatprep.mubr.msk.bf16.mxu0 %vm691_vm3, %v5336_v17 }
  0xd3   : > { %3588 = vmatmul.mubr.msk.bf16.gmra.mrb[16].mxu1 %vm691_vm3, %v4688_v50  ;;  %3742 = vmatmul.mubr.msk.bf16.vlgmr.msra.gmra.mrb[0].mxu0 %vm691_vm3, %v5337_v51 }
  0xd4   : > { %3774 = vmatpush3.bf16.msra.mxu0 %v2719_v10  ;;  %3591 = vmatprep.mubr.msk.bf16.mxu1 %vm691_vm3, %v4710_v20 }
  0xd5   : > { %3745 = vmatprep.mubr.msk.bf16.mxu0 %vm691_vm3, %v5338_v33 }
  0xdb   : > { %3592 = vmatmul.mubr.msk.bf16.gmra.mrb[20].mxu1 %vm691_vm3, %v4721_v0  ;;  %3746 = vmatmul.mubr.msk.bf16.gmra.mrb[4].mxu0 %vm691_vm3, %v5339_v39 }
  0xdc   : > { %3595 = vmatprep.mubr.msk.bf16.mxu1 %vm691_vm3, %v4762_v62  ;;  %3749 = vmatprep.mubr.msk.bf16.mxu0 %vm691_vm3, %v5340_v58 }
  0xe3   : > { %3596 = vmatmul.mubr.msk.bf16.gmra.mrb[24].mxu1 %vm691_vm3, %v4789_v31  ;;  %3750 = vmatmul.mubr.msk.bf16.gmra.mrb[8].mxu0 %vm691_vm3, %v5341_v42 }
  0xe4   : > { %3599 = vmatprep.mubr.msk.bf16.mxu1 %vm691_vm3, %v4825_v44  ;;  %3753 = vmatprep.mubr.msk.bf16.mxu0 %vm691_vm3, %v5342_v15 }
  0xeb   : > { %3600 = vmatmul.mubr.msk.bf16.gmra.mrb[28].mxu1 %vm691_vm3, %v4835_v1  ;;  %3754 = vmatmul.mubr.msk.bf16.gmra.mrb[12].mxu0 %vm691_vm3, %v5343_v27 }
  0xec   : > { %3605 = vmatprep.mubr.msk.bf16.mxu1 %vm691_vm3, %v4227_v38  ;;  %3757 = vmatprep.mubr.msk.bf16.mxu0 %vm691_vm3, %v5344_v6  ;;  %v2486_v38 = vshll.u32 %v4952_v9, 16 }
  0xee   : > { %v2488_v18 = vrot.slane %v2486_v38, 5 }
  0xf0   : > { %v2493_v59 = vor.u32 %v2492_v43, %v2488_v18 }
  0xf2   : > { %v2494_v2 = vrot.slane %v2493_v59, 4 }
  0xf3   : > { %3606 = vmatmul.mubr.msk.bf16.vlgmr.msra.gmra.mrb[0].mxu1 %vm691_vm3, %v4716_v47  ;;  %3758 = vmatmul.mubr.msk.bf16.gmra.mrb[16].mxu0 %vm691_vm3, %v5345_v7  ;;  %v2479_v47 = vrot.slane %v2477_v60, 4 }
  0xf4   : > { %3808 = vmatpush3.bf16.msra.mxu1 %v5346_v25  ;;  %3609 = vmatprep.mubr.msk.bf16.mxu1 %vm691_vm3, %v4742_v23 }
  0xf5   : > { %3761 = vmatprep.mubr.msk.bf16.mxu0 %vm691_vm3, %v5347_v46  ;;  %v2483_v23 = vor.u32 %v2482_v32, %v2479_v47 }
  0xf7   : > { %v2484_v48 = vrot.slane %v2483_v23, 4 }
  0xfb   : > { %3610 = vmatmul.mubr.msk.bf16.gmra.mrb[4].mxu1 %vm691_vm3, %v4787_v56  ;;  %3762 = vmatmul.mubr.msk.bf16.gmra.mrb[20].mxu0 %vm691_vm3, %v5348_v12  ;;  %v2489_v56 = vsel %vm4221_vm4, %v2484_v48, %v2488_v18 }
  0xfc   : > { %3613 = vmatprep.mubr.msk.bf16.mxu1 %vm691_vm3, %v4823_v53  ;;  %3765 = vmatprep.mubr.msk.bf16.mxu0 %vm691_vm3, %v4655_v30  ;;  %v2499_v53 = vsel %vm4221_vm4, %v2494_v2, %v2498_v61 }
  0xfd   : > { %v3307_v17 = vcombine.low %v2489_v56, %v2499_v53 }
 0x103   : > { %3614 = vmatmul.mubr.msk.bf16.gmra.mrb[8].mxu1 %vm691_vm3, %v4829_v8  ;;  %3766 = vmatmul.mubr.msk.bf16.gmra.mrb[24].mxu0 %vm691_vm3, %v4682_v63 }
 0x104   : > { %3617 = vmatprep.mubr.msk.bf16.mxu1 %vm691_vm3, %v4852_v40  ;;  %3769 = vmatprep.mubr.msk.bf16.mxu0 %vm691_vm3, %v4860_v16 }
 0x10b   : > { %3618 = vmatmul.mubr.msk.bf16.gmra.mrb[12].mxu1 %vm691_vm3, %v4748_v22  ;;  %3770 = vmatmul.mubr.msk.bf16.gmra.mrb[28].mxu0 %vm691_vm3, %v3307_v17 }
 0x10c   : > { %3621 = vmatprep.mubr.msk.bf16.mxu1 %vm691_vm3, %v4758_v57  ;;  %3775 = vmatprep.mubr.msk.bf16.mxu0 %vm691_vm3, %v5331_v52 }
 0x113   : > { %3622 = vmatmul.mubr.msk.bf16.gmra.mrb[16].mxu1 %vm691_vm3, %v4767_v5  ;;  %3776 = vmatmul.mubr.msk.bf16.vlgmr.msra.gmra.mrb[0].mxu0 %vm691_vm3, %v5332_v3 }
 0x114   : > { %3625 = vmatprep.mubr.msk.bf16.mxu1 %vm691_vm3, %v4771_v49  ;;  %3779 = vmatprep.mubr.msk.bf16.mxu0 %vm691_vm3, %v5333_v4  ;;  %v5122_v4 = vld [vmem:[%s5270_s3] ss:$0 sm:$0xff] }
 0x11b   : > { %3626 = vmatmul.mubr.msk.bf16.gmra.mrb[20].mxu1 %vm691_vm3, %v4775_v54  ;;  %3780 = vmatmul.mubr.msk.bf16.gmra.mrb[4].mxu0 %vm691_vm3, %v5334_v21 }
 0x11c   : > { %3629 = vmatprep.mubr.msk.bf16.mxu1 %vm691_vm3, %v4779_v36  ;;  %3783 = vmatprep.mubr.msk.bf16.mxu0 %vm691_vm3, %v5335_v13 }
 0x123   : > { %3630 = vmatmul.mubr.msk.bf16.gmra.mrb[24].mxu1 %vm691_vm3, %v4783_v45  ;;  %3784 = vmatmul.mubr.msk.bf16.gmra.mrb[8].mxu0 %vm691_vm3, %v4653_v37  ;;  %v3325_v37 = vrot.slane %v4949_v24, 9 }
 0x124   : > { %3633 = vmatprep.mubr.msk.bf16.mxu1 %vm691_vm3, %v4793_v29  ;;  %3787 = vmatprep.mubr.msk.bf16.mxu0 %vm691_vm3, %v4684_v41  ;;  %v2709_v41 = vrot.slane %v2707_v34, 4 }
 0x12b   : > { %3634 = vmatmul.mubr.msk.bf16.gmra.mrb[28].mxu1 %vm691_vm3, %v4938_v11  ;;  %3788 = vmatmul.mubr.msk.bf16.gmra.mrb[12].mxu0 %vm691_vm3, %v4688_v50  ;;  %v2710_v50 = vrot.slane %v252_v55, 5 }
 0x12c   : > { %3655 = vmatprep.mubr.msk.bf16.mxu1 %vm691_vm3, %v5343_v27  ;;  %3791 = vmatprep.mubr.msk.bf16.mxu0 %vm691_vm3, %v4710_v20  ;;  %v2708_v20 = vsel %vm4402_vm7, %v3325_v37, %v2707_v34 }
 0x133   : > { %3656 = vmatmul.mubr.msk.bf16.vlgmr.msra.gmra.mrb[16].mxu1 %vm691_vm3, %v5344_v6  ;;  %3792 = vmatmul.mubr.msk.bf16.gmra.mrb[16].mxu0 %vm691_vm3, %v4721_v0  ;;  %v2711_v0 = vsel %vm4402_vm7, %v2709_v41, %v2710_v50 }
 0x134   : > { %3659 = vmatprep.mubr.msk.bf16.mxu1 %vm691_vm3, %v5345_v7  ;;  %3795 = vmatprep.mubr.msk.bf16.mxu0 %vm691_vm3, %v4762_v62  ;;  %v3326_v22 = vcombine.low %v2708_v20, %v2711_v0 }
 0x13b   : > { %3660 = vmatmul.mubr.msk.bf16.gmra.mrb[20].mxu1 %vm691_vm3, %v5347_v46  ;;  %3796 = vmatmul.mubr.msk.bf16.gmra.mrb[20].mxu0 %vm691_vm3, %v4789_v31 }
 0x13c   : > { %3663 = vmatprep.mubr.msk.bf16.mxu1 %vm691_vm3, %v5348_v12  ;;  %3799 = vmatprep.mubr.msk.bf16.mxu0 %vm691_vm3, %v4825_v44 }
 0x143   : > { %3664 = vmatmul.mubr.msk.bf16.gmra.mrb[24].mxu1 %vm691_vm3, %v4655_v30  ;;  %3800 = vmatmul.mubr.msk.bf16.gmra.mrb[24].mxu0 %vm691_vm3, %v4835_v1 }
 0x144   : > { %3667 = vmatprep.mubr.msk.bf16.mxu1 %vm691_vm3, %v4682_v63  ;;  %3803 = vmatprep.mubr.msk.bf16.mxu0 %vm691_vm3, %v4854_v19 }
 0x14b   : > { %3668 = vmatmul.mubr.msk.bf16.gmra.mrb[28].mxu1 %vm691_vm3, %v4860_v16  ;;  %3804 = vmatmul.mubr.msk.bf16.gmra.mrb[28].mxu0 %vm691_vm3, %v3326_v22  ;;  %v5117_v16 = vld [vmem:[%s5269_s2] ss:$0 sm:$0xff] }
 0x1c6   : > { %v3607_v30 = vpop.f32.mrb[0].mxu1 }
 0x1c7   : > { %v1669_v57 = vpop.f32.mrb[1].mxu1 }
 0x1c8   : > { %v3608_v62 = vpop.f32.mrb[2].mxu1 }
 0x1c9   : > { %v1672_v5 = vpop.f32.mrb[3].mxu1 }
 0x1ce   : > { %v3611_v63 = vpop.f32.mrb[4].mxu1 }
 0x1cf   : > { %v1685_v49 = vpop.f32.mrb[5].mxu1 }
 0x1d0   : > { %v3612_v54 = vpop.f32.mrb[6].mxu1 }
 0x1d1   : > { %v1688_v36 = vpop.f32.mrb[7].mxu1 }
 0x1d6   : > { %v3615_v45 = vpop.f32.mrb[8].mxu1 }
 0x1d7   : > { %v1701_v31 = vpop.f32.mrb[9].mxu1 }
 0x1d8   : > { %v5102_v29 = vpop.f32.mrb[10].mxu1 }
 0x1d9   : > { %v5104_v26 = vpop.f32.mrb[11].mxu1 }
 0x1de   : > { %v5106_v44 = vpop.f32.mrb[12].mxu1 }
 0x1df   : > { %v5108_v8 = vpop.f32.mrb[13].mxu1 }
 0x1e0   : > { %v5110_v1 = vpop.f32.mrb[14].mxu1 }
 0x1e1   : > { %v5112_v40 = vpop.f32.mrb[15].mxu1 }
 0x1e6   : > { %v3777_v19 = vpop.f32.mrb[0].mxu0 }
 0x1e7   : > { %v3809_v52 = vadd.f32 %v3777_v19, %v3607_v30  ;;  %v2755_v3 = vpop.f32.mrb[1].mxu0 }
 0x1e8   : > { %v3810_v11 = vadd.f32 %v2755_v3, %v1669_v57  ;;  %v3778_v21 = vpop.f32.mrb[2].mxu0 }
 0x1e9   : > { %v2924_v13 = vmul.f32 %v3809_v52, %v5117_v16  ;;  %v3811_v24 = vadd.f32 %v3778_v21, %v3608_v62  ;;  %v2758_v9 = vpop.f32.mrb[3].mxu0 }
 0x1ea   : > { %v2922_v10 = vmul.f32 %v3810_v11, %v5117_v16  ;;  %v3812_v51 = vadd.f32 %v2758_v9, %v1672_v5 }
 0x1eb   : > { %v2962_v33 = vadd.f32 %v5122_v4, %v2924_v13  ;;  %v2925_v39 = vmul.f32 %v3811_v24, %v5117_v16 }
 0x1ec   : > { %v2960_v58 = vadd.f32 %v5122_v4, %v2922_v10  ;;  %v2923_v42 = vmul.f32 %v3812_v51, %v5117_v16 }
 0x1ed   : > { %v2994_v15 = vmax.f32 %v2962_v33, 0.0  ;;  %v2963_v27 = vadd.f32 %v5122_v4, %v2925_v39 }
 0x1ee   : > { %v2992_v6 = vmax.f32 %v2960_v58, 0.0  ;;  %v2961_v7 = vadd.f32 %v5122_v4, %v2923_v42  ;;  %v3781_v60 = vpop.f32.mrb[4].mxu0 }
 0x1ef   : > { %3026 = vst.msk [vmem:[%s5132_s24 + $0x10] sm:$0xff] %vm691_vm3, %v2994_v15  ;;  %v2995_v14 = vmax.f32 %v2963_v27, 0.0  ;;  %v3813_v28 = vadd.f32 %v3781_v60, %v3611_v63  ;;  %v2771_v25 = vpop.f32.mrb[5].mxu0 }
 0x1f0   : > { %3024 = vst.msk [vmem:[%s5132_s24] sm:$0xff] %vm691_vm3, %v2992_v6  ;;  %v2993_v38 = vmax.f32 %v2961_v7, 0.0  ;;  %v3814_v46 = vadd.f32 %v2771_v25, %v1685_v49  ;;  %v3782_v47 = vpop.f32.mrb[6].mxu0 }
 0x1f1   : > { %3027 = vst.msk [vmem:[%s5132_s24 + $0x18] sm:$0xff] %vm691_vm3, %v2995_v14  ;;  %v2928_v32 = vmul.f32 %v3813_v28, %v5117_v16  ;;  %v3815_v18 = vadd.f32 %v3782_v47, %v3612_v54  ;;  %v2774_v43 = vpop.f32.mrb[7].mxu0 }
 0x1f2   : > { %3025 = vst.msk [vmem:[%s5132_s24 + $0x8] sm:$0xff] %vm691_vm3, %v2993_v38  ;;  %v2926_v55 = vmul.f32 %v3814_v46, %v5117_v16  ;;  %v3816_v12 = vadd.f32 %v2774_v43, %v1688_v36 }
 0x1f3   : > { %v2966_v23 = vadd.f32 %v5122_v4, %v2928_v32  ;;  %v2929_v59 = vmul.f32 %v3815_v18, %v5117_v16 }
 0x1f4   : > { %v2964_v35 = vadd.f32 %v5122_v4, %v2926_v55  ;;  %v2927_v48 = vmul.f32 %v3816_v12, %v5117_v16 }
 0x1f5   : > { %v2998_v2 = vmax.f32 %v2966_v23, 0.0  ;;  %v2967_v61 = vadd.f32 %v5122_v4, %v2929_v59 }
 0x1f6   : > { %v2996_v56 = vmax.f32 %v2964_v35, 0.0  ;;  %v2965_v53 = vadd.f32 %v5122_v4, %v2927_v48  ;;  %v3785_v17 = vpop.f32.mrb[8].mxu0 }
 0x1f7   : > { %3030 = vst.msk [vmem:[%s5132_s24 + $0x30] sm:$0xff] %vm691_vm3, %v2998_v2  ;;  %v2999_v34 = vmax.f32 %v2967_v61, 0.0  ;;  %v3817_v37 = vadd.f32 %v3785_v17, %v3615_v45  ;;  %v2787_v41 = vpop.f32.mrb[9].mxu0 }
 0x1f8   : > { %3028 = vst.msk [vmem:[%s5132_s24 + $0x20] sm:$0xff] %vm691_vm3, %v2996_v56  ;;  %v2997_v50 = vmax.f32 %v2965_v53, 0.0  ;;  %v3818_v20 = vadd.f32 %v2787_v41, %v1701_v31  ;;  %v3786_v0 = vpop.f32.mrb[10].mxu0 }
 0x1f9   : > { %3031 = vst.msk [vmem:[%s5132_s24 + $0x38] sm:$0xff] %vm691_vm3, %v2999_v34  ;;  %v2932_v22 = vmul.f32 %v3817_v37, %v5117_v16  ;;  %v3819_v30 = vadd.f32 %v3786_v0, %v5102_v29  ;;  %v2790_v57 = vpop.f32.mrb[11].mxu0 }
 0x1fa   : > { %3029 = vst.msk [vmem:[%s5132_s24 + $0x28] sm:$0xff] %vm691_vm3, %v2997_v50  ;;  %v2930_v62 = vmul.f32 %v3818_v20, %v5117_v16  ;;  %v3820_v5 = vadd.f32 %v2790_v57, %v5104_v26 }
 0x1fb   : > { %v2970_v63 = vadd.f32 %v5122_v4, %v2932_v22  ;;  %v2933_v49 = vmul.f32 %v3819_v30, %v5117_v16 }
 0x1fc   : > { %v2968_v54 = vadd.f32 %v5122_v4, %v2930_v62  ;;  %v2931_v36 = vmul.f32 %v3820_v5, %v5117_v16 }
 0x1fd   : > { %v3002_v45 = vmax.f32 %v2970_v63, 0.0  ;;  %v2971_v31 = vadd.f32 %v5122_v4, %v2933_v49 }
 0x1fe   : > { %v3000_v29 = vmax.f32 %v2968_v54, 0.0  ;;  %v2969_v19 = vadd.f32 %v5122_v4, %v2931_v36  ;;  %v3789_v52 = vpop.f32.mrb[12].mxu0 }
 0x1ff   : > { %3034 = vst.msk [vmem:[%s5132_s24 + $0x50] sm:$0xff] %vm691_vm3, %v3002_v45  ;;  %v3003_v26 = vmax.f32 %v2971_v31, 0.0  ;;  %v3821_v3 = vadd.f32 %v3789_v52, %v5106_v44  ;;  %v2803_v11 = vpop.f32.mrb[13].mxu0 }
 0x200   : > { %3032 = vst.msk [vmem:[%s5132_s24 + $0x40] sm:$0xff] %vm691_vm3, %v3000_v29  ;;  %v3001_v21 = vmax.f32 %v2969_v19, 0.0  ;;  %v3822_v13 = vadd.f32 %v2803_v11, %v5108_v8  ;;  %v3790_v24 = vpop.f32.mrb[14].mxu0 }
 0x201   : > { %3035 = vst.msk [vmem:[%s5132_s24 + $0x58] sm:$0xff] %vm691_vm3, %v3003_v26  ;;  %v2936_v9 = vmul.f32 %v3821_v3, %v5117_v16  ;;  %v3823_v10 = vadd.f32 %v3790_v24, %v5110_v1  ;;  %v2806_v51 = vpop.f32.mrb[15].mxu0 }
 0x202   : > { %3033 = vst.msk [vmem:[%s5132_s24 + $0x48] sm:$0xff] %vm691_vm3, %v3001_v21  ;;  %v2934_v33 = vmul.f32 %v3822_v13, %v5117_v16  ;;  %v3824_v44 = vadd.f32 %v2806_v51, %v5112_v40 }
 0x203   : > { %v2974_v39 = vadd.f32 %v5122_v4, %v2936_v9  ;;  %v2937_v8 = vmul.f32 %v3823_v10, %v5117_v16 }
 0x204   : > { %v2972_v58 = vadd.f32 %v5122_v4, %v2934_v33  ;;  %v2935_v42 = vmul.f32 %v3824_v44, %v5117_v16 }
 0x205   : > { %v3006_v15 = vmax.f32 %v2974_v39, 0.0  ;;  %v2975_v1 = vadd.f32 %v5122_v4, %v2937_v8 }
 0x206   : > { %v3004_v27 = vmax.f32 %v2972_v58, 0.0  ;;  %v2973_v6 = vadd.f32 %v5122_v4, %v2935_v42  ;;  %v3657_v7 = vpop.f32.mrb[16].mxu1  ;;  %v3793_v60 = vpop.f32.mrb[16].mxu0 }
 0x207   : > { %3038 = vst.msk [vmem:[%s5132_s24 + $0x70] sm:$0xff] %vm691_vm3, %v3006_v15  ;;  %v3007_v40 = vmax.f32 %v2975_v1, 0.0  ;;  %v3825_v14 = vadd.f32 %v3793_v60, %v3657_v7  ;;  %v1961_v28 = vpop.f32.mrb[17].mxu1  ;;  %v2819_v25 = vpop.f32.mrb[17].mxu0 }
 0x208   : > { %3036 = vst.msk [vmem:[%s5132_s24 + $0x60] sm:$0xff] %vm691_vm3, %v3004_v27  ;;  %v3005_v38 = vmax.f32 %v2973_v6, 0.0  ;;  %v3826_v46 = vadd.f32 %v2819_v25, %v1961_v28  ;;  %v3658_v47 = vpop.f32.mrb[18].mxu1  ;;  %v3794_v32 = vpop.f32.mrb[18].mxu0 }
 0x209   : > { %3039 = vst.msk [vmem:[%s5132_s24 + $0x78] sm:$0xff] %vm691_vm3, %v3007_v40  ;;  %v2940_v18 = vmul.f32 %v3825_v14, %v5117_v16  ;;  %v3827_v43 = vadd.f32 %v3794_v32, %v3658_v47  ;;  %v1964_v55 = vpop.f32.mrb[19].mxu1  ;;  %v2822_v12 = vpop.f32.mrb[19].mxu0 }
 0x20a   : > { %3037 = vst.msk [vmem:[%s5132_s24 + $0x68] sm:$0xff] %vm691_vm3, %v3005_v38  ;;  %v2938_v23 = vmul.f32 %v3826_v46, %v5117_v16  ;;  %v3828_v59 = vadd.f32 %v2822_v12, %v1964_v55 }
 0x20b   : > { %v2978_v35 = vadd.f32 %v5122_v4, %v2940_v18  ;;  %v2941_v48 = vmul.f32 %v3827_v43, %v5117_v16 }
 0x20c   : > { %v2976_v2 = vadd.f32 %v5122_v4, %v2938_v23  ;;  %v2939_v61 = vmul.f32 %v3828_v59, %v5117_v16 }
 0x20d   : > { %v3010_v56 = vmax.f32 %v2978_v35, 0.0  ;;  %v2979_v53 = vadd.f32 %v5122_v4, %v2941_v48 }
 0x20e   : > { %v3008_v17 = vmax.f32 %v2976_v2, 0.0  ;;  %v2977_v34 = vadd.f32 %v5122_v4, %v2939_v61  ;;  %v3661_v37 = vpop.f32.mrb[20].mxu1  ;;  %v3797_v41 = vpop.f32.mrb[20].mxu0 }
 0x20f   : > { %3042 = vst.msk [vmem:[%s5132_s24 + $0x90] sm:$0xff] %vm691_vm3, %v3010_v56  ;;  %v3011_v50 = vmax.f32 %v2979_v53, 0.0  ;;  %v3829_v20 = vadd.f32 %v3797_v41, %v3661_v37  ;;  %v1977_v0 = vpop.f32.mrb[21].mxu1  ;;  %v2835_v22 = vpop.f32.mrb[21].mxu0 }
 0x210   : > { %3040 = vst.msk [vmem:[%s5132_s24 + $0x80] sm:$0xff] %vm691_vm3, %v3008_v17  ;;  %v3009_v30 = vmax.f32 %v2977_v34, 0.0  ;;  %v3830_v57 = vadd.f32 %v2835_v22, %v1977_v0  ;;  %v3662_v62 = vpop.f32.mrb[22].mxu1  ;;  %v3798_v5 = vpop.f32.mrb[22].mxu0 }
 0x211   : > { %3043 = vst.msk [vmem:[%s5132_s24 + $0x98] sm:$0xff] %vm691_vm3, %v3011_v50  ;;  %v2944_v63 = vmul.f32 %v3829_v20, %v5117_v16  ;;  %v3831_v49 = vadd.f32 %v3798_v5, %v3662_v62  ;;  %v1980_v54 = vpop.f32.mrb[23].mxu1  ;;  %v2838_v36 = vpop.f32.mrb[23].mxu0 }
 0x212   : > { %3041 = vst.msk [vmem:[%s5132_s24 + $0x88] sm:$0xff] %vm691_vm3, %v3009_v30  ;;  %v2942_v45 = vmul.f32 %v3830_v57, %v5117_v16  ;;  %v3832_v31 = vadd.f32 %v2838_v36, %v1980_v54 }
 0x213   : > { %v2982_v29 = vadd.f32 %v5122_v4, %v2944_v63  ;;  %v2945_v19 = vmul.f32 %v3831_v49, %v5117_v16 }
 0x214   : > { %v2980_v52 = vadd.f32 %v5122_v4, %v2942_v45  ;;  %v2943_v26 = vmul.f32 %v3832_v31, %v5117_v16 }
 0x215   : > { %v3014_v3 = vmax.f32 %v2982_v29, 0.0  ;;  %v2983_v11 = vadd.f32 %v5122_v4, %v2945_v19 }
 0x216   : > { %v3012_v21 = vmax.f32 %v2980_v52, 0.0  ;;  %v2981_v13 = vadd.f32 %v5122_v4, %v2943_v26  ;;  %v3665_v24 = vpop.f32.mrb[24].mxu1  ;;  %v3801_v9 = vpop.f32.mrb[24].mxu0 }
 0x217   : > { %3046 = vst.msk [vmem:[%s5132_s24 + $0xb0] sm:$0xff] %vm691_vm3, %v3014_v3  ;;  %v3015_v10 = vmax.f32 %v2983_v11, 0.0  ;;  %v3833_v51 = vadd.f32 %v3801_v9, %v3665_v24  ;;  %v1993_v33 = vpop.f32.mrb[25].mxu1  ;;  %v2851_v44 = vpop.f32.mrb[25].mxu0 }
 0x218   : > { %3044 = vst.msk [vmem:[%s5132_s24 + $0xa0] sm:$0xff] %vm691_vm3, %v3012_v21  ;;  %v3013_v39 = vmax.f32 %v2981_v13, 0.0  ;;  %v3834_v8 = vadd.f32 %v2851_v44, %v1993_v33  ;;  %v3666_v58 = vpop.f32.mrb[26].mxu1  ;;  %v3802_v42 = vpop.f32.mrb[26].mxu0 }
 0x219   : > { %3047 = vst.msk [vmem:[%s5132_s24 + $0xb8] sm:$0xff] %vm691_vm3, %v3015_v10  ;;  %v2948_v15 = vmul.f32 %v3833_v51, %v5117_v16  ;;  %v3835_v1 = vadd.f32 %v3802_v42, %v3666_v58  ;;  %v1996_v27 = vpop.f32.mrb[27].mxu1  ;;  %v2854_v6 = vpop.f32.mrb[27].mxu0 }
 0x21a   : > { %3045 = vst.msk [vmem:[%s5132_s24 + $0xa8] sm:$0xff] %vm691_vm3, %v3013_v39  ;;  %v2946_v7 = vmul.f32 %v3834_v8, %v5117_v16  ;;  %v3836_v60 = vadd.f32 %v2854_v6, %v1996_v27 }
 0x21b   : > { %v2986_v40 = vadd.f32 %v5122_v4, %v2948_v15  ;;  %v2949_v14 = vmul.f32 %v3835_v1, %v5117_v16 }
 0x21c   : > { %v2984_v28 = vadd.f32 %v5122_v4, %v2946_v7  ;;  %v2947_v25 = vmul.f32 %v3836_v60, %v5117_v16 }
 0x21d   : > { %v3018_v38 = vmax.f32 %v2986_v40, 0.0  ;;  %v2987_v46 = vadd.f32 %v5122_v4, %v2949_v14 }
 0x21e   : > { %v3016_v47 = vmax.f32 %v2984_v28, 0.0  ;;  %v2985_v32 = vadd.f32 %v5122_v4, %v2947_v25  ;;  %v3669_v18 = vpop.f32.mrb[28].mxu1  ;;  %v3805_v43 = vpop.f32.mrb[28].mxu0 }
 0x21f   : > { %3050 = vst.msk [vmem:[%s5132_s24 + $0xd0] sm:$0xff] %vm691_vm3, %v3018_v38  ;;  %v3019_v55 = vmax.f32 %v2987_v46, 0.0  ;;  %v3837_v12 = vadd.f32 %v3805_v43, %v3669_v18  ;;  %v2009_v23 = vpop.f32.mrb[29].mxu1  ;;  %v2867_v59 = vpop.f32.mrb[29].mxu0 }
 0x220   : > { %3048 = vst.msk [vmem:[%s5132_s24 + $0xc0] sm:$0xff] %vm691_vm3, %v3016_v47  ;;  %v3017_v35 = vmax.f32 %v2985_v32, 0.0  ;;  %v3838_v48 = vadd.f32 %v2867_v59, %v2009_v23  ;;  %v3670_v2 = vpop.f32.mrb[30].mxu1  ;;  %v3806_v61 = vpop.f32.mrb[30].mxu0 }
 0x221   : > { %3051 = vst.msk [vmem:[%s5132_s24 + $0xd8] sm:$0xff] %vm691_vm3, %v3019_v55  ;;  %v2952_v56 = vmul.f32 %v3837_v12, %v5117_v16  ;;  %v3839_v53 = vadd.f32 %v3806_v61, %v3670_v2  ;;  %v2012_v17 = vpop.f32.mrb[31].mxu1  ;;  %v2870_v34 = vpop.f32.mrb[31].mxu0 }
 0x222   : > { %3049 = vst.msk [vmem:[%s5132_s24 + $0xc8] sm:$0xff] %vm691_vm3, %v3017_v35  ;;  %v2950_v37 = vmul.f32 %v3838_v48, %v5117_v16  ;;  %v3840_v41 = vadd.f32 %v2870_v34, %v2012_v17 }
 0x223   : > { %v2990_v50 = vadd.f32 %v5122_v4, %v2952_v56  ;;  %v2953_v20 = vmul.f32 %v3839_v53, %v5117_v16 }
 0x224   : > { %v2988_v0 = vadd.f32 %v5122_v4, %v2950_v37  ;;  %v2951_v22 = vmul.f32 %v3840_v41, %v5117_v16 }
 0x225   : > { %v3022_v30 = vmax.f32 %v2990_v50, 0.0  ;;  %v2991_v57 = vadd.f32 %v5122_v4, %v2953_v20 }
 0x226   : > { %v3020_v62 = vmax.f32 %v2988_v0, 0.0  ;;  %v2989_v5 = vadd.f32 %v5122_v4, %v2951_v22 }
 0x227   : > { %3054 = vst.msk [vmem:[%s5132_s24 + $0xf0] sm:$0xff] %vm691_vm3, %v3022_v30  ;;  %v3023_v63 = vmax.f32 %v2991_v57, 0.0 }
 0x228   : > { %3052 = vst.msk [vmem:[%s5132_s24 + $0xe0] sm:$0xff] %vm691_vm3, %v3020_v62  ;;  %v3021_v49 = vmax.f32 %v2989_v5, 0.0 }
 0x229   : > { %3055 = vst.msk [vmem:[%s5132_s24 + $0xf8] sm:$0xff] %vm691_vm3, %v3023_v63 }
 0x22a   : > { %3053 = vst.msk [vmem:[%s5132_s24 + $0xe8] sm:$0xff] %vm691_vm3, %v3021_v49 }
 0x22b PF: > { %s14_s15 = sadd.s32 1, %s4112_s15  }
 0x22c   : > { %p11_p4 = scmp.ge.s32.totalorder %s14_s15, 4  }
 0x22e   :  { %13 = sbr.rel (!%p11_p4) target bundleno = 1 (0x1), region = 74 }

// kernel: _forward_taps.2
= control target key start
LH: loop header
LB: loop body
LE: loop exit
PB: predicated region body
PF: predicated region fallthrough
CT: control target
= control target key end

     0   :  { %s8219_s21 = smov 0   ;;  %s10174_s0 = inlined_call_operand.vmem [shape: bf16[2,18,18,2], index: 0, kind: input, shape index: {}]   ;;  %s10175_s1 = inlined_call_operand.vmem [shape: bf16[2,18,18,2], index: 1, kind: input, shape index: {}]   ;;  %s10176_s2 = inlined_call_operand.vmem [shape: bf16[9,2,8], index: 2, kind: input, shape index: {}]   ;;  %s10177_s3 = inlined_call_operand.vmem [shape: bf16[9,2,8], index: 3, kind: input, shape index: {}]   ;;  %s10178_s4 = inlined_call_operand.vmem [shape: f32[1,8], index: 4, kind: input, shape index: {}]   ;;  %s10179_s5 = inlined_call_operand.vmem [shape: f32[1,8], index: 5, kind: input, shape index: {}]   ;;  %s10180_s6 = inlined_call_operand.vmem [shape: bf16[2,16,16,8], index: 6, kind: output, shape index: {}]  }
   0x1 LB: > { %s6065_s22 = sadd.s32 4294967295, %s8182_s21   ;;  %p6069_p0 = scmp.ge.s32.totalorder %s8182_s21, 1  ;;  %s8182_s21 = sphi %s8219_s21, %s16_s21  }
   0x2   : > { %p222_p1 = scmp.lt.s32.totalorder %s8182_s21, 3 }
   0x4   : > { %p223_p2 = pnand %p6069_p0, %p222_p1 }
   0x6   : > { %226 = sbr.rel (%p223_p2) target bundleno = 900 (0x384), region = 44 }
   0xd   : > { %v6074_v0 = vld [vmem:[%s10176_s2 + $0x1] sm:$0x1]  ;;  %vm814_vm0 = vcmask 1040384   ;;  %p257_p3 = scmp.lt.s32.totalorder %s6065_s22, 1  ;;  %v8242_v4 = vld [vmem:[%s10176_s2] sm:$0x1] }
   0xe   : > { %v6298_v1 = vld [vmem:[%s10177_s3 + $0x1] sm:$0x1]  ;;  %8053 = vmatprep.subr.msk.bf16.mxu1 %vm814_vm0, %v6074_v0  ;;  %v816_v2 = vsel %vm814_vm0, %v6074_v0, 0  ;;  %v8247_v5 = vld [vmem:[%s10177_s3] sm:$0x1]  ;;  %v10329_v31 = vmov 0 }
   0xf   : > { %8062 = vmatprep.subr.msk.bf16.mxu0 %vm814_vm0, %v6298_v1  ;;  %v3526_v3 = vsel %vm814_vm0, %v6298_v1, 0  ;;  %6898 = vmatpush3.bf16.msra.mxu1 %v816_v2  ;;  %s10545_s22 = smov (!%p257_p3, %s6065_s22), 1  ;;  %vm330_vm1 = vsmask.f32 3328  ;;  %vm331_vm2 = vsmask.f32 7440 }
  0x10   : > { %7204 = vmatpush3.bf16.msra.mxu0 %v3526_v3  ;;  %8054 = vmatprep.subr.msk.bf16.mxu1 %vm814_vm0, %v8242_v4  ;;  %s8071_s7 = smul.u32 216, %s10545_s22  ;;  %vm8274_vm3 = vmor %vm330_vm1, %vm331_vm2  ;;  %vm765_vm4 = vcmask 15360   ;;  %v1108_v60 = vsel %vm814_vm0, %v8242_v4, 0  ;;  %vm1289_vm5 = vcmask 1042432   ;;  %vm1290_vm6 = vcmask 1046532   ;;  %s6558_s26 = sshll.u32 %s10545_s22, 7 }
  0x11   : > { %8063 = vmatprep.subr.msk.bf16.mxu0 %vm814_vm0, %v8247_v5  ;;  %v10330_v31 = vsel %vm8274_vm3, 4294967295, %v10329_v31  ;;  %vm9089_vm7 = vmor %vm1289_vm5, %vm1290_vm6  ;;  %s10048_s29 = scalar_lea.vmem %s10180_s6, %s6558_s26  ;;  %vm5965_vm8 = vcmask 60416  }
  0x12   : > { %s8257_s10 = scalar_lea.vmem %s10174_s0, %s8071_s7  ;;  %s8262_s13 = scalar_lea.vmem %s10175_s1, %s8071_s7  ;;  %10331 = vst [vmem:[#allocation2_spill] sm:$0xff] %v10330_v31 }
  0x13   : > { %v273_v6 = vld [vmem:[%s8257_s10] sm:$0xf]  ;;  %v274_v7 = vld [vmem:[%s8257_s10 + $0x4] sm:$0xf]  ;;  %v275_v8 = vld [vmem:[%s8257_s10 + $0x8] sm:$0x1] }
  0x14   : > { %v334_v9 = vshrl.u32 %v273_v6, 16  ;;  %v337_v10 = vshll.u32 %v273_v6, 16  ;;  %v343_v11 = vshll.u32 %v274_v7, 16  ;;  %v347_v12 = vshrl.u32 %v274_v7, 16  ;;  %v2988_v13 = vld [vmem:[%s8262_s13] sm:$0xf] }
  0x15   : > { %v353_v14 = vshll.u32 %v275_v8, 16  ;;  %v2989_v15 = vld [vmem:[%s8262_s13 + $0x4] sm:$0xf]  ;;  %v2990_v16 = vld [vmem:[%s8262_s13 + $0x8] sm:$0x1]  ;;  %v3046_v22 = vshrl.u32 %v2988_v13, 16 }
  0x16   : > { %v336_v17 = vrot.slane %v334_v9, 4  ;;  %v339_v18 = vrot.slane %v337_v10, 5  ;;  %v345_v19 = vrot.slane %v343_v11, 5  ;;  %v349_v20 = vrot.slane %v347_v12, 4  ;;  %v276_v29 = vld [vmem:[%s8257_s10 + $0xc] sm:$0xf] }
  0x17   : > { %v355_v21 = vrot.slane %v353_v14, 5  ;;  %v3049_v23 = vshll.u32 %v2988_v13, 16  ;;  %v3055_v24 = vshll.u32 %v2989_v15, 16  ;;  %v3059_v27 = vshrl.u32 %v2989_v15, 16  ;;  %v277_v30 = vld [vmem:[%s8257_s10 + $0x10] sm:$0xf] }
  0x18   : > { %v340_v25 = vor.u32 %v339_v18, %v336_v17  ;;  %v350_v26 = vor.u32 %v349_v20, %v345_v19  ;;  %v3065_v28 = vshll.u32 %v2990_v16, 16  ;;  %v3048_v32 = vrot.slane %v3046_v22, 4  ;;  %v278_v40 = vld [vmem:[%s8257_s10 + $0x14] sm:$0x1]  ;;  %v2991_v52 = vld [vmem:[%s8262_s13 + $0xc] sm:$0xf] }
  0x19   : > { %v3051_v33 = vrot.slane %v3049_v23, 5  ;;  %v3057_v34 = vrot.slane %v3055_v24, 5  ;;  %v3061_v37 = vrot.slane %v3059_v27, 4  ;;  %v358_v41 = vshrl.u32 %v276_v29, 16  ;;  %v2992_v57 = vld [vmem:[%s8262_s13 + $0x10] sm:$0xf] }
  0x1a   : > { %v341_v35 = vrot.slane %v340_v25, 4  ;;  %v351_v36 = vrot.slane %v350_v26, 4  ;;  %v3067_v38 = vrot.slane %v3065_v28, 5  ;;  %v361_v42 = vshll.u32 %v276_v29, 16  ;;  %v2993_v61 = vld [vmem:[%s8262_s13 + $0x14] sm:$0x1] }
  0x1b   : > { %v3052_v39 = vor.u32 %v3051_v33, %v3048_v32  ;;  %v367_v43 = vshll.u32 %v277_v30, 16  ;;  %v3062_v46 = vor.u32 %v3061_v37, %v3057_v34  ;;  %v371_v47 = vshrl.u32 %v277_v30, 16  ;;  %v279_v12 = vld [vmem:[%s8257_s10 + $0x18] sm:$0xf]  ;;  %v280_v15 = vld [vmem:[%s8257_s10 + $0x1c] sm:$0xf] }
  0x1c   : > { %v346_v44 = vsel %vm8274_vm3, %v341_v35, %v345_v19  ;;  %v356_v45 = vsel %vm8274_vm3, %v351_v36, %v355_v21  ;;  %v360_v50 = vrot.slane %v358_v41, 4  ;;  %v363_v51 = vrot.slane %v361_v42, 5  ;;  %v281_v16 = vld [vmem:[%s8257_s10 + $0x20] sm:$0x1]  ;;  %v2994_v21 = vld [vmem:[%s8262_s13 + $0x18] sm:$0xf] }
  0x1d   : > { %v6075_v48 = vcombine.low %v346_v44, %v356_v45  ;;  %v3053_v49 = vrot.slane %v3052_v39, 4  ;;  %v3063_v53 = vrot.slane %v3062_v46, 4  ;;  %v369_v54 = vrot.slane %v367_v43, 5  ;;  %v2996_v39 = vld [vmem:[%s8262_s13 + $0x20] sm:$0x1] }
  0x1e   : > { %v373_v55 = vrot.slane %v371_v47, 4  ;;  %v377_v56 = vshll.u32 %v278_v40, 16  ;;  %v364_v59 = vor.u32 %v363_v51, %v360_v50  ;;  %v3070_v1 = vshrl.u32 %v2991_v52, 16  ;;  %v282_v44 = vld [vmem:[%s8257_s10 + $0x24] sm:$0xf] }
  0x1f   : > { %6899 = vmatprep.mubr.msk.bf16.mxu1 %vm765_vm4, %v6075_v48  ;;  %v3058_v58 = vsel %vm8274_vm3, %v3053_v49, %v3057_v34  ;;  %v3068_v62 = vsel %vm8274_vm3, %v3063_v53, %v3067_v38  ;;  %v3073_v6 = vshll.u32 %v2991_v52, 16  ;;  %v3079_v7 = vshll.u32 %v2992_v57, 16  ;;  %v2995_v34 = vld [vmem:[%s8262_s13 + $0x1c] sm:$0xf]  ;;  %v283_v53 = vld [vmem:[%s8257_s10 + $0x28] sm:$0xf] }
  0x20   : > { %v374_v63 = vor.u32 %v373_v55, %v369_v54  ;;  %v379_v0 = vrot.slane %v377_v56, 5  ;;  %v6299_v2 = vcombine.low %v3058_v58, %v3068_v62  ;;  %v365_v3 = vrot.slane %v364_v59, 4  ;;  %v8935_v31 = vld [vmem:[%s8257_s10 + $0x30] sm:$0xf] }
  0x21   : > { %v3072_v9 = vrot.slane %v3070_v1, 4  ;;  %v3083_v10 = vshrl.u32 %v2992_v57, 16  ;;  %v3089_v11 = vshll.u32 %v2993_v61, 16  ;;  %v3075_v13 = vrot.slane %v3073_v6, 5  ;;  %v284_v61 = vld [vmem:[%s8257_s10 + $0x2c] sm:$0x1] }
  0x22   : > { %v375_v8 = vrot.slane %v374_v63, 4  ;;  %7205 = vmatprep.mubr.msk.bf16.mxu0 %vm765_vm4, %v6299_v2  ;;  %v370_v4 = vsel %vm8274_vm3, %v365_v3, %v369_v54  ;;  %v3081_v14 = vrot.slane %v3079_v7, 5  ;;  %v3818_v20 = vsel %vm814_vm0, %v8247_v5, 0  ;;  %v2997_v63 = vld [vmem:[%s8262_s13 + $0x24] sm:$0xf]  ;;  %10384 = vst [vmem:[#allocation55_spill] sm:$0xff] %v8935_v31 }
  0x23   : > { %v3085_v18 = vrot.slane %v3083_v10, 4  ;;  %v3091_v19 = vrot.slane %v3089_v11, 5  ;;  %v3076_v23 = vor.u32 %v3075_v13, %v3072_v9  ;;  %v382_v24 = vshrl.u32 %v279_v12, 16  ;;  %v2998_v10 = vld [vmem:[%s8262_s13 + $0x28] sm:$0xf] }
  0x24   : > { %v380_v17 = vsel %vm8274_vm3, %v375_v8, %v379_v0  ;;  %v385_v25 = vshll.u32 %v279_v12, 16  ;;  %v391_v27 = vshll.u32 %v280_v15, 16  ;;  %v395_v28 = vshrl.u32 %v280_v15, 16 }
  0x25   : > { %v8304_v22 = vcombine.low %v370_v4, %v380_v17  ;;  %v3086_v26 = vor.u32 %v3085_v18, %v3081_v14  ;;  %v401_v29 = vshll.u32 %v281_v16, 16  ;;  %v3077_v30 = vrot.slane %v3076_v23, 4  ;;  %v2999_v17 = vld [vmem:[%s8262_s13 + $0x2c] sm:$0x1] }
  0x26   : > { %v384_v32 = vrot.slane %v382_v24, 4  ;;  %v387_v33 = vrot.slane %v385_v25, 5  ;;  %v3094_v5 = vshrl.u32 %v2994_v21, 16  ;;  %v393_v36 = vrot.slane %v391_v27, 5 }
  0x27   : > { %10332 = vst [vmem:[#allocation3_spill] sm:$0xff] %v8304_v22  ;;  %6900 = vmatmul.mubr.msk.bf16.vlgmr.msra.gmra.mrb[0].mxu1 %vm765_vm4, %v8304_v22  ;;  %v3087_v35 = vrot.slane %v3086_v26, 4  ;;  %v397_v37 = vrot.slane %v395_v28, 4  ;;  %v403_v38 = vrot.slane %v401_v29, 5  ;;  %v3082_v40 = vsel %vm8274_vm3, %v3077_v30, %v3081_v14  ;;  %v286_v29 = vld [vmem:[%s8257_s10 + $0x34] sm:$0xf] }
  0x28   : > { %6932 = vmatpush3.bf16.msra.mxu1 %v1108_v60  ;;  %v388_v41 = vor.u32 %v387_v33, %v384_v32  ;;  %v3096_v42 = vrot.slane %v3094_v5, 4  ;;  %v3097_v43 = vshll.u32 %v2994_v21, 16  ;;  %v3103_v47 = vshll.u32 %v2995_v34, 16 }
  0x29   : > { %v3092_v45 = vsel %vm8274_vm3, %v3087_v35, %v3091_v19  ;;  %v398_v46 = vor.u32 %v397_v37, %v393_v36  ;;  %v3107_v48 = vshrl.u32 %v2995_v34, 16  ;;  %v3113_v52 = vshll.u32 %v2996_v39, 16  ;;  %v285_v19 = vld [vmem:[%s8257_s10 + $0x30] sm:$0xf]  ;;  %v287_v37 = vld [vmem:[%s8257_s10 + $0x38] sm:$0x1] }
  0x2a   : > { %v8315_v49 = vcombine.low %v3082_v40, %v3092_v45  ;;  %v389_v50 = vrot.slane %v388_v41, 4  ;;  %v3099_v51 = vrot.slane %v3097_v43, 5  ;;  %v3105_v55 = vrot.slane %v3103_v47, 5  ;;  %v3000_v43 = vld [vmem:[%s8262_s13 + $0x30] sm:$0xf] }
  0x2b   : > { %v399_v54 = vrot.slane %v398_v46, 4  ;;  %v3109_v56 = vrot.slane %v3107_v48, 4  ;;  %v406_v57 = vshrl.u32 %v282_v44, 16  ;;  %v3115_v60 = vrot.slane %v3113_v52, 5  ;;  %v3001_v48 = vld [vmem:[%s8262_s13 + $0x34] sm:$0xf] }
  0x2c   : > { %10333 = vst [vmem:[#allocation4_spill] sm:$0xff] %v8315_v49  ;;  %7206 = vmatmul.mubr.msk.bf16.vlgmr.msra.gmra.mrb[0].mxu0 %vm765_vm4, %v8315_v49  ;;  %v394_v58 = vsel %vm8274_vm3, %v389_v50, %v393_v36  ;;  %v3100_v59 = vor.u32 %v3099_v51, %v3096_v42  ;;  %v409_v62 = vshll.u32 %v282_v44, 16  ;;  %v415_v3 = vshll.u32 %v283_v53, 16 }
  0x2d   : > { %7238 = vmatpush3.bf16.msra.mxu0 %v3818_v20  ;;  %v404_v0 = vsel %vm8274_vm3, %v399_v54, %v403_v38  ;;  %v3110_v1 = vor.u32 %v3109_v56, %v3105_v55  ;;  %v408_v2 = vrot.slane %v406_v57, 4  ;;  %v419_v9 = vshrl.u32 %v283_v53, 16  ;;  %v3002_v57 = vld [vmem:[%s8262_s13 + $0x38] sm:$0x1] }
  0x2e   : > { %v8326_v6 = vcombine.low %v394_v58, %v404_v0  ;;  %v3101_v7 = vrot.slane %v3100_v59, 4  ;;  %v411_v8 = vrot.slane %v409_v62, 5  ;;  %v417_v12 = vrot.slane %v415_v3, 5  ;;  %v288_v3 = vld [vmem:[%s8257_s10 + $0x3c] sm:$0xf] }
  0x2f   : > { %v3111_v11 = vrot.slane %v3110_v1, 4  ;;  %v425_v4 = vshll.u32 %v284_v61, 16  ;;  %v3118_v13 = vshrl.u32 %v2997_v63, 16  ;;  %v421_v16 = vrot.slane %v419_v9, 4 }
  0x30   : > { %10334 = vst [vmem:[#allocation5_spill] sm:$0xff] %v8326_v6  ;;  %6903 = vmatprep.mubr.msk.bf16.mxu1 %vm765_vm4, %v8326_v6  ;;  %v3106_v14 = vsel %vm8274_vm3, %v3101_v7, %v3105_v55  ;;  %v412_v15 = vor.u32 %v411_v8, %v408_v2  ;;  %v3121_v18 = vshll.u32 %v2997_v63, 16  ;;  %v3127_v24 = vshll.u32 %v2998_v10, 16 }
  0x31   : > { %v3116_v20 = vsel %vm8274_vm3, %v3111_v11, %v3115_v60  ;;  %v427_v21 = vrot.slane %v425_v4, 5  ;;  %v3120_v23 = vrot.slane %v3118_v13, 4  ;;  %v422_v27 = vor.u32 %v421_v16, %v417_v12  ;;  %v8360_v11 = vld [vmem:[%s8257_s10 + $0x40] sm:$0xf] }
  0x32   : > { %v8337_v25 = vcombine.low %v3106_v14, %v3116_v20  ;;  %v413_v26 = vrot.slane %v412_v15, 4  ;;  %v3123_v28 = vrot.slane %v3121_v18, 5  ;;  %v3129_v30 = vrot.slane %v3127_v24, 5 }
  0x33   : > { %v3131_v32 = vshrl.u32 %v2998_v10, 16  ;;  %v3137_v33 = vshll.u32 %v2999_v17, 16  ;;  %v430_v34 = vshrl.u32 %v285_v19, 16  ;;  %v423_v35 = vrot.slane %v422_v27, 4  ;;  %v290_v17 = vld [vmem:[%s8257_s10 + $0x44] sm:$0x1] }
  0x34   : > { %10335 = vst [vmem:[#allocation6_spill] sm:$0xff] %v8337_v25  ;;  %7209 = vmatprep.mubr.msk.bf16.mxu0 %vm765_vm4, %v8337_v25  ;;  %v418_v5 = vsel %vm8274_vm3, %v413_v26, %v417_v12  ;;  %v3124_v36 = vor.u32 %v3123_v28, %v3120_v23  ;;  %v433_v38 = vshll.u32 %v285_v19, 16  ;;  %v439_v42 = vshll.u32 %v286_v29, 16  ;;  %v8374_v26 = vld [vmem:[%s8262_s13 + $0x3c] sm:$0xf] }
  0x35   : > { %v3133_v39 = vrot.slane %v3131_v32, 4  ;;  %v3139_v40 = vrot.slane %v3137_v33, 5  ;;  %v432_v41 = vrot.slane %v430_v34, 4  ;;  %v428_v44 = vsel %vm8274_vm3, %v423_v35, %v427_v21  ;;  %v8379_v32 = vld [vmem:[%s8262_s13 + $0x40] sm:$0xf] }
  0x36   : > { %v3125_v45 = vrot.slane %v3124_v36, 4  ;;  %v435_v46 = vrot.slane %v433_v38, 5  ;;  %v443_v47 = vshrl.u32 %v286_v29, 16  ;;  %v8349_v50 = vcombine.low %v418_v5, %v428_v44  ;;  %v3005_v38 = vld [vmem:[%s8262_s13 + $0x44] sm:$0x1] }
  0x37   : > { %v3134_v51 = vor.u32 %v3133_v39, %v3129_v30  ;;  %v441_v52 = vrot.slane %v439_v42, 5  ;;  %v449_v53 = vshll.u32 %v287_v37, 16  ;;  %v3142_v58 = vshrl.u32 %v3000_v43, 16 }
  0x38   : > { %10336 = vst [vmem:[#allocation7_spill] sm:$0xff] %v8349_v50  ;;  %v3130_v54 = vsel %vm8274_vm3, %v3125_v45, %v3129_v30  ;;  %v436_v55 = vor.u32 %v435_v46, %v432_v41  ;;  %v445_v56 = vrot.slane %v443_v47, 4  ;;  %6904 = vmatmul.mubr.msk.bf16.gmra.mrb[4].mxu1 %vm765_vm4, %v8349_v50  ;;  %v3145_v61 = vshll.u32 %v3000_v43, 16  ;;  %v8392_v45 = vld [vmem:[%s8257_s10 + $0x48] sm:$0xf] }
  0x39   : > { %v3135_v59 = vrot.slane %v3134_v51, 4  ;;  %v451_v60 = vrot.slane %v449_v53, 5  ;;  %v3151_v62 = vshll.u32 %v3001_v48, 16  ;;  %v3144_v1 = vrot.slane %v3142_v58, 4 }
  0x3a   : > { %v437_v63 = vrot.slane %v436_v55, 4  ;;  %v446_v0 = vor.u32 %v445_v56, %v441_v52  ;;  %v3155_v2 = vshrl.u32 %v3001_v48, 16  ;;  %v3147_v8 = vrot.slane %v3145_v61, 5 }
  0x3b   : > { %v3140_v7 = vsel %vm8274_vm3, %v3135_v59, %v3139_v40  ;;  %v3153_v9 = vrot.slane %v3151_v62, 5  ;;  %v3161_v10 = vshll.u32 %v3002_v57, 16  ;;  %v454_v18 = vshrl.u32 %v288_v3, 16  ;;  %v293_v59 = vld [vmem:[%s8257_s10 + $0x50] sm:$0x1] }
  0x3c   : > { %v8362_v12 = vcombine.low %v3130_v54, %v3140_v7  ;;  %v442_v4 = vsel %vm8274_vm3, %v437_v63, %v441_v52  ;;  %v447_v13 = vrot.slane %v446_v0, 4  ;;  %v3157_v14 = vrot.slane %v3155_v2, 4  ;;  %v8397_v52 = vld [vmem:[%s8257_s10 + $0x4c] sm:$0xf]  ;;  %v8411_v2 = vld [vmem:[%s8262_s13 + $0x48] sm:$0xf] }
  0x3d   : > { %v3148_v15 = vor.u32 %v3147_v8, %v3144_v1  ;;  %v3163_v16 = vrot.slane %v3161_v10, 5  ;;  %v457_v19 = vshll.u32 %v288_v3, 16  ;;  %v463_v23 = vshll.u32 %v8360_v11, 16  ;;  %v8416_v10 = vld [vmem:[%s8262_s13 + $0x4c] sm:$0xf] }
  0x3e   : > { %10337 = vst [vmem:[#allocation8_spill] sm:$0xff] %v8362_v12  ;;  %7210 = vmatmul.mubr.msk.bf16.gmra.mrb[4].mxu0 %vm765_vm4, %v8362_v12  ;;  %v452_v20 = vsel %vm8274_vm3, %v447_v13, %v451_v60  ;;  %v3158_v21 = vor.u32 %v3157_v14, %v3153_v9  ;;  %v467_v24 = vshrl.u32 %v8360_v11, 16  ;;  %v456_v29 = vrot.slane %v454_v18, 4  ;;  %v3008_v18 = vld [vmem:[%s8262_s13 + $0x50] sm:$0x1] }
  0x3f   : > { %v8376_v27 = vcombine.low %v442_v4, %v452_v20  ;;  %v3149_v28 = vrot.slane %v3148_v15, 4  ;;  %v459_v30 = vrot.slane %v457_v19, 5  ;;  %v465_v34 = vrot.slane %v463_v23, 5 }
  0x40   : > { %v3159_v33 = vrot.slane %v3158_v21, 4  ;;  %v469_v5 = vrot.slane %v467_v24, 4  ;;  %v473_v35 = vshll.u32 %v290_v17, 16  ;;  %v3166_v39 = vshrl.u32 %v8374_v26, 16 }
  0x41   : > { %10338 = vst [vmem:[#allocation9_spill] sm:$0xff] %v8376_v27  ;;  %6907 = vmatprep.mubr.msk.bf16.mxu1 %vm765_vm4, %v8376_v27  ;;  %v3154_v36 = vsel %vm8274_vm3, %v3149_v28, %v3153_v9  ;;  %v460_v37 = vor.u32 %v459_v30, %v456_v29  ;;  %v3169_v40 = vshll.u32 %v8374_v26, 16  ;;  %v3175_v44 = vshll.u32 %v8379_v32, 16 }
  0x42   : > { %v3164_v41 = vsel %vm8274_vm3, %v3159_v33, %v3163_v16  ;;  %v470_v42 = vor.u32 %v469_v5, %v465_v34  ;;  %v475_v43 = vrot.slane %v473_v35, 5  ;;  %v3168_v48 = vrot.slane %v3166_v39, 4  ;;  %v8429_v5 = vld [vmem:[%s8257_s10 + $0x54] sm:$0xf]  ;;  %v8434_v39 = vld [vmem:[%s8257_s10 + $0x58] sm:$0xf] }
  0x43   : > { %v8394_v46 = vcombine.low %v3154_v36, %v3164_v41  ;;  %v461_v47 = vrot.slane %v460_v37, 4  ;;  %v3171_v51 = vrot.slane %v3169_v40, 5  ;;  %v3177_v54 = vrot.slane %v3175_v44, 5  ;;  %v296_v44 = vld [vmem:[%s8257_s10 + $0x5c] sm:$0x1] }
  0x44   : > { %v471_v53 = vrot.slane %v470_v42, 4  ;;  %v3179_v55 = vshrl.u32 %v8379_v32, 16  ;;  %v3185_v56 = vshll.u32 %v3005_v38, 16  ;;  %v478_v60 = vshrl.u32 %v8392_v45, 16 }
  0x45   : > { %10339 = vst [vmem:[#allocation10_spill] sm:$0xff] %v8394_v46  ;;  %7213 = vmatprep.mubr.msk.bf16.mxu0 %vm765_vm4, %v8394_v46  ;;  %v466_v57 = vsel %vm8274_vm3, %v461_v47, %v465_v34  ;;  %v3172_v58 = vor.u32 %v3171_v51, %v3168_v48  ;;  %v481_v61 = vshll.u32 %v8392_v45, 16  ;;  %v487_v1 = vshll.u32 %v8397_v52, 16 }
  0x46   : > { %v476_v62 = vsel %vm8274_vm3, %v471_v53, %v475_v43  ;;  %v3181_v63 = vrot.slane %v3179_v55, 4  ;;  %v3187_v0 = vrot.slane %v3185_v56, 5  ;;  %v480_v8 = vrot.slane %v478_v60, 4 }
  0x47   : > { %v8413_v3 = vcombine.low %v466_v57, %v476_v62  ;;  %v3173_v7 = vrot.slane %v3172_v58, 4  ;;  %v483_v9 = vrot.slane %v481_v61, 5  ;;  %v489_v13 = vrot.slane %v487_v1, 5  ;;  %v8448_v58 = vld [vmem:[%s8262_s13 + $0x54] sm:$0xf] }
  0x48   : > { %v3182_v4 = vor.u32 %v3181_v63, %v3177_v54  ;;  %v491_v14 = vshrl.u32 %v8397_v52, 16  ;;  %v497_v15 = vshll.u32 %v293_v59, 16  ;;  %v3190_v19 = vshrl.u32 %v8411_v2, 16  ;;  %v8453_v63 = vld [vmem:[%s8262_s13 + $0x58] sm:$0xf] }
  0x49   : > { %10340 = vst [vmem:[#allocation11_spill] sm:$0xff] %v8413_v3  ;;  %6908 = vmatmul.mubr.msk.bf16.gmra.mrb[8].mxu1 %vm765_vm4, %v8413_v3  ;;  %v3178_v16 = vsel %vm8274_vm3, %v3173_v7, %v3177_v54  ;;  %v484_v17 = vor.u32 %v483_v9, %v480_v8  ;;  %v3193_v20 = vshll.u32 %v8411_v2, 16  ;;  %v3199_v28 = vshll.u32 %v8416_v10, 16 }
  0x4a   : > { %v3183_v21 = vrot.slane %v3182_v4, 4  ;;  %v493_v23 = vrot.slane %v491_v14, 4  ;;  %v499_v24 = vrot.slane %v497_v15, 5  ;;  %v3192_v30 = vrot.slane %v3190_v19, 4  ;;  %v3011_v14 = vld [vmem:[%s8262_s13 + $0x5c] sm:$0x1] }
  0x4b   : > { %v485_v29 = vrot.slane %v484_v17, 4  ;;  %v3195_v33 = vrot.slane %v3193_v20, 5  ;;  %v3203_v34 = vshrl.u32 %v8416_v10, 16  ;;  %v3201_v37 = vrot.slane %v3199_v28, 5  ;;  %v8469_v20 = vld [vmem:[%s8257_s10 + $0x60] sm:$0xf] }
  0x4c   : > { %v3188_v35 = vsel %vm8274_vm3, %v3183_v21, %v3187_v0  ;;  %v494_v36 = vor.u32 %v493_v23, %v489_v13  ;;  %v3209_v38 = vshll.u32 %v3008_v18, 16  ;;  %v502_v51 = vshrl.u32 %v8429_v5, 16 }
  0x4d   : > { %v8436_v40 = vcombine.low %v3178_v16, %v3188_v35  ;;  %v490_v41 = vsel %vm8274_vm3, %v485_v29, %v489_v13  ;;  %v3196_v42 = vor.u32 %v3195_v33, %v3192_v30  ;;  %v3205_v43 = vrot.slane %v3203_v34, 4  ;;  %v8474_v29 = vld [vmem:[%s8257_s10 + $0x64] sm:$0xf] }
  0x4e   : > { %v495_v47 = vrot.slane %v494_v36, 4  ;;  %v3211_v48 = vrot.slane %v3209_v38, 5  ;;  %v505_v53 = vshll.u32 %v8429_v5, 16  ;;  %v511_v56 = vshll.u32 %v8434_v39, 16  ;;  %v299_v36 = vld [vmem:[%s8257_s10 + $0x68] sm:$0x1] }
  0x4f   : > { %10341 = vst [vmem:[#allocation12_spill] sm:$0xff] %v8436_v40  ;;  %7214 = vmatmul.mubr.msk.bf16.gmra.mrb[8].mxu0 %vm765_vm4, %v8436_v40  ;;  %v3197_v54 = vrot.slane %v3196_v42, 4  ;;  %v3206_v55 = vor.u32 %v3205_v43, %v3201_v37  ;;  %v515_v57 = vshrl.u32 %v8434_v39, 16  ;;  %v504_v60 = vrot.slane %v502_v51, 4  ;;  %v8484_v43 = vld [vmem:[%s8262_s13 + $0x60] sm:$0xf] }
  0x50   : > { %v500_v59 = vsel %vm8274_vm3, %v495_v47, %v499_v24  ;;  %v507_v61 = vrot.slane %v505_v53, 5  ;;  %v521_v62 = vshll.u32 %v296_v44, 16  ;;  %v513_v8 = vrot.slane %v511_v56, 5  ;;  %v8490_v53 = vld [vmem:[%s10176_s2 + $0x2] sm:$0x1] }
  0x51   : > { %v8455_v0 = vcombine.low %v490_v41, %v500_v59  ;;  %v3202_v1 = vsel %vm8274_vm3, %v3197_v54, %v3201_v37  ;;  %v3207_v7 = vrot.slane %v3206_v55, 4  ;;  %v517_v4 = vrot.slane %v515_v57, 4  ;;  %v8495_v54 = vld [vmem:[%s10177_s3 + $0x2] sm:$0x1]  ;;  %8055 = vmatprep.subr.msk.bf16.mxu1 %vm814_vm0, %v8490_v53 }
  0x52   : > { %v508_v9 = vor.u32 %v507_v61, %v504_v60  ;;  %v523_v13 = vrot.slane %v521_v62, 5  ;;  %v3214_v15 = vshrl.u32 %v8448_v58, 16  ;;  %v3217_v17 = vshll.u32 %v8448_v58, 16  ;;  %v8501_v60 = vld [vmem:[%s8262_s13 + $0x64] sm:$0xf]  ;;  %8064 = vmatprep.subr.msk.bf16.mxu0 %vm814_vm0, %v8495_v54 }
  0x53   : > { %10342 = vst [vmem:[#allocation13_spill] sm:$0xff] %v8455_v0  ;;  %6911 = vmatprep.mubr.msk.bf16.mxu1 %vm765_vm4, %v8455_v0  ;;  %v3212_v16 = vsel %vm8274_vm3, %v3207_v7, %v3211_v48  ;;  %v3223_v18 = vshll.u32 %v8453_v63, 16  ;;  %v3227_v19 = vshrl.u32 %v8453_v63, 16  ;;  %v518_v24 = vor.u32 %v517_v4, %v513_v8  ;;  %v8635_v0 = vld [vmem:[%s8262_s13 + $0x8c] sm:$0x1] }
  0x54   : > { %v8471_v21 = vcombine.low %v3202_v1, %v3212_v16  ;;  %v509_v23 = vrot.slane %v508_v9, 4  ;;  %v3216_v28 = vrot.slane %v3214_v15, 4  ;;  %v3219_v30 = vrot.slane %v3217_v17, 5  ;;  %v3014_v16 = vld [vmem:[%s8262_s13 + $0x68] sm:$0x1]  ;;  %10354 = vst [vmem:[#allocation25_spill] sm:$0xff] %v8635_v0 }
  0x55   : > { %v3225_v33 = vrot.slane %v3223_v18, 5  ;;  %v3229_v34 = vrot.slane %v3227_v19, 4  ;;  %v3233_v35 = vshll.u32 %v3011_v14, 16  ;;  %v519_v38 = vrot.slane %v518_v24, 4  ;;  %v8520_v19 = vld [vmem:[%s8257_s10 + $0x6c] sm:$0xf] }
  0x56   : > { %10343 = vst [vmem:[#allocation14_spill] sm:$0xff] %v8471_v21  ;;  %7217 = vmatprep.mubr.msk.bf16.mxu0 %vm765_vm4, %v8471_v21  ;;  %v514_v37 = vsel %vm8274_vm3, %v509_v23, %v513_v8  ;;  %v526_v41 = vshrl.u32 %v8469_v20, 16  ;;  %v529_v42 = vshll.u32 %v8469_v20, 16  ;;  %v3220_v44 = vor.u32 %v3219_v30, %v3216_v28 }
  0x57   : > { %v3230_v47 = vor.u32 %v3229_v34, %v3225_v33  ;;  %v3235_v48 = vrot.slane %v3233_v35, 5  ;;  %v535_v51 = vshll.u32 %v8474_v29, 16  ;;  %v524_v55 = vsel %vm8274_vm3, %v519_v38, %v523_v13  ;;  %v8525_v34 = vld [vmem:[%s8257_s10 + $0x70] sm:$0xf] }
  0x58   : > { %v528_v56 = vrot.slane %v526_v41, 4  ;;  %v531_v57 = vrot.slane %v529_v42, 5  ;;  %v539_v59 = vshrl.u32 %v8474_v29, 16  ;;  %v8507_v61 = vcombine.low %v514_v37, %v524_v55 }
  0x59   : > { %v3221_v62 = vrot.slane %v3220_v44, 4  ;;  %v3231_v1 = vrot.slane %v3230_v47, 4  ;;  %v537_v7 = vrot.slane %v535_v51, 5  ;;  %v545_v4 = vshll.u32 %v299_v36, 16  ;;  %v302_v44 = vld [vmem:[%s8257_s10 + $0x74] sm:$0x1] }
  0x5a   : > { %10344 = vst [vmem:[#allocation15_spill] sm:$0xff] %v8507_v61  ;;  %v532_v8 = vor.u32 %v531_v57, %v528_v56  ;;  %v541_v9 = vrot.slane %v539_v59, 4  ;;  %v3238_v13 = vshrl.u32 %v8484_v43, 16  ;;  %6912 = vmatmul.mubr.msk.bf16.gmra.mrb[12].mxu1 %vm765_vm4, %v8507_v61  ;;  %v3241_v17 = vshll.u32 %v8484_v43, 16  ;;  %v8537_v57 = vld [vmem:[%s8262_s13 + $0x6c] sm:$0xf] }
  0x5b   : > { %v3226_v14 = vsel %vm8274_vm3, %v3221_v62, %v3225_v33  ;;  %v3236_v15 = vsel %vm8274_vm3, %v3231_v1, %v3235_v48  ;;  %v3247_v18 = vshll.u32 %v8501_v60, 16  ;;  %v547_v30 = vrot.slane %v545_v4, 5 }
  0x5c   : > { %v8522_v23 = vcombine.low %v3226_v14, %v3236_v15  ;;  %v533_v24 = vrot.slane %v532_v8, 4  ;;  %v542_v28 = vor.u32 %v541_v9, %v537_v7  ;;  %v3240_v33 = vrot.slane %v3238_v13, 4  ;;  %v8545_v14 = vld [vmem:[%s8262_s13 + $0x70] sm:$0xf] }
  0x5d   : > { %v3243_v35 = vrot.slane %v3241_v17, 5  ;;  %v3249_v36 = vrot.slane %v3247_v18, 5  ;;  %v3251_v37 = vshrl.u32 %v8501_v60, 16  ;;  %v3257_v42 = vshll.u32 %v3014_v16, 16 }
  0x5e   : > { %10345 = vst [vmem:[#allocation16_spill] sm:$0xff] %v8522_v23  ;;  %7218 = vmatmul.mubr.msk.bf16.gmra.mrb[12].mxu0 %vm765_vm4, %v8522_v23  ;;  %v538_v38 = vsel %vm8274_vm3, %v533_v24, %v537_v7  ;;  %v543_v41 = vrot.slane %v542_v28, 4  ;;  %v550_v47 = vshrl.u32 %v8520_v19, 16  ;;  %v553_v55 = vshll.u32 %v8520_v19, 16 }
  0x5f   : > { %v3244_v48 = vor.u32 %v3243_v35, %v3240_v33  ;;  %v3253_v51 = vrot.slane %v3251_v37, 4  ;;  %v559_v56 = vshll.u32 %v8525_v34, 16  ;;  %v3259_v62 = vrot.slane %v3257_v42, 5  ;;  %v3017_v33 = vld [vmem:[%s8262_s13 + $0x74] sm:$0x1] }
  0x60   : > { %v548_v59 = vsel %vm8274_vm3, %v543_v41, %v547_v30  ;;  %v552_v1 = vrot.slane %v550_v47, 4  ;;  %v563_v7 = vshrl.u32 %v8525_v34, 16  ;;  %v555_v13 = vrot.slane %v553_v55, 5  ;;  %v8562_v55 = vld [vmem:[%s8257_s10 + $0x7c] sm:$0xf] }
  0x61   : > { %v8542_v8 = vcombine.low %v538_v38, %v548_v59  ;;  %v3245_v9 = vrot.slane %v3244_v48, 4  ;;  %v3254_v4 = vor.u32 %v3253_v51, %v3249_v36  ;;  %v561_v15 = vrot.slane %v559_v56, 5 }
  0x62   : > { %v565_v16 = vrot.slane %v563_v7, 4  ;;  %v569_v17 = vshll.u32 %v302_v44, 16  ;;  %v3262_v18 = vshrl.u32 %v8537_v57, 16  ;;  %v556_v30 = vor.u32 %v555_v13, %v552_v1  ;;  %v8556_v44 = vld [vmem:[%s8257_s10 + $0x78] sm:$0xf] }
  0x63   : > { %10346 = vst [vmem:[#allocation17_spill] sm:$0xff] %v8542_v8  ;;  %6915 = vmatprep.mubr.msk.bf16.mxu1 %vm765_vm4, %v8542_v8  ;;  %v3250_v24 = vsel %vm8274_vm3, %v3245_v9, %v3249_v36  ;;  %v3255_v28 = vrot.slane %v3254_v4, 4  ;;  %v3265_v35 = vshll.u32 %v8537_v57, 16  ;;  %v3271_v42 = vshll.u32 %v8545_v14, 16 }
  0x64   : > { %v566_v37 = vor.u32 %v565_v16, %v561_v15  ;;  %v571_v38 = vrot.slane %v569_v17, 5  ;;  %v3264_v41 = vrot.slane %v3262_v18, 4  ;;  %v557_v48 = vrot.slane %v556_v30, 4  ;;  %v8569_v16 = vld [vmem:[%s8257_s10 + $0x80] sm:$0x1] }
  0x65   : > { %v3260_v47 = vsel %vm8274_vm3, %v3255_v28, %v3259_v62  ;;  %v3267_v51 = vrot.slane %v3265_v35, 5  ;;  %v3275_v36 = vshrl.u32 %v8545_v14, 16  ;;  %v3273_v1 = vrot.slane %v3271_v42, 5  ;;  %10348 = vst [vmem:[#allocation19_spill] sm:$0xff] %v8569_v16  ;;  %v8579_v30 = vld [vmem:[%s8262_s13 + $0x78] sm:$0xf] }
  0x66   : > { %v8564_v56 = vcombine.low %v3250_v24, %v3260_v47  ;;  %v567_v59 = vrot.slane %v566_v37, 4  ;;  %v3281_v7 = vshll.u32 %v3017_v33, 16  ;;  %v562_v9 = vsel %vm8274_vm3, %v557_v48, %v561_v15 }
  0x67   : > { %v3268_v4 = vor.u32 %v3267_v51, %v3264_v41  ;;  %v3277_v13 = vrot.slane %v3275_v36, 4  ;;  %v574_v62 = vshrl.u32 %v8556_v44, 16  ;;  %v577_v24 = vshll.u32 %v8556_v44, 16  ;;  %v8584_v41 = vld [vmem:[%s8262_s13 + $0x7c] sm:$0xf] }
  0x68   : > { %10347 = vst [vmem:[#allocation18_spill] sm:$0xff] %v8564_v56  ;;  %7221 = vmatprep.mubr.msk.bf16.mxu0 %vm765_vm4, %v8564_v56  ;;  %v572_v17 = vsel %vm8274_vm3, %v567_v59, %v571_v38  ;;  %v3283_v18 = vrot.slane %v3281_v7, 5  ;;  %v583_v28 = vshll.u32 %v8562_v55, 16  ;;  %v587_v38 = vshrl.u32 %v8562_v55, 16  ;;  %v8593_v59 = vld [vmem:[%s8262_s13 + $0x80] sm:$0x1] }
  0x69   : > { %v8581_v15 = vcombine.low %v562_v9, %v572_v17  ;;  %v3269_v33 = vrot.slane %v3268_v4, 4  ;;  %v3278_v35 = vor.u32 %v3277_v13, %v3273_v1  ;;  %v576_v37 = vrot.slane %v574_v62, 4  ;;  %10350 = vst [vmem:[#allocation21_spill] sm:$0xff] %v8593_v59 }
  0x6a   : > { %v579_v42 = vrot.slane %v577_v24, 5  ;;  %v585_v47 = vrot.slane %v583_v28, 5  ;;  %v593_v48 = vshll.u32 %v8569_v16, 16  ;;  %v3286_v7 = vshrl.u32 %v8579_v30, 16  ;;  %v8599_v24 = vld [vmem:[%s8257_s10 + $0x84] sm:$0xf] }
  0x6b   : > { %10349 = vst [vmem:[#allocation20_spill] sm:$0xff] %v8581_v15  ;;  %6916 = vmatmul.mubr.msk.bf16.gmra.mrb[16].mxu1 %vm765_vm4, %v8581_v15  ;;  %v3274_v51 = vsel %vm8274_vm3, %v3269_v33, %v3273_v1  ;;  %v3279_v36 = vrot.slane %v3278_v35, 4  ;;  %v3289_v9 = vshll.u32 %v8579_v30, 16  ;;  %v589_v13 = vrot.slane %v587_v38, 4  ;;  %v8605_v35 = vld [vmem:[%s8257_s10 + $0x88] sm:$0xf] }
  0x6c   : > { %v580_v4 = vor.u32 %v579_v42, %v576_v37  ;;  %v595_v62 = vrot.slane %v593_v48, 5  ;;  %v3295_v17 = vshll.u32 %v8584_v41, 16  ;;  %v3288_v56 = vrot.slane %v3286_v7, 4 }
  0x6d   : > { %v3284_v28 = vsel %vm8274_vm3, %v3279_v36, %v3283_v18  ;;  %v3291_v1 = vrot.slane %v3289_v9, 5  ;;  %v3299_v33 = vshrl.u32 %v8584_v41, 16  ;;  %v590_v37 = vor.u32 %v589_v13, %v585_v47 }
  0x6e   : > { %v8607_v15 = vcombine.low %v3274_v51, %v3284_v28  ;;  %v581_v8 = vrot.slane %v580_v4, 4  ;;  %v3297_v42 = vrot.slane %v3295_v17, 5  ;;  %v3305_v23 = vshll.u32 %v8593_v59, 16  ;;  %v8616_v51 = vld [vmem:[%s8257_s10 + $0x8c] sm:$0x1] }
  0x6f   : > { %v3292_v38 = vor.u32 %v3291_v1, %v3288_v56  ;;  %v3301_v48 = vrot.slane %v3299_v33, 4  ;;  %v598_v21 = vshrl.u32 %v8599_v24, 16  ;;  %v591_v36 = vrot.slane %v590_v37, 4  ;;  %10352 = vst [vmem:[#allocation23_spill] sm:$0xff] %v8616_v51  ;;  %v8621_v28 = vld [vmem:[%s8262_s13 + $0x84] sm:$0xf] }
  0x70   : > { %10351 = vst [vmem:[#allocation22_spill] sm:$0xff] %v8607_v15  ;;  %7222 = vmatmul.mubr.msk.bf16.gmra.mrb[16].mxu0 %vm765_vm4, %v8607_v15  ;;  %v586_v18 = vsel %vm8274_vm3, %v581_v8, %v585_v47  ;;  %v601_v7 = vshll.u32 %v8599_v24, 16  ;;  %v607_v9 = vshll.u32 %v8605_v35, 16  ;;  %v3307_v13 = vrot.slane %v3305_v23, 5  ;;  %v8627_v47 = vld [vmem:[%s8262_s13 + $0x88] sm:$0xf] }
  0x71   : > { %v3293_v56 = vrot.slane %v3292_v38, 4  ;;  %v3302_v4 = vor.u32 %v3301_v48, %v3297_v42  ;;  %v600_v17 = vrot.slane %v598_v21, 4  ;;  %v596_v1 = vsel %vm8274_vm3, %v591_v36, %v595_v62 }
  0x72   : > { %v603_v33 = vrot.slane %v601_v7, 5  ;;  %v609_v15 = vrot.slane %v607_v9, 5  ;;  %v611_v8 = vshrl.u32 %v8605_v35, 16  ;;  %v8629_v37 = vcombine.low %v586_v18, %v596_v1 }
  0x73   : > { %v3298_v38 = vsel %vm8274_vm3, %v3293_v56, %v3297_v42  ;;  %v3303_v48 = vrot.slane %v3302_v4, 4  ;;  %v617_v21 = vshll.u32 %v8616_v51, 16  ;;  %v3310_v62 = vshrl.u32 %v8621_v28, 16  ;;  %v8646_v56 = vld [vmem:[%s8257_s10 + $0x90] sm:$0xf] }
  0x74   : > { %10353 = vst [vmem:[#allocation24_spill] sm:$0xff] %v8629_v37  ;;  %v604_v23 = vor.u32 %v603_v33, %v600_v17  ;;  %v613_v61 = vrot.slane %v611_v8, 4  ;;  %v3313_v36 = vshll.u32 %v8621_v28, 16  ;;  %6919 = vmatprep.mubr.msk.bf16.mxu1 %vm765_vm4, %v8629_v37  ;;  %v3319_v42 = vshll.u32 %v8627_v47, 16  ;;  %v8651_v8 = vld [vmem:[%s8257_s10 + $0x94] sm:$0xf] }
  0x75   : > { %v3308_v18 = vsel %vm8274_vm3, %v3303_v48, %v3307_v13  ;;  %v619_v7 = vrot.slane %v617_v21, 5  ;;  %v3323_v9 = vshrl.u32 %v8627_v47, 16  ;;  %v3312_v33 = vrot.slane %v3310_v62, 4 }
  0x76   : > { %v8648_v4 = vcombine.low %v3298_v38, %v3308_v18  ;;  %v605_v17 = vrot.slane %v604_v23, 4  ;;  %v614_v1 = vor.u32 %v613_v61, %v609_v15  ;;  %v3315_v37 = vrot.slane %v3313_v36, 5  ;;  %v8661_v36 = vld [vmem:[%s8257_s10 + $0x98] sm:$0x1] }
  0x77   : > { %v3321_v40 = vrot.slane %v3319_v42, 5  ;;  %v3325_v46 = vrot.slane %v3323_v9, 4  ;;  %v3329_v13 = vshll.u32 %v8635_v0, 16  ;;  %v622_v21 = vshrl.u32 %v8646_v56, 16  ;;  %10356 = vst [vmem:[#allocation27_spill] sm:$0xff] %v8661_v36 }
  0x78   : > { %10355 = vst [vmem:[#allocation26_spill] sm:$0xff] %v8648_v4  ;;  %7225 = vmatprep.mubr.msk.bf16.mxu0 %vm765_vm4, %v8648_v4  ;;  %v610_v38 = vsel %vm8274_vm3, %v605_v17, %v609_v15  ;;  %v615_v48 = vrot.slane %v614_v1, 4  ;;  %v625_v61 = vshll.u32 %v8646_v56, 16  ;;  %v3316_v23 = vor.u32 %v3315_v37, %v3312_v33  ;;  %v8665_v9 = vld [vmem:[%s8262_s13 + $0x90] sm:$0xf] }
  0x79   : > { %v3326_v62 = vor.u32 %v3325_v46, %v3321_v40  ;;  %v3331_v18 = vrot.slane %v3329_v13, 5  ;;  %v631_v42 = vshll.u32 %v8651_v8, 16  ;;  %v624_v3 = vrot.slane %v622_v21, 4  ;;  %v8671_v1 = vld [vmem:[%s8262_s13 + $0x94] sm:$0xf] }
  0x7a   : > { %v620_v4 = vsel %vm8274_vm3, %v615_v48, %v619_v7  ;;  %v627_v15 = vrot.slane %v625_v61, 5  ;;  %v635_v17 = vshrl.u32 %v8651_v8, 16  ;;  %v3317_v46 = vrot.slane %v3316_v23, 4  ;;  %v8689_v61 = vld [vmem:[%s8257_s10 + $0x9c] sm:$0xf] }
  0x7b   : > { %v8673_v37 = vcombine.low %v610_v38, %v620_v4  ;;  %v3327_v33 = vrot.slane %v3326_v62, 4  ;;  %v633_v13 = vrot.slane %v631_v42, 5  ;;  %v641_v25 = vshll.u32 %v8661_v36, 16  ;;  %v8684_v38 = vld [vmem:[%s8262_s13 + $0x98] sm:$0x1] }
  0x7c   : > { %v628_v27 = vor.u32 %v627_v15, %v624_v3  ;;  %v637_v12 = vrot.slane %v635_v17, 4  ;;  %v3334_v7 = vshrl.u32 %v8665_v9, 16  ;;  %v3322_v48 = vsel %vm8274_vm3, %v3317_v46, %v3321_v40  ;;  %10358 = vst [vmem:[#allocation29_spill] sm:$0xff] %v8684_v38  ;;  %v8694_v17 = vld [vmem:[%s8257_s10 + $0xa0] sm:$0xf] }
  0x7d   : > { %10357 = vst [vmem:[#allocation28_spill] sm:$0xff] %v8673_v37  ;;  %6920 = vmatmul.mubr.msk.bf16.gmra.mrb[20].mxu1 %vm765_vm4, %v8673_v37  ;;  %v3332_v4 = vsel %vm8274_vm3, %v3327_v33, %v3331_v18  ;;  %v3337_v21 = vshll.u32 %v8665_v9, 16  ;;  %v3343_v3 = vshll.u32 %v8671_v1, 16  ;;  %v643_v15 = vrot.slane %v641_v25, 5 }
  0x7e   : > { %v8691_v23 = vcombine.low %v3322_v48, %v3332_v4  ;;  %v629_v62 = vrot.slane %v628_v27, 4  ;;  %v638_v42 = vor.u32 %v637_v12, %v633_v13  ;;  %v3336_v40 = vrot.slane %v3334_v7, 4  ;;  %v8703_v12 = vld [vmem:[%s8257_s10 + $0xa4] sm:$0x1] }
  0x7f   : > { %v3339_v46 = vrot.slane %v3337_v21, 5  ;;  %v3345_v18 = vrot.slane %v3343_v3, 5  ;;  %v3347_v33 = vshrl.u32 %v8671_v1, 16  ;;  %v3353_v48 = vshll.u32 %v8684_v38, 16  ;;  %10360 = vst [vmem:[#allocation31_spill] sm:$0xff] %v8703_v12 }
  0x80   : > { %10359 = vst [vmem:[#allocation30_spill] sm:$0xff] %v8691_v23  ;;  %7226 = vmatmul.mubr.msk.bf16.gmra.mrb[20].mxu0 %vm765_vm4, %v8691_v23  ;;  %v634_v37 = vsel %vm8274_vm3, %v629_v62, %v633_v13  ;;  %v639_v50 = vrot.slane %v638_v42, 4  ;;  %v646_v25 = vshrl.u32 %v8689_v61, 16  ;;  %v649_v4 = vshll.u32 %v8689_v61, 16  ;;  %v8709_v3 = vld [vmem:[%s8262_s13 + $0x9c] sm:$0xf] }
  0x81   : > { %v3340_v27 = vor.u32 %v3339_v46, %v3336_v40  ;;  %v3349_v7 = vrot.slane %v3347_v33, 4  ;;  %v655_v21 = vshll.u32 %v8694_v17, 16  ;;  %10361 = vst [vmem:[#allocation32_spill] sm:$0xff] %v8709_v3  ;;  %v3355_v13 = vrot.slane %v3353_v48, 5  ;;  %v8717_v46 = vld [vmem:[%s8262_s13 + $0xa0] sm:$0xf] }
  0x82   : > { %v644_v23 = vsel %vm8274_vm3, %v639_v50, %v643_v15  ;;  %v648_v62 = vrot.slane %v646_v25, 4  ;;  %v659_v42 = vshrl.u32 %v8694_v17, 16  ;;  %v651_v40 = vrot.slane %v649_v4, 5  ;;  %10363 = vst [vmem:[#allocation34_spill] sm:$0xff] %v8717_v46  ;;  %v8726_v15 = vld [vmem:[%s8262_s13 + $0xa4] sm:$0x1] }
  0x83   : > { %v8714_v6 = vcombine.low %v634_v37, %v644_v23  ;;  %v3341_v49 = vrot.slane %v3340_v27, 4  ;;  %v3350_v22 = vor.u32 %v3349_v7, %v3345_v18  ;;  %v657_v33 = vrot.slane %v655_v21, 5  ;;  %10364 = vst [vmem:[#allocation35_spill] sm:$0xff] %v8726_v15  ;;  %v8731_v21 = vld [vmem:[%s8257_s10 + $0xa8] sm:$0xf] }
  0x84   : > { %v661_v38 = vrot.slane %v659_v42, 4  ;;  %v665_v0 = vshll.u32 %v8703_v12, 16  ;;  %v3358_v36 = vshrl.u32 %v8709_v3, 16  ;;  %v652_v23 = vor.u32 %v651_v40, %v648_v62 }
  0x85   : > { %10362 = vst [vmem:[#allocation33_spill] sm:$0xff] %v8714_v6  ;;  %6923 = vmatprep.mubr.msk.bf16.mxu1 %vm765_vm4, %v8714_v6  ;;  %v3346_v50 = vsel %vm8274_vm3, %v3341_v49, %v3345_v18  ;;  %v3351_v37 = vrot.slane %v3350_v22, 4  ;;  %v3361_v48 = vshll.u32 %v8709_v3, 16  ;;  %v3367_v4 = vshll.u32 %v8717_v46, 16  ;;  %v8737_v49 = vld [vmem:[%s8257_s10 + $0xac] sm:$0xf] }
  0x86   : > { %v662_v25 = vor.u32 %v661_v38, %v657_v33  ;;  %v667_v27 = vrot.slane %v665_v0, 5  ;;  %v3360_v7 = vrot.slane %v3358_v36, 4  ;;  %v653_v6 = vrot.slane %v652_v23, 4 }
  0x87   : > { %v3356_v42 = vsel %vm8274_vm3, %v3351_v37, %v3355_v13  ;;  %v3363_v12 = vrot.slane %v3361_v48, 5  ;;  %v3371_v22 = vshrl.u32 %v8717_v46, 16  ;;  %v3369_v0 = vrot.slane %v3367_v4, 5  ;;  %v8745_v13 = vld [vmem:[%s8257_s10 + $0xb0] sm:$0x1] }
  0x88   : > { %v8739_v18 = vcombine.low %v3346_v50, %v3356_v42  ;;  %v663_v38 = vrot.slane %v662_v25, 4  ;;  %v3377_v36 = vshll.u32 %v8726_v15, 16  ;;  %v658_v62 = vsel %vm8274_vm3, %v653_v6, %v657_v33  ;;  %10366 = vst [vmem:[#allocation37_spill] sm:$0xff] %v8745_v13  ;;  %v8755_v4 = vld [vmem:[%s8262_s13 + $0xa8] sm:$0xf] }
  0x89   : > { %v3364_v40 = vor.u32 %v3363_v12, %v3360_v7  ;;  %v3373_v51 = vrot.slane %v3371_v22, 4  ;;  %v670_v37 = vshrl.u32 %v8731_v21, 16  ;;  %v673_v48 = vshll.u32 %v8731_v21, 16  ;;  %10367 = vst [vmem:[#allocation38_spill] sm:$0xff] %v8755_v4  ;;  %v8760_v42 = vld [vmem:[%s8262_s13 + $0xac] sm:$0xf] }
  0x8a   : > { %10365 = vst [vmem:[#allocation36_spill] sm:$0xff] %v8739_v18  ;;  %7229 = vmatprep.mubr.msk.bf16.mxu0 %vm765_vm4, %v8739_v18  ;;  %v668_v50 = vsel %vm8274_vm3, %v663_v38, %v667_v27  ;;  %v3379_v23 = vrot.slane %v3377_v36, 5  ;;  %v679_v25 = vshll.u32 %v8737_v49, 16  ;;  %v683_v27 = vshrl.u32 %v8737_v49, 16 }
  0x8b   : > { %v8757_v6 = vcombine.low %v658_v62, %v668_v50  ;;  %v3365_v12 = vrot.slane %v3364_v40, 4  ;;  %v3374_v33 = vor.u32 %v3373_v51, %v3369_v0  ;;  %v672_v7 = vrot.slane %v670_v37, 4  ;;  %v8769_v40 = vld [vmem:[%s8262_s13 + $0xb0] sm:$0x1] }
  0x8c   : > { %v675_v22 = vrot.slane %v673_v48, 5  ;;  %v681_v18 = vrot.slane %v679_v25, 5  ;;  %v689_v38 = vshll.u32 %v8745_v13, 16  ;;  %10369 = vst [vmem:[#allocation40_spill] sm:$0xff] %v8769_v40  ;;  %v3382_v51 = vshrl.u32 %v8755_v4, 16 }
  0x8d   : > { %10368 = vst [vmem:[#allocation39_spill] sm:$0xff] %v8757_v6  ;;  %6924 = vmatmul.mubr.msk.bf16.gmra.mrb[24].mxu1 %vm765_vm4, %v8757_v6  ;;  %v3370_v36 = vsel %vm8274_vm3, %v3365_v12, %v3369_v0  ;;  %v3375_v62 = vrot.slane %v3374_v33, 4  ;;  %v3385_v37 = vshll.u32 %v8755_v4, 16  ;;  %v685_v48 = vrot.slane %v683_v27, 4  ;;  %v8775_v13 = vld [vmem:[%s8257_s10 + $0xb4] sm:$0xf] }
  0x8e   : > { %v676_v50 = vor.u32 %v675_v22, %v672_v7  ;;  %v691_v25 = vrot.slane %v689_v38, 5  ;;  %v3391_v15 = vshll.u32 %v8760_v42, 16  ;;  %10370 = vst [vmem:[#allocation41_spill] sm:$0xff] %v8775_v13  ;;  %v3384_v59 = vrot.slane %v3382_v51, 4  ;;  %v8781_v33 = vld [vmem:[%s8257_s10 + $0xb8] sm:$0xf] }
  0x8f   : > { %v3380_v6 = vsel %vm8274_vm3, %v3375_v62, %v3379_v23  ;;  %v3387_v0 = vrot.slane %v3385_v37, 5  ;;  %v3395_v12 = vshrl.u32 %v8760_v42, 16  ;;  %v686_v7 = vor.u32 %v685_v48, %v681_v18  ;;  %v8797_v48 = vld [vmem:[%s8262_s13 + $0xb4] sm:$0xf] }
  0x90   : > { %v8783_v16 = vcombine.low %v3370_v36, %v3380_v6  ;;  %v677_v4 = vrot.slane %v676_v50, 4  ;;  %v3393_v22 = vrot.slane %v3391_v15, 5  ;;  %v3401_v3 = vshll.u32 %v8769_v40, 16  ;;  %v8792_v6 = vld [vmem:[%s8257_s10 + $0xbc] sm:$0x1] }
  0x91   : > { %v3388_v27 = vor.u32 %v3387_v0, %v3384_v59  ;;  %v3397_v38 = vrot.slane %v3395_v12, 4  ;;  %v694_v46 = vshrl.u32 %v8775_v13, 16  ;;  %v687_v62 = vrot.slane %v686_v7, 4  ;;  %10372 = vst [vmem:[#allocation43_spill] sm:$0xff] %v8792_v6 }
  0x92   : > { %10371 = vst [vmem:[#allocation42_spill] sm:$0xff] %v8783_v16  ;;  %7230 = vmatmul.mubr.msk.bf16.gmra.mrb[24].mxu0 %vm765_vm4, %v8783_v16  ;;  %v682_v23 = vsel %vm8274_vm3, %v677_v4, %v681_v18  ;;  %v697_v36 = vshll.u32 %v8775_v13, 16  ;;  %v703_v15 = vshll.u32 %v8781_v33, 16  ;;  %v3403_v37 = vrot.slane %v3401_v3, 5  ;;  %v8803_v4 = vld [vmem:[%s8262_s13 + $0xb8] sm:$0xf] }
  0x93   : > { %v3389_v59 = vrot.slane %v3388_v27, 4  ;;  %v3398_v51 = vor.u32 %v3397_v38, %v3393_v22  ;;  %v696_v50 = vrot.slane %v694_v46, 4  ;;  %v692_v0 = vsel %vm8274_vm3, %v687_v62, %v691_v25  ;;  %v8811_v13 = vld [vmem:[%s8262_s13 + $0xbc] sm:$0x1] }
  0x94   : > { %v699_v12 = vrot.slane %v697_v36, 5  ;;  %v705_v16 = vrot.slane %v703_v15, 5  ;;  %v707_v18 = vshrl.u32 %v8781_v33, 16  ;;  %v8805_v7 = vcombine.low %v682_v23, %v692_v0  ;;  %10374 = vst [vmem:[#allocation45_spill] sm:$0xff] %v8811_v13 }
  0x95   : > { %v3394_v27 = vsel %vm8274_vm3, %v3389_v59, %v3393_v22  ;;  %v3399_v40 = vrot.slane %v3398_v51, 4  ;;  %v713_v3 = vshll.u32 %v8792_v6, 16  ;;  %v3406_v25 = vshrl.u32 %v8797_v48, 16 }
  0x96   : > { %10373 = vst [vmem:[#allocation44_spill] sm:$0xff] %v8805_v7  ;;  %v700_v46 = vor.u32 %v699_v12, %v696_v50  ;;  %v709_v38 = vrot.slane %v707_v18, 4  ;;  %v3409_v62 = vshll.u32 %v8797_v48, 16  ;;  %6927 = vmatprep.mubr.msk.bf16.mxu1 %vm765_vm4, %v8805_v7  ;;  %v3415_v22 = vshll.u32 %v8803_v4, 16 }
  0x97   : > { %v3404_v23 = vsel %vm8274_vm3, %v3399_v40, %v3403_v37  ;;  %v715_v36 = vrot.slane %v713_v3, 5  ;;  %v3419_v15 = vshrl.u32 %v8803_v4, 16  ;;  %v3408_v0 = vrot.slane %v3406_v25, 4  ;;  %v8834_v25 = vld [vmem:[%s8257_s10 + $0x4] sm:$0xf] }
  0x98   : > { %v8821_v59 = vcombine.low %v3394_v27, %v3404_v23  ;;  %v701_v51 = vrot.slane %v700_v46, 4  ;;  %v710_v50 = vor.u32 %v709_v38, %v705_v16  ;;  %v3411_v12 = vrot.slane %v3409_v62, 5  ;;  %v8831_v38 = vld [vmem:[%s8257_s10] sm:$0xf] }
  0x99   : > { %v3417_v18 = vrot.slane %v3415_v22, 5  ;;  %v3421_v6 = vrot.slane %v3419_v15, 4  ;;  %v3425_v7 = vshll.u32 %v8811_v13, 16  ;;  %v6107_v62 = vcombine.low %v8831_v38, %v8834_v25  ;;  %v8962_v13 = vld [vmem:[%s8262_s13 + $0x34] sm:$0xf] }
  0x9a   : > { %10375 = vst [vmem:[#allocation46_spill] sm:$0xff] %v8821_v59  ;;  %7233 = vmatprep.mubr.msk.bf16.mxu0 %vm765_vm4, %v8821_v59  ;;  %v706_v40 = vsel %vm8274_vm3, %v701_v51, %v705_v16  ;;  %v711_v37 = vrot.slane %v710_v50, 4  ;;  %v3412_v27 = vor.u32 %v3411_v12, %v3408_v0  ;;  %v8850_v51 = vld [vmem:[%s8262_s13 + $0x4] sm:$0xf]  ;;  %v8861_v12 = vld [vmem:[%s8257_s10 + $0xc] sm:$0xf] }
  0x9b   : > { %v3422_v3 = vor.u32 %v3421_v6, %v3417_v18  ;;  %v3427_v23 = vrot.slane %v3425_v7, 5 }
  0x9c   : > { %v716_v46 = vsel %vm8274_vm3, %v711_v37, %v715_v36  ;;  %v3413_v16 = vrot.slane %v3412_v27, 4  ;;  %v8847_v36 = vld [vmem:[%s8262_s13] sm:$0xf]  ;;  %v8871_v37 = vld [vmem:[%s8257_s10 + $0x18] sm:$0xf] }
  0x9d   : > { %v8838_v22 = vcombine.low %v706_v40, %v716_v46  ;;  %v3423_v15 = vrot.slane %v3422_v3, 4  ;;  %v6331_v50 = vcombine.low %v8847_v36, %v8850_v51  ;;  %v8874_v27 = vld [vmem:[%s8257_s10 + $0x1c] sm:$0xf]  ;;  %v8883_v46 = vld [vmem:[%s8262_s13 + $0xc] sm:$0xf] }
  0x9e   : > { %v3418_v6 = vsel %vm8274_vm3, %v3413_v16, %v3417_v18  ;;  %v8864_v18 = vld [vmem:[%s8257_s10 + $0x10] sm:$0xf]  ;;  %v8878_v3 = vcombine.low %v8871_v37, %v8874_v27 }
  0x9f   : > { %10376 = vst [vmem:[#allocation47_spill] sm:$0xff] %v8838_v22  ;;  %6928 = vmatmul.mubr.msk.bf16.gmra.mrb[28].mxu1 %vm765_vm4, %v8838_v22  ;;  %v3428_v7 = vsel %vm8274_vm3, %v3423_v15, %v3427_v23  ;;  %v8868_v40 = vcombine.low %v8861_v12, %v8864_v18  ;;  %v1501_v23 = vsel %vm814_vm0, %v8490_v53, 0  ;;  %v8895_v15 = vld [vmem:[%s10176_s2 + $0x3] sm:$0x1]  ;;  %v8900_v53 = vld [vmem:[%s8262_s13 + $0x18] sm:$0xf] }
  0xa0   : > { %v8854_v0 = vcombine.low %v3418_v6, %v3428_v7  ;;  %6933 = vmatprep.mubr.msk.bf16.mxu1 %vm765_vm4, %v6107_v62  ;;  %10379 = vst [vmem:[#allocation50_spill] sm:$0xff] %v8878_v3  ;;  %v8886_v62 = vld [vmem:[%s8262_s13 + $0x10] sm:$0xf]  ;;  %v8903_v6 = vld [vmem:[%s8262_s13 + $0x1c] sm:$0xf] }
  0xa1   : > { %10378 = vst [vmem:[#allocation49_spill] sm:$0xff] %v8868_v40  ;;  %v8890_v16 = vcombine.low %v8883_v46, %v8886_v62  ;;  %v8907_v7 = vcombine.low %v8900_v53, %v8903_v6  ;;  %v8938_v22 = vld [vmem:[%s8257_s10 + $0x34] sm:$0xf] }
  0xa2   : > { %10377 = vst [vmem:[#allocation48_spill] sm:$0xff] %v8854_v0  ;;  %7234 = vmatmul.mubr.msk.bf16.gmra.mrb[28].mxu0 %vm765_vm4, %v8854_v0  ;;  %v8918_v0 = vld [vmem:[%s10177_s3 + $0x3] sm:$0x1] }
  0xa3   : > { %7239 = vmatprep.mubr.msk.bf16.mxu0 %vm765_vm4, %v6331_v50  ;;  %10380 = vst [vmem:[#allocation51_spill] sm:$0xff] %v8890_v16  ;;  %10381 = vst [vmem:[#allocation52_spill] sm:$0xff] %v8907_v7  ;;  %v4208_v50 = vsel %vm814_vm0, %v8495_v54, 0  ;;  %v8925_v54 = vld [vmem:[%s8257_s10 + $0x24] sm:$0xf] }
  0xa4   : > { %10382 = vst [vmem:[#allocation53_spill] sm:$0xff] %v8918_v0 }
  0xa7   : > { %6934 = vmatmul.mubr.msk.bf16.vlgmr.msra.gmra.mrb[0].mxu1 %vm765_vm4, %v8868_v40  ;;  %v8959_v40 = vld [vmem:[%s8262_s13 + $0x30] sm:$0xf] }
  0xa8   : > { %6966 = vmatpush3.bf16.msra.mxu1 %v1501_v23  ;;  %6937 = vmatprep.mubr.msk.bf16.mxu1 %vm765_vm4, %v8878_v3  ;;  %v8928_v23 = vld [vmem:[%s8257_s10 + $0x28] sm:$0xf]  ;;  %v8942_v3 = vcombine.low %v8935_v31, %v8938_v22  ;;  %10386 = vst [vmem:[#allocation57_spill] sm:$0xff] %v8959_v40  ;;  %v8966_v31 = vcombine.low %v8959_v40, %v8962_v13 }
  0xa9   : > { %8056 = vmatprep.subr.msk.bf16.mxu1 %vm814_vm0, %v8895_v15  ;;  %v8932_v59 = vcombine.low %v8925_v54, %v8928_v23  ;;  %v8987_v40 = vcombine.low %v8374_v26, %v8379_v32  ;;  %v9007_v26 = vcombine.low %v8469_v20, %v8474_v29  ;;  %v9011_v32 = vcombine.low %v8448_v58, %v8453_v63 }
  0xaa   : > { %7240 = vmatmul.mubr.msk.bf16.vlgmr.msra.gmra.mrb[0].mxu0 %vm765_vm4, %v8890_v16  ;;  %10387 = vst [vmem:[#allocation58_spill] sm:$0xff] %v8966_v31  ;;  %v9055_v58 = vcombine.low %v8646_v56, %v8651_v8  ;;  %v9059_v63 = vcombine.low %v8621_v28, %v8627_v47  ;;  %v9065_v20 = vcombine.low %v8665_v9, %v8671_v1  ;;  %v1294_v29 = vrot.slane %v8834_v25, 5 }
  0xab   : > { %7272 = vmatpush3.bf16.msra.mxu0 %v4208_v50  ;;  %7243 = vmatprep.mubr.msk.bf16.mxu0 %vm765_vm4, %v8907_v7  ;;  %10383 = vst [vmem:[#allocation54_spill] sm:$0xff] %v8932_v59  ;;  %v8947_v50 = vld [vmem:[%s8262_s13 + $0x24] sm:$0xf]  ;;  %v8950_v7 = vld [vmem:[%s8262_s13 + $0x28] sm:$0xf]  ;;  %10391 = vst [vmem:[#allocation62_spill] sm:$0xff] %v9007_v26 }
  0xac   : > { %8065 = vmatprep.subr.msk.bf16.mxu0 %vm814_vm0, %v8918_v0  ;;  %10385 = vst [vmem:[#allocation56_spill] sm:$0xff] %v8947_v50  ;;  %v8954_v16 = vcombine.low %v8947_v50, %v8950_v7  ;;  %v8975_v0 = vld [vmem:[%s8257_s10 + $0x3c] sm:$0xf]  ;;  %v8983_v50 = vcombine.low %v8392_v45, %v8397_v52  ;;  %10392 = vst [vmem:[#allocation63_spill] sm:$0xff] %v9011_v32  ;;  %v9017_v45 = vcombine.low %v8484_v43, %v8501_v60 }
  0xad   : > { %v9027_v52 = vcombine.low %v8520_v19, %v8525_v34  ;;  %10399 = vst [vmem:[#allocation70_spill] sm:$0xff] %v9055_v58  ;;  %10400 = vst [vmem:[#allocation71_spill] sm:$0xff] %v9059_v63  ;;  %v9076_v43 = vcombine.low %v8689_v61, %v8694_v17  ;;  %v9080_v60 = vcombine.low %v8731_v21, %v8737_v49  ;;  %v4001_v19 = vrot.slane %v8850_v51, 5  ;;  %v8137_v34 = vld [vmem:[%s8257_s10 + $0x8] sm:$0x1]  ;;  %v10409_v51 = vld [vmem:[#allocation38_spill] sm:$0xff] }
  0xae   : > { %10388 = vst [vmem:[#allocation59_spill] sm:$0xff] %v8983_v50  ;;  %10393 = vst [vmem:[#allocation64_spill] sm:$0xff] %v9017_v45  ;;  %v1296_v25 = vrot.slane %v1294_v29, 4 }
  0xaf   : > { %6938 = vmatmul.mubr.msk.bf16.gmra.mrb[4].mxu1 %vm765_vm4, %v8932_v59  ;;  %v8979_v59 = vcombine.low %v8975_v0, %v8360_v11  ;;  %v9003_v11 = vcombine.low %v8429_v5, %v8434_v39  ;;  %10394 = vst [vmem:[#allocation65_spill] sm:$0xff] %v9027_v52  ;;  %v9041_v5 = vcombine.low %v8579_v30, %v8584_v41  ;;  %10401 = vst [vmem:[#allocation72_spill] sm:$0xff] %v9065_v20 }
  0xb0   : > { %6941 = vmatprep.mubr.msk.bf16.mxu1 %vm765_vm4, %v8942_v3  ;;  %v9051_v39 = vcombine.low %v8599_v24, %v8605_v35  ;;  %10402 = vst [vmem:[#allocation73_spill] sm:$0xff] %v9076_v43  ;;  %10403 = vst [vmem:[#allocation74_spill] sm:$0xff] %v9080_v60 }
  0xb1   : > { %10390 = vst [vmem:[#allocation61_spill] sm:$0xff] %v9003_v11  ;;  %10397 = vst [vmem:[#allocation68_spill] sm:$0xff] %v9041_v5 }
  0xb2   : > { %7244 = vmatmul.mubr.msk.bf16.gmra.mrb[4].mxu0 %vm765_vm4, %v8954_v16  ;;  %10398 = vst [vmem:[#allocation69_spill] sm:$0xff] %v9051_v39 }
  0xb3   : > { %7247 = vmatprep.mubr.msk.bf16.mxu0 %vm765_vm4, %v8966_v31  ;;  %v8993_v31 = vcombine.low %v8411_v2, %v8416_v10  ;;  %v9031_v2 = vcombine.low %v8556_v44, %v8562_v55  ;;  %v9035_v10 = vcombine.low %v8537_v57, %v8545_v14  ;;  %v1297_v57 = vrot.slane %v8137_v34, 5 }
  0xb4   : > { %v6140_v14 = vrot.slane %v8831_v38, 9  ;;  %v9098_v34 = vcombine.low %v10409_v51, %v8760_v42  ;;  %v8138_v38 = vld [vmem:[%s8262_s13 + $0x8] sm:$0x1] }
  0xb5   : > { %10389 = vst [vmem:[#allocation60_spill] sm:$0xff] %v8993_v31  ;;  %10395 = vst [vmem:[#allocation66_spill] sm:$0xff] %v9031_v2 }
  0xb6   : > { %10396 = vst [vmem:[#allocation67_spill] sm:$0xff] %v9035_v10 }
  0xb7   : > { %6942 = vmatmul.mubr.msk.bf16.gmra.mrb[8].mxu1 %vm765_vm4, %v8979_v59 }
  0xb8   : > { %6945 = vmatprep.mubr.msk.bf16.mxu1 %vm765_vm4, %v8983_v50  ;;  %v9130_v50 = vcombine.low %v8797_v48, %v8803_v4 }
  0xba   : > { %7248 = vmatmul.mubr.msk.bf16.gmra.mrb[8].mxu0 %vm765_vm4, %v8987_v40 }
  0xbb   : > { %7251 = vmatprep.mubr.msk.bf16.mxu0 %vm765_vm4, %v8993_v31  ;;  %v8141_v31 = vld [vmem:[%s8262_s13 + $0x14] sm:$0x1] }
  0xbf   : > { %6946 = vmatmul.mubr.msk.bf16.gmra.mrb[12].mxu1 %vm765_vm4, %v9003_v11  ;;  %v4011_v11 = vrot.slane %v8141_v31, 5  ;;  %v6366_v31 = vrot.slane %v8900_v53, 9 }
  0xc0   : > { %6949 = vmatprep.mubr.msk.bf16.mxu1 %vm765_vm4, %v9007_v26  ;;  %v8139_v26 = vld [vmem:[%s8257_s10 + $0x14] sm:$0x1] }
  0xc2   : > { %7252 = vmatmul.mubr.msk.bf16.gmra.mrb[12].mxu0 %vm765_vm4, %v9011_v32  ;;  %v8140_v32 = vld [vmem:[%s8257_s10 + $0x20] sm:$0x1] }
  0xc3   : > { %7255 = vmatprep.mubr.msk.bf16.mxu0 %vm765_vm4, %v9017_v45  ;;  %v4003_v45 = vrot.slane %v4001_v19, 4 }
  0xc7   : > { %6950 = vmatmul.mubr.msk.bf16.gmra.mrb[16].mxu1 %vm765_vm4, %v9027_v52  ;;  %v1295_v52 = vsel %vm9089_vm7, %v6140_v14, %v1294_v29  ;;  %v10411_v29 = vld [vmem:[#allocation41_spill] sm:$0xff] }
  0xc8   : > { %6953 = vmatprep.mubr.msk.bf16.mxu1 %vm765_vm4, %v9031_v2  ;;  %v4004_v2 = vrot.slane %v8138_v38, 5  ;;  %v6141_v38 = vrot.slane %v8861_v12, 9  ;;  %v9118_v14 = vcombine.low %v10411_v29, %v8781_v33  ;;  %v4015_v12 = vrot.slane %v8903_v6, 5  ;;  %10413 = vst [vmem:[#allocation41_spill] sm:$0xff] %v9130_v50 }
  0xca   : > { %7256 = vmatmul.mubr.msk.bf16.gmra.mrb[16].mxu0 %vm765_vm4, %v9035_v10  ;;  %v6364_v10 = vrot.slane %v8847_v36, 9  ;;  %v4008_v36 = vrot.slane %v8886_v62, 5  ;;  %10412 = vst [vmem:[#allocation38_spill] sm:$0xff] %v9118_v14 }
  0xcb   : > { %7259 = vmatprep.mubr.msk.bf16.mxu0 %vm765_vm4, %v9041_v5  ;;  %v10035_v5 = vld [vmem:[%s10179_s5] ss:$0 sm:$0xff] }
  0xcf   : > { %6954 = vmatmul.mubr.msk.bf16.gmra.mrb[20].mxu1 %vm765_vm4, %v9051_v39  ;;  %v1301_v39 = vrot.slane %v8864_v18, 5  ;;  %v1298_v18 = vsel %vm9089_vm7, %v1296_v25, %v1297_v57 }
  0xd0   : > { %6957 = vmatprep.mubr.msk.bf16.mxu1 %vm765_vm4, %v9055_v58  ;;  %v10404_v58 = vld [vmem:[#allocation34_spill] sm:$0xff]  ;;  %v6156_v25 = vcombine.low %v1295_v52, %v1298_v18  ;;  %v1322_v18 = vrot.slane %v8938_v22, 5 }
  0xd1   : > { %v1303_v57 = vrot.slane %v1301_v39, 4  ;;  %v1302_v52 = vsel %vm9089_vm7, %v6141_v38, %v1301_v39 }
  0xd2   : > { %7260 = vmatmul.mubr.msk.bf16.gmra.mrb[20].mxu0 %vm765_vm4, %v9059_v63  ;;  %v10405_v63 = vld [vmem:[#allocation32_spill] sm:$0xff] }
  0xd3   : > { %7263 = vmatprep.mubr.msk.bf16.mxu0 %vm765_vm4, %v9065_v20  ;;  %v9087_v20 = vcombine.low %v10405_v63, %v10404_v58  ;;  %10410 = vst [vmem:[#allocation32_spill] sm:$0xff] %v9098_v34 }
  0xd5   : > { %10406 = vst [vmem:[#allocation34_spill] sm:$0xff] %v9087_v20 }
  0xd7   : > { %6958 = vmatmul.mubr.msk.bf16.gmra.mrb[24].mxu1 %vm765_vm4, %v9076_v43  ;;  %v1308_v43 = vrot.slane %v8874_v27, 5  ;;  %v4002_v27 = vsel %vm9089_vm7, %v6364_v10, %v4001_v19  ;;  %v6365_v10 = vrot.slane %v8883_v46, 9  ;;  %v8142_v19 = vld [vmem:[%s8262_s13 + $0x20] sm:$0x1] }
  0xd8   : > { %6961 = vmatprep.mubr.msk.bf16.mxu1 %vm765_vm4, %v9080_v60  ;;  %v1304_v60 = vrot.slane %v8139_v26, 5  ;;  %v6142_v26 = vrot.slane %v8871_v37, 9  ;;  %v4018_v39 = vrot.slane %v8142_v19, 5 }
  0xd9   : > { %v1310_v62 = vrot.slane %v1308_v43, 4  ;;  %v4009_v53 = vsel %vm9089_vm7, %v6365_v10, %v4008_v36  ;;  %v8144_v10 = vld [vmem:[%s8257_s10 + $0x38] sm:$0x1] }
  0xda   : > { %7264 = vmatmul.mubr.msk.bf16.gmra.mrb[24].mxu0 %vm765_vm4, %v9087_v20  ;;  %v4005_v20 = vsel %vm9089_vm7, %v4003_v45, %v4004_v2  ;;  %v1305_v37 = vsel %vm9089_vm7, %v1303_v57, %v1304_v60  ;;  %v4010_v45 = vrot.slane %v4008_v36, 4  ;;  %v4017_v2 = vrot.slane %v4015_v12, 4 }
  0xdb   : > { %7267 = vmatprep.mubr.msk.bf16.mxu0 %vm765_vm4, %v9098_v34  ;;  %v1311_v34 = vrot.slane %v8140_v32, 5  ;;  %v6380_v6 = vcombine.low %v4002_v27, %v4005_v20  ;;  %v1315_v32 = vrot.slane %v8928_v23, 5  ;;  %v1309_v46 = vsel %vm9089_vm7, %v6142_v26, %v1308_v43  ;;  %v10414_v26 = vld [vmem:[#allocation55_spill] sm:$0xff] }
  0xdc   : > { %v9150_v23 = vcombine.low %v1302_v52, %v1305_v37  ;;  %v6143_v60 = vrot.slane %v8925_v54, 9  ;;  %v4012_v43 = vsel %vm9089_vm7, %v4010_v45, %v4011_v11  ;;  %v4022_v57 = vrot.slane %v8950_v7, 5 }
  0xdd   : > { %v1312_v20 = vsel %vm9089_vm7, %v1310_v62, %v1311_v34  ;;  %v1317_v38 = vrot.slane %v1315_v32, 4  ;;  %v8143_v34 = vld [vmem:[%s8257_s10 + $0x2c] sm:$0x1]  ;;  %v4016_v27 = vsel %vm9089_vm7, %v6366_v31, %v4015_v12  ;;  %v4019_v36 = vsel %vm9089_vm7, %v4017_v2, %v4018_v39  ;;  %v10415_v12 = vld [vmem:[#allocation56_spill] sm:$0xff]  ;;  %v8146_v39 = vld [vmem:[%s8257_s10 + $0x40] sm:$0xf] }
  0xde   : > { %v1318_v22 = vrot.slane %v8143_v34, 5  ;;  %v4029_v54 = vrot.slane %v8962_v13, 5  ;;  %v1707_v11 = vsel %vm814_vm0, %v8895_v15, 0  ;;  %v6144_v62 = vrot.slane %v10414_v26, 9  ;;  %v8145_v31 = vld [vmem:[%s8262_s13 + $0x2c] sm:$0x1] }
  0xdf   : > { %6962 = vmatmul.mubr.msk.bf16.gmra.mrb[28].mxu1 %vm765_vm4, %v9118_v14  ;;  %v1324_v52 = vrot.slane %v1322_v18, 4  ;;  %v9171_v7 = vcombine.low %v4009_v53, %v4012_v43  ;;  %v1316_v37 = vsel %vm9089_vm7, %v6143_v60, %v1315_v32  ;;  %v6367_v45 = vrot.slane %v10415_v12, 9  ;;  %v9180_v13 = vld [vmem:[%s10176_s2 + $0x4] sm:$0x1]  ;;  %v10418_v60 = vld [vmem:[#allocation57_spill] sm:$0xff] }
  0xe0   : > { %6967 = vmatprep.mubr.msk.bf16.mxu1 %vm765_vm4, %v6156_v25  ;;  %v9160_v25 = vcombine.low %v1309_v46, %v1312_v20  ;;  %v4025_v2 = vrot.slane %v8145_v31, 5  ;;  %v9184_v15 = vcombine.low %v4016_v27, %v4019_v36  ;;  %v1319_v19 = vsel %vm9089_vm7, %v1317_v38, %v1318_v22  ;;  %v10417_v20 = vld [vmem:[#allocation53_spill] sm:$0xff]  ;;  %v8148_v22 = vld [vmem:[%s8257_s10 + $0x4c] sm:$0xf]  ;;  %v8149_v31 = vld [vmem:[%s8257_s10 + $0x44] sm:$0x1] }
  0xe1   : > { %v4024_v32 = vrot.slane %v4022_v57, 4  ;;  %v1329_v46 = vrot.slane %v8146_v39, 5  ;;  %v4414_v53 = vsel %vm814_vm0, %v10417_v20, 0  ;;  %v6368_v43 = vrot.slane %v10418_v60, 9  ;;  %v8147_v26 = vld [vmem:[%s8262_s13 + $0x38] sm:$0x1] }
  0xe2   : > { %7268 = vmatmul.mubr.msk.bf16.gmra.mrb[28].mxu0 %vm765_vm4, %v9130_v50  ;;  %10416 = vst [vmem:[#allocation55_spill] sm:$0xff] %v9184_v15  ;;  %v4031_v34 = vrot.slane %v4029_v54, 4  ;;  %v4032_v27 = vrot.slane %v8147_v26, 5  ;;  %v1323_v36 = vsel %vm9089_vm7, %v6144_v62, %v1322_v18  ;;  %v9209_v12 = vcombine.low %v1316_v37, %v1319_v19  ;;  %v8150_v37 = vld [vmem:[%s8262_s13 + $0x40] sm:$0xf] }
  0xe3   : > { %7273 = vmatprep.mubr.msk.bf16.mxu0 %vm765_vm4, %v6380_v6  ;;  %v1325_v6 = vrot.slane %v8144_v10, 5  ;;  %v9205_v10 = vld [vmem:[%s10177_s3 + $0x4] sm:$0x1]  ;;  %v4023_v18 = vsel %vm9089_vm7, %v6367_v45, %v4022_v57  ;;  %v6145_v62 = vrot.slane %v8975_v0, 9  ;;  %v1332_v39 = vrot.slane %v8149_v31, 5 }
  0xe4   : > { %v4036_v19 = vrot.slane %v8150_v37, 5  ;;  %v4030_v0 = vsel %vm9089_vm7, %v6368_v43, %v4029_v54  ;;  %v4033_v57 = vsel %vm9089_vm7, %v4031_v34, %v4032_v27  ;;  %v8151_v45 = vld [vmem:[%s8262_s13 + $0x4c] sm:$0xf]  ;;  %v8153_v26 = vld [vmem:[%s8257_s10 + $0x50] sm:$0x1] }
  0xe5   : > { %v1326_v38 = vsel %vm9089_vm7, %v1324_v52, %v1325_v6  ;;  %v4026_v52 = vsel %vm9089_vm7, %v4024_v32, %v4025_v2  ;;  %v1331_v6 = vrot.slane %v1329_v46, 4  ;;  %v8152_v2 = vld [vmem:[%s8257_s10 + $0x48] sm:$0xf]  ;;  %v1330_v54 = vsel %vm9089_vm7, %v6145_v62, %v1329_v46  ;;  %v8154_v43 = vld [vmem:[%s8262_s13 + $0x3c] sm:$0xf] }
  0xe6   : > { %v9220_v20 = vcombine.low %v1323_v36, %v1326_v38  ;;  %v6146_v32 = vrot.slane %v8152_v2, 9  ;;  %v9231_v36 = vcombine.low %v4023_v18, %v4026_v52  ;;  %v6369_v34 = vrot.slane %v8154_v43, 9  ;;  %v8155_v27 = vld [vmem:[%s8262_s13 + $0x44] sm:$0x1]  ;;  %v8156_v18 = vld [vmem:[%s8257_s10 + $0x58] sm:$0xf] }
  0xe7   : > { %6968 = vmatmul.mubr.msk.bf16.vlgmr.msra.gmra.mrb[0].mxu1 %vm765_vm4, %v9150_v23  ;;  %v4039_v38 = vrot.slane %v8155_v27, 5  ;;  %v9239_v31 = vcombine.low %v4030_v0, %v4033_v57  ;;  %v1333_v37 = vsel %vm9089_vm7, %v1331_v6, %v1332_v39  ;;  %v1343_v52 = vrot.slane %v8156_v18, 5  ;;  %v8157_v46 = vld [vmem:[%s8262_s13 + $0x48] sm:$0xf]  ;;  %v8159_v39 = vld [vmem:[%s8257_s10 + $0x64] sm:$0xf] }
  0xe8   : > { %7000 = vmatpush3.bf16.msra.mxu1 %v1707_v11  ;;  %6971 = vmatprep.mubr.msk.bf16.mxu1 %vm765_vm4, %v9160_v25  ;;  %v1336_v11 = vrot.slane %v8148_v22, 5  ;;  %10419 = vst [vmem:[#allocation56_spill] sm:$0xff] %v9220_v20  ;;  %v1339_v22 = vrot.slane %v8153_v26, 5  ;;  %10420 = vst [vmem:[#allocation53_spill] sm:$0xff] %v9231_v36  ;;  %v6370_v62 = vrot.slane %v8157_v46, 9  ;;  %v1350_v57 = vrot.slane %v8159_v39, 5 }
  0xe9   : > { %8057 = vmatprep.subr.msk.bf16.mxu1 %vm814_vm0, %v9180_v13  ;;  %10421 = vst [vmem:[#allocation57_spill] sm:$0xff] %v9239_v31  ;;  %v8158_v26 = vld [vmem:[%s8262_s13 + $0x50] sm:$0x1]  ;;  %v9255_v27 = vcombine.low %v1330_v54, %v1333_v37  ;;  %v4037_v18 = vsel %vm9089_vm7, %v6369_v34, %v4036_v19  ;;  %v8160_v46 = vld [vmem:[%s8257_s10 + $0x54] sm:$0xf] }
  0xea   : > { %7274 = vmatmul.mubr.msk.bf16.vlgmr.msra.gmra.mrb[0].mxu0 %vm765_vm4, %v9171_v7  ;;  %v1338_v60 = vrot.slane %v1336_v11, 4  ;;  %v4046_v43 = vrot.slane %v8158_v26, 5  ;;  %v1337_v0 = vsel %vm9089_vm7, %v6146_v32, %v1336_v11  ;;  %v6147_v26 = vrot.slane %v8160_v46, 9  ;;  %v8162_v39 = vld [vmem:[%s8262_s13 + $0x58] sm:$0xf] }
  0xeb   : > { %7306 = vmatpush3.bf16.msra.mxu0 %v4414_v53  ;;  %7277 = vmatprep.mubr.msk.bf16.mxu0 %vm765_vm4, %v9184_v15  ;;  %v4043_v53 = vrot.slane %v8151_v45, 5  ;;  %v4038_v45 = vrot.slane %v4036_v19, 4  ;;  %v1345_v32 = vrot.slane %v1343_v52, 4  ;;  %v4050_v54 = vrot.slane %v8162_v39, 5  ;;  %v8163_v46 = vld [vmem:[%s8262_s13 + $0x64] sm:$0xf] }
  0xec   : > { %8066 = vmatprep.subr.msk.bf16.mxu0 %vm814_vm0, %v9205_v10  ;;  %v1340_v6 = vsel %vm9089_vm7, %v1338_v60, %v1339_v22  ;;  %v8161_v60 = vld [vmem:[%s8257_s10 + $0x5c] sm:$0x1] }
  0xed   : > { %v4045_v2 = vrot.slane %v4043_v53, 4  ;;  %v4040_v11 = vsel %vm9089_vm7, %v4038_v45, %v4039_v38  ;;  %v1346_v22 = vrot.slane %v8161_v60, 5  ;;  %v9266_v37 = vcombine.low %v1337_v0, %v1340_v6  ;;  %v8166_v6 = vld [vmem:[%s8262_s13 + $0x54] sm:$0xf] }
  0xee   : > { %v4044_v19 = vsel %vm9089_vm7, %v6370_v62, %v4043_v53  ;;  %v1352_v45 = vrot.slane %v1350_v57, 4  ;;  %v9275_v15 = vcombine.low %v4037_v18, %v4040_v11  ;;  %v1344_v0 = vsel %vm9089_vm7, %v6147_v26, %v1343_v52  ;;  %v8167_v62 = vld [vmem:[%s8262_s13 + $0x5c] sm:$0x1]  ;;  %v8169_v52 = vld [vmem:[%s8262_s13 + $0x60] sm:$0xf] }
  0xef   : > { %6972 = vmatmul.mubr.msk.bf16.gmra.mrb[4].mxu1 %vm765_vm4, %v9209_v12  ;;  %10422 = vst [vmem:[#allocation75_spill] sm:$0xff] %v9266_v37  ;;  %v4047_v34 = vsel %vm9089_vm7, %v4045_v2, %v4046_v43  ;;  %v6371_v53 = vrot.slane %v8166_v6, 9  ;;  %v4053_v39 = vrot.slane %v8167_v62, 5  ;;  %v8168_v43 = vld [vmem:[%s8257_s10 + $0x70] sm:$0xf]  ;;  %v6372_v26 = vrot.slane %v8169_v52, 9 }
  0xf0   : > { %6975 = vmatprep.mubr.msk.bf16.mxu1 %vm765_vm4, %v9220_v20  ;;  %v8164_v20 = vld [vmem:[%s8257_s10 + $0x60] sm:$0xf]  ;;  %10423 = vst [vmem:[#allocation76_spill] sm:$0xff] %v9275_v15  ;;  %v9283_v2 = vcombine.low %v4044_v19, %v4047_v34  ;;  %v1357_v18 = vrot.slane %v8168_v43, 5  ;;  %v8171_v43 = vld [vmem:[%s8257_s10 + $0x6c] sm:$0xf] }
  0xf1   : > { %v6148_v38 = vrot.slane %v8164_v20, 9  ;;  %v1347_v20 = vsel %vm9089_vm7, %v1345_v32, %v1346_v22  ;;  %v1364_v22 = vrot.slane %v8562_v55, 5  ;;  %v4051_v62 = vsel %vm9089_vm7, %v6371_v53, %v4050_v54  ;;  %v8172_v55 = vld [vmem:[%s8257_s10 + $0x74] sm:$0x1] }
  0xf2   : > { %7278 = vmatmul.mubr.msk.bf16.gmra.mrb[4].mxu0 %vm765_vm4, %v9231_v36  ;;  %v8165_v36 = vld [vmem:[%s8257_s10 + $0x68] sm:$0x1]  ;;  %10424 = vst [vmem:[#allocation77_spill] sm:$0xff] %v9283_v2  ;;  %v9299_v34 = vcombine.low %v1344_v0, %v1347_v20  ;;  %v6149_v52 = vrot.slane %v8171_v43, 9  ;;  %v4071_v20 = vrot.slane %v8584_v41, 5  ;;  %v6150_v43 = vrot.slane %v8556_v44, 9 }
  0xf3   : > { %7281 = vmatprep.mubr.msk.bf16.mxu0 %vm765_vm4, %v9239_v31  ;;  %v4057_v31 = vrot.slane %v8163_v46, 5  ;;  %v1353_v60 = vrot.slane %v8165_v36, 5  ;;  %v4052_v36 = vrot.slane %v4050_v54, 4  ;;  %v8170_v46 = vld [vmem:[%s8262_s13 + $0x68] sm:$0x1]  ;;  %v1351_v19 = vsel %vm9089_vm7, %v6148_v38, %v1350_v57 }
  0xf4   : > { %v4060_v6 = vrot.slane %v8170_v46, 5  ;;  %v1359_v38 = vrot.slane %v1357_v18, 4 }
  0xf5   : > { %v4059_v11 = vrot.slane %v4057_v31, 4  ;;  %v1354_v32 = vsel %vm9089_vm7, %v1352_v45, %v1353_v60  ;;  %v4054_v57 = vsel %vm9089_vm7, %v4052_v36, %v4053_v39  ;;  %v1360_v45 = vrot.slane %v8172_v55, 5  ;;  %v8173_v60 = vld [vmem:[%s8262_s13 + $0x70] sm:$0xf]  ;;  %v10425_v39 = vld [vmem:[#allocation19_spill] sm:$0xff] }
  0xf6   : > { %v4064_v46 = vrot.slane %v8173_v60, 5  ;;  %v9310_v0 = vcombine.low %v1351_v19, %v1354_v32  ;;  %v4058_v54 = vsel %vm9089_vm7, %v6372_v26, %v4057_v31  ;;  %v1367_v36 = vrot.slane %v10425_v39, 5  ;;  %v8174_v19 = vld [vmem:[%s8262_s13 + $0x6c] sm:$0xf]  ;;  %v8175_v60 = vld [vmem:[%s8262_s13 + $0x74] sm:$0x1] }
  0xf7   : > { %6976 = vmatmul.mubr.msk.bf16.gmra.mrb[8].mxu1 %vm765_vm4, %v9255_v27  ;;  %v4061_v53 = vsel %vm9089_vm7, %v4059_v11, %v4060_v6  ;;  %v1358_v55 = vsel %vm9089_vm7, %v6149_v52, %v1357_v18  ;;  %v6373_v32 = vrot.slane %v8174_v19, 9  ;;  %v1361_v44 = vsel %vm9089_vm7, %v1359_v38, %v1360_v45  ;;  %v10426_v6 = vld [vmem:[#allocation21_spill] sm:$0xff]  ;;  %v10428_v19 = vld [vmem:[#allocation27_spill] sm:$0xff] }
  0xf8   : > { %6979 = vmatprep.mubr.msk.bf16.mxu1 %vm765_vm4, %v9266_v37  ;;  %v9319_v37 = vcombine.low %v4051_v62, %v4054_v57  ;;  %v9327_v31 = vcombine.low %v4058_v54, %v4061_v53  ;;  %v4066_v41 = vrot.slane %v4064_v46, 4  ;;  %v1371_v26 = vrot.slane %v8605_v35, 5 }
  0xf9   : > { %v6374_v18 = vrot.slane %v8579_v30, 9  ;;  %v4073_v11 = vrot.slane %v4071_v20, 4  ;;  %v4074_v62 = vrot.slane %v10426_v6, 5  ;;  %v1365_v52 = vsel %vm9089_vm7, %v6150_v43, %v1364_v22 }
  0xfa   : > { %7282 = vmatmul.mubr.msk.bf16.gmra.mrb[8].mxu0 %vm765_vm4, %v9275_v15  ;;  %v4067_v15 = vrot.slane %v8175_v60, 5  ;;  %v1378_v54 = vrot.slane %v8651_v8, 5  ;;  %v9343_v35 = vcombine.low %v1358_v55, %v1361_v44  ;;  %v4065_v38 = vsel %vm9089_vm7, %v6373_v32, %v4064_v46  ;;  %v10429_v44 = vld [vmem:[#allocation25_spill] sm:$0xff] }
  0xfb   : > { %7285 = vmatprep.mubr.msk.bf16.mxu0 %vm765_vm4, %v9283_v2  ;;  %v1366_v2 = vrot.slane %v1364_v22, 4  ;;  %v6151_v30 = vrot.slane %v8599_v24, 9  ;;  %v1373_v45 = vrot.slane %v1371_v26, 4  ;;  %v4078_v8 = vrot.slane %v8627_v47, 5 }
  0xfc   : > { %v4068_v22 = vsel %vm9089_vm7, %v4066_v41, %v4067_v15  ;;  %v4072_v39 = vsel %vm9089_vm7, %v6374_v18, %v4071_v20  ;;  %v4075_v46 = vsel %vm9089_vm7, %v4073_v11, %v4074_v62  ;;  %v4085_v24 = vrot.slane %v8671_v1, 5 }
  0xfd   : > { %v1368_v57 = vsel %vm9089_vm7, %v1366_v2, %v1367_v36  ;;  %v10427_v2 = vld [vmem:[#allocation23_spill] sm:$0xff]  ;;  %v6152_v36 = vrot.slane %v8646_v56, 9  ;;  %v1380_v55 = vrot.slane %v1378_v54, 4  ;;  %v1381_v15 = vrot.slane %v10428_v19, 5 }
  0xfe   : > { %v1374_v53 = vrot.slane %v10427_v2, 5  ;;  %v9354_v43 = vcombine.low %v1365_v52, %v1368_v57  ;;  %v9363_v32 = vcombine.low %v4065_v38, %v4068_v22  ;;  %v1372_v47 = vsel %vm9089_vm7, %v6151_v30, %v1371_v26  ;;  %v10431_v22 = vld [vmem:[#allocation31_spill] sm:$0xff] }
  0xff   : > { %6980 = vmatmul.mubr.msk.bf16.gmra.mrb[12].mxu1 %vm765_vm4, %v9299_v34  ;;  %v6375_v60 = vrot.slane %v8621_v28, 9  ;;  %v4081_v41 = vrot.slane %v10429_v44, 5  ;;  %v9371_v20 = vcombine.low %v4072_v39, %v4075_v46  ;;  %v4080_v1 = vrot.slane %v4078_v8, 4  ;;  %v10430_v28 = vld [vmem:[#allocation29_spill] sm:$0xff] }
 0x100   : > { %6983 = vmatprep.mubr.msk.bf16.mxu1 %vm765_vm4, %v9310_v0  ;;  %v1375_v56 = vsel %vm9089_vm7, %v1373_v45, %v1374_v53  ;;  %v1385_v18 = vrot.slane %v8694_v17, 5  ;;  %v6376_v26 = vrot.slane %v8665_v9, 9  ;;  %v4087_v11 = vrot.slane %v4085_v24, 4 }
 0x101   : > { %v4088_v6 = vrot.slane %v10430_v28, 5  ;;  %v1379_v62 = vsel %vm9089_vm7, %v6152_v36, %v1378_v54  ;;  %v1382_v52 = vsel %vm9089_vm7, %v1380_v55, %v1381_v15  ;;  %v1392_v57 = vrot.slane %v8737_v49, 5  ;;  %v10432_v36 = vld [vmem:[#allocation37_spill] sm:$0xff] }
 0x102   : > { %7286 = vmatmul.mubr.msk.bf16.gmra.mrb[12].mxu0 %vm765_vm4, %v9319_v37  ;;  %v9387_v17 = vcombine.low %v1372_v47, %v1375_v56  ;;  %v4079_v38 = vsel %vm9089_vm7, %v6375_v60, %v4078_v8  ;;  %v6153_v9 = vrot.slane %v8689_v61, 9  ;;  %v4082_v54 = vsel %vm9089_vm7, %v4080_v1, %v4081_v41  ;;  %v10434_v56 = vld [vmem:[#allocation40_spill] sm:$0xff] }
 0x103   : > { %7289 = vmatprep.mubr.msk.bf16.mxu0 %vm765_vm4, %v9327_v31  ;;  %v1387_v30 = vrot.slane %v1385_v18, 4  ;;  %v1388_v45 = vrot.slane %v10431_v22, 5  ;;  %v4092_v49 = vrot.slane %v10404_v58, 5  ;;  %v9398_v2 = vcombine.low %v1379_v62, %v1382_v52 }
 0x104   : > { %v4086_v53 = vsel %vm9089_vm7, %v6376_v26, %v4085_v24  ;;  %v4089_v8 = vsel %vm9089_vm7, %v4087_v11, %v4088_v6  ;;  %v4099_v61 = vrot.slane %v8760_v42, 5  ;;  %v6154_v39 = vrot.slane %v8731_v21, 9  ;;  %v10433_v21 = vld [vmem:[#allocation35_spill] sm:$0xff] }
 0x105   : > { %v1394_v46 = vrot.slane %v1392_v57, 4  ;;  %v1395_v55 = vrot.slane %v10432_v36, 5  ;;  %v9407_v19 = vcombine.low %v4079_v38, %v4082_v54  ;;  %v1386_v58 = vsel %vm9089_vm7, %v6153_v9, %v1385_v18  ;;  %v10435_v6 = vld [vmem:[#allocation43_spill] sm:$0xff]  ;;  %v10437_v36 = vld [vmem:[#allocation49_spill] sm:$0xff] }
 0x106   : > { %v6377_v15 = vrot.slane %v10405_v63, 9  ;;  %v9414_v24 = vcombine.low %v4086_v53, %v4089_v8  ;;  %v1389_v42 = vsel %vm9089_vm7, %v1387_v30, %v1388_v45  ;;  %v4094_v47 = vrot.slane %v4092_v49, 4 }
 0x107   : > { %6984 = vmatmul.mubr.msk.bf16.gmra.mrb[16].mxu1 %vm765_vm4, %v9343_v35  ;;  %v4095_v60 = vrot.slane %v10433_v21, 5  ;;  %v6378_v44 = vrot.slane %v10409_v51, 9  ;;  %v4101_v41 = vrot.slane %v4099_v61, 4  ;;  %v4102_v1 = vrot.slane %v10434_v56, 5  ;;  %v10440_v21 = vld [vmem:[#allocation54_spill] sm:$0xff]  ;;  %v10445_v56 = vld [vmem:[#allocation60_spill] sm:$0xff] }
 0x108   : > { %6987 = vmatprep.mubr.msk.bf16.mxu1 %vm765_vm4, %v9354_v43  ;;  %v1399_v63 = vrot.slane %v8781_v33, 5  ;;  %v1393_v18 = vsel %vm9089_vm7, %v6154_v39, %v1392_v57  ;;  %v1396_v26 = vsel %vm9089_vm7, %v1394_v46, %v1395_v55  ;;  %v9430_v11 = vcombine.low %v1386_v58, %v1389_v42  ;;  %v10438_v55 = vld [vmem:[#allocation51_spill] sm:$0xff]  ;;  %v10439_v42 = vld [vmem:[#allocation50_spill] sm:$0xff] }
 0x109   : > { %v4093_v28 = vsel %vm9089_vm7, %v6377_v15, %v4092_v49  ;;  %v4096_v33 = vsel %vm9089_vm7, %v4094_v47, %v4095_v60  ;;  %v6155_v51 = vrot.slane %v10411_v29, 9  ;;  %v1402_v62 = vrot.slane %v10435_v6, 5  ;;  %v6224_v15 = vld [vmem:[%s10176_s2 + $0x5] sm:$0x1]  ;;  %v10441_v60 = vld [vmem:[#allocation52_spill] sm:$0xff] }
 0x10a   : > { %7290 = vmatmul.mubr.msk.bf16.gmra.mrb[16].mxu0 %vm765_vm4, %v9363_v32  ;;  %v4106_v52 = vrot.slane %v8803_v4, 5  ;;  %v9441_v57 = vcombine.low %v1393_v18, %v1396_v26  ;;  %v4100_v38 = vsel %vm9089_vm7, %v6378_v44, %v4099_v61  ;;  %v4103_v9 = vsel %vm9089_vm7, %v4101_v41, %v4102_v1  ;;  %v10436_v4 = vld [vmem:[#allocation45_spill] sm:$0xff]  ;;  %v10443_v44 = vld [vmem:[#allocation59_spill] sm:$0xff]  ;;  %v10449_v26 = vld [vmem:[#allocation64_spill] sm:$0xff] }
 0x10b   : > { %7293 = vmatprep.mubr.msk.bf16.mxu0 %vm765_vm4, %v9371_v20  ;;  %v1401_v54 = vrot.slane %v1399_v63, 4  ;;  %v9447_v30 = vcombine.low %v4093_v28, %v4096_v33  ;;  %v9451_v22 = vcombine.low %v4100_v38, %v4103_v9  ;;  %v6379_v29 = vrot.slane %v8797_v48, 9  ;;  %v10444_v41 = vld [vmem:[#allocation61_spill] sm:$0xff]  ;;  %v10446_v1 = vld [vmem:[#allocation63_spill] sm:$0xff]  ;;  %v10451_v33 = vld [vmem:[#allocation66_spill] sm:$0xff] }
 0x10c   : > { %v4108_v45 = vrot.slane %v4106_v52, 4  ;;  %v4109_v49 = vrot.slane %v10436_v4, 5  ;;  %v1400_v53 = vsel %vm9089_vm7, %v6155_v51, %v1399_v63  ;;  %v1935_v58 = vsel %vm814_vm0, %v9180_v13, 0  ;;  %v6448_v13 = vld [vmem:[%s10177_s3 + $0x5] sm:$0x1]  ;;  %v10448_v18 = vld [vmem:[#allocation65_spill] sm:$0xff] }
 0x10d   : > { %v1403_v8 = vsel %vm9089_vm7, %v1401_v54, %v1402_v62  ;;  %v4107_v48 = vsel %vm9089_vm7, %v6379_v29, %v4106_v52  ;;  %v4642_v47 = vsel %vm814_vm0, %v9205_v10, 0  ;;  %v10442_v10 = vld [vmem:[#allocation58_spill] sm:$0xff]  ;;  %v10450_v28 = vld [vmem:[#allocation67_spill] sm:$0xff]  ;;  %v10452_v51 = vld [vmem:[#allocation69_spill] sm:$0xff] }
 0x10e   : > { %v9465_v61 = vcombine.low %v1400_v53, %v1403_v8  ;;  %v4110_v39 = vsel %vm9089_vm7, %v4108_v45, %v4109_v49  ;;  %v10447_v63 = vld [vmem:[#allocation62_spill] sm:$0xff]  ;;  %v10453_v6 = vld [vmem:[#allocation68_spill] sm:$0xff]  ;;  %v10454_v62 = vld [vmem:[#allocation71_spill] sm:$0xff] }
 0x10f   : > { %6988 = vmatmul.mubr.msk.bf16.gmra.mrb[20].mxu1 %vm765_vm4, %v9387_v17  ;;  %v9471_v46 = vcombine.low %v4107_v48, %v4110_v39  ;;  %v10455_v52 = vld [vmem:[#allocation70_spill] sm:$0xff]  ;;  %v10456_v38 = vld [vmem:[#allocation73_spill] sm:$0xff]  ;;  %v10457_v9 = vld [vmem:[#allocation72_spill] sm:$0xff] }
 0x110   : > { %6991 = vmatprep.mubr.msk.bf16.mxu1 %vm765_vm4, %v9398_v2  ;;  %v10458_v54 = vld [vmem:[#allocation34_spill] sm:$0xff]  ;;  %v10460_v49 = vld [vmem:[#allocation32_spill] sm:$0xff] }
 0x111   : > { %v10459_v29 = vld [vmem:[#allocation74_spill] sm:$0xff] }
 0x112   : > { %7294 = vmatmul.mubr.msk.bf16.gmra.mrb[20].mxu0 %vm765_vm4, %v9407_v19  ;;  %v9546_v45 = vld [vmem:[%s8257_s10 + $0xc0] sm:$0xf]  ;;  %v9549_v4 = vld [vmem:[%s8257_s10 + $0xc4] sm:$0xf] }
 0x113   : > { %7297 = vmatprep.mubr.msk.bf16.mxu0 %vm765_vm4, %v9414_v24  ;;  %v9557_v53 = vcombine.low %v9546_v45, %v9549_v4  ;;  %v9560_v8 = vld [vmem:[%s8262_s13 + $0xc0] sm:$0xf]  ;;  %v9563_v48 = vld [vmem:[%s8262_s13 + $0xc4] sm:$0xf] }
 0x114   : > { %v9567_v39 = vcombine.low %v9560_v8, %v9563_v48 }
 0x115   : > { %10461 = vst [vmem:[#allocation19_spill] sm:$0xff] %v9557_v53 }
 0x116   : > { %10462 = vst [vmem:[#allocation21_spill] sm:$0xff] %v9567_v39 }
 0x117   : > { %6992 = vmatmul.mubr.msk.bf16.gmra.mrb[24].mxu1 %vm765_vm4, %v9430_v11 }
 0x118   : > { %6995 = vmatprep.mubr.msk.bf16.mxu1 %vm765_vm4, %v9441_v57 }
 0x11a   : > { %7298 = vmatmul.mubr.msk.bf16.gmra.mrb[24].mxu0 %vm765_vm4, %v9447_v30 }
 0x11b   : > { %7301 = vmatprep.mubr.msk.bf16.mxu0 %vm765_vm4, %v9451_v22 }
 0x11f   : > { %6996 = vmatmul.mubr.msk.bf16.gmra.mrb[28].mxu1 %vm765_vm4, %v9465_v61 }
 0x120   : > { %7001 = vmatprep.mubr.msk.bf16.mxu1 %vm765_vm4, %v10437_v36  ;;  %v10463_v36 = vld [vmem:[#allocation3_spill] sm:$0xff] }
 0x122   : > { %7302 = vmatmul.mubr.msk.bf16.gmra.mrb[28].mxu0 %vm765_vm4, %v9471_v46 }
 0x123   : > { %7307 = vmatprep.mubr.msk.bf16.mxu0 %vm765_vm4, %v10438_v55  ;;  %v10464_v55 = vld [vmem:[#allocation4_spill] sm:$0xff] }
 0x127   : > { %7002 = vmatmul.mubr.msk.bf16.vlgmr.msra.gmra.mrb[0].mxu1 %vm765_vm4, %v10439_v42 }
 0x128   : > { %7034 = vmatpush3.bf16.msra.mxu1 %v1935_v58  ;;  %7005 = vmatprep.mubr.msk.bf16.mxu1 %vm765_vm4, %v10440_v21  ;;  %v2147_v58 = vsel %vm814_vm0, %v6224_v15, 0 }
 0x129   : > { %8058 = vmatprep.subr.msk.bf16.mxu1 %vm814_vm0, %v6224_v15  ;;  %v9593_v15 = vld [vmem:[%s10177_s3 + $0x6] sm:$0x1] }
 0x12a   : > { %7308 = vmatmul.mubr.msk.bf16.vlgmr.msra.gmra.mrb[0].mxu0 %vm765_vm4, %v10441_v60 }
 0x12b   : > { %7340 = vmatpush3.bf16.msra.mxu0 %v4642_v47  ;;  %7311 = vmatprep.mubr.msk.bf16.mxu0 %vm765_vm4, %v8954_v16  ;;  %v9581_v47 = vld [vmem:[%s10176_s2 + $0x6] sm:$0x1] }
 0x12c   : > { %8067 = vmatprep.subr.msk.bf16.mxu0 %vm814_vm0, %v6448_v13 }
 0x12f   : > { %7006 = vmatmul.mubr.msk.bf16.gmra.mrb[4].mxu1 %vm765_vm4, %v8942_v3 }
 0x130   : > { %7009 = vmatprep.mubr.msk.bf16.mxu1 %vm765_vm4, %v8979_v59 }
 0x132   : > { %7312 = vmatmul.mubr.msk.bf16.gmra.mrb[4].mxu0 %vm765_vm4, %v10442_v10 }
 0x133   : > { %7315 = vmatprep.mubr.msk.bf16.mxu0 %vm765_vm4, %v8987_v40 }
 0x137   : > { %7010 = vmatmul.mubr.msk.bf16.gmra.mrb[8].mxu1 %vm765_vm4, %v10443_v44 }
 0x138   : > { %7013 = vmatprep.mubr.msk.bf16.mxu1 %vm765_vm4, %v10444_v41 }
 0x13a   : > { %7316 = vmatmul.mubr.msk.bf16.gmra.mrb[8].mxu0 %vm765_vm4, %v10445_v56 }
 0x13b   : > { %7319 = vmatprep.mubr.msk.bf16.mxu0 %vm765_vm4, %v10446_v1 }
 0x13f   : > { %7014 = vmatmul.mubr.msk.bf16.gmra.mrb[12].mxu1 %vm765_vm4, %v10447_v63  ;;  %v10490_v63 = vld [vmem:[#allocation47_spill] sm:$0xff] }
 0x140   : > { %7017 = vmatprep.mubr.msk.bf16.mxu1 %vm765_vm4, %v10448_v18  ;;  %v10486_v18 = vld [vmem:[#allocation39_spill] sm:$0xff] }
 0x142   : > { %7320 = vmatmul.mubr.msk.bf16.gmra.mrb[12].mxu0 %vm765_vm4, %v10449_v26 }
 0x143   : > { %7323 = vmatprep.mubr.msk.bf16.mxu0 %vm765_vm4, %v10450_v28 }
 0x147   : > { %7018 = vmatmul.mubr.msk.bf16.gmra.mrb[16].mxu1 %vm765_vm4, %v10451_v33 }
 0x148   : > { %7021 = vmatprep.mubr.msk.bf16.mxu1 %vm765_vm4, %v10452_v51  ;;  %v10485_v51 = vld [vmem:[#allocation33_spill] sm:$0xff] }
 0x14a   : > { %7324 = vmatmul.mubr.msk.bf16.gmra.mrb[16].mxu0 %vm765_vm4, %v10453_v6 }
 0x14b   : > { %7327 = vmatprep.mubr.msk.bf16.mxu0 %vm765_vm4, %v10454_v62 }
 0x14f   : > { %7022 = vmatmul.mubr.msk.bf16.gmra.mrb[20].mxu1 %vm765_vm4, %v10455_v52  ;;  %v9642_v52 = vld [vmem:[%s8257_s10 + $0xc8] sm:$0x1] }
 0x150   : > { %7025 = vmatprep.mubr.msk.bf16.mxu1 %vm765_vm4, %v10456_v38  ;;  %v1924_v1 = vshll.u32 %v9642_v52, 16 }
 0x152   : > { %7328 = vmatmul.mubr.msk.bf16.gmra.mrb[20].mxu0 %vm765_vm4, %v10457_v9 }
 0x153   : > { %7331 = vmatprep.mubr.msk.bf16.mxu0 %vm765_vm4, %v10458_v54  ;;  %v10484_v54 = vld [vmem:[#allocation30_spill] sm:$0xff] }
 0x157   : > { %7026 = vmatmul.mubr.msk.bf16.gmra.mrb[24].mxu1 %vm765_vm4, %v10459_v29  ;;  %v4621_v29 = vshll.u32 %v9563_v48, 16 }
 0x158   : > { %7029 = vmatprep.mubr.msk.bf16.mxu1 %vm765_vm4, %v9118_v14  ;;  %v10476_v14 = vld [vmem:[#allocation16_spill] sm:$0xff] }
 0x159   : > { %v4623_v28 = vrot.slane %v4621_v29, 5 }
 0x15a   : > { %7332 = vmatmul.mubr.msk.bf16.gmra.mrb[24].mxu0 %vm765_vm4, %v10460_v49  ;;  %v10483_v49 = vld [vmem:[#allocation26_spill] sm:$0xff] }
 0x15b   : > { %7335 = vmatprep.mubr.msk.bf16.mxu0 %vm765_vm4, %v9130_v50  ;;  %v10465_v50 = vld [vmem:[#allocation5_spill] sm:$0xff] }
 0x15f   : > { %7030 = vmatmul.mubr.msk.bf16.gmra.mrb[28].mxu1 %vm765_vm4, %v9557_v53  ;;  %v4854_v53 = vsel %vm814_vm0, %v6448_v13, 0  ;;  %v10469_v13 = vld [vmem:[#allocation9_spill] sm:$0xff] }
 0x160   : > { %7035 = vmatprep.mubr.msk.bf16.mxu1 %vm765_vm4, %v10463_v36  ;;  %v10466_v36 = vld [vmem:[#allocation7_spill] sm:$0xff] }
 0x162   : > { %7336 = vmatmul.mubr.msk.bf16.gmra.mrb[28].mxu0 %vm765_vm4, %v9567_v39  ;;  %v10468_v39 = vld [vmem:[#allocation8_spill] sm:$0xff] }
 0x163   : > { %7341 = vmatprep.mubr.msk.bf16.mxu0 %vm765_vm4, %v10464_v55  ;;  %v10467_v55 = vld [vmem:[#allocation6_spill] sm:$0xff] }
 0x167   : > { %7036 = vmatmul.mubr.msk.bf16.vlgmr.msra.gmra.mrb[0].mxu1 %vm765_vm4, %v10465_v50  ;;  %v10472_v50 = vld [vmem:[#allocation12_spill] sm:$0xff] }
 0x168   : > { %7068 = vmatpush3.bf16.msra.mxu1 %v2147_v58  ;;  %7039 = vmatprep.mubr.msk.bf16.mxu1 %vm765_vm4, %v10466_v36  ;;  %v10470_v58 = vld [vmem:[#allocation11_spill] sm:$0xff]  ;;  %v10471_v36 = vld [vmem:[#allocation10_spill] sm:$0xff] }
 0x169   : > { %8059 = vmatprep.subr.msk.bf16.mxu1 %vm814_vm0, %v9581_v47 }
 0x16a   : > { %7342 = vmatmul.mubr.msk.bf16.vlgmr.msra.gmra.mrb[0].mxu0 %vm765_vm4, %v10467_v55  ;;  %v10473_v55 = vld [vmem:[#allocation13_spill] sm:$0xff] }
 0x16b   : > { %7374 = vmatpush3.bf16.msra.mxu0 %v4854_v53  ;;  %7345 = vmatprep.mubr.msk.bf16.mxu0 %vm765_vm4, %v10468_v39  ;;  %v10474_v53 = vld [vmem:[#allocation15_spill] sm:$0xff]  ;;  %v10475_v39 = vld [vmem:[#allocation14_spill] sm:$0xff] }
 0x16c   : > { %8068 = vmatprep.subr.msk.bf16.mxu0 %vm814_vm0, %v9593_v15 }
 0x16f   : > { %7040 = vmatmul.mubr.msk.bf16.gmra.mrb[4].mxu1 %vm765_vm4, %v10469_v13  ;;  %v10477_v13 = vld [vmem:[#allocation17_spill] sm:$0xff] }
 0x170   : > { %7043 = vmatprep.mubr.msk.bf16.mxu1 %vm765_vm4, %v10470_v58  ;;  %v10478_v58 = vld [vmem:[#allocation20_spill] sm:$0xff] }
 0x172   : > { %7346 = vmatmul.mubr.msk.bf16.gmra.mrb[4].mxu0 %vm765_vm4, %v10471_v36  ;;  %v10479_v36 = vld [vmem:[#allocation18_spill] sm:$0xff] }
 0x173   : > { %7349 = vmatprep.mubr.msk.bf16.mxu0 %vm765_vm4, %v10472_v50  ;;  %v10480_v50 = vld [vmem:[#allocation22_spill] sm:$0xff] }
 0x177   : > { %7044 = vmatmul.mubr.msk.bf16.gmra.mrb[8].mxu1 %vm765_vm4, %v10473_v55  ;;  %v10481_v55 = vld [vmem:[#allocation24_spill] sm:$0xff] }
 0x178   : > { %7047 = vmatprep.mubr.msk.bf16.mxu1 %vm765_vm4, %v10474_v53  ;;  %v1905_v53 = vshrl.u32 %v9546_v45, 16 }
 0x17a   : > { %7350 = vmatmul.mubr.msk.bf16.gmra.mrb[8].mxu0 %vm765_vm4, %v10475_v39  ;;  %v1918_v39 = vshrl.u32 %v9549_v4, 16  ;;  %v1907_v38 = vrot.slane %v1905_v53, 4  ;;  %v9650_v53 = vld [vmem:[%s8262_s13 + $0xc8] sm:$0x1] }
 0x17b   : > { %7353 = vmatprep.mubr.msk.bf16.mxu0 %vm765_vm4, %v10476_v14  ;;  %v1908_v14 = vshll.u32 %v9546_v45, 16  ;;  %v4631_v29 = vshll.u32 %v9650_v53, 16 }
 0x17c   : > { %v1920_v62 = vrot.slane %v1918_v39, 4  ;;  %v10488_v39 = vld [vmem:[#allocation42_spill] sm:$0xff] }
 0x17d   : > { %v1910_v9 = vrot.slane %v1908_v14, 5  ;;  %v10487_v14 = vld [vmem:[#allocation36_spill] sm:$0xff] }
 0x17f   : > { %7048 = vmatmul.mubr.msk.bf16.gmra.mrb[12].mxu1 %vm765_vm4, %v10477_v13  ;;  %v10482_v13 = vld [vmem:[#allocation28_spill] sm:$0xff] }
 0x180   : > { %7051 = vmatprep.mubr.msk.bf16.mxu1 %vm765_vm4, %v10478_v58  ;;  %v1914_v58 = vshll.u32 %v9549_v4, 16 }
 0x182   : > { %7354 = vmatmul.mubr.msk.bf16.gmra.mrb[12].mxu0 %vm765_vm4, %v10479_v36  ;;  %v4615_v36 = vshll.u32 %v9560_v8, 16 }
 0x183   : > { %7357 = vmatprep.mubr.msk.bf16.mxu0 %vm765_vm4, %v10480_v50  ;;  %v4612_v50 = vshrl.u32 %v9560_v8, 16 }
 0x184   : > { %v4617_v6 = vrot.slane %v4615_v36, 5 }
 0x187   : > { %7052 = vmatmul.mubr.msk.bf16.gmra.mrb[16].mxu1 %vm765_vm4, %v10481_v55  ;;  %v4625_v55 = vshrl.u32 %v9563_v48, 16 }
 0x188   : > { %7055 = vmatprep.mubr.msk.bf16.mxu1 %vm765_vm4, %v10482_v13  ;;  %v1916_v13 = vrot.slane %v1914_v58, 5 }
 0x189   : > { %v4627_v33 = vrot.slane %v4625_v55, 4 }
 0x18a   : > { %7358 = vmatmul.mubr.msk.bf16.gmra.mrb[16].mxu0 %vm765_vm4, %v10483_v49  ;;  %v4614_v49 = vrot.slane %v4612_v50, 4  ;;  %v1921_v26 = vor.u32 %v1920_v62, %v1916_v13 }
 0x18b   : > { %7361 = vmatprep.mubr.msk.bf16.mxu0 %vm765_vm4, %v10484_v54  ;;  %v1911_v54 = vor.u32 %v1910_v9, %v1907_v38  ;;  %v4628_v50 = vor.u32 %v4627_v33, %v4623_v28  ;;  %v4633_v9 = vrot.slane %v4631_v29, 5  ;;  %v10499_v29 = vld [vmem:[#allocation75_spill] sm:$0xff] }
 0x18c   : > { %v4618_v58 = vor.u32 %v4617_v6, %v4614_v49  ;;  %v1922_v55 = vrot.slane %v1921_v26, 4  ;;  %v10492_v6 = vld [vmem:[#allocation46_spill] sm:$0xff]  ;;  %v10493_v26 = vld [vmem:[#allocation48_spill] sm:$0xff] }
 0x18d   : > { %v1912_v36 = vrot.slane %v1911_v54, 4  ;;  %v4629_v38 = vrot.slane %v4628_v50, 4  ;;  %v10498_v50 = vld [vmem:[#allocation76_spill] sm:$0xff] }
 0x18e   : > { %v4619_v62 = vrot.slane %v4618_v58, 4 }
 0x18f   : > { %7056 = vmatmul.mubr.msk.bf16.gmra.mrb[20].mxu1 %vm765_vm4, %v10485_v51  ;;  %v1926_v51 = vrot.slane %v1924_v1, 5  ;;  %v1917_v41 = vsel %vm8274_vm3, %v1912_v36, %v1916_v13  ;;  %v4634_v49 = vsel %vm8274_vm3, %v4629_v38, %v4633_v9  ;;  %v10496_v13 = vld [vmem:[#allocation56_spill] sm:$0xff]  ;;  %v10500_v36 = vld [vmem:[#allocation77_spill] sm:$0xff]  ;;  %v6225_v38 = vrot.slane %v9546_v45, 9 }
 0x190   : > { %7059 = vmatprep.mubr.msk.bf16.mxu1 %vm765_vm4, %v10486_v18  ;;  %v10489_v18 = vld [vmem:[#allocation44_spill] sm:$0xff]  ;;  %v4624_v54 = vsel %vm8274_vm3, %v4619_v62, %v4623_v28  ;;  %v6261_v28 = vld [vmem:[%s10176_s2 + $0x7] sm:$0x1]  ;;  %v4842_v62 = vrot.slane %v9563_v48, 5 }
 0x191   : > { %v1927_v33 = vsel %vm8274_vm3, %v1922_v55, %v1926_v51  ;;  %v9675_v58 = vcombine.low %v4624_v54, %v4634_v49  ;;  %v10494_v51 = vld [vmem:[#allocation55_spill] sm:$0xff]  ;;  %v2135_v55 = vrot.slane %v9549_v4, 5  ;;  %v6449_v54 = vrot.slane %v9560_v8, 9 }
 0x192   : > { %7362 = vmatmul.mubr.msk.bf16.gmra.mrb[20].mxu0 %vm765_vm4, %v10487_v14  ;;  %v9669_v1 = vcombine.low %v1917_v41, %v1927_v33  ;;  %v2353_v41 = vsel %vm814_vm0, %v9581_v47, 0  ;;  %v10495_v47 = vld [vmem:[#allocation53_spill] sm:$0xff]  ;;  %v2138_v33 = vrot.slane %v9642_v52, 5  ;;  %v4844_v49 = vrot.slane %v4842_v62, 4 }
 0x193   : > { %7365 = vmatprep.mubr.msk.bf16.mxu0 %vm765_vm4, %v10488_v39  ;;  %v2137_v9 = vrot.slane %v2135_v55, 4  ;;  %v4845_v4 = vrot.slane %v9650_v53, 5  ;;  %v4843_v8 = vsel %vm9089_vm7, %v6449_v54, %v4842_v62  ;;  %v10515_v54 = vld [vmem:[#allocation34_spill] sm:$0xff] }
 0x195   : > { %v2139_v45 = vsel %vm9089_vm7, %v2137_v9, %v2138_v33  ;;  %v4846_v48 = vsel %vm9089_vm7, %v4844_v49, %v4845_v4  ;;  %v10513_v9 = vld [vmem:[#allocation73_spill] sm:$0xff]  ;;  %v10514_v33 = vld [vmem:[#allocation74_spill] sm:$0xff]  ;;  %v10516_v49 = vld [vmem:[#allocation32_spill] sm:$0xff] }
 0x196   : > { %v9769_v53 = vcombine.low %v4843_v8, %v4846_v48  ;;  %v10517_v4 = vld [vmem:[#allocation38_spill] sm:$0xff]  ;;  %v9845_v8 = vld [vmem:[%s8257_s10 + $0xd0] sm:$0xf]  ;;  %v10519_v48 = vld [vmem:[#allocation41_spill] sm:$0xff] }
 0x197   : > { %7060 = vmatmul.mubr.msk.bf16.gmra.mrb[24].mxu1 %vm765_vm4, %v10489_v18 }
 0x198   : > { %7063 = vmatprep.mubr.msk.bf16.mxu1 %vm765_vm4, %v10490_v63 }
 0x19a   : > { %7366 = vmatmul.mubr.msk.bf16.gmra.mrb[24].mxu0 %vm765_vm4, %v10492_v6 }
 0x19b   : > { %7369 = vmatprep.mubr.msk.bf16.mxu0 %vm765_vm4, %v10493_v26 }
 0x19f   : > { %7064 = vmatmul.mubr.msk.bf16.gmra.mrb[28].mxu1 %vm765_vm4, %v9669_v1 }
 0x1a0   : > { %7069 = vmatprep.mubr.msk.bf16.mxu1 %vm765_vm4, %v9150_v23  ;;  %v5060_v23 = vsel %vm814_vm0, %v9593_v15, 0  ;;  %v10497_v15 = vld [vmem:[#allocation57_spill] sm:$0xff] }
 0x1a2   : > { %7370 = vmatmul.mubr.msk.bf16.gmra.mrb[28].mxu0 %vm765_vm4, %v9675_v58 }
 0x1a3   : > { %7375 = vmatprep.mubr.msk.bf16.mxu0 %vm765_vm4, %v9171_v7  ;;  %v6485_v7 = vld [vmem:[%s10177_s3 + $0x7] sm:$0x1] }
 0x1a4   : > { %v5288_v62 = vsel %vm814_vm0, %v6485_v7, 0 }
 0x1a7   : > { %7070 = vmatmul.mubr.msk.bf16.vlgmr.msra.gmra.mrb[0].mxu1 %vm765_vm4, %v9160_v25 }
 0x1a8   : > { %7102 = vmatpush3.bf16.msra.mxu1 %v2353_v41  ;;  %7073 = vmatprep.mubr.msk.bf16.mxu1 %vm765_vm4, %v9209_v12  ;;  %v2136_v41 = vsel %vm9089_vm7, %v6225_v38, %v2135_v55  ;;  %v6279_v55 = vld [vmem:[%s10176_s2 + $0x8] sm:$0x1]  ;;  %v10512_v38 = vld [vmem:[#allocation72_spill] sm:$0xff] }
 0x1a9   : > { %8060 = vmatprep.subr.msk.bf16.mxu1 %vm814_vm0, %v6261_v28  ;;  %v9763_v52 = vcombine.low %v2136_v41, %v2139_v45  ;;  %v10518_v41 = vld [vmem:[#allocation19_spill] sm:$0xff] }
 0x1aa   : > { %7376 = vmatmul.mubr.msk.bf16.vlgmr.msra.gmra.mrb[0].mxu0 %vm765_vm4, %v10494_v51  ;;  %v9842_v45 = vld [vmem:[%s8257_s10 + $0xcc] sm:$0xf] }
 0x1ab   : > { %7408 = vmatpush3.bf16.msra.mxu0 %v5060_v23  ;;  %7379 = vmatprep.mubr.msk.bf16.mxu0 %vm765_vm4, %v10495_v47  ;;  %v2581_v23 = vsel %vm814_vm0, %v6261_v28, 0  ;;  %v10510_v28 = vld [vmem:[#allocation70_spill] sm:$0xff] }
 0x1ac   : > { %8069 = vmatprep.subr.msk.bf16.mxu0 %vm814_vm0, %v6485_v7  ;;  %v10511_v7 = vld [vmem:[#allocation71_spill] sm:$0xff] }
 0x1af   : > { %7074 = vmatmul.mubr.msk.bf16.gmra.mrb[4].mxu1 %vm765_vm4, %v10496_v13 }
 0x1b0   : > { %7077 = vmatprep.mubr.msk.bf16.mxu1 %vm765_vm4, %v9255_v27 }
 0x1b2   : > { %7380 = vmatmul.mubr.msk.bf16.gmra.mrb[4].mxu0 %vm765_vm4, %v10497_v15 }
 0x1b3   : > { %7383 = vmatprep.mubr.msk.bf16.mxu0 %vm765_vm4, %v10498_v50 }
 0x1b7   : > { %7078 = vmatmul.mubr.msk.bf16.gmra.mrb[8].mxu1 %vm765_vm4, %v10499_v29 }
 0x1b8   : > { %7081 = vmatprep.mubr.msk.bf16.mxu1 %vm765_vm4, %v9299_v34 }
 0x1ba   : > { %7384 = vmatmul.mubr.msk.bf16.gmra.mrb[8].mxu0 %vm765_vm4, %v10500_v36 }
 0x1bb   : > { %7387 = vmatprep.mubr.msk.bf16.mxu0 %vm765_vm4, %v9319_v37 }
 0x1bf   : > { %7082 = vmatmul.mubr.msk.bf16.gmra.mrb[12].mxu1 %vm765_vm4, %v9310_v0 }
 0x1c0   : > { %7085 = vmatprep.mubr.msk.bf16.mxu1 %vm765_vm4, %v9343_v35 }
 0x1c2   : > { %7388 = vmatmul.mubr.msk.bf16.gmra.mrb[12].mxu0 %vm765_vm4, %v9327_v31 }
 0x1c3   : > { %7391 = vmatprep.mubr.msk.bf16.mxu0 %vm765_vm4, %v9363_v32 }
 0x1c7   : > { %7086 = vmatmul.mubr.msk.bf16.gmra.mrb[16].mxu1 %vm765_vm4, %v9354_v43 }
 0x1c8   : > { %7089 = vmatprep.mubr.msk.bf16.mxu1 %vm765_vm4, %v9387_v17 }
 0x1ca   : > { %7392 = vmatmul.mubr.msk.bf16.gmra.mrb[16].mxu0 %vm765_vm4, %v9371_v20 }
 0x1cb   : > { %7395 = vmatprep.mubr.msk.bf16.mxu0 %vm765_vm4, %v9407_v19 }
 0x1cf   : > { %7090 = vmatmul.mubr.msk.bf16.gmra.mrb[20].mxu1 %vm765_vm4, %v9398_v2 }
 0x1d0   : > { %7093 = vmatprep.mubr.msk.bf16.mxu1 %vm765_vm4, %v9430_v11 }
 0x1d2   : > { %7396 = vmatmul.mubr.msk.bf16.gmra.mrb[20].mxu0 %vm765_vm4, %v9414_v24 }
 0x1d3   : > { %7399 = vmatprep.mubr.msk.bf16.mxu0 %vm765_vm4, %v9447_v30 }
 0x1d7   : > { %7094 = vmatmul.mubr.msk.bf16.gmra.mrb[24].mxu1 %vm765_vm4, %v9441_v57 }
 0x1d8   : > { %7097 = vmatprep.mubr.msk.bf16.mxu1 %vm765_vm4, %v9465_v61 }
 0x1da   : > { %7400 = vmatmul.mubr.msk.bf16.gmra.mrb[24].mxu0 %vm765_vm4, %v9451_v22 }
 0x1db   : > { %7403 = vmatprep.mubr.msk.bf16.mxu0 %vm765_vm4, %v9471_v46 }
 0x1df   : > { %7098 = vmatmul.mubr.msk.bf16.gmra.mrb[28].mxu1 %vm765_vm4, %v9763_v52 }
 0x1e0   : > { %7103 = vmatprep.mubr.msk.bf16.mxu1 %vm765_vm4, %v10439_v42  ;;  %v6503_v42 = vld [vmem:[%s10177_s3 + $0x8] sm:$0x1] }
 0x1e2   : > { %7404 = vmatmul.mubr.msk.bf16.gmra.mrb[28].mxu0 %vm765_vm4, %v9769_v53 }
 0x1e3   : > { %7409 = vmatprep.mubr.msk.bf16.mxu0 %vm765_vm4, %v10441_v60  ;;  %v10504_v60 = vld [vmem:[#allocation64_spill] sm:$0xff] }
 0x1e7   : > { %7104 = vmatmul.mubr.msk.bf16.vlgmr.msra.gmra.mrb[0].mxu1 %vm765_vm4, %v10440_v21  ;;  %v10503_v21 = vld [vmem:[#allocation63_spill] sm:$0xff] }
 0x1e8   : > { %7136 = vmatpush3.bf16.msra.mxu1 %v2581_v23  ;;  %7107 = vmatprep.mubr.msk.bf16.mxu1 %vm765_vm4, %v8942_v3  ;;  %v10501_v3 = vld [vmem:[#allocation61_spill] sm:$0xff] }
 0x1e9   : > { %8061 = vmatprep.subr.msk.bf16.mxu1 %vm814_vm0, %v6279_v55  ;;  %v10520_v23 = vld [vmem:[#allocation21_spill] sm:$0xff] }
 0x1ea   : > { %7410 = vmatmul.mubr.msk.bf16.vlgmr.msra.gmra.mrb[0].mxu0 %vm765_vm4, %v8954_v16  ;;  %v10502_v16 = vld [vmem:[#allocation62_spill] sm:$0xff] }
 0x1eb   : > { %7442 = vmatpush3.bf16.msra.mxu0 %v5288_v62  ;;  %7413 = vmatprep.mubr.msk.bf16.mxu0 %vm765_vm4, %v10442_v10  ;;  %v10507_v10 = vld [vmem:[#allocation67_spill] sm:$0xff]  ;;  %v6244_v62 = vcombine.low %v9842_v45, %v9845_v8 }
 0x1ec   : > { %8070 = vmatprep.subr.msk.bf16.mxu0 %vm814_vm0, %v6503_v42 }
 0x1ef   : > { %7108 = vmatmul.mubr.msk.bf16.gmra.mrb[4].mxu1 %vm765_vm4, %v8979_v59  ;;  %v10505_v59 = vld [vmem:[#allocation65_spill] sm:$0xff] }
 0x1f0   : > { %7111 = vmatprep.mubr.msk.bf16.mxu1 %vm765_vm4, %v10443_v44  ;;  %v10508_v44 = vld [vmem:[#allocation68_spill] sm:$0xff] }
 0x1f2   : > { %7414 = vmatmul.mubr.msk.bf16.gmra.mrb[4].mxu0 %vm765_vm4, %v8987_v40  ;;  %v10506_v40 = vld [vmem:[#allocation66_spill] sm:$0xff] }
 0x1f3   : > { %7417 = vmatprep.mubr.msk.bf16.mxu0 %vm765_vm4, %v10445_v56  ;;  %v10509_v56 = vld [vmem:[#allocation69_spill] sm:$0xff] }
 0x1f7   : > { %7112 = vmatmul.mubr.msk.bf16.gmra.mrb[8].mxu1 %vm765_vm4, %v10501_v3  ;;  %v9854_v3 = vld [vmem:[%s8262_s13 + $0xcc] sm:$0xf] }
 0x1f8   : > { %7115 = vmatprep.mubr.msk.bf16.mxu1 %vm765_vm4, %v10502_v16  ;;  %v9857_v16 = vld [vmem:[%s8262_s13 + $0xd0] sm:$0xf] }
 0x1fa   : > { %7418 = vmatmul.mubr.msk.bf16.gmra.mrb[8].mxu0 %vm765_vm4, %v10503_v21  ;;  %v6468_v21 = vcombine.low %v9854_v3, %v9857_v16 }
 0x1fb   : > { %7421 = vmatprep.mubr.msk.bf16.mxu0 %vm765_vm4, %v10504_v60  ;;  %v10521_v60 = vld [vmem:[#allocation5_spill] sm:$0xff] }
 0x1ff   : > { %7116 = vmatmul.mubr.msk.bf16.gmra.mrb[12].mxu1 %vm765_vm4, %v10505_v59  ;;  %v10522_v59 = vld [vmem:[#allocation6_spill] sm:$0xff] }
 0x200   : > { %7119 = vmatprep.mubr.msk.bf16.mxu1 %vm765_vm4, %v10506_v40  ;;  %v2793_v40 = vsel %vm814_vm0, %v6279_v55, 0  ;;  %v10528_v55 = vld [vmem:[#allocation13_spill] sm:$0xff] }
 0x202   : > { %7422 = vmatmul.mubr.msk.bf16.gmra.mrb[12].mxu0 %vm765_vm4, %v10507_v10  ;;  %v10523_v10 = vld [vmem:[#allocation7_spill] sm:$0xff] }
 0x203   : > { %7425 = vmatprep.mubr.msk.bf16.mxu0 %vm765_vm4, %v10508_v44  ;;  %v5500_v44 = vsel %vm814_vm0, %v6503_v42, 0  ;;  %v10530_v42 = vld [vmem:[#allocation14_spill] sm:$0xff] }
 0x207   : > { %7120 = vmatmul.mubr.msk.bf16.gmra.mrb[16].mxu1 %vm765_vm4, %v10509_v56  ;;  %v10524_v56 = vld [vmem:[#allocation9_spill] sm:$0xff] }
 0x208   : > { %7123 = vmatprep.mubr.msk.bf16.mxu1 %vm765_vm4, %v10510_v28  ;;  %v10525_v28 = vld [vmem:[#allocation8_spill] sm:$0xff] }
 0x20a   : > { %7426 = vmatmul.mubr.msk.bf16.gmra.mrb[16].mxu0 %vm765_vm4, %v10511_v7  ;;  %v10526_v7 = vld [vmem:[#allocation10_spill] sm:$0xff] }
 0x20b   : > { %7429 = vmatprep.mubr.msk.bf16.mxu0 %vm765_vm4, %v10512_v38  ;;  %v10527_v38 = vld [vmem:[#allocation11_spill] sm:$0xff] }
 0x20f   : > { %7124 = vmatmul.mubr.msk.bf16.gmra.mrb[20].mxu1 %vm765_vm4, %v10513_v9  ;;  %v10529_v9 = vld [vmem:[#allocation12_spill] sm:$0xff] }
 0x210   : > { %7127 = vmatprep.mubr.msk.bf16.mxu1 %vm765_vm4, %v10514_v33  ;;  %v10531_v33 = vld [vmem:[#allocation15_spill] sm:$0xff] }
 0x212   : > { %7430 = vmatmul.mubr.msk.bf16.gmra.mrb[20].mxu0 %vm765_vm4, %v10515_v54  ;;  %v10532_v54 = vld [vmem:[#allocation17_spill] sm:$0xff] }
 0x213   : > { %7433 = vmatprep.mubr.msk.bf16.mxu0 %vm765_vm4, %v10516_v49  ;;  %v10533_v49 = vld [vmem:[#allocation16_spill] sm:$0xff] }
 0x217   : > { %7128 = vmatmul.mubr.msk.bf16.gmra.mrb[24].mxu1 %vm765_vm4, %v10517_v4  ;;  %v10534_v4 = vld [vmem:[#allocation18_spill] sm:$0xff] }
 0x218   : > { %7131 = vmatprep.mubr.msk.bf16.mxu1 %vm765_vm4, %v10518_v41  ;;  %v10535_v41 = vld [vmem:[#allocation20_spill] sm:$0xff] }
 0x21a   : > { %7434 = vmatmul.mubr.msk.bf16.gmra.mrb[24].mxu0 %vm765_vm4, %v10519_v48  ;;  %v10536_v48 = vld [vmem:[#allocation24_spill] sm:$0xff] }
 0x21b   : > { %7437 = vmatprep.mubr.msk.bf16.mxu0 %vm765_vm4, %v10520_v23  ;;  %v10537_v23 = vld [vmem:[#allocation22_spill] sm:$0xff] }
 0x21f   : > { %7132 = vmatmul.mubr.msk.bf16.gmra.mrb[28].mxu1 %vm765_vm4, %v6244_v62  ;;  %v10538_v62 = vld [vmem:[#allocation26_spill] sm:$0xff] }
 0x220   : > { %7137 = vmatprep.mubr.msk.bf16.mxu1 %vm765_vm4, %v10521_v60  ;;  %v2551_v60 = vshrl.u32 %v9842_v45, 16 }
 0x222   : > { %7438 = vmatmul.mubr.msk.bf16.gmra.mrb[28].mxu0 %vm765_vm4, %v6468_v21  ;;  %v10539_v21 = vld [vmem:[#allocation28_spill] sm:$0xff] }
 0x223   : > { %7443 = vmatprep.mubr.msk.bf16.mxu0 %vm765_vm4, %v10522_v59  ;;  %v2554_v59 = vshll.u32 %v9842_v45, 16 }
 0x227   : > { %7138 = vmatmul.mubr.msk.bf16.vlgmr.msra.gmra.mrb[0].mxu1 %vm765_vm4, %v10523_v10  ;;  %v10540_v10 = vld [vmem:[#allocation33_spill] sm:$0xff] }
 0x228   : > { %7170 = vmatpush3.bf16.msra.mxu1 %v2793_v40  ;;  %7141 = vmatprep.mubr.msk.bf16.mxu1 %vm765_vm4, %v10524_v56  ;;  %v2564_v40 = vshrl.u32 %v9845_v8, 16  ;;  %v10541_v56 = vld [vmem:[#allocation30_spill] sm:$0xff] }
 0x22a   : > { %7444 = vmatmul.mubr.msk.bf16.vlgmr.msra.gmra.mrb[0].mxu0 %vm765_vm4, %v10525_v28  ;;  %v5258_v28 = vshrl.u32 %v9854_v3, 16 }
 0x22b   : > { %7476 = vmatpush3.bf16.msra.mxu0 %v5500_v44  ;;  %7447 = vmatprep.mubr.msk.bf16.mxu0 %vm765_vm4, %v10526_v7  ;;  %v2560_v44 = vshll.u32 %v9845_v8, 16  ;;  %v5261_v7 = vshll.u32 %v9854_v3, 16 }
 0x22f   : > { %7142 = vmatmul.mubr.msk.bf16.gmra.mrb[4].mxu1 %vm765_vm4, %v10527_v38  ;;  %v5271_v38 = vshrl.u32 %v9857_v16, 16 }
 0x230   : > { %7145 = vmatprep.mubr.msk.bf16.mxu1 %vm765_vm4, %v10528_v55  ;;  %v10542_v55 = vld [vmem:[#allocation36_spill] sm:$0xff] }
 0x232   : > { %7448 = vmatmul.mubr.msk.bf16.gmra.mrb[4].mxu0 %vm765_vm4, %v10529_v9  ;;  %v5267_v9 = vshll.u32 %v9857_v16, 16 }
 0x233   : > { %7451 = vmatprep.mubr.msk.bf16.mxu0 %vm765_vm4, %v10530_v42  ;;  %v2553_v42 = vrot.slane %v2551_v60, 4  ;;  %v9926_v60 = vld [vmem:[%s8262_s13 + $0xd4] sm:$0x1] }
 0x237   : > { %7146 = vmatmul.mubr.msk.bf16.gmra.mrb[8].mxu1 %vm765_vm4, %v10531_v33  ;;  %v2556_v33 = vrot.slane %v2554_v59, 5 }
 0x238   : > { %7149 = vmatprep.mubr.msk.bf16.mxu1 %vm765_vm4, %v10532_v54  ;;  %v2562_v54 = vrot.slane %v2560_v44, 5  ;;  %v5277_v44 = vshll.u32 %v9926_v60, 16 }
 0x23a   : > { %7452 = vmatmul.mubr.msk.bf16.gmra.mrb[8].mxu0 %vm765_vm4, %v10533_v49  ;;  %v2566_v49 = vrot.slane %v2564_v40, 4 }
 0x23b   : > { %7455 = vmatprep.mubr.msk.bf16.mxu0 %vm765_vm4, %v10534_v4  ;;  %v9918_v4 = vld [vmem:[%s8257_s10 + $0xd4] sm:$0x1] }
 0x23f   : > { %7150 = vmatmul.mubr.msk.bf16.gmra.mrb[12].mxu1 %vm765_vm4, %v10535_v41  ;;  %v10543_v41 = vld [vmem:[#allocation39_spill] sm:$0xff] }
 0x240   : > { %7153 = vmatprep.mubr.msk.bf16.mxu1 %vm765_vm4, %v10536_v48  ;;  %v5260_v48 = vrot.slane %v5258_v28, 4 }
 0x242   : > { %7456 = vmatmul.mubr.msk.bf16.gmra.mrb[12].mxu0 %vm765_vm4, %v10537_v23  ;;  %v5263_v23 = vrot.slane %v5261_v7, 5 }
 0x243   : > { %7459 = vmatprep.mubr.msk.bf16.mxu0 %vm765_vm4, %v10538_v62  ;;  %v5269_v62 = vrot.slane %v5267_v9, 5 }
 0x244   : > { %v5264_v59 = vor.u32 %v5263_v23, %v5260_v48 }
 0x247   : > { %7154 = vmatmul.mubr.msk.bf16.gmra.mrb[16].mxu1 %vm765_vm4, %v10539_v21  ;;  %v5273_v21 = vrot.slane %v5271_v38, 4 }
 0x248   : > { %7157 = vmatprep.mubr.msk.bf16.mxu1 %vm765_vm4, %v10540_v10  ;;  %v2557_v10 = vor.u32 %v2556_v33, %v2553_v42  ;;  %v5279_v42 = vrot.slane %v5277_v44, 5 }
 0x249   : > { %v5274_v40 = vor.u32 %v5273_v21, %v5269_v62 }
 0x24a   : > { %7460 = vmatmul.mubr.msk.bf16.gmra.mrb[16].mxu0 %vm765_vm4, %v10541_v56  ;;  %v2567_v56 = vor.u32 %v2566_v49, %v2562_v54  ;;  %v2558_v28 = vrot.slane %v2557_v10, 4 }
 0x24b   : > { %7463 = vmatprep.mubr.msk.bf16.mxu0 %vm765_vm4, %v10542_v55  ;;  %v2570_v55 = vshll.u32 %v9918_v4, 16  ;;  %v5275_v9 = vrot.slane %v5274_v40, 4 }
 0x24c   : > { %v2568_v7 = vrot.slane %v2567_v56, 4 }
 0x24d   : > { %v2572_v38 = vrot.slane %v2570_v55, 5  ;;  %v5280_v49 = vsel %vm8274_vm3, %v5275_v9, %v5279_v42 }
 0x24f   : > { %7158 = vmatmul.mubr.msk.bf16.gmra.mrb[20].mxu1 %vm765_vm4, %v10543_v41 }
 0x250   : > { %7161 = vmatprep.mubr.msk.bf16.mxu1 %vm765_vm4, %v10489_v18  ;;  %v5265_v18 = vrot.slane %v5264_v59, 4 }
 0x252   : > { %7464 = vmatmul.mubr.msk.bf16.gmra.mrb[20].mxu0 %vm765_vm4, %v10488_v39  ;;  %v2563_v39 = vsel %vm8274_vm3, %v2558_v28, %v2562_v54 }
 0x253   : > { %7467 = vmatprep.mubr.msk.bf16.mxu0 %vm765_vm4, %v10492_v6  ;;  %v2573_v6 = vsel %vm8274_vm3, %v2568_v7, %v2572_v38 }
 0x254   : > { %v6262_v33 = vcombine.low %v2563_v39, %v2573_v6 }
 0x257   : > { %7162 = vmatmul.mubr.msk.bf16.gmra.mrb[24].mxu1 %vm765_vm4, %v10490_v63  ;;  %v5270_v63 = vsel %vm8274_vm3, %v5265_v18, %v5269_v62 }
 0x258   : > { %7165 = vmatprep.mubr.msk.bf16.mxu1 %vm765_vm4, %v9669_v1  ;;  %v6486_v1 = vcombine.low %v5270_v63, %v5280_v49 }
 0x25a   : > { %7468 = vmatmul.mubr.msk.bf16.gmra.mrb[24].mxu0 %vm765_vm4, %v10493_v26 }
 0x25b   : > { %7471 = vmatprep.mubr.msk.bf16.mxu0 %vm765_vm4, %v9675_v58 }
 0x25f   : > { %7166 = vmatmul.mubr.msk.bf16.gmra.mrb[28].mxu1 %vm765_vm4, %v6262_v33 }
 0x260   : > { %7171 = vmatprep.mubr.msk.bf16.mxu1 %vm765_vm4, %v9160_v25  ;;  %v2781_v25 = vrot.slane %v9845_v8, 5 }
 0x262   : > { %7472 = vmatmul.mubr.msk.bf16.gmra.mrb[28].mxu0 %vm765_vm4, %v6486_v1 }
 0x263   : > { %7477 = vmatprep.mubr.msk.bf16.mxu0 %vm765_vm4, %v10494_v51 }
 0x267   : > { %7172 = vmatmul.mubr.msk.bf16.vlgmr.msra.gmra.mrb[0].mxu1 %vm765_vm4, %v9209_v12  ;;  %v5488_v12 = vrot.slane %v9857_v16, 5 }
 0x268   : > { %7175 = vmatprep.mubr.msk.bf16.mxu1 %vm765_vm4, %v10496_v13 }
 0x26a   : > { %7478 = vmatmul.mubr.msk.bf16.vlgmr.msra.gmra.mrb[0].mxu0 %vm765_vm4, %v10495_v47 }
 0x26b   : > { %7481 = vmatprep.mubr.msk.bf16.mxu0 %vm765_vm4, %v10497_v15 }
 0x26f   : > { %7176 = vmatmul.mubr.msk.bf16.gmra.mrb[4].mxu1 %vm765_vm4, %v9255_v27  ;;  %v6280_v27 = vrot.slane %v9842_v45, 9 }
 0x270   : > { %7179 = vmatprep.mubr.msk.bf16.mxu1 %vm765_vm4, %v10499_v29 }
 0x272   : > { %7482 = vmatmul.mubr.msk.bf16.gmra.mrb[4].mxu0 %vm765_vm4, %v10498_v50 }
 0x273   : > { %7485 = vmatprep.mubr.msk.bf16.mxu0 %vm765_vm4, %v10500_v36 }
 0x277   : > { %7180 = vmatmul.mubr.msk.bf16.gmra.mrb[8].mxu1 %vm765_vm4, %v9299_v34  ;;  %v2784_v34 = vrot.slane %v9918_v4, 5 }
 0x278   : > { %7183 = vmatprep.mubr.msk.bf16.mxu1 %vm765_vm4, %v9310_v0  ;;  %v6504_v0 = vrot.slane %v9854_v3, 9 }
 0x27a   : > { %7486 = vmatmul.mubr.msk.bf16.gmra.mrb[8].mxu0 %vm765_vm4, %v9319_v37  ;;  %v2783_v37 = vrot.slane %v2781_v25, 4 }
 0x27b   : > { %7489 = vmatprep.mubr.msk.bf16.mxu0 %vm765_vm4, %v9327_v31  ;;  %v5490_v31 = vrot.slane %v5488_v12, 4 }
 0x27f   : > { %7184 = vmatmul.mubr.msk.bf16.gmra.mrb[12].mxu1 %vm765_vm4, %v9343_v35  ;;  %v5491_v35 = vrot.slane %v9926_v60, 5 }
 0x280   : > { %7187 = vmatprep.mubr.msk.bf16.mxu1 %vm765_vm4, %v9354_v43  ;;  %v2782_v43 = vsel %vm9089_vm7, %v6280_v27, %v2781_v25 }
 0x282   : > { %7490 = vmatmul.mubr.msk.bf16.gmra.mrb[12].mxu0 %vm765_vm4, %v9363_v32  ;;  %v2785_v32 = vsel %vm9089_vm7, %v2783_v37, %v2784_v34 }
 0x283   : > { %7493 = vmatprep.mubr.msk.bf16.mxu0 %vm765_vm4, %v9371_v20  ;;  %v6281_v20 = vcombine.low %v2782_v43, %v2785_v32 }
 0x287   : > { %7188 = vmatmul.mubr.msk.bf16.gmra.mrb[16].mxu1 %vm765_vm4, %v9387_v17  ;;  %v5489_v17 = vsel %vm9089_vm7, %v6504_v0, %v5488_v12 }
 0x288   : > { %7191 = vmatprep.mubr.msk.bf16.mxu1 %vm765_vm4, %v9398_v2  ;;  %v5492_v2 = vsel %vm9089_vm7, %v5490_v31, %v5491_v35 }
 0x28a   : > { %7494 = vmatmul.mubr.msk.bf16.gmra.mrb[16].mxu0 %vm765_vm4, %v9407_v19  ;;  %v6505_v19 = vcombine.low %v5489_v17, %v5492_v2 }
 0x28b   : > { %7497 = vmatprep.mubr.msk.bf16.mxu0 %vm765_vm4, %v9414_v24 }
 0x28f   : > { %7192 = vmatmul.mubr.msk.bf16.gmra.mrb[20].mxu1 %vm765_vm4, %v9430_v11 }
 0x290   : > { %7195 = vmatprep.mubr.msk.bf16.mxu1 %vm765_vm4, %v9441_v57 }
 0x292   : > { %7498 = vmatmul.mubr.msk.bf16.gmra.mrb[20].mxu0 %vm765_vm4, %v9447_v30 }
 0x293   : > { %7501 = vmatprep.mubr.msk.bf16.mxu0 %vm765_vm4, %v9451_v22  ;;  %v10030_v22 = vld [vmem:[%s10178_s4] ss:$0 sm:$0xff] }
 0x297   : > { %7196 = vmatmul.mubr.msk.bf16.gmra.mrb[24].mxu1 %vm765_vm4, %v9465_v61 }
 0x298   : > { %7199 = vmatprep.mubr.msk.bf16.mxu1 %vm765_vm4, %v9763_v52 }
 0x29a   : > { %7502 = vmatmul.mubr.msk.bf16.gmra.mrb[24].mxu0 %vm765_vm4, %v9471_v46 }
 0x29b   : > { %7505 = vmatprep.mubr.msk.bf16.mxu0 %vm765_vm4, %v9769_v53 }
 0x29f   : > { %7200 = vmatmul.mubr.msk.bf16.gmra.mrb[28].mxu1 %vm765_vm4, %v6281_v20 }
 0x2a2   : > { %7506 = vmatmul.mubr.msk.bf16.gmra.mrb[28].mxu0 %vm765_vm4, %v6505_v19 }
 0x33a   : > { %v7173_v24 = vpop.f32.mrb[0].mxu1 }
 0x33b   : > { %v2829_v11 = vpop.f32.mrb[1].mxu1 }
 0x33c   : > { %v7174_v57 = vpop.f32.mrb[2].mxu1 }
 0x33d   : > { %v7479_v30 = vpop.f32.mrb[0].mxu0  ;;  %v2832_v61 = vpop.f32.mrb[3].mxu1 }
 0x33e   : > { %v7509_v46 = vadd.f32 %v7479_v30, %v7173_v24  ;;  %v5536_v14 = vpop.f32.mrb[1].mxu0 }
 0x33f   : > { %v7510_v26 = vadd.f32 %v5536_v14, %v2829_v11  ;;  %v7480_v58 = vpop.f32.mrb[2].mxu0 }
 0x340   : > { %v5737_v51 = vmul.f32 %v7509_v46, %v10030_v22  ;;  %v7511_v47 = vadd.f32 %v7480_v58, %v7174_v57  ;;  %v5539_v13 = vpop.f32.mrb[3].mxu0 }
 0x341   : > { %v5735_v15 = vmul.f32 %v7510_v26, %v10030_v22  ;;  %v7512_v50 = vadd.f32 %v5539_v13, %v2832_v61 }
 0x342   : > { %v5775_v29 = vadd.f32 %v10035_v5, %v5737_v51  ;;  %v5738_v36 = vmul.f32 %v7511_v47, %v10030_v22  ;;  %v7177_v52 = vpop.f32.mrb[4].mxu1 }
 0x343   : > { %v5773_v53 = vadd.f32 %v10035_v5, %v5735_v15  ;;  %v5736_v45 = vmul.f32 %v7512_v50, %v10030_v22  ;;  %v2845_v8 = vpop.f32.mrb[5].mxu1 }
 0x344   : > { %v5807_v3 = vmax.f32 %v5775_v29, 0.0  ;;  %v5776_v16 = vadd.f32 %v10035_v5, %v5738_v36  ;;  %v7178_v54 = vpop.f32.mrb[6].mxu1 }
 0x345   : > { %v5805_v4 = vmax.f32 %v5773_v53, 0.0  ;;  %v5774_v41 = vadd.f32 %v10035_v5, %v5736_v45  ;;  %v7483_v48 = vpop.f32.mrb[4].mxu0  ;;  %v2848_v23 = vpop.f32.mrb[7].mxu1 }
 0x346   : > { %v6561_v62 = vpack.c.bf16 %v5807_v3, %v5807_v3  ;;  %v5808_v21 = vmax.f32 %v5776_v16, 0.0  ;;  %v7513_v10 = vadd.f32 %v7483_v48, %v7177_v52  ;;  %v5552_v56 = vpop.f32.mrb[5].mxu0 }
 0x347   : > { %v6559_v55 = vpack.c.bf16 %v5805_v4, %v5805_v4  ;;  %v5806_v60 = vmax.f32 %v5774_v41, 0.0  ;;  %v7514_v59 = vadd.f32 %v5552_v56, %v2845_v8  ;;  %v7484_v40 = vpop.f32.mrb[6].mxu0 }
 0x348   : > { %5968 = vst.msk [vmem:[%s10048_s29 + $0x8] sm:$0xf] %vm5965_vm8, %v6561_v62  ;;  %v6562_v44 = vpack.c.bf16 %v5808_v21, %v5808_v21  ;;  %v5741_v28 = vmul.f32 %v7513_v10, %v10030_v22  ;;  %v7515_v7 = vadd.f32 %v7484_v40, %v7178_v54  ;;  %v5555_v38 = vpop.f32.mrb[7].mxu0 }
 0x349   : > { %5966 = vst.msk [vmem:[%s10048_s29] sm:$0xf] %vm5965_vm8, %v6559_v55  ;;  %v6560_v18 = vpack.c.bf16 %v5806_v60, %v5806_v60  ;;  %v5739_v9 = vmul.f32 %v7514_v59, %v10030_v22  ;;  %v7516_v42 = vadd.f32 %v5555_v38, %v2848_v23 }
 0x34a   : > { %5969 = vst.msk [vmem:[%s10048_s29 + $0xc] sm:$0xf] %vm5965_vm8, %v6562_v44  ;;  %v5779_v39 = vadd.f32 %v10035_v5, %v5741_v28  ;;  %v5742_v6 = vmul.f32 %v7515_v7, %v10030_v22  ;;  %v7181_v33 = vpop.f32.mrb[8].mxu1 }
 0x34b   : > { %5967 = vst.msk [vmem:[%s10048_s29 + $0x4] sm:$0xf] %vm5965_vm8, %v6560_v18  ;;  %v5777_v63 = vadd.f32 %v10035_v5, %v5739_v9  ;;  %v5740_v49 = vmul.f32 %v7516_v42, %v10030_v22  ;;  %v2861_v1 = vpop.f32.mrb[9].mxu1 }
 0x34c   : > { %v5811_v25 = vmax.f32 %v5779_v39, 0.0  ;;  %v5780_v12 = vadd.f32 %v10035_v5, %v5742_v6  ;;  %v7182_v27 = vpop.f32.mrb[10].mxu1 }
 0x34d   : > { %v5809_v37 = vmax.f32 %v5777_v63, 0.0  ;;  %v5778_v34 = vadd.f32 %v10035_v5, %v5740_v49  ;;  %v7487_v0 = vpop.f32.mrb[8].mxu0  ;;  %v2864_v31 = vpop.f32.mrb[11].mxu1 }
 0x34e   : > { %v6565_v35 = vpack.c.bf16 %v5811_v25, %v5811_v25  ;;  %v5812_v43 = vmax.f32 %v5780_v12, 0.0  ;;  %v7517_v32 = vadd.f32 %v7487_v0, %v7181_v33  ;;  %v5568_v20 = vpop.f32.mrb[9].mxu0 }
 0x34f   : > { %v6563_v17 = vpack.c.bf16 %v5809_v37, %v5809_v37  ;;  %v5810_v2 = vmax.f32 %v5778_v34, 0.0  ;;  %v7518_v19 = vadd.f32 %v5568_v20, %v2861_v1  ;;  %v7488_v24 = vpop.f32.mrb[10].mxu0 }
 0x350   : > { %5972 = vst.msk [vmem:[%s10048_s29 + $0x18] sm:$0xf] %vm5965_vm8, %v6565_v35  ;;  %v6566_v11 = vpack.c.bf16 %v5812_v43, %v5812_v43  ;;  %v5745_v57 = vmul.f32 %v7517_v32, %v10030_v22  ;;  %v7519_v30 = vadd.f32 %v7488_v24, %v7182_v27  ;;  %v5571_v61 = vpop.f32.mrb[11].mxu0 }
 0x351   : > { %5970 = vst.msk [vmem:[%s10048_s29 + $0x10] sm:$0xf] %vm5965_vm8, %v6563_v17  ;;  %v6564_v46 = vpack.c.bf16 %v5810_v2, %v5810_v2  ;;  %v5743_v14 = vmul.f32 %v7518_v19, %v10030_v22  ;;  %v7520_v26 = vadd.f32 %v5571_v61, %v2864_v31 }
 0x352   : > { %5973 = vst.msk [vmem:[%s10048_s29 + $0x1c] sm:$0xf] %vm5965_vm8, %v6566_v11  ;;  %v5783_v58 = vadd.f32 %v10035_v5, %v5745_v57  ;;  %v5746_v51 = vmul.f32 %v7519_v30, %v10030_v22  ;;  %v7185_v47 = vpop.f32.mrb[12].mxu1 }
 0x353   : > { %5971 = vst.msk [vmem:[%s10048_s29 + $0x14] sm:$0xf] %vm5965_vm8, %v6564_v46  ;;  %v5781_v13 = vadd.f32 %v10035_v5, %v5743_v14  ;;  %v5744_v15 = vmul.f32 %v7520_v26, %v10030_v22  ;;  %v2877_v50 = vpop.f32.mrb[13].mxu1 }
 0x354   : > { %v5815_v29 = vmax.f32 %v5783_v58, 0.0  ;;  %v5784_v36 = vadd.f32 %v10035_v5, %v5746_v51  ;;  %v7186_v52 = vpop.f32.mrb[14].mxu1 }
 0x355   : > { %v5813_v53 = vmax.f32 %v5781_v13, 0.0  ;;  %v5782_v45 = vadd.f32 %v10035_v5, %v5744_v15  ;;  %v7491_v8 = vpop.f32.mrb[12].mxu0  ;;  %v2880_v3 = vpop.f32.mrb[15].mxu1 }
 0x356   : > { %v6569_v16 = vpack.c.bf16 %v5815_v29, %v5815_v29  ;;  %v5816_v54 = vmax.f32 %v5784_v36, 0.0  ;;  %v7521_v4 = vadd.f32 %v7491_v8, %v7185_v47  ;;  %v5584_v41 = vpop.f32.mrb[13].mxu0 }
 0x357   : > { %v6567_v48 = vpack.c.bf16 %v5813_v53, %v5813_v53  ;;  %v5814_v23 = vmax.f32 %v5782_v45, 0.0  ;;  %v7522_v62 = vadd.f32 %v5584_v41, %v2877_v50  ;;  %v7492_v21 = vpop.f32.mrb[14].mxu0 }
 0x358   : > { %5976 = vst.msk [vmem:[%s10048_s29 + $0x28] sm:$0xf] %vm5965_vm8, %v6569_v16  ;;  %v6570_v10 = vpack.c.bf16 %v5816_v54, %v5816_v54  ;;  %v5749_v56 = vmul.f32 %v7521_v4, %v10030_v22  ;;  %v7523_v55 = vadd.f32 %v7492_v21, %v7186_v52  ;;  %v5587_v60 = vpop.f32.mrb[15].mxu0 }
 0x359   : > { %5974 = vst.msk [vmem:[%s10048_s29 + $0x20] sm:$0xf] %vm5965_vm8, %v6567_v48  ;;  %v6568_v59 = vpack.c.bf16 %v5814_v23, %v5814_v23  ;;  %v5747_v40 = vmul.f32 %v7522_v62, %v10030_v22  ;;  %v7524_v44 = vadd.f32 %v5587_v60, %v2880_v3 }
 0x35a   : > { %5977 = vst.msk [vmem:[%s10048_s29 + $0x2c] sm:$0xf] %vm5965_vm8, %v6570_v10  ;;  %v5787_v28 = vadd.f32 %v10035_v5, %v5749_v56  ;;  %v5750_v7 = vmul.f32 %v7523_v55, %v10030_v22  ;;  %v7189_v38 = vpop.f32.mrb[16].mxu1 }
 0x35b   : > { %5975 = vst.msk [vmem:[%s10048_s29 + $0x24] sm:$0xf] %vm5965_vm8, %v6568_v59  ;;  %v5785_v18 = vadd.f32 %v10035_v5, %v5747_v40  ;;  %v5748_v9 = vmul.f32 %v7524_v44, %v10030_v22  ;;  %v2893_v42 = vpop.f32.mrb[17].mxu1 }
 0x35c   : > { %v5819_v39 = vmax.f32 %v5787_v28, 0.0  ;;  %v5788_v6 = vadd.f32 %v10035_v5, %v5750_v7  ;;  %v7190_v33 = vpop.f32.mrb[18].mxu1 }
 0x35d   : > { %v5817_v63 = vmax.f32 %v5785_v18, 0.0  ;;  %v5786_v49 = vadd.f32 %v10035_v5, %v5748_v9  ;;  %v7495_v1 = vpop.f32.mrb[16].mxu0  ;;  %v2896_v25 = vpop.f32.mrb[19].mxu1 }
 0x35e   : > { %v6573_v12 = vpack.c.bf16 %v5819_v39, %v5819_v39  ;;  %v5820_v27 = vmax.f32 %v5788_v6, 0.0  ;;  %v7525_v37 = vadd.f32 %v7495_v1, %v7189_v38  ;;  %v5600_v34 = vpop.f32.mrb[17].mxu0 }
 0x35f   : > { %v6571_v0 = vpack.c.bf16 %v5817_v63, %v5817_v63  ;;  %v5818_v31 = vmax.f32 %v5786_v49, 0.0  ;;  %v7526_v35 = vadd.f32 %v5600_v34, %v2893_v42  ;;  %v7496_v43 = vpop.f32.mrb[18].mxu0 }
 0x360   : > { %5980 = vst.msk [vmem:[%s10048_s29 + $0x38] sm:$0xf] %vm5965_vm8, %v6573_v12  ;;  %v6574_v32 = vpack.c.bf16 %v5820_v27, %v5820_v27  ;;  %v5753_v20 = vmul.f32 %v7525_v37, %v10030_v22  ;;  %v7527_v17 = vadd.f32 %v7496_v43, %v7190_v33  ;;  %v5603_v2 = vpop.f32.mrb[19].mxu0 }
 0x361   : > { %5978 = vst.msk [vmem:[%s10048_s29 + $0x30] sm:$0xf] %vm5965_vm8, %v6571_v0  ;;  %v6572_v19 = vpack.c.bf16 %v5818_v31, %v5818_v31  ;;  %v5751_v24 = vmul.f32 %v7526_v35, %v10030_v22  ;;  %v7528_v11 = vadd.f32 %v5603_v2, %v2896_v25 }
 0x362   : > { %5981 = vst.msk [vmem:[%s10048_s29 + $0x3c] sm:$0xf] %vm5965_vm8, %v6574_v32  ;;  %v5791_v57 = vadd.f32 %v10035_v5, %v5753_v20  ;;  %v5754_v30 = vmul.f32 %v7527_v17, %v10030_v22  ;;  %v7193_v61 = vpop.f32.mrb[20].mxu1 }
 0x363   : > { %5979 = vst.msk [vmem:[%s10048_s29 + $0x34] sm:$0xf] %vm5965_vm8, %v6572_v19  ;;  %v5789_v46 = vadd.f32 %v10035_v5, %v5751_v24  ;;  %v5752_v14 = vmul.f32 %v7528_v11, %v10030_v22  ;;  %v2909_v26 = vpop.f32.mrb[21].mxu1 }
 0x364   : > { %v5823_v58 = vmax.f32 %v5791_v57, 0.0  ;;  %v5792_v51 = vadd.f32 %v10035_v5, %v5754_v30  ;;  %v7194_v47 = vpop.f32.mrb[22].mxu1 }
 0x365   : > { %v5821_v13 = vmax.f32 %v5789_v46, 0.0  ;;  %v5790_v15 = vadd.f32 %v10035_v5, %v5752_v14  ;;  %v7499_v50 = vpop.f32.mrb[20].mxu0  ;;  %v2912_v29 = vpop.f32.mrb[23].mxu1 }
 0x366   : > { %v6577_v36 = vpack.c.bf16 %v5823_v58, %v5823_v58  ;;  %v5824_v52 = vmax.f32 %v5792_v51, 0.0  ;;  %v7529_v53 = vadd.f32 %v7499_v50, %v7193_v61  ;;  %v5616_v45 = vpop.f32.mrb[21].mxu0 }
 0x367   : > { %v6575_v8 = vpack.c.bf16 %v5821_v13, %v5821_v13  ;;  %v5822_v3 = vmax.f32 %v5790_v15, 0.0  ;;  %v7530_v16 = vadd.f32 %v5616_v45, %v2909_v26  ;;  %v7500_v54 = vpop.f32.mrb[22].mxu0 }
 0x368   : > { %5984 = vst.msk [vmem:[%s10048_s29 + $0x48] sm:$0xf] %vm5965_vm8, %v6577_v36  ;;  %v6578_v4 = vpack.c.bf16 %v5824_v52, %v5824_v52  ;;  %v5757_v41 = vmul.f32 %v7529_v53, %v10030_v22  ;;  %v7531_v48 = vadd.f32 %v7500_v54, %v7194_v47  ;;  %v5619_v23 = vpop.f32.mrb[23].mxu0 }
 0x369   : > { %5982 = vst.msk [vmem:[%s10048_s29 + $0x40] sm:$0xf] %vm5965_vm8, %v6575_v8  ;;  %v6576_v62 = vpack.c.bf16 %v5822_v3, %v5822_v3  ;;  %v5755_v21 = vmul.f32 %v7530_v16, %v10030_v22  ;;  %v7532_v10 = vadd.f32 %v5619_v23, %v2912_v29 }
 0x36a   : > { %5985 = vst.msk [vmem:[%s10048_s29 + $0x4c] sm:$0xf] %vm5965_vm8, %v6578_v4  ;;  %v5795_v56 = vadd.f32 %v10035_v5, %v5757_v41  ;;  %v5758_v55 = vmul.f32 %v7531_v48, %v10030_v22  ;;  %v7197_v60 = vpop.f32.mrb[24].mxu1 }
 0x36b   : > { %5983 = vst.msk [vmem:[%s10048_s29 + $0x44] sm:$0xf] %vm5965_vm8, %v6576_v62  ;;  %v5793_v59 = vadd.f32 %v10035_v5, %v5755_v21  ;;  %v5756_v40 = vmul.f32 %v7532_v10, %v10030_v22  ;;  %v2925_v44 = vpop.f32.mrb[25].mxu1 }
 0x36c   : > { %v5827_v28 = vmax.f32 %v5795_v56, 0.0  ;;  %v5796_v7 = vadd.f32 %v10035_v5, %v5758_v55  ;;  %v7198_v38 = vpop.f32.mrb[26].mxu1 }
 0x36d   : > { %v5825_v18 = vmax.f32 %v5793_v59, 0.0  ;;  %v5794_v9 = vadd.f32 %v10035_v5, %v5756_v40  ;;  %v7503_v42 = vpop.f32.mrb[24].mxu0  ;;  %v2928_v39 = vpop.f32.mrb[27].mxu1 }
 0x36e   : > { %v6581_v6 = vpack.c.bf16 %v5827_v28, %v5827_v28  ;;  %v5828_v33 = vmax.f32 %v5796_v7, 0.0  ;;  %v7533_v63 = vadd.f32 %v7503_v42, %v7197_v60  ;;  %v5632_v49 = vpop.f32.mrb[25].mxu0 }
 0x36f   : > { %v6579_v1 = vpack.c.bf16 %v5825_v18, %v5825_v18  ;;  %v5826_v25 = vmax.f32 %v5794_v9, 0.0  ;;  %v7534_v12 = vadd.f32 %v5632_v49, %v2925_v44  ;;  %v7504_v27 = vpop.f32.mrb[26].mxu0 }
 0x370   : > { %5988 = vst.msk [vmem:[%s10048_s29 + $0x58] sm:$0xf] %vm5965_vm8, %v6581_v6  ;;  %v6582_v37 = vpack.c.bf16 %v5828_v33, %v5828_v33  ;;  %v5761_v34 = vmul.f32 %v7533_v63, %v10030_v22  ;;  %v7535_v0 = vadd.f32 %v7504_v27, %v7198_v38  ;;  %v5635_v31 = vpop.f32.mrb[27].mxu0 }
 0x371   : > { %5986 = vst.msk [vmem:[%s10048_s29 + $0x50] sm:$0xf] %vm5965_vm8, %v6579_v1  ;;  %v6580_v35 = vpack.c.bf16 %v5826_v25, %v5826_v25  ;;  %v5759_v43 = vmul.f32 %v7534_v12, %v10030_v22  ;;  %v7536_v32 = vadd.f32 %v5635_v31, %v2928_v39 }
 0x372   : > { %5989 = vst.msk [vmem:[%s10048_s29 + $0x5c] sm:$0xf] %vm5965_vm8, %v6582_v37  ;;  %v5799_v20 = vadd.f32 %v10035_v5, %v5761_v34  ;;  %v5762_v17 = vmul.f32 %v7535_v0, %v10030_v22  ;;  %v7201_v2 = vpop.f32.mrb[28].mxu1 }
 0x373   : > { %5987 = vst.msk [vmem:[%s10048_s29 + $0x54] sm:$0xf] %vm5965_vm8, %v6580_v35  ;;  %v5797_v19 = vadd.f32 %v10035_v5, %v5759_v43  ;;  %v5760_v24 = vmul.f32 %v7536_v32, %v10030_v22  ;;  %v2941_v11 = vpop.f32.mrb[29].mxu1 }
 0x374   : > { %v5831_v57 = vmax.f32 %v5799_v20, 0.0  ;;  %v5800_v30 = vadd.f32 %v10035_v5, %v5762_v17  ;;  %v7202_v61 = vpop.f32.mrb[30].mxu1 }
 0x375   : > { %v5829_v46 = vmax.f32 %v5797_v19, 0.0  ;;  %v5798_v14 = vadd.f32 %v10035_v5, %v5760_v24  ;;  %v7507_v26 = vpop.f32.mrb[28].mxu0  ;;  %v2944_v58 = vpop.f32.mrb[31].mxu1 }
 0x376   : > { %v6585_v51 = vpack.c.bf16 %v5831_v57, %v5831_v57  ;;  %v5832_v47 = vmax.f32 %v5800_v30, 0.0  ;;  %v7537_v13 = vadd.f32 %v7507_v26, %v7201_v2  ;;  %v5648_v15 = vpop.f32.mrb[29].mxu0 }
 0x377   : > { %v6583_v50 = vpack.c.bf16 %v5829_v46, %v5829_v46  ;;  %v5830_v29 = vmax.f32 %v5798_v14, 0.0  ;;  %v7538_v36 = vadd.f32 %v5648_v15, %v2941_v11  ;;  %v7508_v52 = vpop.f32.mrb[30].mxu0 }
 0x378   : > { %5992 = vst.msk [vmem:[%s10048_s29 + $0x68] sm:$0xf] %vm5965_vm8, %v6585_v51  ;;  %v6586_v53 = vpack.c.bf16 %v5832_v47, %v5832_v47  ;;  %v5765_v45 = vmul.f32 %v7537_v13, %v10030_v22  ;;  %v7539_v8 = vadd.f32 %v7508_v52, %v7202_v61  ;;  %v5651_v3 = vpop.f32.mrb[31].mxu0 }
 0x379   : > { %5990 = vst.msk [vmem:[%s10048_s29 + $0x60] sm:$0xf] %vm5965_vm8, %v6583_v50  ;;  %v6584_v16 = vpack.c.bf16 %v5830_v29, %v5830_v29  ;;  %v5763_v54 = vmul.f32 %v7538_v36, %v10030_v22  ;;  %v7540_v4 = vadd.f32 %v5651_v3, %v2944_v58 }
 0x37a   : > { %5993 = vst.msk [vmem:[%s10048_s29 + $0x6c] sm:$0xf] %vm5965_vm8, %v6586_v53  ;;  %v5803_v41 = vadd.f32 %v10035_v5, %v5765_v45  ;;  %v5766_v48 = vmul.f32 %v7539_v8, %v10030_v22 }
 0x37b   : > { %5991 = vst.msk [vmem:[%s10048_s29 + $0x64] sm:$0xf] %vm5965_vm8, %v6584_v16  ;;  %v5801_v23 = vadd.f32 %v10035_v5, %v5763_v54  ;;  %v5764_v62 = vmul.f32 %v7540_v4, %v10030_v22 }
 0x37c   : > { %v5835_v21 = vmax.f32 %v5803_v41, 0.0  ;;  %v5804_v10 = vadd.f32 %v10035_v5, %v5766_v48 }
 0x37d   : > { %v5833_v56 = vmax.f32 %v5801_v23, 0.0  ;;  %v5802_v55 = vadd.f32 %v10035_v5, %v5764_v62 }
 0x37e   : > { %v6589_v60 = vpack.c.bf16 %v5835_v21, %v5835_v21  ;;  %v5836_v59 = vmax.f32 %v5804_v10, 0.0 }
 0x37f   : > { %v6587_v40 = vpack.c.bf16 %v5833_v56, %v5833_v56  ;;  %v5834_v44 = vmax.f32 %v5802_v55, 0.0 }
 0x380   : > { %5996 = vst.msk [vmem:[%s10048_s29 + $0x78] sm:$0xf] %vm5965_vm8, %v6589_v60  ;;  %v6590_v28 = vpack.c.bf16 %v5836_v59, %v5836_v59 }
 0x381   : > { %5994 = vst.msk [vmem:[%s10048_s29 + $0x70] sm:$0xf] %vm5965_vm8, %v6587_v40  ;;  %v6588_v7 = vpack.c.bf16 %v5834_v44, %v5834_v44 }
 0x382   : > { %5997 = vst.msk [vmem:[%s10048_s29 + $0x7c] sm:$0xf] %vm5965_vm8, %v6590_v28 }
 0x383   : > { %5995 = vst.msk [vmem:[%s10048_s29 + $0x74] sm:$0xf] %vm5965_vm8, %v6588_v7 }
 0x384 PF: > { %s16_s21 = sadd.s32 1, %s8182_s21  }
 0x385   : > { %p13_p4 = scmp.ge.s32.totalorder %s16_s21, 4  }
 0x387   :  { %15 = sbr.rel (!%p13_p4) target bundleno = 1 (0x1), region = 93 }

</bundles_post_ra>
